<compile_context>
chip_gen: v5e
topology: v5e:2x2
jax: 0.10.0
libtpu: 0.0.40
codegen_flags: <defaults>
</compile_context>

<pallas_src>
import jax
import jax.numpy as jnp
import numpy as np
from jax.experimental import pallas as pl
from jax.experimental.pallas import tpu as pltpu


def _fused_convt_kernel(a_ref, b_ref, bias_ref, add_ref, o_ref):
    # y = hardswish(A @ B + conv_bias + add_input); accumulate & epilogue in f32.
    acc = jnp.dot(a_ref[...], b_ref[...], preferred_element_type=jnp.float32)
    y = acc + bias_ref[...].astype(jnp.float32) + add_ref[...].astype(jnp.float32)
    o_ref[...] = (y * jnp.clip(y + 3.0, 0.0, 6.0) * (1.0 / 6.0)).astype(o_ref.dtype)


def _vmem_capacity_bytes():
    try:
        return int(pltpu.get_tpu_info().vmem_capacity_bytes)
    except Exception:
        return 64 << 20          # conservative default (v7x per-TensorCore physical VMEM)


def _choose_tm(M, K, Ncol, a_bytes, add_bytes, out_bytes, tm_max):
    """Largest sublane-aligned row tile that (a) fits the per-generation VMEM budget,
    (b) divides M (avoids a padding pass), (c) leaves >=2 (ideally even) grid steps (v7x)."""
    vmem_cap = _vmem_capacity_bytes()
    budget = min(max(vmem_cap - (16 << 20), 12 << 20), 40 << 20)
    fixed = 2 * K * Ncol * a_bytes + 2 * Ncol * 4                       # resident B (+bias)
    per_row = 2 * (K * a_bytes + Ncol * add_bytes + Ncol * out_bytes)   # dbl-buffered A/add/out
    cap = max(8, min(int(tm_max), int((budget - fixed) // per_row)))
    cap -= cap % 8
    best, best_key = None, None
    for t in range(8, cap + 1, 8):
        if M % t:
            continue
        steps = M // t
        key = (steps >= 2, steps % 2 == 0, t)                           # >=2 steps, even, largest
        if best_key is None or key > best_key:
            best, best_key = t, key
    needs_pad = best is None
    tm = cap if needs_pad else best
    return max(8, tm), needs_pad


def _vmem_limit_for(tm, K, Ncol, a_bytes, add_bytes, out_bytes):
    fixed = 2 * K * Ncol * a_bytes + 2 * Ncol * 4
    per_row = 2 * (K * a_bytes + Ncol * add_bytes + Ncol * out_bytes)
    need = fixed + per_row * tm
    return int(min(max(need + (6 << 20), 32 << 20), min(_vmem_capacity_bytes(), 96 << 20)))


def conv_transpose3d_add_hardswish(x, add_input, weight, conv_bias, *,
                                   stride=2, padding=1, output_padding=1,
                                   stream_dtype=jnp.float32, channels_last_out=False,
                                   tm=None, tm_max=2048):
    """x: (N, Cin, D, H, W); add_input: (N, Cout, 2D, 2H, 2W);
    weight: (Cin, Cout, 3, 3, 3) [PyTorch ConvTranspose3d layout]; conv_bias: (Cout,)."""
    N, Cin, D, H, W = x.shape
    _, Cout, kd, kh, kw = weight.shape
    assert (stride, padding, output_padding) == (2, 1, 1) and (kd, kh, kw) == (3, 3, 3), \
        "phase decomposition specialized for k=3, s=2, p=1, op=1 (the module's config)"
    Do, Ho, Wo = 2 * D, 2 * H, 2 * W
    M, K, Ncol = N * D * H * W, 8 * Cin, 8 * Cout

    # ---- A: channels-last + 1-voxel high-side pad, dense 2x2x2 im2col (cols = (dd,dh,dw,ci)) ----
    x_cl = jnp.transpose(x, (0, 2, 3, 4, 1))                                 # (N, D, H, W, Cin)
    x_pad = jnp.pad(x_cl, ((0, 0), (0, 1), (0, 1), (0, 1), (0, 0)))
    patches = [x_pad[:, dd:dd + D, dh:dh + H, dw:dw + W, :]
               for dd in range(2) for dh in range(2) for dw in range(2)]
    A = jnp.stack(patches, axis=4).reshape(M, K)                             # (M, 256)

    # ---- weight -> (8*Cin, 8*Cout) phase matrix, cols = (pd,ph,pw,co) ----
    # (phase p, delta d) -> kernel tap:  p=0,d=0 -> 1 ; p=1,d=0 -> 2 ; p=1,d=1 -> 0 ; p=0,d=1 -> pad
    kidx = ((1, 3), (2, 0))                                                  # tap 3 hits the zero pad
    w_ext = jnp.pad(weight, ((0, 0), (0, 0), (0, 1), (0, 1), (0, 1)))        # (Cin, Cout, 4, 4, 4)
    rows = []
    for dd in range(2):
        for dh in range(2):
            for dw in range(2):
                cols = [w_ext[:, :, kidx[pd][dd], kidx[ph][dh], kidx[pw][dw]]
                        for pd in range(2) for ph in range(2) for pw in range(2)]
                rows.append(jnp.concatenate(cols, axis=1))                   # (Cin, 8*Cout)
    Bmat = jnp.concatenate(rows, axis=0)                                     # (256, 512)

    # residual in the kernel's (n,t,u,v | pd,ph,pw,co) layout; conv bias tiled over the 8 phases
    add_m = jnp.transpose(add_input.reshape(N, Cout, D, 2, H, 2, W, 2),
                          (0, 2, 4, 6, 3, 5, 7, 1)).reshape(M, Ncol)         # (M, 512)
    bias2 = jnp.tile(conv_bias, 8).reshape(1, Ncol).astype(jnp.float32)

    A = A.astype(stream_dtype)
    Bmat = Bmat.astype(stream_dtype)
    add_m = add_m.astype(stream_dtype)
    out_dtype = jnp.float32
    a_bytes = jnp.dtype(stream_dtype).itemsize

    if tm is None:
        tm, needs_pad = _choose_tm(M, K, Ncol, a_bytes, a_bytes, 4, tm_max)
    else:
        tm = max(8, (int(tm) // 8) * 8)
        needs_pad = (M % tm) != 0
    vmem_limit = _vmem_limit_for(tm, K, Ncol, a_bytes, a_bytes, 4)

    Mp = M
    if needs_pad:                                            # fallback only (e.g. M not /8); normally skipped
        Mp = pl.cdiv(M, tm) * tm
        A = jnp.pad(A, ((0, Mp - M), (0, 0)))
        add_m = jnp.pad(add_m, ((0, Mp - M), (0, 0)))

    # alias the residual buffer to the output when dtypes match (frees one (Mp,512) HBM allocation)
    io_alias = {3: 0} if jnp.dtype(stream_dtype) == jnp.dtype(out_dtype) else {}

    out = pl.pallas_call(
        _fused_convt_kernel,
        out_shape=jax.ShapeDtypeStruct((Mp, Ncol), out_dtype),
        grid_spec=pltpu.PrefetchScalarGridSpec(
            num_scalar_prefetch=0,
            grid=(Mp // tm,),
            in_specs=[
                pl.BlockSpec((tm, K), lambda i: (i, 0)),      # A row tile   (K=256, lane-dense)
                pl.BlockSpec((K, Ncol), lambda i: (0, 0)),    # phase-weight matrix (constant -> no re-DMA)
                pl.BlockSpec((1, Ncol), lambda i: (0, 0)),    # conv bias tiled over phases (constant)
                pl.BlockSpec((tm, Ncol), lambda i: (i, 0)),   # residual row tile (512 wide, unmasked)
            ],
            out_specs=pl.BlockSpec((tm, Ncol), lambda i: (i, 0)),
        ),
        compiler_params=pltpu.CompilerParams(
            dimension_semantics=("parallel",),
            vmem_limit_bytes=vmem_limit),
        input_output_aliases=io_alias,
    )(A, Bmat, bias2, add_m)

    out = out[:M].reshape(N, D, H, W, 2, 2, 2, Cout)
    # interleave phases keeping Cout as the contiguous minor dim -> NDHWC  (od=2t+pd, ...)
    out = jnp.transpose(out, (0, 1, 4, 2, 5, 3, 6, 7)).reshape(N, Do, Ho, Wo, Cout)
    if channels_last_out:
        return out
    return jnp.transpose(out, (0, 4, 1, 2, 3))               # NCDHW (XLA folds the two transposes)


if __name__ == "__main__":
    # Small deterministic shapes consistent with the module (Cin=32, Cout=64).
    N, Cin, Cout = 2, 32, 64
    D = H = W = 8
    stride, padding, output_padding, k = 2, 1, 1, 3
    Do = Ho = Wo = 2 * D

    key = jax.random.PRNGKey(0)
    k1, k2, k3, k4, k5 = jax.random.split(key, 5)
    x = jax.random.normal(k1, (N, Cin, D, H, W), jnp.float32)
    add_input = jax.random.normal(k2, (N, Cout, Do, Ho, Wo), jnp.float32)
    weight = jax.random.normal(k3, (Cin, Cout, k, k, k), jnp.float32) * 0.05
    conv_bias = jax.random.normal(k4, (Cout,), jnp.float32) * 0.05
    # TODO(synk): self.bias (Cout,1,1,1,1) exists in the PyTorch module but is unused in forward().
    _unused_bias = jax.random.normal(k5, (Cout, 1, 1, 1, 1), jnp.float32)

    fwd = jax.jit(conv_transpose3d_add_hardswish,
                  static_argnames=("stride", "padding", "output_padding",
                                   "stream_dtype", "channels_last_out", "tm", "tm_max"))

    # Reference: lax dilated conv (== ConvTranspose3d) + bias + add + hardswish, all f32.
    pb = k - 1 - padding
    pa = k - 1 - padding + output_padding
    w_conv = jnp.transpose(weight[:, :, ::-1, ::-1, ::-1], (1, 0, 2, 3, 4))
    ref = jax.lax.conv_general_dilated(
        x, w_conv, window_strides=(1, 1, 1),
        padding=[(pb, pa)] * 3, lhs_dilation=(stride, stride, stride),
        dimension_numbers=('NCDHW', 'OIDHW', 'NCDHW'))
    ref = ref + conv_bias.reshape(1, Cout, 1, 1, 1) + add_input
    ref = ref * jnp.clip(ref + 3.0, 0.0, 6.0) / 6.0
    ref = np.asarray(ref)

    # f32 streaming path (exact module semantics).
    out_f32 = jax.block_until_ready(fwd(x, add_input, weight, conv_bias,
                                        stride=stride, padding=padding,
                                        output_padding=output_padding))
    np.testing.assert_allclose(np.asarray(out_f32), ref, rtol=1e-4, atol=1e-4)

    # bf16 streaming path (bandwidth-optimized: halves A/B/residual HBM bytes; f32 accumulation).
    out_bf16 = jax.block_until_ready(fwd(x, add_input, weight, conv_bias,
                                         stride=stride, padding=padding,
                                         output_padding=output_padding,
                                         stream_dtype=jnp.bfloat16))
    np.testing.assert_allclose(np.asarray(out_bf16), ref, rtol=5e-2, atol=5e-2)

    print("KERNEL_OK")
</pallas_src>

<mosaic_0001>
module attributes {stable_mosaic.version = 11 : i64} {
  func.func @_fused_convt_kernel(%arg0: i32, %arg1: memref<512x256xf32, #tpu.memory_space<vmem>>, %arg2: memref<256x512xf32, #tpu.memory_space<vmem>>, %arg3: memref<1x512xf32, #tpu.memory_space<vmem>>, %arg4: memref<512x512xf32, #tpu.memory_space<vmem>>, %arg5: memref<512x512xf32, #tpu.memory_space<vmem>>) attributes {dimension_semantics = [#tpu.dimension_semantics<parallel>], iteration_bounds = array<i64: 2>, scalar_prefetch = 0 : i64, scratch_operands = 0 : i64, tpu.core_type = #tpu.core_type<tc>, window_params = [{transform_indices = @transform_0, window_bounds = array<i64: 512, 256>}, {pipeline_mode = #tpu.pipeline_mode<synchronous>, transform_indices = @transform_1, window_bounds = array<i64: 256, 512>}, {pipeline_mode = #tpu.pipeline_mode<synchronous>, transform_indices = @transform_2, window_bounds = array<i64: 1, 512>}, {transform_indices = @transform_3, window_bounds = array<i64: 512, 512>}, {transform_indices = @transform_4, window_bounds = array<i64: 512, 512>}]} {
    %c0 = arith.constant 0 : index
    %c0_0 = arith.constant 0 : index
    %0 = vector.load %arg1[%c0, %c0_0] : memref<512x256xf32, #tpu.memory_space<vmem>>, vector<512x256xf32>
    %c0_1 = arith.constant 0 : index
    %c0_2 = arith.constant 0 : index
    %1 = vector.load %arg2[%c0_1, %c0_2] : memref<256x512xf32, #tpu.memory_space<vmem>>, vector<256x512xf32>
    %cst = arith.constant dense<0.000000e+00> : vector<512x512xf32>
    %2 = tpu.matmul %0, %1, %cst {dimension_numbers = #tpu.dot_dimension_numbers<[1], [0], [0], [1], [0, 0, 1, 1], [], []>} : vector<512x256xf32>, vector<256x512xf32>, vector<512x512xf32> -> vector<512x512xf32>
    %c0_3 = arith.constant 0 : index
    %c0_4 = arith.constant 0 : index
    %3 = vector.load %arg3[%c0_3, %c0_4] : memref<1x512xf32, #tpu.memory_space<vmem>>, vector<1x512xf32>
    %4 = vector.broadcast %3 : vector<1x512xf32> to vector<512x512xf32>
    %5 = arith.addf %2, %4 : vector<512x512xf32>
    %c0_5 = arith.constant 0 : index
    %c0_6 = arith.constant 0 : index
    %6 = vector.load %arg4[%c0_5, %c0_6] : memref<512x512xf32, #tpu.memory_space<vmem>>, vector<512x512xf32>
    %7 = arith.addf %5, %6 : vector<512x512xf32>
    %cst_7 = arith.constant 3.000000e+00 : f32
    %8 = vector.broadcast %cst_7 : f32 to vector<512x512xf32>
    %9 = arith.addf %7, %8 : vector<512x512xf32>
    %cst_8 = arith.constant 0.000000e+00 : f32
    %cst_9 = arith.constant 6.000000e+00 : f32
    %10 = vector.broadcast %cst_8 : f32 to vector<512x512xf32>
    %11 = arith.maximumf %10, %9 : vector<512x512xf32>
    %12 = vector.broadcast %cst_9 : f32 to vector<512x512xf32>
    %13 = arith.minimumf %12, %11 : vector<512x512xf32>
    %14 = arith.mulf %7, %13 : vector<512x512xf32>
    %cst_10 = arith.constant 0.166666672 : f32
    %15 = vector.broadcast %cst_10 : f32 to vector<512x512xf32>
    %16 = arith.mulf %14, %15 : vector<512x512xf32>
    %c0_11 = arith.constant 0 : index
    %c0_12 = arith.constant 0 : index
    %17 = vector.load %arg5[%c0_11, %c0_12] : memref<512x512xf32, #tpu.memory_space<vmem>>, vector<512x512xf32>
    tpu.vector_store %arg5[%c0_11, %c0_12], %16 {strides = array<i32>} : memref<512x512xf32, #tpu.memory_space<vmem>>, vector<512x512xf32>,
    return
  }
  func.func @transform_0(%arg0: i32) -> (i32, i32) {
    %c0_i32 = arith.constant 0 : i32
    %c0_i32_0 = arith.constant 0 : i32
    return %arg0, %c0_i32 : i32, i32
  }
  func.func @transform_1(%arg0: i32) -> (i32, i32) {
    %c0_i32 = arith.constant 0 : i32
    %c0_i32_0 = arith.constant 0 : i32
    %c0_i32_1 = arith.constant 0 : i32
    return %c0_i32, %c0_i32_0 : i32, i32
  }
  func.func @transform_2(%arg0: i32) -> (i32, i32) {
    %c0_i32 = arith.constant 0 : i32
    %c0_i32_0 = arith.constant 0 : i32
    %c0_i32_1 = arith.constant 0 : i32
    return %c0_i32, %c0_i32_0 : i32, i32
  }
  func.func @transform_3(%arg0: i32) -> (i32, i32) {
    %c0_i32 = arith.constant 0 : i32
    %c0_i32_0 = arith.constant 0 : i32
    return %arg0, %c0_i32 : i32, i32
  }
  func.func @transform_4(%arg0: i32) -> (i32, i32) {
    %c0_i32 = arith.constant 0 : i32
    %c0_i32_0 = arith.constant 0 : i32
    return %arg0, %c0_i32 : i32, i32
  }
}

</mosaic_0001>

<bundles_post_ra>
// kernel: tile.8
= control target key start
LH: loop header
LB: loop body
LE: loop exit
PB: predicated region body
PF: predicated region fallthrough
CT: control target
= control target key end

     0   :  { %s22_s0 = inlined_call_operand.vmem [shape: f32[64], index: 0, kind: input, shape index: {}]   ;;  %s23_s1 = inlined_call_operand.vmem [shape: f32[8,64], index: 1, kind: output, shape index: {}]  }
   0x1   :  { %v4_v0 = vld [vmem:[%s22_s0] ss:$0 sm:$0xff] }
   0x2   :  { %5 = vst [vmem:[%s23_s1] sm:$0xff] %v4_v0 }

// kernel: tile.9
= control target key start
LH: loop header
LB: loop body
LE: loop exit
PB: predicated region body
PF: predicated region fallthrough
CT: control target
= control target key end

     0   :  { %vm3_vm0 = vcmask 523264   ;;  %s40_s8 = smov 64   ;;  %vm9_vm1 = vcmask 1048064   ;;  %s69_s0 = inlined_call_operand.vmem [shape: f32[8,64], index: 0, kind: input, shape index: {}]   ;;  %s70_s1 = inlined_call_operand.vmem [shape: f32[1,512], index: 1, kind: output, shape index: {}]  }
   0x1   :  { %v35_v0 = vld [vmem:[%s69_s0 + $0x1] ss:$2 sm:$0xf]   ;;  %v2_v1 = vld [vmem:[%s69_s0] ss:$2 sm:$0xf]  }
   0x2   :  { %7 = vrot.lane.b32.xlu0 %v35_v0, %s40_s8  ;;  %4 = vst.msk [vmem:[#allocation0] ss:$8 sm:$0xf] %vm3_vm0, %v2_v1  }
  0x74   :  { %v8_v2 = vpop.permute.xlu0 %7  }
  0x75   :  { %10 = vst.msk [vmem:[#allocation0] ss:$8 sm:$0xf] %vm9_vm1, %v8_v2  }
  0x7c   :  { %v13_v3 = vld [vmem:[#allocation0] sm:$0x1]  ;;  %v18_v4 = vld [vmem:[#allocation0 + $0x8] sm:$0x1]  ;;  %v24_v5 = vld [vmem:[#allocation0 + $0x10] sm:$0x1] }
  0x7d   :  { %16 = vst [vmem:[%s70_s1] sm:$0x1] %v13_v3  ;;  %v30_v6 = vld [vmem:[#allocation0 + $0x18] sm:$0x1] }
  0x7e   :  { %36 = vst [vmem:[%s70_s1 + $0x1] sm:$0x1] %v18_v4 }
  0x7f   :  { %37 = vst [vmem:[%s70_s1 + $0x2] sm:$0x1] %v24_v5 }
  0x80   :  { %38 = vst [vmem:[%s70_s1 + $0x3] sm:$0x1] %v30_v6 }

// kernel: conv_transpose3d_add_hardswish.1
= control target key start
LH: loop header
LB: loop body
LE: loop exit
PB: predicated region body
PF: predicated region fallthrough
CT: control target
= control target key end

     0   :  { %s4476_s15 = smov 0   ;;  %s6820_s0 = inlined_call_operand.vmem [shape: f32[1024,256], index: 0, kind: input, shape index: {}]   ;;  %s6821_s1 = inlined_call_operand.vmem [shape: f32[256,512], index: 1, kind: input, shape index: {}]   ;;  %s6822_s2 = inlined_call_operand.vmem [shape: f32[1,512], index: 2, kind: input, shape index: {}]   ;;  %s6823_s3 = inlined_call_operand.vmem [shape: f32[1024,512], index: 3, kind: input, shape index: {}, may-alias: {3,4}]   ;;  %s6824_s4 = inlined_call_operand.vmem [shape: f32[1024,512], index: 4, kind: output, shape index: {}, may-alias: {3,4}]  }
   0x1 LB: > { %s4287_s16 = sadd.s32 4294967295, %s4449_s15   ;;  %p4291_p0 = scmp.ge.s32.totalorder %s4449_s15, 1  ;;  %s4449_s15 = sphi %s4476_s15, %s14_s15  }
   0x2   : > { %p176_p1 = scmp.lt.s32.totalorder %s4449_s15, 3 }
   0x4   : > { %p177_p2 = pnand %p4291_p0, %p176_p1 }
   0x6   : > { %180 = sbr.rel (%p177_p2) target bundleno = 1406 (0x57e), region = 36 }
   0xb   : > { %v419_v0 = vld [vmem:[%s6821_s1 + $0x1e0] sm:$0xff]  ;;  %v420_v1 = vld [vmem:[%s6821_s1 + $0x1e8] sm:$0xff]  ;;  %s4576_s29 = sshll.u32 %s4287_s16, 6  ;;  %v422_v63 = vld [vmem:[%s6821_s1 + $0x1f8] sm:$0xff] }
   0xc   : > { %v415_v2 = vld [vmem:[%s6821_s1 + $0x1c0] sm:$0xff]  ;;  %497 = vmatpush.msra.mxu0 %v419_v0  ;;  %915 = vmatpush.msra.mxu2 %v420_v1  ;;  %v416_v4 = vld [vmem:[%s6821_s1 + $0x1c8] sm:$0xff]  ;;  %p211_p3 = scmp.lt.s32.totalorder %s4576_s29, 127 }
   0xd   : > { %v483_v3 = vld [vmem:[%s6821_s1 + $0x3e0] sm:$0xff]  ;;  %v484_v5 = vld [vmem:[%s6821_s1 + $0x3e8] sm:$0xff] }
   0xe   : > { %706 = vmatpush.msra.mxu1 %v483_v3  ;;  %1124 = vmatpush.msra.mxu3 %v484_v5  ;;  %v411_v6 = vld [vmem:[%s6821_s1 + $0x1a0] sm:$0xff]  ;;  %v412_v8 = vld [vmem:[%s6821_s1 + $0x1a8] sm:$0xff]  ;;  %s7269_s29 = smov (!%p211_p3, %s4576_s29), 127  ;;  %v421_v3 = vld [vmem:[%s6821_s1 + $0x1f0] sm:$0xff] }
   0xf   : > { %v479_v7 = vld [vmem:[%s6821_s1 + $0x3c0] sm:$0xff]  ;;  %498 = vmatpush.msra.mxu0 %v415_v2  ;;  %916 = vmatpush.msra.mxu2 %v416_v4  ;;  %v480_v9 = vld [vmem:[%s6821_s1 + $0x3c8] sm:$0xff]  ;;  %s4303_s25 = sshll.u32 %s7269_s29, 4  ;;  %v486_v4 = vld [vmem:[%s6821_s1 + $0x3f8] sm:$0xff]  ;;  %s4304_s8 = sshll.u32 %s7269_s29, 5 }
  0x10   : > { %v475_v10 = vld [vmem:[%s6821_s1 + $0x3a0] sm:$0xff]  ;;  %707 = vmatpush.msra.mxu1 %v479_v7  ;;  %1125 = vmatpush.msra.mxu3 %v480_v9  ;;  %v408_v12 = vld [vmem:[%s6821_s1 + $0x188] sm:$0xff]  ;;  %s4672_s14 = scalar_lea.vmem %s6820_s0, %s4303_s25  ;;  %v485_v5 = vld [vmem:[%s6821_s1 + $0x3f0] sm:$0xff]  ;;  %s4834_s16 = scalar_lea.vmem %s6823_s3, %s4304_s8 }
  0x11   : > { %v407_v11 = vld [vmem:[%s6821_s1 + $0x180] sm:$0xff]  ;;  %v476_v13 = vld [vmem:[%s6821_s1 + $0x3a8] sm:$0xff]  ;;  %499 = vmatpush.msra.mxu0 %v411_v6  ;;  %917 = vmatpush.msra.mxu2 %v412_v8  ;;  %v418_v6 = vld [vmem:[%s6821_s1 + $0x1d8] sm:$0xff]  ;;  %s5722_s24 = scalar_lea.vmem %s6824_s4, %s4304_s8 }
  0x12   : > { %v471_v14 = vld [vmem:[%s6821_s1 + $0x380] sm:$0xff]  ;;  %v472_v15 = vld [vmem:[%s6821_s1 + $0x388] sm:$0xff]  ;;  %708 = vmatpush.msra.mxu1 %v475_v10  ;;  %1126 = vmatpush.msra.mxu3 %v476_v13  ;;  %v482_v7 = vld [vmem:[%s6821_s1 + $0x3d8] sm:$0xff] }
  0x13   : > { %v403_v16 = vld [vmem:[%s6821_s1 + $0x160] sm:$0xff]  ;;  %v404_v17 = vld [vmem:[%s6821_s1 + $0x168] sm:$0xff]  ;;  %500 = vmatpush.msra.mxu0 %v407_v11  ;;  %918 = vmatpush.msra.mxu2 %v408_v12  ;;  %v417_v8 = vld [vmem:[%s6821_s1 + $0x1d0] sm:$0xff] }
  0x14   : > { %v467_v18 = vld [vmem:[%s6821_s1 + $0x360] sm:$0xff]  ;;  %v468_v19 = vld [vmem:[%s6821_s1 + $0x368] sm:$0xff]  ;;  %709 = vmatpush.msra.mxu1 %v471_v14  ;;  %1127 = vmatpush.msra.mxu3 %v472_v15  ;;  %v233_v9 = vld [vmem:[%s4672_s14 + $0x10] sm:$0xff] }
  0x15   : > { %v399_v20 = vld [vmem:[%s6821_s1 + $0x140] sm:$0xff]  ;;  %v400_v21 = vld [vmem:[%s6821_s1 + $0x148] sm:$0xff]  ;;  %501 = vmatpush.msra.mxu0 %v403_v16  ;;  %919 = vmatpush.msra.mxu2 %v404_v17  ;;  %v234_v10 = vld [vmem:[%s4672_s14 + $0x18] sm:$0xff] }
  0x16   : > { %v463_v22 = vld [vmem:[%s6821_s1 + $0x340] sm:$0xff]  ;;  %v464_v23 = vld [vmem:[%s6821_s1 + $0x348] sm:$0xff]  ;;  %710 = vmatpush.msra.mxu1 %v467_v18  ;;  %1128 = vmatpush.msra.mxu3 %v468_v19  ;;  %v481_v11 = vld [vmem:[%s6821_s1 + $0x3d0] sm:$0xff] }
  0x17   : > { %v395_v24 = vld [vmem:[%s6821_s1 + $0x120] sm:$0xff]  ;;  %v396_v25 = vld [vmem:[%s6821_s1 + $0x128] sm:$0xff]  ;;  %502 = vmatpush.msra.mxu0 %v399_v20  ;;  %920 = vmatpush.msra.mxu2 %v400_v21  ;;  %v237_v14 = vld [vmem:[%s4672_s14 + $0x30] sm:$0xff] }
  0x18   : > { %v459_v26 = vld [vmem:[%s6821_s1 + $0x320] sm:$0xff]  ;;  %v460_v27 = vld [vmem:[%s6821_s1 + $0x328] sm:$0xff]  ;;  %711 = vmatpush.msra.mxu1 %v463_v22  ;;  %1129 = vmatpush.msra.mxu3 %v464_v23  ;;  %v238_v15 = vld [vmem:[%s4672_s14 + $0x38] sm:$0xff] }
  0x19   : > { %v391_v28 = vld [vmem:[%s6821_s1 + $0x100] sm:$0xff]  ;;  %v392_v29 = vld [vmem:[%s6821_s1 + $0x108] sm:$0xff]  ;;  %503 = vmatpush.msra.mxu0 %v395_v24  ;;  %921 = vmatpush.msra.mxu2 %v396_v25  ;;  %v414_v18 = vld [vmem:[%s6821_s1 + $0x1b8] sm:$0xff] }
  0x1a   : > { %v455_v30 = vld [vmem:[%s6821_s1 + $0x300] sm:$0xff]  ;;  %v456_v31 = vld [vmem:[%s6821_s1 + $0x308] sm:$0xff]  ;;  %712 = vmatpush.msra.mxu1 %v459_v26  ;;  %1130 = vmatpush.msra.mxu3 %v460_v27  ;;  %v478_v19 = vld [vmem:[%s6821_s1 + $0x3b8] sm:$0xff] }
  0x1b   : > { %v387_v32 = vld [vmem:[%s6821_s1 + $0xe0] sm:$0xff]  ;;  %v388_v33 = vld [vmem:[%s6821_s1 + $0xe8] sm:$0xff]  ;;  %504 = vmatpush.msra.mxu0 %v391_v28  ;;  %922 = vmatpush.msra.mxu2 %v392_v29  ;;  %v413_v20 = vld [vmem:[%s6821_s1 + $0x1b0] sm:$0xff] }
  0x1c   : > { %v451_v34 = vld [vmem:[%s6821_s1 + $0x2e0] sm:$0xff]  ;;  %v452_v35 = vld [vmem:[%s6821_s1 + $0x2e8] sm:$0xff]  ;;  %713 = vmatpush.msra.mxu1 %v455_v30  ;;  %1131 = vmatpush.msra.mxu3 %v456_v31  ;;  %v241_v21 = vld [vmem:[%s4672_s14 + $0x50] sm:$0xff] }
  0x1d   : > { %v383_v36 = vld [vmem:[%s6821_s1 + $0xc0] sm:$0xff]  ;;  %v384_v37 = vld [vmem:[%s6821_s1 + $0xc8] sm:$0xff]  ;;  %505 = vmatpush.msra.mxu0 %v387_v32  ;;  %923 = vmatpush.msra.mxu2 %v388_v33  ;;  %v242_v22 = vld [vmem:[%s4672_s14 + $0x58] sm:$0xff] }
  0x1e   : > { %v447_v38 = vld [vmem:[%s6821_s1 + $0x2c0] sm:$0xff]  ;;  %v448_v39 = vld [vmem:[%s6821_s1 + $0x2c8] sm:$0xff]  ;;  %714 = vmatpush.msra.mxu1 %v451_v34  ;;  %1132 = vmatpush.msra.mxu3 %v452_v35  ;;  %v477_v23 = vld [vmem:[%s6821_s1 + $0x3b0] sm:$0xff] }
  0x1f   : > { %v379_v40 = vld [vmem:[%s6821_s1 + $0xa0] sm:$0xff]  ;;  %v380_v41 = vld [vmem:[%s6821_s1 + $0xa8] sm:$0xff]  ;;  %506 = vmatpush.msra.mxu0 %v383_v36  ;;  %924 = vmatpush.msra.mxu2 %v384_v37  ;;  %v245_v26 = vld [vmem:[%s4672_s14 + $0x70] sm:$0xff] }
  0x20   : > { %v443_v42 = vld [vmem:[%s6821_s1 + $0x2a0] sm:$0xff]  ;;  %v444_v43 = vld [vmem:[%s6821_s1 + $0x2a8] sm:$0xff]  ;;  %715 = vmatpush.msra.mxu1 %v447_v38  ;;  %1133 = vmatpush.msra.mxu3 %v448_v39  ;;  %v246_v27 = vld [vmem:[%s4672_s14 + $0x78] sm:$0xff] }
  0x21   : > { %v375_v44 = vld [vmem:[%s6821_s1 + $0x80] sm:$0xff]  ;;  %v376_v45 = vld [vmem:[%s6821_s1 + $0x88] sm:$0xff]  ;;  %507 = vmatpush.msra.mxu0 %v379_v40  ;;  %925 = vmatpush.msra.mxu2 %v380_v41  ;;  %v410_v30 = vld [vmem:[%s6821_s1 + $0x198] sm:$0xff] }
  0x22   : > { %v439_v46 = vld [vmem:[%s6821_s1 + $0x280] sm:$0xff]  ;;  %v440_v47 = vld [vmem:[%s6821_s1 + $0x288] sm:$0xff]  ;;  %716 = vmatpush.msra.mxu1 %v443_v42  ;;  %1134 = vmatpush.msra.mxu3 %v444_v43  ;;  %v474_v31 = vld [vmem:[%s6821_s1 + $0x398] sm:$0xff] }
  0x23   : > { %v371_v48 = vld [vmem:[%s6821_s1 + $0x60] sm:$0xff]  ;;  %v372_v49 = vld [vmem:[%s6821_s1 + $0x68] sm:$0xff]  ;;  %508 = vmatpush.msra.mxu0 %v375_v44  ;;  %926 = vmatpush.msra.mxu2 %v376_v45  ;;  %v409_v32 = vld [vmem:[%s6821_s1 + $0x190] sm:$0xff] }
  0x24   : > { %v435_v50 = vld [vmem:[%s6821_s1 + $0x260] sm:$0xff]  ;;  %v436_v51 = vld [vmem:[%s6821_s1 + $0x268] sm:$0xff]  ;;  %717 = vmatpush.msra.mxu1 %v439_v46  ;;  %1135 = vmatpush.msra.mxu3 %v440_v47  ;;  %v249_v33 = vld [vmem:[%s4672_s14 + $0x90] sm:$0xff] }
  0x25   : > { %v367_v52 = vld [vmem:[%s6821_s1 + $0x40] sm:$0xff]  ;;  %v368_v53 = vld [vmem:[%s6821_s1 + $0x48] sm:$0xff]  ;;  %509 = vmatpush.msra.mxu0 %v371_v48  ;;  %927 = vmatpush.msra.mxu2 %v372_v49  ;;  %v250_v34 = vld [vmem:[%s4672_s14 + $0x98] sm:$0xff] }
  0x26   : > { %v431_v54 = vld [vmem:[%s6821_s1 + $0x240] sm:$0xff]  ;;  %v432_v55 = vld [vmem:[%s6821_s1 + $0x248] sm:$0xff]  ;;  %718 = vmatpush.msra.mxu1 %v435_v50  ;;  %1136 = vmatpush.msra.mxu3 %v436_v51  ;;  %v473_v35 = vld [vmem:[%s6821_s1 + $0x390] sm:$0xff] }
  0x27   : > { %v363_v56 = vld [vmem:[%s6821_s1 + $0x20] sm:$0xff]  ;;  %v364_v57 = vld [vmem:[%s6821_s1 + $0x28] sm:$0xff]  ;;  %510 = vmatpush.msra.mxu0 %v367_v52  ;;  %928 = vmatpush.msra.mxu2 %v368_v53  ;;  %v253_v38 = vld [vmem:[%s4672_s14 + $0xb0] sm:$0xff] }
  0x28   : > { %v427_v58 = vld [vmem:[%s6821_s1 + $0x220] sm:$0xff]  ;;  %v428_v59 = vld [vmem:[%s6821_s1 + $0x228] sm:$0xff]  ;;  %719 = vmatpush.msra.mxu1 %v431_v54  ;;  %1137 = vmatpush.msra.mxu3 %v432_v55  ;;  %v254_v39 = vld [vmem:[%s4672_s14 + $0xb8] sm:$0xff] }
  0x29   : > { %v359_v60 = vld [vmem:[%s6821_s1] sm:$0xff]  ;;  %v360_v61 = vld [vmem:[%s6821_s1 + $0x8] sm:$0xff]  ;;  %511 = vmatpush.msra.mxu0 %v363_v56  ;;  %929 = vmatpush.msra.mxu2 %v364_v57  ;;  %v257_v42 = vld [vmem:[%s4672_s14 + $0xd0] sm:$0xff] }
  0x2a   : > { %v231_v62 = vld [vmem:[%s4672_s14] sm:$0xff]  ;;  %720 = vmatpush.msra.mxu1 %v427_v58  ;;  %1138 = vmatpush.msra.mxu3 %v428_v59  ;;  %v424_v1 = vld [vmem:[%s6821_s1 + $0x208] sm:$0xff]  ;;  %v258_v43 = vld [vmem:[%s4672_s14 + $0xd8] sm:$0xff] }
  0x2b   : > { %v423_v0 = vld [vmem:[%s6821_s1 + $0x200] sm:$0xff]  ;;  %512 = vmatpush.msra.mxu0 %v359_v60  ;;  %930 = vmatpush.msra.mxu2 %v360_v61  ;;  %v232_v2 = vld [vmem:[%s4672_s14 + $0x8] sm:$0xff]  ;;  %v406_v44 = vld [vmem:[%s6821_s1 + $0x178] sm:$0xff] }
  0x2c   : > { %513 = vmatmul.f32.vlgmr.msra.gmra.mxu0 %v231_v62  ;;  %931 = vmatmul.f32.vlgmr.msra.gmra.mxu2 %v231_v62  ;;  %v235_v12 = vld [vmem:[%s4672_s14 + $0x20] sm:$0xff]  ;;  %v236_v13 = vld [vmem:[%s4672_s14 + $0x28] sm:$0xff]  ;;  %v470_v45 = vld [vmem:[%s6821_s1 + $0x378] sm:$0xff] }
  0x2d   : > { %1751 = vmatpush.msrb.mxu2 %v422_v63  ;;  %721 = vmatpush.msra.mxu1 %v423_v0  ;;  %v239_v16 = vld [vmem:[%s4672_s14 + $0x40] sm:$0xff]  ;;  %v240_v17 = vld [vmem:[%s4672_s14 + $0x48] sm:$0xff]  ;;  %v405_v48 = vld [vmem:[%s6821_s1 + $0x170] sm:$0xff] }
  0x2e   : > { %1139 = vmatpush.msra.mxu3 %v424_v1  ;;  %722 = vmatmul.f32.vlgmr.msra.gmra.mxu1 %v232_v2  ;;  %v243_v24 = vld [vmem:[%s4672_s14 + $0x60] sm:$0xff]  ;;  %v244_v25 = vld [vmem:[%s4672_s14 + $0x68] sm:$0xff]  ;;  %v469_v49 = vld [vmem:[%s6821_s1 + $0x370] sm:$0xff] }
  0x2f   : > { %1140 = vmatmul.f32.vlgmr.msra.gmra.mxu3 %v232_v2  ;;  %1333 = vmatpush.msrb.mxu0 %v421_v3  ;;  %v247_v28 = vld [vmem:[%s4672_s14 + $0x80] sm:$0xff]  ;;  %v248_v29 = vld [vmem:[%s4672_s14 + $0x88] sm:$0xff]  ;;  %v261_v50 = vld [vmem:[%s4672_s14 + $0xf0] sm:$0xff] }
  0x30   : > { %1960 = vmatpush.msrb.mxu3 %v486_v4  ;;  %1542 = vmatpush.msrb.mxu1 %v485_v5  ;;  %v251_v36 = vld [vmem:[%s4672_s14 + $0xa0] sm:$0xff]  ;;  %v252_v37 = vld [vmem:[%s4672_s14 + $0xa8] sm:$0xff]  ;;  %v262_v51 = vld [vmem:[%s4672_s14 + $0xf8] sm:$0xff] }
  0x31   : > { %1752 = vmatpush.msrb.mxu2 %v418_v6  ;;  %1334 = vmatpush.msrb.mxu0 %v417_v8  ;;  %v255_v40 = vld [vmem:[%s4672_s14 + $0xc0] sm:$0xff]  ;;  %v256_v41 = vld [vmem:[%s4672_s14 + $0xc8] sm:$0xff]  ;;  %v265_v62 = vld [vmem:[%s4672_s14 + $0x110] sm:$0xff] }
  0x32   : > { %1961 = vmatpush.msrb.mxu3 %v482_v7  ;;  %1543 = vmatpush.msrb.mxu1 %v481_v11  ;;  %v259_v46 = vld [vmem:[%s4672_s14 + $0xe0] sm:$0xff]  ;;  %v260_v47 = vld [vmem:[%s4672_s14 + $0xe8] sm:$0xff]  ;;  %v266_v1 = vld [vmem:[%s4672_s14 + $0x118] sm:$0xff] }
  0x33   : > { %1753 = vmatpush.msrb.mxu2 %v414_v18  ;;  %1335 = vmatpush.msrb.mxu0 %v413_v20  ;;  %v487_v52 = vld [vmem:[%s6822_s2] sm:$0xf]  ;;  %v264_v58 = vld [vmem:[%s4672_s14 + $0x108] sm:$0xff]  ;;  %v402_v3 = vld [vmem:[%s6821_s1 + $0x158] sm:$0xff] }
  0x34   : > { %516 = vmatmul.f32.gmra.mxu0 %v233_v9  ;;  %934 = vmatmul.f32.gmra.mxu2 %v233_v9  ;;  %v4787_v53 = vperm.slane %v487_v52, 0  ;;  %v263_v55 = vld [vmem:[%s4672_s14 + $0x100] sm:$0xff]  ;;  %v466_v4 = vld [vmem:[%s6821_s1 + $0x358] sm:$0xff]  ;;  %v268_v9 = vld [vmem:[%s4672_s14 + $0x128] sm:$0xff] }
  0x35   : > { %1962 = vmatpush.msrb.mxu3 %v478_v19  ;;  %1544 = vmatpush.msrb.mxu1 %v477_v23  ;;  %v267_v6 = vld [vmem:[%s4672_s14 + $0x120] sm:$0xff]  ;;  %v401_v11 = vld [vmem:[%s6821_s1 + $0x150] sm:$0xff]  ;;  %v272_v23 = vld [vmem:[%s4672_s14 + $0x148] sm:$0xff] }
  0x36   : > { %725 = vmatmul.f32.gmra.mxu1 %v234_v10  ;;  %1754 = vmatpush.msrb.mxu2 %v410_v30  ;;  %v271_v20 = vld [vmem:[%s4672_s14 + $0x140] sm:$0xff] }
  0x37   : > { %1143 = vmatmul.f32.gmra.mxu3 %v234_v10  ;;  %1336 = vmatpush.msrb.mxu0 %v409_v32 }
  0x38   : > { %1963 = vmatpush.msrb.mxu3 %v474_v31  ;;  %1545 = vmatpush.msrb.mxu1 %v473_v35  ;;  %v274_v35 = vld [vmem:[%s4672_s14 + $0x158] sm:$0xff] }
  0x39   : > { %1755 = vmatpush.msrb.mxu2 %v406_v44  ;;  %1337 = vmatpush.msrb.mxu0 %v405_v48 }
  0x3a   : > { %1964 = vmatpush.msrb.mxu3 %v470_v45  ;;  %1546 = vmatpush.msrb.mxu1 %v469_v49 }
  0x3b   : > { %1756 = vmatpush.msrb.mxu2 %v402_v3  ;;  %1338 = vmatpush.msrb.mxu0 %v401_v11  ;;  %v461_v11 = vld [vmem:[%s6821_s1 + $0x330] sm:$0xff] }
  0x3c   : > { %519 = vmatmul.f32.gmra.mxu0 %v235_v12  ;;  %937 = vmatmul.f32.gmra.mxu2 %v235_v12  ;;  %v465_v12 = vld [vmem:[%s6821_s1 + $0x350] sm:$0xff] }
  0x3d   : > { %1965 = vmatpush.msrb.mxu3 %v466_v4  ;;  %1547 = vmatpush.msrb.mxu1 %v465_v12  ;;  %v2178_v4 = vld [vmem:[%s4834_s16 + $0x48] sm:$0xff] }
  0x3e   : > { %728 = vmatmul.f32.gmra.mxu1 %v236_v13 }
  0x3f   : > { %1146 = vmatmul.f32.gmra.mxu3 %v236_v13  ;;  %1548 = vmatpush.msrb.mxu1 %v461_v11 }
  0x44   : > { %522 = vmatmul.f32.gmra.mxu0 %v237_v14  ;;  %940 = vmatmul.f32.gmra.mxu2 %v237_v14  ;;  %v269_v14 = vld [vmem:[%s4672_s14 + $0x130] sm:$0xff] }
  0x46   : > { %731 = vmatmul.f32.gmra.mxu1 %v238_v15 }
  0x47   : > { %1149 = vmatmul.f32.gmra.mxu3 %v238_v15 }
  0x4c   : > { %525 = vmatmul.f32.gmra.mxu0 %v239_v16  ;;  %943 = vmatmul.f32.gmra.mxu2 %v239_v16 }
  0x4e   : > { %734 = vmatmul.f32.gmra.mxu1 %v240_v17 }
  0x4f   : > { %1152 = vmatmul.f32.gmra.mxu3 %v240_v17  ;;  %v270_v17 = vld [vmem:[%s4672_s14 + $0x138] sm:$0xff] }
  0x54   : > { %528 = vmatmul.f32.gmra.mxu0 %v241_v21  ;;  %946 = vmatmul.f32.gmra.mxu2 %v241_v21 }
  0x56   : > { %737 = vmatmul.f32.gmra.mxu1 %v242_v22 }
  0x57   : > { %1155 = vmatmul.f32.gmra.mxu3 %v242_v22 }
  0x5c   : > { %531 = vmatmul.f32.gmra.mxu0 %v243_v24  ;;  %949 = vmatmul.f32.gmra.mxu2 %v243_v24  ;;  %v4827_v24 = vperm.slane %v487_v52, 1 }
  0x5e   : > { %740 = vmatmul.f32.gmra.mxu1 %v244_v25 }
  0x5f   : > { %1158 = vmatmul.f32.gmra.mxu3 %v244_v25 }
  0x64   : > { %534 = vmatmul.f32.gmra.mxu0 %v245_v26  ;;  %952 = vmatmul.f32.gmra.mxu2 %v245_v26  ;;  %v2169_v26 = vld [vmem:[%s4834_s16] sm:$0xff] }
  0x66   : > { %743 = vmatmul.f32.gmra.mxu1 %v246_v27 }
  0x67   : > { %1161 = vmatmul.f32.gmra.mxu3 %v246_v27 }
  0x6c   : > { %537 = vmatmul.f32.gmra.mxu0 %v247_v28  ;;  %955 = vmatmul.f32.gmra.mxu2 %v247_v28 }
  0x6e   : > { %746 = vmatmul.f32.gmra.mxu1 %v248_v29 }
  0x6f   : > { %1164 = vmatmul.f32.gmra.mxu3 %v248_v29  ;;  %v273_v29 = vld [vmem:[%s4672_s14 + $0x150] sm:$0xff] }
  0x74   : > { %540 = vmatmul.f32.gmra.mxu0 %v249_v33  ;;  %958 = vmatmul.f32.gmra.mxu2 %v249_v33 }
  0x76   : > { %749 = vmatmul.f32.gmra.mxu1 %v250_v34 }
  0x77   : > { %1167 = vmatmul.f32.gmra.mxu3 %v250_v34 }
  0x7c   : > { %543 = vmatmul.f32.gmra.mxu0 %v251_v36  ;;  %961 = vmatmul.f32.gmra.mxu2 %v251_v36 }
  0x7e   : > { %752 = vmatmul.f32.gmra.mxu1 %v252_v37 }
  0x7f   : > { %1170 = vmatmul.f32.gmra.mxu3 %v252_v37  ;;  %v2170_v37 = vld [vmem:[%s4834_s16 + $0x8] sm:$0xff] }
  0x84   : > { %546 = vmatmul.f32.gmra.mxu0 %v253_v38  ;;  %964 = vmatmul.f32.gmra.mxu2 %v253_v38 }
  0x86   : > { %755 = vmatmul.f32.gmra.mxu1 %v254_v39 }
  0x87   : > { %1173 = vmatmul.f32.gmra.mxu3 %v254_v39 }
  0x8c   : > { %549 = vmatmul.f32.gmra.mxu0 %v255_v40  ;;  %967 = vmatmul.f32.gmra.mxu2 %v255_v40 }
  0x8e   : > { %758 = vmatmul.f32.gmra.mxu1 %v256_v41 }
  0x8f   : > { %1176 = vmatmul.f32.gmra.mxu3 %v256_v41  ;;  %v2173_v41 = vld [vmem:[%s4834_s16 + $0x20] sm:$0xff] }
  0x94   : > { %552 = vmatmul.f32.gmra.mxu0 %v257_v42  ;;  %970 = vmatmul.f32.gmra.mxu2 %v257_v42 }
  0x96   : > { %761 = vmatmul.f32.gmra.mxu1 %v258_v43 }
  0x97   : > { %1179 = vmatmul.f32.gmra.mxu3 %v258_v43 }
  0x9c   : > { %555 = vmatmul.f32.gmra.mxu0 %v259_v46  ;;  %973 = vmatmul.f32.gmra.mxu2 %v259_v46  ;;  %v398_v46 = vld [vmem:[%s6821_s1 + $0x138] sm:$0xff] }
  0x9d   : > { %1757 = vmatpush.msrb.mxu2 %v398_v46 }
  0x9e   : > { %764 = vmatmul.f32.gmra.mxu1 %v260_v47 }
  0x9f   : > { %1182 = vmatmul.f32.gmra.mxu3 %v260_v47  ;;  %v462_v47 = vld [vmem:[%s6821_s1 + $0x338] sm:$0xff] }
  0xa0   : > { %1966 = vmatpush.msrb.mxu3 %v462_v47 }
  0xa4   : > { %558 = vmatmul.f32.gmra.mxu0 %v261_v50  ;;  %976 = vmatmul.f32.gmra.mxu2 %v261_v50 }
  0xa6   : > { %767 = vmatmul.f32.gmra.mxu1 %v262_v51 }
  0xa7   : > { %1185 = vmatmul.f32.gmra.mxu3 %v262_v51  ;;  %v275_v51 = vld [vmem:[%s4672_s14 + $0x160] sm:$0xff] }
  0xa9   : > { %v514_v54 = vpop.f32.mrf.mxu0 }
  0xaa   : > { %v515_v56 = vadd.f32 %v514_v54, %v4787_v53  ;;  %v2174_v54 = vld [vmem:[%s4834_s16 + $0x28] sm:$0xff] }
  0xab   : > { %v723_v57 = vpop.f32.mrf.mxu1 }
  0xac   : > { %v4792_v59 = vadd.f32 %v723_v57, %v515_v56  ;;  %561 = vmatmul.f32.gmra.mxu0 %v263_v55  ;;  %979 = vmatmul.f32.gmra.mxu2 %v263_v55 }
  0xae   : > { %770 = vmatmul.f32.gmra.mxu1 %v264_v58  ;;  %v2425_v32 = vadd.f32 %v2169_v26, %v4792_v59  ;;  %v276_v59 = vld [vmem:[%s4672_s14 + $0x168] sm:$0xff] }
  0xaf   : > { %1188 = vmatmul.f32.gmra.mxu3 %v264_v58  ;;  %v932_v60 = vpop.f32.mrf.mxu2 }
  0xb0   : > { %v933_v27 = vadd.f32 %v932_v60, %v4827_v24  ;;  %v2681_v40 = vadd.f32 3.0, %v2425_v32 }
  0xb1   : > { %v517_v61 = vpop.f32.mrf.mxu0 }
  0xb2   : > { %v1141_v63 = vpop.f32.mrf.mxu3  ;;  %v518_v30 = vadd.f32 %v517_v61, %v4787_v53  ;;  %v2937_v56 = vmax.f32 %v2681_v40, 0.0  ;;  %v2177_v61 = vld [vmem:[%s4834_s16 + $0x40] sm:$0xff] }
  0xb3   : > { %v4795_v0 = vpop.f32.mrf.mxu1  ;;  %v1142_v36 = vadd.f32 %v1141_v63, %v933_v27 }
  0xb4   : > { %564 = vmatmul.f32.gmra.mxu0 %v265_v62  ;;  %982 = vmatmul.f32.gmra.mxu2 %v265_v62  ;;  %v727_v39 = vadd.f32 %v4795_v0, %v518_v30 }
  0xb5   : > { %v4855_v44 = vadd.f32 %v2170_v37, %v1142_v36 }
  0xb6   : > { %773 = vmatmul.f32.gmra.mxu1 %v266_v1  ;;  %v4866_v52 = vadd.f32 %v2173_v41, %v727_v39 }
  0xb7   : > { %1191 = vmatmul.f32.gmra.mxu3 %v266_v1  ;;  %v935_v2 = vpop.f32.mrf.mxu2  ;;  %v2682_v60 = vadd.f32 3.0, %v4855_v44 }
  0xb8   : > { %v936_v33 = vadd.f32 %v935_v2, %v4827_v24  ;;  %v2685_v1 = vadd.f32 3.0, %v4866_v52  ;;  %v3193_v2 = vmin.f32 %v2937_v56, 6.0 }
  0xb9   : > { %v520_v5 = vpop.f32.mrf.mxu0 }
  0xba   : > { %v1144_v7 = vpop.f32.mrf.mxu3  ;;  %v521_v38 = vadd.f32 %v520_v5, %v4787_v53 }
  0xbb   : > { %v729_v8 = vpop.f32.mrf.mxu1  ;;  %v1145_v42 = vadd.f32 %v1144_v7, %v936_v33  ;;  %v2938_v7 = vmax.f32 %v2682_v60, 0.0 }
  0xbc   : > { %567 = vmatmul.f32.gmra.mxu0 %v267_v6  ;;  %985 = vmatmul.f32.gmra.mxu2 %v267_v6  ;;  %v730_v48 = vadd.f32 %v729_v8, %v521_v38  ;;  %v397_v6 = vld [vmem:[%s6821_s1 + $0x130] sm:$0xff] }
  0xbd   : > { %v4871_v57 = vadd.f32 %v2174_v54, %v1145_v42  ;;  %1339 = vmatpush.msrb.mxu0 %v397_v6  ;;  %v3194_v30 = vmin.f32 %v2938_v7, 6.0  ;;  %v2189_v6 = vld [vmem:[%s4834_s16 + $0xa0] sm:$0xff] }
  0xbe   : > { %776 = vmatmul.f32.gmra.mxu1 %v268_v9  ;;  %v4878_v63 = vadd.f32 %v2177_v61, %v730_v48 }
  0xbf   : > { %1194 = vmatmul.f32.gmra.mxu3 %v268_v9  ;;  %v938_v10 = vpop.f32.mrf.mxu2  ;;  %v2686_v3 = vadd.f32 3.0, %v4871_v57  ;;  %v2181_v9 = vld [vmem:[%s4834_s16 + $0x60] sm:$0xff] }
  0xc0   : > { %v939_v45 = vadd.f32 %v938_v10, %v4827_v24  ;;  %v2689_v12 = vadd.f32 3.0, %v4878_v63 }
  0xc1   : > { %v523_v13 = vpop.f32.mrf.mxu0  ;;  %v2942_v26 = vmax.f32 %v2686_v3, 0.0 }
  0xc2   : > { %v1147_v15 = vpop.f32.mrf.mxu3  ;;  %v524_v49 = vadd.f32 %v523_v13, %v4787_v53  ;;  %v2945_v36 = vmax.f32 %v2689_v12, 0.0 }
  0xc3   : > { %v4813_v16 = vpop.f32.mrf.mxu1  ;;  %v1148_v62 = vadd.f32 %v1147_v15, %v939_v45  ;;  %v277_v15 = vld [vmem:[%s4672_s14 + $0x170] sm:$0xff]  ;;  %v3198_v40 = vmin.f32 %v2942_v26, 6.0  ;;  %v2194_v26 = vld [vmem:[%s4834_s16 + $0xc8] sm:$0xff] }
  0xc4   : > { %570 = vmatmul.f32.gmra.mxu0 %v269_v14  ;;  %988 = vmatmul.f32.gmra.mxu2 %v269_v14  ;;  %v733_v0 = vadd.f32 %v4813_v16, %v524_v49  ;;  %v2941_v16 = vmax.f32 %v2685_v1, 0.0  ;;  %v3201_v47 = vmin.f32 %v2945_v36, 6.0  ;;  %v2185_v49 = vld [vmem:[%s4834_s16 + $0x80] sm:$0xff] }
  0xc5   : > { %v4887_v8 = vadd.f32 %v2178_v4, %v1148_v62  ;;  %v280_v4 = vld [vmem:[%s4672_s14 + $0x188] sm:$0xff] }
  0xc6   : > { %779 = vmatmul.f32.gmra.mxu1 %v270_v17  ;;  %v4896_v13 = vadd.f32 %v2181_v9, %v733_v0  ;;  %v3454_v0 = vmul.f32 %v3198_v40, %v4871_v57  ;;  %v3457_v57 = vmul.f32 %v3201_v47, %v4878_v63 }
  0xc7   : > { %1197 = vmatmul.f32.gmra.mxu3 %v270_v17  ;;  %v4816_v18 = vpop.f32.mrf.mxu2  ;;  %v2690_v33 = vadd.f32 3.0, %v4887_v8 }
  0xc8   : > { %v942_v10 = vadd.f32 %v4816_v18, %v4827_v24  ;;  %v2693_v37 = vadd.f32 3.0, %v4896_v13 }
  0xc9   : > { %v4818_v19 = vpop.f32.mrf.mxu0  ;;  %v2946_v46 = vmax.f32 %v2690_v33, 0.0 }
  0xca   : > { %v4822_v21 = vpop.f32.mrf.mxu3  ;;  %v527_v17 = vadd.f32 %v4818_v19, %v4787_v53  ;;  %v2949_v48 = vmax.f32 %v2693_v37, 0.0  ;;  %v4963_v37 = vmul.f32 0.16666667, %v3457_v57  ;;  %v5025_v57 = vld [vmem:[%s4834_s16 + $0x160] sm:$0xff] }
  0xcb   : > { %v4824_v22 = vpop.f32.mrf.mxu1 }
  0xcc   : > { %573 = vmatmul.f32.gmra.mxu0 %v271_v20  ;;  %991 = vmatmul.f32.gmra.mxu2 %v271_v20  ;;  %v736_v38 = vadd.f32 %v4824_v22, %v527_v17  ;;  %v3205_v9 = vmin.f32 %v2949_v48, 6.0 }
  0xce   : > { %782 = vmatmul.f32.gmra.mxu1 %v272_v23 }
  0xcf   : > { %1200 = vmatmul.f32.gmra.mxu3 %v272_v23  ;;  %v4836_v25 = vpop.f32.mrf.mxu2  ;;  %v3449_v23 = vmul.f32 %v3193_v2, %v2425_v32  ;;  %v3197_v32 = vmin.f32 %v2941_v16, 6.0  ;;  %v2193_v16 = vld [vmem:[%s4834_s16 + $0xc0] sm:$0xff] }
  0xd0   : > { %v945_v18 = vadd.f32 %v4836_v25, %v4827_v24 }
  0xd1   : > { %v4840_v28 = vpop.f32.mrf.mxu0  ;;  %v4911_v39 = vmul.f32 0.16666667, %v3449_v23  ;;  %v3453_v56 = vmul.f32 %v3197_v32, %v4866_v52 }
  0xd2   : > { %v4844_v31 = vpop.f32.mrf.mxu3  ;;  %v530_v19 = vadd.f32 %v4840_v28, %v4787_v53  ;;  %v3450_v28 = vmul.f32 %v3194_v30, %v4855_v44  ;;  %v2186_v44 = vld [vmem:[%s4834_s16 + $0x88] sm:$0xff] }
  0xd3   : > { %v4848_v34 = vpop.f32.mrf.mxu1  ;;  %v1154_v41 = vadd.f32 %v4844_v31, %v945_v18  ;;  %v4944_v12 = vmul.f32 0.16666667, %v3453_v56  ;;  %v2202_v56 = vld [vmem:[%s4834_s16 + $0x108] sm:$0xff] }
  0xd4   : > { %576 = vmatmul.f32.gmra.mxu0 %v273_v29  ;;  %994 = vmatmul.f32.gmra.mxu2 %v273_v29  ;;  %v278_v29 = vld [vmem:[%s4672_s14 + $0x178] sm:$0xff]  ;;  %v4936_v52 = vmul.f32 0.16666667, %v3450_v28 }
  0xd5   : > { %v4931_v1 = vadd.f32 %v2186_v44, %v1154_v41 }
  0xd6   : > { %785 = vmatmul.f32.gmra.mxu1 %v274_v35 }
  0xd7   : > { %1203 = vmatmul.f32.gmra.mxu3 %v274_v35  ;;  %v947_v43 = vpop.f32.mrf.mxu2  ;;  %v1151_v35 = vadd.f32 %v4822_v21, %v942_v10  ;;  %v2182_v21 = vld [vmem:[%s4834_s16 + $0x68] sm:$0xff]  ;;  %v4953_v63 = vadd.f32 3.0, %v4931_v1 }
  0xd8   : > { %v948_v25 = vadd.f32 %v947_v43, %v4827_v24 }
  0xd9   : > { %v532_v50 = vpop.f32.mrf.mxu0  ;;  %v4917_v22 = vadd.f32 %v2182_v21, %v1151_v35  ;;  %v2197_v35 = vld [vmem:[%s4834_s16 + $0xe0] sm:$0xff]  ;;  %v281_v21 = vld [vmem:[%s4672_s14 + $0x190] sm:$0xff] }
  0xda   : > { %v4869_v55 = vpop.f32.mrf.mxu3  ;;  %v533_v42 = vadd.f32 %v532_v50, %v4787_v53  ;;  %v279_v50 = vld [vmem:[%s4672_s14 + $0x180] sm:$0xff] }
  0xdb   : > { %v4873_v58 = vpop.f32.mrf.mxu1  ;;  %v1157_v60 = vadd.f32 %v4869_v55, %v948_v25  ;;  %v2694_v55 = vadd.f32 3.0, %v4917_v22  ;;  %v2198_v25 = vld [vmem:[%s4834_s16 + $0xe8] sm:$0xff] }
  0xdc   : > { %579 = vmatmul.f32.gmra.mxu0 %v275_v51  ;;  %997 = vmatmul.f32.gmra.mxu2 %v275_v51  ;;  %v739_v51 = vadd.f32 %v4848_v34, %v530_v19  ;;  %v742_v34 = vadd.f32 %v4873_v58, %v533_v42  ;;  %v2190_v58 = vld [vmem:[%s4834_s16 + $0xa8] sm:$0xff]  ;;  %v3461_v19 = vmul.f32 %v3205_v9, %v4896_v13 }
  0xdd   : > { %v2950_v30 = vmax.f32 %v2694_v55, 0.0  ;;  %v5016_v55 = vld [vmem:[%s4834_s16 + $0x128] sm:$0xff] }
  0xde   : > { %788 = vmatmul.f32.gmra.mxu1 %v276_v59  ;;  %v4941_v10 = vadd.f32 %v2189_v6, %v739_v51  ;;  %v4955_v23 = vadd.f32 %v2193_v16, %v742_v34  ;;  %v4987_v51 = vld [vmem:[%s4672_s14 + $0x198] sm:$0xff]  ;;  %v2205_v34 = vld [vmem:[%s4834_s16 + $0x120] sm:$0xff]  ;;  %v5028_v9 = vld [vmem:[%s4834_s16 + $0x168] sm:$0xff] }
  0xdf   : > { %1206 = vmatmul.f32.gmra.mxu3 %v276_v59  ;;  %v950_v5 = vpop.f32.mrf.mxu2  ;;  %v4925_v59 = vadd.f32 %v2185_v49, %v736_v38  ;;  %v5019_v6 = vld [vmem:[%s4834_s16 + $0x140] sm:$0xff]  ;;  %v5040_v16 = vld [vmem:[%s4834_s16 + $0x1a8] sm:$0xff] }
  0xe0   : > { %v951_v43 = vadd.f32 %v950_v5, %v4827_v24  ;;  %v3202_v5 = vmin.f32 %v2946_v46, 6.0  ;;  %v4967_v32 = vadd.f32 3.0, %v4941_v10  ;;  %v5112_v46 = vld [vmem:[%s4834_s16 + $0x328] sm:$0xff] }
  0xe1   : > { %v535_v14 = vpop.f32.mrf.mxu0  ;;  %6841 = vst [vmem:[#allocation18_spill] sm:$0xff] %v5112_v46  ;;  %v5133_v46 = vld [vmem:[%s4834_s16 + $0x3a0] sm:$0xff] }
  0xe2   : > { %v1159_v20 = vpop.f32.mrf.mxu3  ;;  %v536_v31 = vadd.f32 %v535_v14, %v4787_v53  ;;  %v2697_v14 = vadd.f32 3.0, %v4925_v59  ;;  %6848 = vst [vmem:[#allocation25_spill] sm:$0xff] %v5133_v46  ;;  %v5154_v46 = vld [vmem:[%s4834_s16 + $0x408] sm:$0xff] }
  0xe3   : > { %v744_v27 = vpop.f32.mrf.mxu1  ;;  %v1160_v7 = vadd.f32 %v1159_v20, %v951_v43  ;;  %v4950_v20 = vmul.f32 0.16666667, %v3454_v0  ;;  %v4982_v43 = vadd.f32 3.0, %v4955_v23  ;;  %6855 = vst [vmem:[#allocation32_spill] sm:$0xff] %v5154_v46  ;;  %v5175_v46 = vld [vmem:[%s4834_s16 + $0x480] sm:$0xff] }
  0xe4   : > { %582 = vmatmul.f32.gmra.mxu0 %v277_v15  ;;  %1000 = vmatmul.f32.gmra.mxu2 %v277_v15  ;;  %v745_v11 = vadd.f32 %v744_v27, %v536_v31  ;;  %v4947_v15 = vadd.f32 %v2190_v58, %v1157_v60  ;;  %v4997_v60 = vmul.f32 0.16666667, %v3461_v19  ;;  %v5031_v58 = vld [vmem:[%s4834_s16 + $0x180] sm:$0xff]  ;;  %6862 = vst [vmem:[#allocation39_spill] sm:$0xff] %v5175_v46  ;;  %v5196_v46 = vld [vmem:[%s4834_s16 + $0x4e8] sm:$0xff] }
  0xe5   : > { %v4959_v33 = vadd.f32 %v2194_v26, %v1160_v7  ;;  %v5022_v7 = vld [vmem:[%s4834_s16 + $0x148] sm:$0xff]  ;;  %v5067_v19 = vld [vmem:[%s4834_s16 + $0x240] sm:$0xff]  ;;  %6869 = vst [vmem:[#allocation46_spill] sm:$0xff] %v5196_v46 }
  0xe6   : > { %791 = vmatmul.f32.gmra.mxu1 %v278_v29  ;;  %v4969_v38 = vadd.f32 %v2197_v35, %v745_v11  ;;  %v4974_v41 = vadd.f32 3.0, %v4947_v15  ;;  %v5034_v11 = vld [vmem:[%s4834_s16 + $0x188] sm:$0xff]  ;;  %v5061_v35 = vld [vmem:[%s4834_s16 + $0x220] sm:$0xff]  ;;  %6826 = vst [vmem:[#allocation3_spill] sm:$0xff] %v5067_v19 }
  0xe7   : > { %1209 = vmatmul.f32.gmra.mxu3 %v278_v29  ;;  %v953_v45 = vpop.f32.mrf.mxu2  ;;  %v3458_v29 = vmul.f32 %v3202_v5, %v4887_v8  ;;  %v2953_v8 = vmax.f32 %v2697_v14, 0.0  ;;  %v5037_v14 = vld [vmem:[%s4834_s16 + $0x1a0] sm:$0xff]  ;;  %v5046_v26 = vld [vmem:[%s4834_s16 + $0x1c8] sm:$0xff] }
  0xe8   : > { %v954_v61 = vadd.f32 %v953_v45, %v4827_v24  ;;  %v2201_v45 = vld [vmem:[%s4834_s16 + $0x100] sm:$0xff] }
  0xe9   : > { %v538_v54 = vpop.f32.mrf.mxu0  ;;  %v4989_v31 = vmul.f32 0.16666667, %v3458_v29  ;;  %v5055_v29 = vld [vmem:[%s4834_s16 + $0x200] sm:$0xff] }
  0xea   : > { %v1162_v62 = vpop.f32.mrf.mxu3  ;;  %v539_v2 = vadd.f32 %v538_v54, %v4787_v53  ;;  %v4991_v54 = vmin.f32 %v2950_v30, 6.0  ;;  %v5058_v30 = vld [vmem:[%s4834_s16 + $0x208] sm:$0xff]  ;;  %v5217_v46 = vld [vmem:[%s4834_s16 + $0x560] sm:$0xff] }
  0xeb   : > { %v747_v3 = vpop.f32.mrf.mxu1  ;;  %v1163_v17 = vadd.f32 %v1162_v62, %v954_v61  ;;  %v5001_v62 = vadd.f32 3.0, %v4969_v38  ;;  %v5109_v61 = vld [vmem:[%s4834_s16 + $0x320] sm:$0xff]  ;;  %6876 = vst [vmem:[#allocation53_spill] sm:$0xff] %v5217_v46  ;;  %v5238_v46 = vld [vmem:[%s4834_s16 + $0x5c8] sm:$0xff] }
  0xec   : > { %585 = vmatmul.f32.gmra.mxu0 %v279_v50  ;;  %1003 = vmatmul.f32.gmra.mxu2 %v279_v50  ;;  %v748_v18 = vadd.f32 %v747_v3, %v539_v2  ;;  %v4994_v50 = vadd.f32 3.0, %v4959_v33  ;;  %v5006_v2 = vmin.f32 %v2953_v8, 6.0  ;;  %v5079_v8 = vld [vmem:[%s4834_s16 + $0x280] sm:$0xff]  ;;  %v5106_v3 = vld [vmem:[%s4834_s16 + $0x308] sm:$0xff]  ;;  %6840 = vst [vmem:[#allocation17_spill] sm:$0xff] %v5109_v61 }
  0xed   : > { %v4976_v42 = vadd.f32 %v2198_v25, %v1163_v17  ;;  %v5043_v17 = vld [vmem:[%s4834_s16 + $0x1c0] sm:$0xff]  ;;  %v5070_v25 = vld [vmem:[%s4834_s16 + $0x248] sm:$0xff]  ;;  %6830 = vst [vmem:[#allocation7_spill] sm:$0xff] %v5079_v8  ;;  %v5746_v8 = vld [vmem:[%s4834_s16 + $0x7d8] sm:$0xff] }
  0xee   : > { %794 = vmatmul.f32.gmra.mxu1 %v280_v4  ;;  %v4984_v47 = vadd.f32 %v2201_v45, %v748_v18  ;;  %v5049_v18 = vld [vmem:[%s4834_s16 + $0x1e0] sm:$0xff]  ;;  %6827 = vst [vmem:[#allocation4_spill] sm:$0xff] %v5070_v25  ;;  %v5082_v45 = vld [vmem:[%s4834_s16 + $0x288] sm:$0xff] }
  0xef   : > { %1212 = vmatmul.f32.gmra.mxu3 %v280_v4  ;;  %v956_v27 = vpop.f32.mrf.mxu2  ;;  %v5010_v4 = vadd.f32 3.0, %v4976_v42  ;;  %6831 = vst [vmem:[#allocation8_spill] sm:$0xff] %v5082_v45  ;;  %v5130_v61 = vld [vmem:[%s4834_s16 + $0x388] sm:$0xff]  ;;  %v5709_v45 = vld [vmem:[%s4834_s16 + $0x790] sm:$0xff] }
  0xf0   : > { %v957_v36 = vadd.f32 %v956_v27, %v4827_v24  ;;  %v5052_v27 = vld [vmem:[%s4834_s16 + $0x1e8] sm:$0xff]  ;;  %6839 = vst [vmem:[#allocation16_spill] sm:$0xff] %v5106_v3  ;;  %v5127_v3 = vld [vmem:[%s4834_s16 + $0x380] sm:$0xff] }
  0xf1   : > { %v541_v40 = vpop.f32.mrf.mxu0  ;;  %6846 = vst [vmem:[#allocation23_spill] sm:$0xff] %v5127_v3  ;;  %v5148_v3 = vld [vmem:[%s4834_s16 + $0x3e8] sm:$0xff] }
  0xf2   : > { %v542_v28 = vadd.f32 %v541_v40, %v4787_v53  ;;  %v1165_v13 = vpop.f32.mrf.mxu3  ;;  %v5073_v40 = vld [vmem:[%s4834_s16 + $0x260] sm:$0xff]  ;;  %6847 = vst [vmem:[#allocation24_spill] sm:$0xff] %v5130_v61 }
  0xf3   : > { %v1166_v48 = vadd.f32 %v1165_v13, %v957_v36  ;;  %v750_v49 = vpop.f32.mrf.mxu1  ;;  %v5064_v36 = vld [vmem:[%s4834_s16 + $0x228] sm:$0xff]  ;;  %6828 = vst [vmem:[#allocation5_spill] sm:$0xff] %v5073_v40  ;;  %v5151_v61 = vld [vmem:[%s4834_s16 + $0x400] sm:$0xff] }
  0xf4   : > { %v751_v44 = vadd.f32 %v750_v49, %v542_v28  ;;  %588 = vmatmul.f32.gmra.mxu0 %v281_v21  ;;  %1006 = vmatmul.f32.gmra.mxu2 %v281_v21  ;;  %6825 = vst [vmem:[#allocation2_spill] sm:$0xff] %v5064_v36  ;;  %v5076_v21 = vld [vmem:[%s4834_s16 + $0x268] sm:$0xff]  ;;  %v5085_v28 = vld [vmem:[%s4834_s16 + $0x2a0] sm:$0xff] }
  0xf5   : > { %v5003_v0 = vadd.f32 %v2202_v56, %v1166_v48  ;;  %6829 = vst [vmem:[#allocation6_spill] sm:$0xff] %v5076_v21  ;;  %v5088_v13 = vld [vmem:[%s4834_s16 + $0x2a8] sm:$0xff]  ;;  %v5091_v48 = vld [vmem:[%s4834_s16 + $0x2c0] sm:$0xff]  ;;  %v5749_v21 = vld [vmem:[%s4834_s16 + $0x7f0] sm:$0xff] }
  0xf6   : > { %v5012_v5 = vadd.f32 %v2205_v34, %v751_v44  ;;  %797 = vmatmul.f32.gmra.mxu1 %v4987_v51  ;;  %6832 = vst [vmem:[#allocation9_spill] sm:$0xff] %v5085_v28  ;;  %v5094_v49 = vld [vmem:[%s4834_s16 + $0x2c8] sm:$0xff]  ;;  %v5097_v56 = vld [vmem:[%s4834_s16 + $0x2e0] sm:$0xff] }
  0xf7   : > { %6833 = vst [vmem:[#allocation10_spill] sm:$0xff] %v5088_v13  ;;  %v5100_v44 = vld [vmem:[%s4834_s16 + $0x2e8] sm:$0xff]  ;;  %v5103_v34 = vld [vmem:[%s4834_s16 + $0x300] sm:$0xff]  ;;  %v5667_v13 = vld [vmem:[%s4834_s16 + $0x6d0] sm:$0xff]  ;;  %1215 = vmatmul.f32.gmra.mxu3 %v4987_v51  ;;  %v2714_v51 = vadd.f32 3.0, %v5003_v0 }
  0xf8   : > { %6834 = vst [vmem:[#allocation11_spill] sm:$0xff] %v5091_v48  ;;  %v5658_v48 = vld [vmem:[%s4834_s16 + $0x698] sm:$0xff]  ;;  %v284_v36 = vld [vmem:[%s4672_s14 + $0x1a8] sm:$0xff] }
  0xf9   : > { %6835 = vst [vmem:[#allocation12_spill] sm:$0xff] %v5094_v49  ;;  %v5115_v49 = vld [vmem:[%s4834_s16 + $0x340] sm:$0xff] }
  0xfa   : > { %6836 = vst [vmem:[#allocation13_spill] sm:$0xff] %v5097_v56  ;;  %v5118_v56 = vld [vmem:[%s4834_s16 + $0x348] sm:$0xff] }
  0xfb   : > { %6837 = vst [vmem:[#allocation14_spill] sm:$0xff] %v5100_v44  ;;  %v5121_v44 = vld [vmem:[%s4834_s16 + $0x360] sm:$0xff]  ;;  %v753_v19 = vpop.f32.mrf.mxu1 }
  0xfc   : > { %6838 = vst [vmem:[#allocation15_spill] sm:$0xff] %v5103_v34  ;;  %v5124_v34 = vld [vmem:[%s4834_s16 + $0x368] sm:$0xff] }
  0xfd   : > { %6842 = vst [vmem:[#allocation19_spill] sm:$0xff] %v5115_v49  ;;  %v5136_v49 = vld [vmem:[%s4834_s16 + $0x3a8] sm:$0xff] }
  0xfe   : > { %6843 = vst [vmem:[#allocation20_spill] sm:$0xff] %v5118_v56  ;;  %v5139_v56 = vld [vmem:[%s4834_s16 + $0x3c0] sm:$0xff]  ;;  %800 = vmatmul.f32.gmra.mxu1 %v284_v36 }
  0xff   : > { %6844 = vst [vmem:[#allocation21_spill] sm:$0xff] %v5121_v44  ;;  %v5142_v44 = vld [vmem:[%s4834_s16 + $0x3c8] sm:$0xff]  ;;  %1218 = vmatmul.f32.gmra.mxu3 %v284_v36 }
 0x100   : > { %6845 = vst [vmem:[#allocation22_spill] sm:$0xff] %v5124_v34  ;;  %v5145_v34 = vld [vmem:[%s4834_s16 + $0x3e0] sm:$0xff] }
 0x101   : > { %6849 = vst [vmem:[#allocation26_spill] sm:$0xff] %v5136_v49  ;;  %v5157_v49 = vld [vmem:[%s4834_s16 + $0x420] sm:$0xff] }
 0x102   : > { %6850 = vst [vmem:[#allocation27_spill] sm:$0xff] %v5139_v56  ;;  %v5160_v56 = vld [vmem:[%s4834_s16 + $0x428] sm:$0xff] }
 0x103   : > { %6851 = vst [vmem:[#allocation28_spill] sm:$0xff] %v5142_v44  ;;  %v5163_v44 = vld [vmem:[%s4834_s16 + $0x440] sm:$0xff] }
 0x104   : > { %6852 = vst [vmem:[#allocation29_spill] sm:$0xff] %v5145_v34  ;;  %v5166_v34 = vld [vmem:[%s4834_s16 + $0x448] sm:$0xff] }
 0x105   : > { %6853 = vst [vmem:[#allocation30_spill] sm:$0xff] %v5148_v3  ;;  %v5169_v3 = vld [vmem:[%s4834_s16 + $0x460] sm:$0xff] }
 0x106   : > { %6854 = vst [vmem:[#allocation31_spill] sm:$0xff] %v5151_v61  ;;  %v5172_v61 = vld [vmem:[%s4834_s16 + $0x468] sm:$0xff] }
 0x107   : > { %6856 = vst [vmem:[#allocation33_spill] sm:$0xff] %v5157_v49  ;;  %v5178_v49 = vld [vmem:[%s4834_s16 + $0x488] sm:$0xff] }
 0x108   : > { %6857 = vst [vmem:[#allocation34_spill] sm:$0xff] %v5160_v56  ;;  %v5181_v56 = vld [vmem:[%s4834_s16 + $0x4a0] sm:$0xff] }
 0x109   : > { %6858 = vst [vmem:[#allocation35_spill] sm:$0xff] %v5163_v44  ;;  %v5184_v44 = vld [vmem:[%s4834_s16 + $0x4a8] sm:$0xff] }
 0x10a   : > { %6859 = vst [vmem:[#allocation36_spill] sm:$0xff] %v5166_v34  ;;  %v5187_v34 = vld [vmem:[%s4834_s16 + $0x4c0] sm:$0xff] }
 0x10b   : > { %6860 = vst [vmem:[#allocation37_spill] sm:$0xff] %v5169_v3  ;;  %v5190_v3 = vld [vmem:[%s4834_s16 + $0x4c8] sm:$0xff] }
 0x10c   : > { %6861 = vst [vmem:[#allocation38_spill] sm:$0xff] %v5172_v61  ;;  %v5193_v61 = vld [vmem:[%s4834_s16 + $0x4e0] sm:$0xff] }
 0x10d   : > { %6863 = vst [vmem:[#allocation40_spill] sm:$0xff] %v5178_v49  ;;  %v5199_v49 = vld [vmem:[%s4834_s16 + $0x500] sm:$0xff] }
 0x10e   : > { %6864 = vst [vmem:[#allocation41_spill] sm:$0xff] %v5181_v56  ;;  %v5202_v56 = vld [vmem:[%s4834_s16 + $0x508] sm:$0xff] }
 0x10f   : > { %6865 = vst [vmem:[#allocation42_spill] sm:$0xff] %v5184_v44  ;;  %v5205_v44 = vld [vmem:[%s4834_s16 + $0x520] sm:$0xff] }
 0x110   : > { %6866 = vst [vmem:[#allocation43_spill] sm:$0xff] %v5187_v34  ;;  %v5208_v34 = vld [vmem:[%s4834_s16 + $0x528] sm:$0xff] }
 0x111   : > { %6867 = vst [vmem:[#allocation44_spill] sm:$0xff] %v5190_v3  ;;  %v5211_v3 = vld [vmem:[%s4834_s16 + $0x540] sm:$0xff] }
 0x112   : > { %6868 = vst [vmem:[#allocation45_spill] sm:$0xff] %v5193_v61  ;;  %v5214_v61 = vld [vmem:[%s4834_s16 + $0x548] sm:$0xff] }
 0x113   : > { %6870 = vst [vmem:[#allocation47_spill] sm:$0xff] %v5199_v49  ;;  %v5220_v49 = vld [vmem:[%s4834_s16 + $0x568] sm:$0xff] }
 0x114   : > { %6871 = vst [vmem:[#allocation48_spill] sm:$0xff] %v5202_v56  ;;  %v5223_v56 = vld [vmem:[%s4834_s16 + $0x580] sm:$0xff] }
 0x115   : > { %6872 = vst [vmem:[#allocation49_spill] sm:$0xff] %v5205_v44  ;;  %v5226_v44 = vld [vmem:[%s4834_s16 + $0x588] sm:$0xff] }
 0x116   : > { %6873 = vst [vmem:[#allocation50_spill] sm:$0xff] %v5208_v34  ;;  %v5229_v34 = vld [vmem:[%s4834_s16 + $0x5a0] sm:$0xff] }
 0x117   : > { %6874 = vst [vmem:[#allocation51_spill] sm:$0xff] %v5211_v3  ;;  %v5232_v3 = vld [vmem:[%s4834_s16 + $0x5a8] sm:$0xff] }
 0x118   : > { %6875 = vst [vmem:[#allocation52_spill] sm:$0xff] %v5214_v61  ;;  %v5235_v61 = vld [vmem:[%s4834_s16 + $0x5c0] sm:$0xff] }
 0x119   : > { %6877 = vst [vmem:[#allocation54_spill] sm:$0xff] %v5220_v49  ;;  %v5241_v49 = vld [vmem:[%s4834_s16 + $0x5e0] sm:$0xff] }
 0x11a   : > { %6878 = vst [vmem:[#allocation55_spill] sm:$0xff] %v5223_v56  ;;  %v5244_v56 = vld [vmem:[%s4834_s16 + $0x5e8] sm:$0xff] }
 0x11b   : > { %6879 = vst [vmem:[#allocation56_spill] sm:$0xff] %v5226_v44  ;;  %v5247_v44 = vld [vmem:[%s4834_s16 + $0x600] sm:$0xff] }
 0x11c   : > { %6880 = vst [vmem:[#allocation57_spill] sm:$0xff] %v5229_v34  ;;  %v5250_v34 = vld [vmem:[%s4834_s16 + $0x608] sm:$0xff] }
 0x11d   : > { %6881 = vst [vmem:[#allocation58_spill] sm:$0xff] %v5232_v3  ;;  %v5253_v3 = vld [vmem:[%s4834_s16 + $0x620] sm:$0xff] }
 0x11e   : > { %6882 = vst [vmem:[#allocation59_spill] sm:$0xff] %v5235_v61  ;;  %v5256_v61 = vld [vmem:[%s4834_s16 + $0x628] sm:$0xff] }
 0x11f   : > { %6883 = vst [vmem:[#allocation60_spill] sm:$0xff] %v5238_v46  ;;  %v5259_v46 = vld [vmem:[%s4834_s16 + $0x640] sm:$0xff] }
 0x120   : > { %6884 = vst [vmem:[#allocation61_spill] sm:$0xff] %v5241_v49  ;;  %v5262_v49 = vld [vmem:[%s4834_s16 + $0x648] sm:$0xff] }
 0x121   : > { %6885 = vst [vmem:[#allocation62_spill] sm:$0xff] %v5244_v56  ;;  %v5265_v56 = vld [vmem:[%s4834_s16 + $0x660] sm:$0xff] }
 0x122   : > { %6886 = vst [vmem:[#allocation63_spill] sm:$0xff] %v5247_v44  ;;  %v5268_v44 = vld [vmem:[%s4834_s16 + $0x668] sm:$0xff] }
 0x123   : > { %6887 = vst [vmem:[#allocation64_spill] sm:$0xff] %v5250_v34  ;;  %v5271_v34 = vld [vmem:[%s4834_s16 + $0x680] sm:$0xff] }
 0x124   : > { %6888 = vst [vmem:[#allocation65_spill] sm:$0xff] %v5253_v3  ;;  %v5274_v3 = vld [vmem:[%s4834_s16 + $0x688] sm:$0xff] }
 0x125   : > { %6889 = vst [vmem:[#allocation66_spill] sm:$0xff] %v5256_v61  ;;  %v5277_v61 = vld [vmem:[%s4834_s16 + $0x6a0] sm:$0xff] }
 0x126   : > { %6890 = vst [vmem:[#allocation67_spill] sm:$0xff] %v5259_v46  ;;  %v5280_v46 = vld [vmem:[%s4834_s16 + $0x6a8] sm:$0xff] }
 0x127   : > { %6891 = vst [vmem:[#allocation68_spill] sm:$0xff] %v5262_v49  ;;  %v5283_v49 = vld [vmem:[%s4834_s16 + $0x6c0] sm:$0xff] }
 0x128   : > { %6892 = vst [vmem:[#allocation69_spill] sm:$0xff] %v5265_v56  ;;  %v5286_v56 = vld [vmem:[%s4834_s16 + $0x6c8] sm:$0xff] }
 0x129   : > { %6893 = vst [vmem:[#allocation70_spill] sm:$0xff] %v5268_v44  ;;  %v5289_v44 = vld [vmem:[%s4834_s16 + $0x6e0] sm:$0xff] }
 0x12a   : > { %6894 = vst [vmem:[#allocation71_spill] sm:$0xff] %v5271_v34  ;;  %v5292_v34 = vld [vmem:[%s4834_s16 + $0x6e8] sm:$0xff] }
 0x12b   : > { %6895 = vst [vmem:[#allocation72_spill] sm:$0xff] %v5274_v3  ;;  %v5295_v3 = vld [vmem:[%s4834_s16 + $0x700] sm:$0xff] }
 0x12c   : > { %6896 = vst [vmem:[#allocation73_spill] sm:$0xff] %v5277_v61  ;;  %v5298_v61 = vld [vmem:[%s4834_s16 + $0x708] sm:$0xff] }
 0x12d   : > { %6897 = vst [vmem:[#allocation74_spill] sm:$0xff] %v5280_v46  ;;  %v5301_v46 = vld [vmem:[%s4834_s16 + $0x720] sm:$0xff] }
 0x12e   : > { %6898 = vst [vmem:[#allocation75_spill] sm:$0xff] %v5283_v49  ;;  %v5304_v49 = vld [vmem:[%s4834_s16 + $0x728] sm:$0xff] }
 0x12f   : > { %6899 = vst [vmem:[#allocation76_spill] sm:$0xff] %v5286_v56  ;;  %v5307_v56 = vld [vmem:[%s4834_s16 + $0x740] sm:$0xff] }
 0x130   : > { %6900 = vst [vmem:[#allocation77_spill] sm:$0xff] %v5289_v44  ;;  %v5310_v44 = vld [vmem:[%s4834_s16 + $0x748] sm:$0xff] }
 0x131   : > { %6901 = vst [vmem:[#allocation78_spill] sm:$0xff] %v5292_v34  ;;  %v5313_v34 = vld [vmem:[%s4834_s16 + $0x760] sm:$0xff] }
 0x132   : > { %6902 = vst [vmem:[#allocation79_spill] sm:$0xff] %v5295_v3  ;;  %v5316_v3 = vld [vmem:[%s4834_s16 + $0x768] sm:$0xff] }
 0x133   : > { %6903 = vst [vmem:[#allocation80_spill] sm:$0xff] %v5298_v61  ;;  %v5319_v61 = vld [vmem:[%s4834_s16 + $0x780] sm:$0xff] }
 0x134   : > { %6904 = vst [vmem:[#allocation81_spill] sm:$0xff] %v5301_v46  ;;  %v5322_v46 = vld [vmem:[%s4834_s16 + $0x788] sm:$0xff] }
 0x135   : > { %6905 = vst [vmem:[#allocation82_spill] sm:$0xff] %v5304_v49  ;;  %v5325_v49 = vld [vmem:[%s4834_s16 + $0x7a0] sm:$0xff] }
 0x136   : > { %6906 = vst [vmem:[#allocation83_spill] sm:$0xff] %v5307_v56  ;;  %v5328_v56 = vld [vmem:[%s4834_s16 + $0x7a8] sm:$0xff] }
 0x137   : > { %6907 = vst [vmem:[#allocation84_spill] sm:$0xff] %v5310_v44  ;;  %v5331_v44 = vld [vmem:[%s4834_s16 + $0x7c0] sm:$0xff] }
 0x138   : > { %6908 = vst [vmem:[#allocation85_spill] sm:$0xff] %v5313_v34  ;;  %v5334_v34 = vld [vmem:[%s4834_s16 + $0x7c8] sm:$0xff] }
 0x139   : > { %6909 = vst [vmem:[#allocation86_spill] sm:$0xff] %v5316_v3  ;;  %v5337_v3 = vld [vmem:[%s4834_s16 + $0x7e0] sm:$0xff] }
 0x13a   : > { %6910 = vst [vmem:[#allocation87_spill] sm:$0xff] %v5319_v61  ;;  %v5340_v61 = vld [vmem:[%s4834_s16 + $0x7e8] sm:$0xff] }
 0x13b   : > { %6911 = vst [vmem:[#allocation88_spill] sm:$0xff] %v5322_v46  ;;  %v5343_v46 = vld [vmem:[%s4834_s16 + $0x10] sm:$0xff] }
 0x13c   : > { %6912 = vst [vmem:[#allocation89_spill] sm:$0xff] %v5325_v49  ;;  %v5346_v49 = vld [vmem:[%s4834_s16 + $0x18] sm:$0xff] }
 0x13d   : > { %6913 = vst [vmem:[#allocation90_spill] sm:$0xff] %v5328_v56  ;;  %v5349_v56 = vld [vmem:[%s4834_s16 + $0x30] sm:$0xff] }
 0x13e   : > { %6914 = vst [vmem:[#allocation91_spill] sm:$0xff] %v5331_v44  ;;  %v5352_v44 = vld [vmem:[%s4834_s16 + $0x38] sm:$0xff] }
 0x13f   : > { %6915 = vst [vmem:[#allocation92_spill] sm:$0xff] %v5334_v34  ;;  %v5355_v34 = vld [vmem:[%s4834_s16 + $0x50] sm:$0xff] }
 0x140   : > { %6916 = vst [vmem:[#allocation93_spill] sm:$0xff] %v5337_v3  ;;  %v5358_v3 = vld [vmem:[%s4834_s16 + $0x58] sm:$0xff] }
 0x141   : > { %6917 = vst [vmem:[#allocation94_spill] sm:$0xff] %v5340_v61  ;;  %v5361_v61 = vld [vmem:[%s4834_s16 + $0x70] sm:$0xff] }
 0x142   : > { %6918 = vst [vmem:[#allocation95_spill] sm:$0xff] %v5343_v46  ;;  %v5364_v46 = vld [vmem:[%s4834_s16 + $0x78] sm:$0xff] }
 0x143   : > { %6919 = vst [vmem:[#allocation96_spill] sm:$0xff] %v5346_v49  ;;  %v5367_v49 = vld [vmem:[%s4834_s16 + $0x90] sm:$0xff] }
 0x144   : > { %6920 = vst [vmem:[#allocation97_spill] sm:$0xff] %v5349_v56  ;;  %v5370_v56 = vld [vmem:[%s4834_s16 + $0x98] sm:$0xff] }
 0x145   : > { %6921 = vst [vmem:[#allocation98_spill] sm:$0xff] %v5352_v44  ;;  %v5373_v44 = vld [vmem:[%s4834_s16 + $0xb0] sm:$0xff] }
 0x146   : > { %6922 = vst [vmem:[#allocation99_spill] sm:$0xff] %v5355_v34  ;;  %v5376_v34 = vld [vmem:[%s4834_s16 + $0xb8] sm:$0xff] }
 0x147   : > { %6923 = vst [vmem:[#allocation100_spill] sm:$0xff] %v5358_v3  ;;  %v5379_v3 = vld [vmem:[%s4834_s16 + $0xd0] sm:$0xff] }
 0x148   : > { %6924 = vst [vmem:[#allocation101_spill] sm:$0xff] %v5361_v61  ;;  %v5382_v61 = vld [vmem:[%s4834_s16 + $0xd8] sm:$0xff] }
 0x149   : > { %6925 = vst [vmem:[#allocation102_spill] sm:$0xff] %v5364_v46  ;;  %v5385_v46 = vld [vmem:[%s4834_s16 + $0xf0] sm:$0xff] }
 0x14a   : > { %6926 = vst [vmem:[#allocation103_spill] sm:$0xff] %v5367_v49  ;;  %v5388_v49 = vld [vmem:[%s4834_s16 + $0xf8] sm:$0xff] }
 0x14b   : > { %6927 = vst [vmem:[#allocation104_spill] sm:$0xff] %v5370_v56  ;;  %v5391_v56 = vld [vmem:[%s4834_s16 + $0x110] sm:$0xff] }
 0x14c   : > { %6928 = vst [vmem:[#allocation105_spill] sm:$0xff] %v5373_v44  ;;  %v5394_v44 = vld [vmem:[%s4834_s16 + $0x118] sm:$0xff] }
 0x14d   : > { %6929 = vst [vmem:[#allocation106_spill] sm:$0xff] %v5376_v34  ;;  %v5397_v34 = vld [vmem:[%s4834_s16 + $0x130] sm:$0xff] }
 0x14e   : > { %6930 = vst [vmem:[#allocation107_spill] sm:$0xff] %v5379_v3  ;;  %v5400_v3 = vld [vmem:[%s4834_s16 + $0x138] sm:$0xff] }
 0x14f   : > { %6931 = vst [vmem:[#allocation108_spill] sm:$0xff] %v5382_v61  ;;  %v5403_v61 = vld [vmem:[%s4834_s16 + $0x150] sm:$0xff] }
 0x150   : > { %6932 = vst [vmem:[#allocation109_spill] sm:$0xff] %v5385_v46  ;;  %v5406_v46 = vld [vmem:[%s4834_s16 + $0x158] sm:$0xff] }
 0x151   : > { %6933 = vst [vmem:[#allocation110_spill] sm:$0xff] %v5388_v49  ;;  %v5409_v49 = vld [vmem:[%s4834_s16 + $0x170] sm:$0xff] }
 0x152   : > { %6934 = vst [vmem:[#allocation111_spill] sm:$0xff] %v5391_v56  ;;  %v5412_v56 = vld [vmem:[%s4834_s16 + $0x178] sm:$0xff] }
 0x153   : > { %6935 = vst [vmem:[#allocation112_spill] sm:$0xff] %v5394_v44  ;;  %v5415_v44 = vld [vmem:[%s4834_s16 + $0x190] sm:$0xff] }
 0x154   : > { %6936 = vst [vmem:[#allocation113_spill] sm:$0xff] %v5397_v34  ;;  %v5418_v34 = vld [vmem:[%s4834_s16 + $0x198] sm:$0xff] }
 0x155   : > { %6937 = vst [vmem:[#allocation114_spill] sm:$0xff] %v5400_v3  ;;  %v5421_v3 = vld [vmem:[%s4834_s16 + $0x1b0] sm:$0xff] }
 0x156   : > { %6938 = vst [vmem:[#allocation115_spill] sm:$0xff] %v5403_v61  ;;  %v5424_v61 = vld [vmem:[%s4834_s16 + $0x1b8] sm:$0xff] }
 0x157   : > { %6939 = vst [vmem:[#allocation116_spill] sm:$0xff] %v5406_v46  ;;  %v5427_v46 = vld [vmem:[%s4834_s16 + $0x1d0] sm:$0xff] }
 0x158   : > { %6940 = vst [vmem:[#allocation117_spill] sm:$0xff] %v5409_v49  ;;  %v5430_v49 = vld [vmem:[%s4834_s16 + $0x1d8] sm:$0xff] }
 0x159   : > { %6941 = vst [vmem:[#allocation118_spill] sm:$0xff] %v5412_v56  ;;  %v5433_v56 = vld [vmem:[%s4834_s16 + $0x1f0] sm:$0xff] }
 0x15a   : > { %6942 = vst [vmem:[#allocation119_spill] sm:$0xff] %v5415_v44  ;;  %v5436_v44 = vld [vmem:[%s4834_s16 + $0x1f8] sm:$0xff] }
 0x15b   : > { %6943 = vst [vmem:[#allocation120_spill] sm:$0xff] %v5418_v34  ;;  %v5439_v34 = vld [vmem:[%s4834_s16 + $0x210] sm:$0xff] }
 0x15c   : > { %6944 = vst [vmem:[#allocation121_spill] sm:$0xff] %v5421_v3  ;;  %v5442_v3 = vld [vmem:[%s4834_s16 + $0x218] sm:$0xff] }
 0x15d   : > { %6945 = vst [vmem:[#allocation122_spill] sm:$0xff] %v5424_v61  ;;  %v5445_v61 = vld [vmem:[%s4834_s16 + $0x230] sm:$0xff] }
 0x15e   : > { %6946 = vst [vmem:[#allocation123_spill] sm:$0xff] %v5427_v46  ;;  %v5448_v46 = vld [vmem:[%s4834_s16 + $0x238] sm:$0xff] }
 0x15f   : > { %6947 = vst [vmem:[#allocation124_spill] sm:$0xff] %v5430_v49  ;;  %v5451_v49 = vld [vmem:[%s4834_s16 + $0x250] sm:$0xff] }
 0x160   : > { %6948 = vst [vmem:[#allocation125_spill] sm:$0xff] %v5433_v56  ;;  %v5454_v56 = vld [vmem:[%s4834_s16 + $0x258] sm:$0xff] }
 0x161   : > { %6949 = vst [vmem:[#allocation126_spill] sm:$0xff] %v5436_v44  ;;  %v5457_v44 = vld [vmem:[%s4834_s16 + $0x270] sm:$0xff] }
 0x162   : > { %6950 = vst [vmem:[#allocation127_spill] sm:$0xff] %v5439_v34  ;;  %v5460_v34 = vld [vmem:[%s4834_s16 + $0x278] sm:$0xff] }
 0x163   : > { %6951 = vst [vmem:[#allocation128_spill] sm:$0xff] %v5442_v3  ;;  %v5463_v3 = vld [vmem:[%s4834_s16 + $0x290] sm:$0xff] }
 0x164   : > { %6952 = vst [vmem:[#allocation129_spill] sm:$0xff] %v5445_v61  ;;  %v5466_v61 = vld [vmem:[%s4834_s16 + $0x298] sm:$0xff] }
 0x165   : > { %6953 = vst [vmem:[#allocation130_spill] sm:$0xff] %v5448_v46  ;;  %v5469_v46 = vld [vmem:[%s4834_s16 + $0x2b0] sm:$0xff] }
 0x166   : > { %6954 = vst [vmem:[#allocation131_spill] sm:$0xff] %v5451_v49  ;;  %v5472_v49 = vld [vmem:[%s4834_s16 + $0x2b8] sm:$0xff] }
 0x167   : > { %6955 = vst [vmem:[#allocation132_spill] sm:$0xff] %v5454_v56  ;;  %v5475_v56 = vld [vmem:[%s4834_s16 + $0x2d0] sm:$0xff] }
 0x168   : > { %6956 = vst [vmem:[#allocation133_spill] sm:$0xff] %v5457_v44  ;;  %v5478_v44 = vld [vmem:[%s4834_s16 + $0x2d8] sm:$0xff] }
 0x169   : > { %6957 = vst [vmem:[#allocation134_spill] sm:$0xff] %v5460_v34  ;;  %v5481_v34 = vld [vmem:[%s4834_s16 + $0x2f0] sm:$0xff] }
 0x16a   : > { %6958 = vst [vmem:[#allocation135_spill] sm:$0xff] %v5463_v3  ;;  %v5484_v3 = vld [vmem:[%s4834_s16 + $0x2f8] sm:$0xff] }
 0x16b   : > { %6959 = vst [vmem:[#allocation136_spill] sm:$0xff] %v5466_v61  ;;  %v5487_v61 = vld [vmem:[%s4834_s16 + $0x310] sm:$0xff] }
 0x16c   : > { %6960 = vst [vmem:[#allocation137_spill] sm:$0xff] %v5469_v46  ;;  %v5490_v46 = vld [vmem:[%s4834_s16 + $0x318] sm:$0xff] }
 0x16d   : > { %6961 = vst [vmem:[#allocation138_spill] sm:$0xff] %v5472_v49  ;;  %v5493_v49 = vld [vmem:[%s4834_s16 + $0x330] sm:$0xff] }
 0x16e   : > { %6962 = vst [vmem:[#allocation139_spill] sm:$0xff] %v5475_v56  ;;  %v5496_v56 = vld [vmem:[%s4834_s16 + $0x338] sm:$0xff] }
 0x16f   : > { %6963 = vst [vmem:[#allocation140_spill] sm:$0xff] %v5478_v44  ;;  %v5499_v44 = vld [vmem:[%s4834_s16 + $0x350] sm:$0xff] }
 0x170   : > { %6964 = vst [vmem:[#allocation141_spill] sm:$0xff] %v5481_v34  ;;  %v5502_v34 = vld [vmem:[%s4834_s16 + $0x358] sm:$0xff] }
 0x171   : > { %6965 = vst [vmem:[#allocation142_spill] sm:$0xff] %v5484_v3  ;;  %v5505_v3 = vld [vmem:[%s4834_s16 + $0x370] sm:$0xff] }
 0x172   : > { %6966 = vst [vmem:[#allocation143_spill] sm:$0xff] %v5487_v61  ;;  %v5508_v61 = vld [vmem:[%s4834_s16 + $0x378] sm:$0xff] }
 0x173   : > { %6967 = vst [vmem:[#allocation144_spill] sm:$0xff] %v5490_v46  ;;  %v5511_v46 = vld [vmem:[%s4834_s16 + $0x390] sm:$0xff] }
 0x174   : > { %6968 = vst [vmem:[#allocation145_spill] sm:$0xff] %v5493_v49  ;;  %v5514_v49 = vld [vmem:[%s4834_s16 + $0x398] sm:$0xff] }
 0x175   : > { %6969 = vst [vmem:[#allocation146_spill] sm:$0xff] %v5496_v56  ;;  %v5517_v56 = vld [vmem:[%s4834_s16 + $0x3b0] sm:$0xff] }
 0x176   : > { %6970 = vst [vmem:[#allocation147_spill] sm:$0xff] %v5499_v44  ;;  %v5520_v44 = vld [vmem:[%s4834_s16 + $0x3b8] sm:$0xff] }
 0x177   : > { %6971 = vst [vmem:[#allocation148_spill] sm:$0xff] %v5502_v34  ;;  %v5523_v34 = vld [vmem:[%s4834_s16 + $0x3d0] sm:$0xff] }
 0x178   : > { %6972 = vst [vmem:[#allocation149_spill] sm:$0xff] %v5505_v3  ;;  %v5526_v3 = vld [vmem:[%s4834_s16 + $0x3d8] sm:$0xff] }
 0x179   : > { %6973 = vst [vmem:[#allocation150_spill] sm:$0xff] %v5508_v61  ;;  %v5529_v61 = vld [vmem:[%s4834_s16 + $0x3f0] sm:$0xff] }
 0x17a   : > { %6974 = vst [vmem:[#allocation151_spill] sm:$0xff] %v5511_v46  ;;  %v5532_v46 = vld [vmem:[%s4834_s16 + $0x3f8] sm:$0xff] }
 0x17b   : > { %6975 = vst [vmem:[#allocation152_spill] sm:$0xff] %v5514_v49  ;;  %v5535_v49 = vld [vmem:[%s4834_s16 + $0x410] sm:$0xff] }
 0x17c   : > { %6976 = vst [vmem:[#allocation153_spill] sm:$0xff] %v5517_v56  ;;  %v5538_v56 = vld [vmem:[%s4834_s16 + $0x418] sm:$0xff] }
 0x17d   : > { %6977 = vst [vmem:[#allocation154_spill] sm:$0xff] %v5520_v44  ;;  %v5541_v44 = vld [vmem:[%s4834_s16 + $0x430] sm:$0xff] }
 0x17e   : > { %6978 = vst [vmem:[#allocation155_spill] sm:$0xff] %v5523_v34  ;;  %v5544_v34 = vld [vmem:[%s4834_s16 + $0x438] sm:$0xff] }
 0x17f   : > { %6979 = vst [vmem:[#allocation156_spill] sm:$0xff] %v5526_v3  ;;  %v5547_v3 = vld [vmem:[%s4834_s16 + $0x450] sm:$0xff] }
 0x180   : > { %6980 = vst [vmem:[#allocation157_spill] sm:$0xff] %v5529_v61  ;;  %v5550_v61 = vld [vmem:[%s4834_s16 + $0x458] sm:$0xff] }
 0x181   : > { %6981 = vst [vmem:[#allocation158_spill] sm:$0xff] %v5532_v46  ;;  %v5553_v46 = vld [vmem:[%s4834_s16 + $0x470] sm:$0xff] }
 0x182   : > { %6982 = vst [vmem:[#allocation159_spill] sm:$0xff] %v5535_v49  ;;  %v5556_v49 = vld [vmem:[%s4834_s16 + $0x478] sm:$0xff] }
 0x183   : > { %6983 = vst [vmem:[#allocation160_spill] sm:$0xff] %v5538_v56  ;;  %v5559_v56 = vld [vmem:[%s4834_s16 + $0x490] sm:$0xff] }
 0x184   : > { %6984 = vst [vmem:[#allocation161_spill] sm:$0xff] %v5541_v44  ;;  %v5562_v44 = vld [vmem:[%s4834_s16 + $0x498] sm:$0xff] }
 0x185   : > { %6985 = vst [vmem:[#allocation162_spill] sm:$0xff] %v5544_v34  ;;  %v5565_v34 = vld [vmem:[%s4834_s16 + $0x4b0] sm:$0xff] }
 0x186   : > { %6986 = vst [vmem:[#allocation163_spill] sm:$0xff] %v5547_v3  ;;  %v5568_v3 = vld [vmem:[%s4834_s16 + $0x4b8] sm:$0xff] }
 0x187   : > { %6987 = vst [vmem:[#allocation164_spill] sm:$0xff] %v5550_v61  ;;  %v5571_v61 = vld [vmem:[%s4834_s16 + $0x4d0] sm:$0xff] }
 0x188   : > { %6988 = vst [vmem:[#allocation165_spill] sm:$0xff] %v5553_v46  ;;  %v5574_v46 = vld [vmem:[%s4834_s16 + $0x4d8] sm:$0xff] }
 0x189   : > { %6989 = vst [vmem:[#allocation166_spill] sm:$0xff] %v5556_v49  ;;  %v5577_v49 = vld [vmem:[%s4834_s16 + $0x4f0] sm:$0xff] }
 0x18a   : > { %6990 = vst [vmem:[#allocation167_spill] sm:$0xff] %v5559_v56  ;;  %v5580_v56 = vld [vmem:[%s4834_s16 + $0x4f8] sm:$0xff] }
 0x18b   : > { %6991 = vst [vmem:[#allocation168_spill] sm:$0xff] %v5562_v44  ;;  %v5583_v44 = vld [vmem:[%s4834_s16 + $0x510] sm:$0xff] }
 0x18c   : > { %6992 = vst [vmem:[#allocation169_spill] sm:$0xff] %v5565_v34  ;;  %v5586_v34 = vld [vmem:[%s4834_s16 + $0x518] sm:$0xff] }
 0x18d   : > { %6993 = vst [vmem:[#allocation170_spill] sm:$0xff] %v5568_v3  ;;  %v5589_v3 = vld [vmem:[%s4834_s16 + $0x530] sm:$0xff] }
 0x18e   : > { %6994 = vst [vmem:[#allocation171_spill] sm:$0xff] %v5571_v61  ;;  %v5592_v61 = vld [vmem:[%s4834_s16 + $0x538] sm:$0xff] }
 0x18f   : > { %6995 = vst [vmem:[#allocation172_spill] sm:$0xff] %v5574_v46  ;;  %v5595_v46 = vld [vmem:[%s4834_s16 + $0x550] sm:$0xff] }
 0x190   : > { %6996 = vst [vmem:[#allocation173_spill] sm:$0xff] %v5577_v49  ;;  %v5598_v49 = vld [vmem:[%s4834_s16 + $0x558] sm:$0xff] }
 0x191   : > { %6997 = vst [vmem:[#allocation174_spill] sm:$0xff] %v5580_v56  ;;  %v5601_v56 = vld [vmem:[%s4834_s16 + $0x570] sm:$0xff] }
 0x192   : > { %6998 = vst [vmem:[#allocation175_spill] sm:$0xff] %v5583_v44  ;;  %v5604_v44 = vld [vmem:[%s4834_s16 + $0x578] sm:$0xff] }
 0x193   : > { %6999 = vst [vmem:[#allocation176_spill] sm:$0xff] %v5586_v34  ;;  %v5607_v34 = vld [vmem:[%s4834_s16 + $0x590] sm:$0xff] }
 0x194   : > { %7000 = vst [vmem:[#allocation177_spill] sm:$0xff] %v5589_v3  ;;  %v5610_v3 = vld [vmem:[%s4834_s16 + $0x598] sm:$0xff] }
 0x195   : > { %7001 = vst [vmem:[#allocation178_spill] sm:$0xff] %v5592_v61  ;;  %v5613_v61 = vld [vmem:[%s4834_s16 + $0x5b0] sm:$0xff] }
 0x196   : > { %7002 = vst [vmem:[#allocation179_spill] sm:$0xff] %v5595_v46  ;;  %v5616_v46 = vld [vmem:[%s4834_s16 + $0x5b8] sm:$0xff] }
 0x197   : > { %7003 = vst [vmem:[#allocation180_spill] sm:$0xff] %v5598_v49  ;;  %v5619_v49 = vld [vmem:[%s4834_s16 + $0x5d0] sm:$0xff] }
 0x198   : > { %7004 = vst [vmem:[#allocation181_spill] sm:$0xff] %v5601_v56  ;;  %v5622_v56 = vld [vmem:[%s4834_s16 + $0x5d8] sm:$0xff] }
 0x199   : > { %7005 = vst [vmem:[#allocation182_spill] sm:$0xff] %v5604_v44  ;;  %v5625_v44 = vld [vmem:[%s4834_s16 + $0x5f0] sm:$0xff] }
 0x19a   : > { %7006 = vst [vmem:[#allocation183_spill] sm:$0xff] %v5607_v34  ;;  %v5628_v34 = vld [vmem:[%s4834_s16 + $0x5f8] sm:$0xff] }
 0x19b   : > { %7007 = vst [vmem:[#allocation184_spill] sm:$0xff] %v5610_v3  ;;  %v5631_v3 = vld [vmem:[%s4834_s16 + $0x610] sm:$0xff] }
 0x19c   : > { %7008 = vst [vmem:[#allocation185_spill] sm:$0xff] %v5613_v61  ;;  %v5634_v61 = vld [vmem:[%s4834_s16 + $0x618] sm:$0xff] }
 0x19d   : > { %7009 = vst [vmem:[#allocation186_spill] sm:$0xff] %v5616_v46  ;;  %v5637_v46 = vld [vmem:[%s4834_s16 + $0x630] sm:$0xff] }
 0x19e   : > { %7010 = vst [vmem:[#allocation187_spill] sm:$0xff] %v5619_v49  ;;  %v5640_v49 = vld [vmem:[%s4834_s16 + $0x638] sm:$0xff] }
 0x19f   : > { %7011 = vst [vmem:[#allocation188_spill] sm:$0xff] %v5622_v56  ;;  %v5643_v56 = vld [vmem:[%s4834_s16 + $0x650] sm:$0xff] }
 0x1a0   : > { %7012 = vst [vmem:[#allocation189_spill] sm:$0xff] %v5625_v44  ;;  %v5646_v44 = vld [vmem:[%s4834_s16 + $0x658] sm:$0xff] }
 0x1a1   : > { %7013 = vst [vmem:[#allocation190_spill] sm:$0xff] %v5628_v34  ;;  %v5649_v34 = vld [vmem:[%s4834_s16 + $0x670] sm:$0xff] }
 0x1a2   : > { %7014 = vst [vmem:[#allocation191_spill] sm:$0xff] %v5631_v3  ;;  %v5652_v3 = vld [vmem:[%s4834_s16 + $0x678] sm:$0xff] }
 0x1a3   : > { %7015 = vst [vmem:[#allocation192_spill] sm:$0xff] %v5634_v61  ;;  %v5655_v61 = vld [vmem:[%s4834_s16 + $0x690] sm:$0xff] }
 0x1a4   : > { %7016 = vst [vmem:[#allocation193_spill] sm:$0xff] %v5637_v46  ;;  %v5661_v46 = vld [vmem:[%s4834_s16 + $0x6b0] sm:$0xff] }
 0x1a5   : > { %7017 = vst [vmem:[#allocation194_spill] sm:$0xff] %v5640_v49  ;;  %v5664_v49 = vld [vmem:[%s4834_s16 + $0x6b8] sm:$0xff] }
 0x1a6   : > { %7018 = vst [vmem:[#allocation195_spill] sm:$0xff] %v5643_v56  ;;  %v5670_v56 = vld [vmem:[%s4834_s16 + $0x6d8] sm:$0xff] }
 0x1a7   : > { %7019 = vst [vmem:[#allocation196_spill] sm:$0xff] %v5646_v44  ;;  %v5673_v44 = vld [vmem:[%s4834_s16 + $0x6f0] sm:$0xff] }
 0x1a8   : > { %7020 = vst [vmem:[#allocation197_spill] sm:$0xff] %v5649_v34  ;;  %v5676_v34 = vld [vmem:[%s4834_s16 + $0x6f8] sm:$0xff] }
 0x1a9   : > { %7021 = vst [vmem:[#allocation198_spill] sm:$0xff] %v5652_v3  ;;  %v5679_v3 = vld [vmem:[%s4834_s16 + $0x710] sm:$0xff] }
 0x1aa   : > { %7022 = vst [vmem:[#allocation199_spill] sm:$0xff] %v5655_v61  ;;  %v5682_v61 = vld [vmem:[%s4834_s16 + $0x718] sm:$0xff] }
 0x1ab   : > { %7023 = vst [vmem:[#allocation200_spill] sm:$0xff] %v5658_v48  ;;  %v5697_v48 = vld [vmem:[%s4834_s16 + $0x770] sm:$0xff] }
 0x1ac   : > { %7024 = vst [vmem:[#allocation201_spill] sm:$0xff] %v5661_v46  ;;  %v5685_v46 = vld [vmem:[%s4834_s16 + $0x730] sm:$0xff] }
 0x1ad   : > { %7025 = vst [vmem:[#allocation202_spill] sm:$0xff] %v5664_v49  ;;  %v5688_v49 = vld [vmem:[%s4834_s16 + $0x738] sm:$0xff] }
 0x1ae   : > { %7026 = vst [vmem:[#allocation203_spill] sm:$0xff] %v5667_v13  ;;  %v5691_v13 = vld [vmem:[%s4834_s16 + $0x750] sm:$0xff] }
 0x1af   : > { %7027 = vst [vmem:[#allocation204_spill] sm:$0xff] %v5670_v56  ;;  %v5694_v56 = vld [vmem:[%s4834_s16 + $0x758] sm:$0xff] }
 0x1b0   : > { %7028 = vst [vmem:[#allocation205_spill] sm:$0xff] %v5673_v44  ;;  %v5700_v44 = vld [vmem:[%s4834_s16 + $0x778] sm:$0xff] }
 0x1b1   : > { %7029 = vst [vmem:[#allocation206_spill] sm:$0xff] %v5676_v34  ;;  %v7038_v34 = vmax.f32 %v4953_v63, 0.0  ;;  %v3462_v63 = vmul.f32 %v4991_v54, %v4917_v22  ;;  %v2965_v54 = vmax.f32 %v5001_v62, 0.0  ;;  %v2966_v62 = vmax.f32 %v5010_v4, 0.0 }
 0x1b2   : > { %7030 = vst [vmem:[#allocation207_spill] sm:$0xff] %v5679_v3  ;;  %v2961_v3 = vmax.f32 %v4982_v43, 0.0  ;;  %v2962_v43 = vmax.f32 %v4994_v50, 0.0  ;;  %v2717_v50 = vadd.f32 3.0, %v5012_v5 }
 0x1b3   : > { %7031 = vst [vmem:[#allocation208_spill] sm:$0xff] %v5682_v61  ;;  %v3210_v28 = vmin.f32 %v7038_v34, 6.0  ;;  %v2713_v61 = vadd.f32 3.0, %v4984_v47 }
 0x1b4   : > { %7032 = vst [vmem:[#allocation209_spill] sm:$0xff] %v5685_v46  ;;  %v959_v46 = vpop.f32.mrf.mxu2  ;;  %v3217_v25 = vmin.f32 %v2961_v3, 6.0  ;;  %v2973_v3 = vmax.f32 %v2717_v50, 0.0 }
 0x1b5   : > { %7033 = vst [vmem:[#allocation210_spill] sm:$0xff] %v5688_v49  ;;  %v283_v49 = vld [vmem:[%s4672_s14 + $0x1a0] sm:$0xff]  ;;  %v960_v34 = vadd.f32 %v959_v46, %v4827_v24  ;;  %v5743_v46 = vld [vmem:[%s4834_s16 + $0x7d0] sm:$0xff] }
 0x1b6   : > { %7034 = vst [vmem:[#allocation211_spill] sm:$0xff] %v5691_v13  ;;  %v5712_v13 = vld [vmem:[%s4834_s16 + $0x798] sm:$0xff]  ;;  %591 = vmatmul.f32.gmra.mxu0 %v283_v49  ;;  %1009 = vmatmul.f32.gmra.mxu2 %v283_v49 }
 0x1b7   : > { %7035 = vst [vmem:[#allocation212_spill] sm:$0xff] %v5694_v56  ;;  %v544_v56 = vpop.f32.mrf.mxu0 }
 0x1b8   : > { %7036 = vst [vmem:[#allocation213_spill] sm:$0xff] %v5697_v48  ;;  %v5715_v48 = vld [vmem:[%s4834_s16 + $0x7b0] sm:$0xff]  ;;  %v545_v40 = vadd.f32 %v544_v56, %v4787_v53 }
 0x1b9   : > { %7037 = vst [vmem:[#allocation214_spill] sm:$0xff] %v5700_v44  ;;  %v7043_v44 = vmax.f32 %v4967_v32, 0.0  ;;  %v7047_v32 = vmax.f32 %v4974_v41, 0.0  ;;  %v3218_v41 = vmin.f32 %v2962_v43, 6.0 }
 0x1ba   : > { %7039 = vst [vmem:[#allocation215_spill] sm:$0xff] %v5709_v45  ;;  %v5736_v45 = vld [vmem:[%s4834_s16 + $0x7b8] sm:$0xff]  ;;  %v754_v4 = vadd.f32 %v753_v19, %v545_v40 }
 0x1bb   : > { %7040 = vst [vmem:[#allocation216_spill] sm:$0xff] %v5712_v13  ;;  %v458_v13 = vld [vmem:[%s6821_s1 + $0x318] sm:$0xff]  ;;  %v3213_v22 = vmin.f32 %v7043_v44, 6.0  ;;  %v3214_v44 = vmin.f32 %v7047_v32, 6.0  ;;  %v756_v32 = vpop.f32.mrf.mxu1 }
 0x1bc   : > { %7041 = vst [vmem:[#allocation217_spill] sm:$0xff] %v5715_v48  ;;  %v394_v48 = vld [vmem:[%s6821_s1 + $0x118] sm:$0xff]  ;;  %1967 = vmatpush.msrb.mxu3 %v458_v13  ;;  %v2465_v43 = vadd.f32 %v5019_v6, %v754_v4 }
 0x1bd   : > { %7042 = vst [vmem:[#allocation218_spill] sm:$0xff] %v5736_v45  ;;  %1758 = vmatpush.msrb.mxu2 %v394_v48  ;;  %v3465_v45 = vmul.f32 %v5006_v2, %v4925_v59  ;;  %v1168_v48 = vpop.f32.mrf.mxu3  ;;  %v5758_v13 = vld [vmem:[%s4834_s16 + $0x7f8] sm:$0xff]  ;;  %v3718_v59 = vmul.f32 0.16666667, %v3462_v63  ;;  %v2970_v2 = vmax.f32 %v2714_v51, 0.0  ;;  %v3469_v56 = vmul.f32 %v3213_v22, %v4941_v10 }
 0x1be   : > { %7044 = vst [vmem:[#allocation219_spill] sm:$0xff] %v5743_v46  ;;  %v3466_v46 = vmul.f32 %v3210_v28, %v4931_v1  ;;  %v3221_v1 = vmin.f32 %v2965_v54, 6.0  ;;  %v3222_v63 = vmin.f32 %v2966_v62, 6.0  ;;  %v3473_v10 = vmul.f32 %v3217_v25, %v4955_v23  ;;  %v457_v23 = vld [vmem:[%s6821_s1 + $0x310] sm:$0xff] }
 0x1bf   : > { %7045 = vst [vmem:[#allocation220_spill] sm:$0xff] %v5746_v8  ;;  %v2969_v8 = vmax.f32 %v2713_v61, 0.0  ;;  %v3721_v28 = vmul.f32 0.16666667, %v3465_v45  ;;  %v3226_v6 = vmin.f32 %v2970_v2, 6.0  ;;  %1549 = vmatpush.msrb.mxu1 %v457_v23 }
 0x1c0   : > { %7046 = vst [vmem:[#allocation221_spill] sm:$0xff] %v5749_v21  ;;  %v1169_v21 = vadd.f32 %v1168_v48, %v960_v34  ;;  %v3725_v36 = vmul.f32 0.16666667, %v3469_v56  ;;  %v3477_v25 = vmul.f32 %v3221_v1, %v4969_v38  ;;  %v3478_v51 = vmul.f32 %v3222_v63, %v4976_v42 }
 0x1c1   : > { %3961 = vst [vmem:[%s5722_s24] sm:$0xff] %v4911_v39  ;;  %v3470_v39 = vmul.f32 %v3214_v44, %v4947_v15  ;;  %v3225_v19 = vmin.f32 %v2969_v8, 6.0  ;;  %v3474_v15 = vmul.f32 %v3218_v41, %v4959_v33  ;;  %v3229_v8 = vmin.f32 %v2973_v3, 6.0  ;;  %v285_v33 = vld [vmem:[%s4672_s14 + $0x1b0] sm:$0xff]  ;;  %v286_v44 = vld [vmem:[%s4672_s14 + $0x1b8] sm:$0xff] }
 0x1c2   : > { %3962 = vst [vmem:[%s5722_s24 + $0x8] sm:$0xff] %v4936_v52  ;;  %v2462_v61 = vadd.f32 %v5016_v55, %v1169_v21  ;;  %v3722_v52 = vmul.f32 0.16666667, %v3466_v46  ;;  %v962_v55 = vpop.f32.mrf.mxu2  ;;  %v2721_v21 = vadd.f32 3.0, %v2465_v43  ;;  %v3729_v54 = vmul.f32 0.16666667, %v3473_v10  ;;  %594 = vmatmul.f32.gmra.mxu0 %v285_v33  ;;  %1012 = vmatmul.f32.gmra.mxu2 %v285_v33 }
 0x1c3   : > { %3965 = vst [vmem:[%s5722_s24 + $0x20] sm:$0xff] %v4944_v12  ;;  %v393_v12 = vld [vmem:[%s6821_s1 + $0x110] sm:$0xff]  ;;  %v3726_v49 = vmul.f32 0.16666667, %v3470_v39  ;;  %v3481_v38 = vmul.f32 %v3225_v19, %v4984_v47  ;;  %v3482_v62 = vmul.f32 %v3226_v6, %v5003_v0  ;;  %v3485_v41 = vmul.f32 %v3229_v8, %v5012_v5  ;;  %803 = vmatmul.f32.gmra.mxu1 %v286_v44  ;;  %v759_v6 = vpop.f32.mrf.mxu1 }
 0x1c4   : > { %3966 = vst [vmem:[%s5722_s24 + $0x28] sm:$0xff] %v4950_v20  ;;  %v2718_v40 = vadd.f32 3.0, %v2462_v61  ;;  %v963_v20 = vadd.f32 %v962_v55, %v4827_v24  ;;  %1340 = vmatpush.msrb.mxu0 %v393_v12  ;;  %v2977_v34 = vmax.f32 %v2721_v21, 0.0  ;;  %v3734_v2 = vmul.f32 0.16666667, %v3478_v51  ;;  %1221 = vmatmul.f32.gmra.mxu3 %v286_v44  ;;  %v288_v21 = vld [vmem:[%s4672_s14 + $0x1c8] sm:$0xff] }
 0x1c5   : > { %3969 = vst [vmem:[%s5722_s24 + $0x40] sm:$0xff] %v4963_v37  ;;  %v547_v37 = vpop.f32.mrf.mxu0  ;;  %v3737_v0 = vmul.f32 0.16666667, %v3481_v38  ;;  %v3738_v5 = vmul.f32 0.16666667, %v3482_v62 }
 0x1c6   : > { %3970 = vst [vmem:[%s5722_s24 + $0x48] sm:$0xff] %v4989_v31  ;;  %v2974_v45 = vmax.f32 %v2718_v40, 0.0  ;;  %v548_v22 = vadd.f32 %v547_v37, %v4787_v53  ;;  %v1171_v31 = vpop.f32.mrf.mxu3  ;;  %v3233_v42 = vmin.f32 %v2977_v34, 6.0 }
 0x1c7   : > { %3973 = vst [vmem:[%s5722_s24 + $0x60] sm:$0xff] %v4997_v60  ;;  %v1172_v46 = vadd.f32 %v1171_v31, %v963_v20  ;;  %v3730_v60 = vmul.f32 0.16666667, %v3474_v15 }
 0x1c8   : > { %3974 = vst [vmem:[%s5722_s24 + $0x68] sm:$0xff] %v3718_v59  ;;  %v3230_v50 = vmin.f32 %v2974_v45, 6.0  ;;  %v757_v48 = vadd.f32 %v756_v32, %v548_v22  ;;  %v3733_v59 = vmul.f32 0.16666667, %v3477_v25  ;;  %v3489_v1 = vmul.f32 %v3233_v42, %v2465_v43 }
 0x1c9   : > { %3977 = vst [vmem:[%s5722_s24 + $0x80] sm:$0xff] %v3721_v28  ;;  %v2466_v47 = vadd.f32 %v5022_v7, %v1172_v46 }
 0x1ca   : > { %3978 = vst [vmem:[%s5722_s24 + $0x88] sm:$0xff] %v3722_v52  ;;  %v3486_v4 = vmul.f32 %v3230_v50, %v2462_v61  ;;  %v2469_v56 = vadd.f32 %v5025_v57, %v757_v48  ;;  %v965_v28 = vpop.f32.mrf.mxu2  ;;  %v3741_v61 = vmul.f32 0.16666667, %v3485_v41  ;;  %v287_v52 = vld [vmem:[%s4672_s14 + $0x1c0] sm:$0xff]  ;;  %v3745_v55 = vmul.f32 0.16666667, %v3489_v1 }
 0x1cb   : > { %3981 = vst [vmem:[%s5722_s24 + $0xa0] sm:$0xff] %v3725_v36  ;;  %v2722_v3 = vadd.f32 3.0, %v2466_v47  ;;  %v966_v7 = vadd.f32 %v965_v28, %v4827_v24  ;;  %597 = vmatmul.f32.gmra.mxu0 %v287_v52  ;;  %1015 = vmatmul.f32.gmra.mxu2 %v287_v52  ;;  %v762_v44 = vpop.f32.mrf.mxu1  ;;  %v390_v28 = vld [vmem:[%s6821_s1 + $0xf8] sm:$0xff] }
 0x1cc   : > { %3982 = vst [vmem:[%s5722_s24 + $0xa8] sm:$0xff] %v3726_v49  ;;  %v2725_v39 = vadd.f32 3.0, %v2469_v56  ;;  %v3742_v10 = vmul.f32 0.16666667, %v3486_v4  ;;  %806 = vmatmul.f32.gmra.mxu1 %v288_v21  ;;  %1224 = vmatmul.f32.gmra.mxu3 %v288_v21 }
 0x1cd   : > { %3985 = vst [vmem:[%s5722_s24 + $0xc0] sm:$0xff] %v3729_v54  ;;  %v2978_v57 = vmax.f32 %v2722_v3, 0.0  ;;  %v550_v63 = vpop.f32.mrf.mxu0  ;;  %v289_v54 = vld [vmem:[%s4672_s14 + $0x1d0] sm:$0xff]  ;;  %1759 = vmatpush.msrb.mxu2 %v390_v28  ;;  %v296_v28 = vld [vmem:[%s4672_s14 + $0x208] sm:$0xff] }
 0x1ce   : > { %3986 = vst [vmem:[%s5722_s24 + $0xc8] sm:$0xff] %v3730_v60  ;;  %v2981_v43 = vmax.f32 %v2725_v39, 0.0  ;;  %v551_v19 = vadd.f32 %v550_v63, %v4787_v53  ;;  %v1174_v40 = vpop.f32.mrf.mxu3  ;;  %v290_v60 = vld [vmem:[%s4672_s14 + $0x1d8] sm:$0xff]  ;;  %v291_v39 = vld [vmem:[%s4672_s14 + $0x1e0] sm:$0xff] }
 0x1cf   : > { %3989 = vst [vmem:[%s5722_s24 + $0xe0] sm:$0xff] %v3733_v59  ;;  %v3234_v12 = vmin.f32 %v2978_v57, 6.0  ;;  %v1175_v15 = vadd.f32 %v1174_v40, %v966_v7 }
 0x1d0   : > { %3990 = vst [vmem:[%s5722_s24 + $0xe8] sm:$0xff] %v3734_v2  ;;  %v3237_v20 = vmin.f32 %v2981_v43, 6.0  ;;  %v760_v23 = vadd.f32 %v759_v6, %v551_v19  ;;  %v292_v43 = vld [vmem:[%s4672_s14 + $0x1e8] sm:$0xff] }
 0x1d1   : > { %3993 = vst [vmem:[%s5722_s24 + $0x100] sm:$0xff] %v3737_v0  ;;  %v3490_v36 = vmul.f32 %v3234_v12, %v2466_v47  ;;  %v2470_v25 = vadd.f32 %v5028_v9, %v1175_v15 }
 0x1d2   : > { %3994 = vst [vmem:[%s5722_s24 + $0x108] sm:$0xff] %v3738_v5  ;;  %v3493_v8 = vmul.f32 %v3237_v20, %v2469_v56  ;;  %v2473_v45 = vadd.f32 %v5031_v58, %v760_v23  ;;  %v968_v49 = vpop.f32.mrf.mxu2 }
 0x1d3   : > { %3997 = vst [vmem:[%s5722_s24 + $0x120] sm:$0xff] %v3741_v61  ;;  %v3746_v37 = vmul.f32 0.16666667, %v3490_v36  ;;  %v2726_v33 = vadd.f32 3.0, %v2470_v25  ;;  %v969_v22 = vadd.f32 %v968_v49, %v4827_v24  ;;  %600 = vmatmul.f32.gmra.mxu0 %v289_v54  ;;  %1018 = vmatmul.f32.gmra.mxu2 %v289_v54  ;;  %v389_v36 = vld [vmem:[%s6821_s1 + $0xf0] sm:$0xff]  ;;  %v294_v54 = vld [vmem:[%s4672_s14 + $0x1f8] sm:$0xff] }
 0x1d4   : > { %3998 = vst [vmem:[%s5722_s24 + $0x128] sm:$0xff] %v3742_v10  ;;  %v3749_v51 = vmul.f32 0.16666667, %v3493_v8  ;;  %v2729_v34 = vadd.f32 3.0, %v2473_v45  ;;  %809 = vmatmul.f32.gmra.mxu1 %v290_v60  ;;  %1227 = vmatmul.f32.gmra.mxu3 %v290_v60  ;;  %v765_v10 = vpop.f32.mrf.mxu1 }
 0x1d5   : > { %4001 = vst [vmem:[%s5722_s24 + $0x140] sm:$0xff] %v3745_v55  ;;  %v2982_v9 = vmax.f32 %v2726_v33, 0.0  ;;  %v553_v31 = vpop.f32.mrf.mxu0  ;;  %1341 = vmatpush.msrb.mxu0 %v389_v36  ;;  %v293_v33 = vld [vmem:[%s4672_s14 + $0x1f0] sm:$0xff] }
 0x1d6   : > { %4002 = vst [vmem:[%s5722_s24 + $0x148] sm:$0xff] %v3746_v37  ;;  %v2985_v38 = vmax.f32 %v2729_v34, 0.0  ;;  %v554_v58 = vadd.f32 %v553_v31, %v4787_v53  ;;  %v1177_v50 = vpop.f32.mrf.mxu3 }
 0x1d7   : > { %4005 = vst [vmem:[%s5722_s24 + $0x160] sm:$0xff] %v3749_v51  ;;  %v3238_v46 = vmin.f32 %v2982_v9, 6.0  ;;  %v1178_v32 = vadd.f32 %v1177_v50, %v969_v22 }
 0x1d8   : > { %v3241_v62 = vmin.f32 %v2985_v38, 6.0  ;;  %v763_v42 = vadd.f32 %v762_v44, %v554_v58 }
 0x1d9   : > { %v3494_v48 = vmul.f32 %v3238_v46, %v2470_v25  ;;  %v2474_v59 = vadd.f32 %v5034_v11, %v1178_v32  ;;  %v454_v11 = vld [vmem:[%s6821_s1 + $0x2f8] sm:$0xff] }
 0x1da   : > { %v3497_v41 = vmul.f32 %v3241_v62, %v2473_v45  ;;  %v2477_v47 = vadd.f32 %v5037_v14, %v763_v42  ;;  %v971_v56 = vpop.f32.mrf.mxu2  ;;  %1968 = vmatpush.msrb.mxu3 %v454_v11 }
 0x1db   : > { %v3750_v2 = vmul.f32 0.16666667, %v3494_v48  ;;  %v2730_v4 = vadd.f32 3.0, %v2474_v59  ;;  %v972_v3 = vadd.f32 %v971_v56, %v4827_v24  ;;  %603 = vmatmul.f32.gmra.mxu0 %v291_v39  ;;  %1021 = vmatmul.f32.gmra.mxu2 %v291_v39 }
 0x1dc   : > { %v3753_v0 = vmul.f32 0.16666667, %v3497_v41  ;;  %v2733_v1 = vadd.f32 3.0, %v2477_v47  ;;  %812 = vmatmul.f32.gmra.mxu1 %v292_v43  ;;  %1230 = vmatmul.f32.gmra.mxu3 %v292_v43  ;;  %v768_v31 = vpop.f32.mrf.mxu1 }
 0x1dd   : > { %v2986_v14 = vmax.f32 %v2730_v4, 0.0  ;;  %v556_v5 = vpop.f32.mrf.mxu0  ;;  %4006 = vst [vmem:[%s5722_s24 + $0x168] sm:$0xff] %v3750_v2  ;;  %v295_v4 = vld [vmem:[%s4672_s14 + $0x200] sm:$0xff] }
 0x1de   : > { %v2989_v7 = vmax.f32 %v2733_v1, 0.0  ;;  %v557_v61 = vadd.f32 %v556_v5, %v4787_v53  ;;  %v1180_v57 = vpop.f32.mrf.mxu3  ;;  %4009 = vst [vmem:[%s5722_s24 + $0x180] sm:$0xff] %v3753_v0 }
 0x1df   : > { %v3242_v63 = vmin.f32 %v2986_v14, 6.0  ;;  %v1181_v52 = vadd.f32 %v1180_v57, %v972_v3 }
 0x1e0   : > { %v3245_v19 = vmin.f32 %v2989_v7, 6.0  ;;  %v766_v40 = vadd.f32 %v765_v10, %v557_v61 }
 0x1e1   : > { %v3498_v55 = vmul.f32 %v3242_v63, %v2474_v59  ;;  %v2478_v12 = vadd.f32 %v5040_v16, %v1181_v52 }
 0x1e2   : > { %v3501_v15 = vmul.f32 %v3245_v19, %v2477_v47  ;;  %v2481_v6 = vadd.f32 %v5043_v17, %v766_v40  ;;  %v974_v23 = vpop.f32.mrf.mxu2  ;;  %v453_v17 = vld [vmem:[%s6821_s1 + $0x2f0] sm:$0xff] }
 0x1e3   : > { %v3754_v21 = vmul.f32 0.16666667, %v3498_v55  ;;  %v2734_v20 = vadd.f32 3.0, %v2478_v12  ;;  %v975_v16 = vadd.f32 %v974_v23, %v4827_v24  ;;  %1550 = vmatpush.msrb.mxu1 %v453_v17  ;;  %606 = vmatmul.f32.gmra.mxu0 %v293_v33  ;;  %v298_v23 = vld [vmem:[%s4672_s14 + $0x218] sm:$0xff] }
 0x1e4   : > { %v3757_v25 = vmul.f32 0.16666667, %v3501_v15  ;;  %v2737_v8 = vadd.f32 3.0, %v2481_v6  ;;  %1024 = vmatmul.f32.gmra.mxu2 %v293_v33  ;;  %815 = vmatmul.f32.gmra.mxu1 %v294_v54  ;;  %v771_v3 = vpop.f32.mrf.mxu1 }
 0x1e5   : > { %v2990_v45 = vmax.f32 %v2734_v20, 0.0  ;;  %v559_v37 = vpop.f32.mrf.mxu0  ;;  %4010 = vst [vmem:[%s5722_s24 + $0x188] sm:$0xff] %v3754_v21  ;;  %1233 = vmatmul.f32.gmra.mxu3 %v294_v54  ;;  %v299_v54 = vld [vmem:[%s4672_s14 + $0x220] sm:$0xff] }
 0x1e6   : > { %v2993_v49 = vmax.f32 %v2737_v8, 0.0  ;;  %v560_v51 = vadd.f32 %v559_v37, %v4787_v53  ;;  %v1183_v34 = vpop.f32.mrf.mxu3  ;;  %4013 = vst [vmem:[%s5722_s24 + $0x1a0] sm:$0xff] %v3757_v25 }
 0x1e7   : > { %v3246_v22 = vmin.f32 %v2990_v45, 6.0  ;;  %v1184_v9 = vadd.f32 %v1183_v34, %v975_v16 }
 0x1e8   : > { %v3249_v38 = vmin.f32 %v2993_v49, 6.0  ;;  %v769_v58 = vadd.f32 %v768_v31, %v560_v51 }
 0x1e9   : > { %v3502_v50 = vmul.f32 %v3246_v22, %v2478_v12  ;;  %v2482_v46 = vadd.f32 %v5046_v26, %v1184_v9  ;;  %v297_v12 = vld [vmem:[%s4672_s14 + $0x210] sm:$0xff]  ;;  %v386_v9 = vld [vmem:[%s6821_s1 + $0xd8] sm:$0xff] }
 0x1ea   : > { %v3505_v32 = vmul.f32 %v3249_v38, %v2481_v6  ;;  %v2485_v44 = vadd.f32 %v5049_v18, %v769_v58  ;;  %v977_v42 = vpop.f32.mrf.mxu2  ;;  %1760 = vmatpush.msrb.mxu2 %v386_v9  ;;  %v304_v9 = vld [vmem:[%s4672_s14 + $0x248] sm:$0xff] }
 0x1eb   : > { %v3758_v60 = vmul.f32 0.16666667, %v3502_v50  ;;  %v2738_v62 = vadd.f32 3.0, %v2482_v46  ;;  %v978_v41 = vadd.f32 %v977_v42, %v4827_v24  ;;  %609 = vmatmul.f32.gmra.mxu0 %v295_v4 }
 0x1ec   : > { %v3761_v48 = vmul.f32 0.16666667, %v3505_v32  ;;  %v2741_v59 = vadd.f32 3.0, %v2485_v44  ;;  %1027 = vmatmul.f32.gmra.mxu2 %v295_v4  ;;  %818 = vmatmul.f32.gmra.mxu1 %v296_v28  ;;  %v774_v20 = vpop.f32.mrf.mxu1 }
 0x1ed   : > { %v2994_v47 = vmax.f32 %v2738_v62, 0.0  ;;  %v562_v2 = vpop.f32.mrf.mxu0  ;;  %4014 = vst [vmem:[%s5722_s24 + $0x1a8] sm:$0xff] %v3758_v60  ;;  %1236 = vmatmul.f32.gmra.mxu3 %v296_v28  ;;  %v300_v60 = vld [vmem:[%s4672_s14 + $0x228] sm:$0xff] }
 0x1ee   : > { %v2997_v56 = vmax.f32 %v2741_v59, 0.0  ;;  %v563_v26 = vadd.f32 %v562_v2, %v4787_v53  ;;  %v1186_v0 = vpop.f32.mrf.mxu3  ;;  %4017 = vst [vmem:[%s5722_s24 + $0x1c0] sm:$0xff] %v3761_v48  ;;  %v7048_v59 = vld [vmem:[#allocation2_spill] sm:$0xff]  ;;  %v7049_v2 = vld [vmem:[#allocation3_spill] sm:$0xff] }
 0x1ef   : > { %v3250_v18 = vmin.f32 %v2994_v47, 6.0  ;;  %v1187_v1 = vadd.f32 %v1186_v0, %v978_v41 }
 0x1f0   : > { %v3253_v11 = vmin.f32 %v2997_v56, 6.0  ;;  %v772_v14 = vadd.f32 %v771_v3, %v563_v26 }
 0x1f1   : > { %v3506_v5 = vmul.f32 %v3250_v18, %v2482_v46  ;;  %v2486_v39 = vadd.f32 %v5052_v27, %v1187_v1  ;;  %v385_v18 = vld [vmem:[%s6821_s1 + $0xd0] sm:$0xff] }
 0x1f2   : > { %v3509_v7 = vmul.f32 %v3253_v11, %v2485_v44  ;;  %v2489_v61 = vadd.f32 %v5055_v29, %v772_v14  ;;  %v980_v52 = vpop.f32.mrf.mxu2  ;;  %1342 = vmatpush.msrb.mxu0 %v385_v18  ;;  %v449_v11 = vld [vmem:[%s6821_s1 + $0x2d0] sm:$0xff] }
 0x1f3   : > { %v3762_v57 = vmul.f32 0.16666667, %v3506_v5  ;;  %v2742_v63 = vadd.f32 3.0, %v2486_v39  ;;  %v981_v19 = vadd.f32 %v980_v52, %v4827_v24  ;;  %612 = vmatmul.f32.gmra.mxu0 %v297_v12  ;;  %1551 = vmatpush.msrb.mxu1 %v449_v11 }
 0x1f4   : > { %v3765_v10 = vmul.f32 0.16666667, %v3509_v7  ;;  %v2745_v43 = vadd.f32 3.0, %v2489_v61  ;;  %1030 = vmatmul.f32.gmra.mxu2 %v297_v12  ;;  %821 = vmatmul.f32.gmra.mxu1 %v298_v23  ;;  %v777_v44 = vpop.f32.mrf.mxu1  ;;  %v7050_v12 = vld [vmem:[#allocation4_spill] sm:$0xff] }
 0x1f5   : > { %v2998_v40 = vmax.f32 %v2742_v63, 0.0  ;;  %v565_v55 = vpop.f32.mrf.mxu0  ;;  %4018 = vst [vmem:[%s5722_s24 + $0x1c8] sm:$0xff] %v3762_v57  ;;  %1239 = vmatmul.f32.gmra.mxu3 %v298_v23 }
 0x1f6   : > { %v3001_v15 = vmax.f32 %v2745_v43, 0.0  ;;  %v566_v27 = vadd.f32 %v565_v55, %v4787_v53  ;;  %v1189_v6 = vpop.f32.mrf.mxu3  ;;  %4021 = vst [vmem:[%s5722_s24 + $0x1e0] sm:$0xff] %v3765_v10  ;;  %v302_v43 = vld [vmem:[%s4672_s14 + $0x238] sm:$0xff] }
 0x1f7   : > { %v3254_v29 = vmin.f32 %v2998_v40, 6.0  ;;  %v1190_v21 = vadd.f32 %v1189_v6, %v981_v19  ;;  %v7051_v6 = vld [vmem:[#allocation5_spill] sm:$0xff] }
 0x1f8   : > { %v3257_v36 = vmin.f32 %v3001_v15, 6.0  ;;  %v775_v25 = vadd.f32 %v774_v20, %v566_v27 }
 0x1f9   : > { %v3510_v8 = vmul.f32 %v3254_v29, %v2486_v39  ;;  %v2490_v16 = vadd.f32 %v5058_v30, %v1190_v21  ;;  %v450_v30 = vld [vmem:[%s6821_s1 + $0x2d8] sm:$0xff]  ;;  %v301_v39 = vld [vmem:[%s4672_s14 + $0x230] sm:$0xff] }
 0x1fa   : > { %v3513_v17 = vmul.f32 %v3257_v36, %v2489_v61  ;;  %v2493_v45 = vadd.f32 %v5061_v35, %v775_v25  ;;  %v983_v49 = vpop.f32.mrf.mxu2  ;;  %1969 = vmatpush.msrb.mxu3 %v450_v30 }
 0x1fb   : > { %v3766_v37 = vmul.f32 0.16666667, %v3510_v8  ;;  %v2746_v33 = vadd.f32 3.0, %v2490_v16  ;;  %v984_v22 = vadd.f32 %v983_v49, %v4827_v24  ;;  %615 = vmatmul.f32.gmra.mxu0 %v299_v54 }
 0x1fc   : > { %v3769_v51 = vmul.f32 0.16666667, %v3513_v17  ;;  %v2749_v34 = vadd.f32 3.0, %v2493_v45  ;;  %1033 = vmatmul.f32.gmra.mxu2 %v299_v54  ;;  %824 = vmatmul.f32.gmra.mxu1 %v300_v60  ;;  %v780_v10 = vpop.f32.mrf.mxu1  ;;  %v7052_v54 = vld [vmem:[#allocation6_spill] sm:$0xff] }
 0x1fd   : > { %v3002_v35 = vmax.f32 %v2746_v33, 0.0  ;;  %v568_v31 = vpop.f32.mrf.mxu0  ;;  %4022 = vst [vmem:[%s5722_s24 + $0x1e8] sm:$0xff] %v3766_v37  ;;  %1242 = vmatmul.f32.gmra.mxu3 %v300_v60 }
 0x1fe   : > { %v3005_v38 = vmax.f32 %v2749_v34, 0.0  ;;  %v569_v58 = vadd.f32 %v568_v31, %v4787_v53  ;;  %v1192_v50 = vpop.f32.mrf.mxu3  ;;  %4025 = vst [vmem:[%s5722_s24 + $0x200] sm:$0xff] %v3769_v51 }
 0x1ff   : > { %v3258_v46 = vmin.f32 %v3002_v35, 6.0  ;;  %v1193_v32 = vadd.f32 %v1192_v50, %v984_v22  ;;  %v7053_v50 = vld [vmem:[#allocation7_spill] sm:$0xff] }
 0x200   : > { %v3261_v62 = vmin.f32 %v3005_v38, 6.0  ;;  %v778_v42 = vadd.f32 %v777_v44, %v569_v58 }
 0x201   : > { %v3514_v48 = vmul.f32 %v3258_v46, %v2490_v16  ;;  %v2494_v41 = vadd.f32 %v7048_v59, %v1193_v32 }
 0x202   : > { %v3517_v47 = vmul.f32 %v3261_v62, %v2493_v45  ;;  %v2497_v4 = vadd.f32 %v7049_v2, %v778_v42  ;;  %v986_v0 = vpop.f32.mrf.mxu2  ;;  %v303_v45 = vld [vmem:[%s4672_s14 + $0x240] sm:$0xff] }
 0x203   : > { %v3770_v56 = vmul.f32 0.16666667, %v3514_v48  ;;  %v2750_v26 = vadd.f32 3.0, %v2494_v41  ;;  %v987_v28 = vadd.f32 %v986_v0, %v4827_v24  ;;  %618 = vmatmul.f32.gmra.mxu0 %v301_v39 }
 0x204   : > { %v3773_v1 = vmul.f32 0.16666667, %v3517_v47  ;;  %v2753_v3 = vadd.f32 3.0, %v2497_v4  ;;  %1036 = vmatmul.f32.gmra.mxu2 %v301_v39  ;;  %827 = vmatmul.f32.gmra.mxu1 %v302_v43  ;;  %v783_v22 = vpop.f32.mrf.mxu1  ;;  %v305_v47 = vld [vmem:[%s4672_s14 + $0x250] sm:$0xff] }
 0x205   : > { %v3006_v14 = vmax.f32 %v2750_v26, 0.0  ;;  %v571_v5 = vpop.f32.mrf.mxu0  ;;  %4026 = vst [vmem:[%s5722_s24 + $0x208] sm:$0xff] %v3770_v56  ;;  %1245 = vmatmul.f32.gmra.mxu3 %v302_v43 }
 0x206   : > { %v3009_v7 = vmax.f32 %v2753_v3, 0.0  ;;  %v572_v61 = vadd.f32 %v571_v5, %v4787_v53  ;;  %v1195_v57 = vpop.f32.mrf.mxu3  ;;  %4029 = vst [vmem:[%s5722_s24 + $0x220] sm:$0xff] %v3773_v1  ;;  %v306_v1 = vld [vmem:[%s4672_s14 + $0x258] sm:$0xff] }
 0x207   : > { %v3262_v63 = vmin.f32 %v3006_v14, 6.0  ;;  %v1196_v52 = vadd.f32 %v1195_v57, %v987_v28  ;;  %v7054_v14 = vld [vmem:[#allocation8_spill] sm:$0xff] }
 0x208   : > { %v3265_v19 = vmin.f32 %v3009_v7, 6.0  ;;  %v781_v40 = vadd.f32 %v780_v10, %v572_v61  ;;  %v7055_v7 = vld [vmem:[#allocation9_spill] sm:$0xff] }
 0x209   : > { %v3518_v55 = vmul.f32 %v3262_v63, %v2494_v41  ;;  %v2498_v15 = vadd.f32 %v7050_v12, %v1196_v52 }
 0x20a   : > { %v3521_v27 = vmul.f32 %v3265_v19, %v2497_v4  ;;  %v2501_v29 = vadd.f32 %v7051_v6, %v781_v40  ;;  %v989_v23 = vpop.f32.mrf.mxu2  ;;  %v382_v40 = vld [vmem:[%s6821_s1 + $0xb8] sm:$0xff] }
 0x20b   : > { %v3774_v21 = vmul.f32 0.16666667, %v3518_v55  ;;  %v2754_v20 = vadd.f32 3.0, %v2498_v15  ;;  %v990_v8 = vadd.f32 %v989_v23, %v4827_v24  ;;  %621 = vmatmul.f32.gmra.mxu0 %v303_v45  ;;  %v446_v55 = vld [vmem:[%s6821_s1 + $0x2b8] sm:$0xff]  ;;  %1761 = vmatpush.msrb.mxu2 %v382_v40  ;;  %v312_v40 = vld [vmem:[%s4672_s14 + $0x288] sm:$0xff] }
 0x20c   : > { %v3777_v36 = vmul.f32 0.16666667, %v3521_v27  ;;  %v2757_v25 = vadd.f32 3.0, %v2501_v29  ;;  %1039 = vmatmul.f32.gmra.mxu2 %v303_v45  ;;  %830 = vmatmul.f32.gmra.mxu1 %v304_v9  ;;  %v786_v18 = vpop.f32.mrf.mxu1  ;;  %v307_v27 = vld [vmem:[%s4672_s14 + $0x260] sm:$0xff] }
 0x20d   : > { %v3010_v16 = vmax.f32 %v2754_v20, 0.0  ;;  %v574_v17 = vpop.f32.mrf.mxu0  ;;  %4030 = vst [vmem:[%s5722_s24 + $0x228] sm:$0xff] %v3774_v21  ;;  %1248 = vmatmul.f32.gmra.mxu3 %v304_v9  ;;  %v7056_v45 = vld [vmem:[#allocation10_spill] sm:$0xff] }
 0x20e   : > { %v3013_v37 = vmax.f32 %v2757_v25, 0.0  ;;  %v575_v33 = vadd.f32 %v574_v17, %v4787_v53  ;;  %v1198_v49 = vpop.f32.mrf.mxu3  ;;  %4033 = vst [vmem:[%s5722_s24 + $0x240] sm:$0xff] %v3777_v36  ;;  %1970 = vmatpush.msrb.mxu3 %v446_v55  ;;  %v308_v25 = vld [vmem:[%s4672_s14 + $0x268] sm:$0xff] }
 0x20f   : > { %v3266_v51 = vmin.f32 %v3010_v16, 6.0  ;;  %v1199_v34 = vadd.f32 %v1198_v49, %v990_v8  ;;  %v7057_v49 = vld [vmem:[#allocation11_spill] sm:$0xff] }
 0x210   : > { %v3269_v30 = vmin.f32 %v3013_v37, 6.0  ;;  %v784_v35 = vadd.f32 %v783_v22, %v575_v33 }
 0x211   : > { %v3522_v31 = vmul.f32 %v3266_v51, %v2498_v15  ;;  %v2502_v38 = vadd.f32 %v7052_v54, %v1199_v34 }
 0x212   : > { %v3525_v58 = vmul.f32 %v3269_v30, %v2501_v29  ;;  %v2505_v46 = vadd.f32 %v7053_v50, %v784_v35  ;;  %v992_v60 = vpop.f32.mrf.mxu2  ;;  %v381_v30 = vld [vmem:[%s6821_s1 + $0xb0] sm:$0xff] }
 0x213   : > { %v3778_v32 = vmul.f32 0.16666667, %v3522_v31  ;;  %v2758_v44 = vadd.f32 3.0, %v2502_v38  ;;  %v993_v48 = vadd.f32 %v992_v60, %v4827_v24  ;;  %624 = vmatmul.f32.gmra.mxu0 %v305_v47 }
 0x214   : > { %v3781_v62 = vmul.f32 0.16666667, %v3525_v58  ;;  %v2761_v42 = vadd.f32 3.0, %v2505_v46  ;;  %1042 = vmatmul.f32.gmra.mxu2 %v305_v47  ;;  %833 = vmatmul.f32.gmra.mxu1 %v306_v1  ;;  %v789_v36 = vpop.f32.mrf.mxu1 }
 0x215   : > { %v3014_v59 = vmax.f32 %v2758_v44, 0.0  ;;  %v577_v41 = vpop.f32.mrf.mxu0  ;;  %4034 = vst [vmem:[%s5722_s24 + $0x248] sm:$0xff] %v3778_v32  ;;  %1251 = vmatmul.f32.gmra.mxu3 %v306_v1  ;;  %1343 = vmatpush.msrb.mxu0 %v381_v30 }
 0x216   : > { %v3017_v2 = vmax.f32 %v2761_v42, 0.0  ;;  %v578_v4 = vadd.f32 %v577_v41, %v4787_v53  ;;  %v1201_v56 = vpop.f32.mrf.mxu3  ;;  %4037 = vst [vmem:[%s5722_s24 + $0x260] sm:$0xff] %v3781_v62 }
 0x217   : > { %v3270_v26 = vmin.f32 %v3014_v59, 6.0  ;;  %v1202_v0 = vadd.f32 %v1201_v56, %v993_v48  ;;  %v310_v59 = vld [vmem:[%s4672_s14 + $0x278] sm:$0xff] }
 0x218   : > { %v3273_v3 = vmin.f32 %v3017_v2, 6.0  ;;  %v787_v28 = vadd.f32 %v786_v18, %v578_v4  ;;  %v7058_v4 = vld [vmem:[#allocation12_spill] sm:$0xff] }
 0x219   : > { %v3526_v11 = vmul.f32 %v3270_v26, %v2502_v38  ;;  %v2506_v5 = vadd.f32 %v7054_v14, %v1202_v0  ;;  %v445_v38 = vld [vmem:[%s6821_s1 + $0x2b0] sm:$0xff]  ;;  %v7059_v0 = vld [vmem:[#allocation13_spill] sm:$0xff] }
 0x21a   : > { %v3529_v39 = vmul.f32 %v3273_v3, %v2505_v46  ;;  %v2509_v61 = vadd.f32 %v7055_v7, %v787_v28  ;;  %v995_v52 = vpop.f32.mrf.mxu2  ;;  %v309_v46 = vld [vmem:[%s4672_s14 + $0x270] sm:$0xff]  ;;  %1552 = vmatpush.msrb.mxu1 %v445_v38 }
 0x21b   : > { %v3782_v57 = vmul.f32 0.16666667, %v3526_v11  ;;  %v2762_v63 = vadd.f32 3.0, %v2506_v5  ;;  %v996_v19 = vadd.f32 %v995_v52, %v4827_v24  ;;  %627 = vmatmul.f32.gmra.mxu0 %v307_v27 }
 0x21c   : > { %v3785_v10 = vmul.f32 0.16666667, %v3529_v39  ;;  %v2765_v43 = vadd.f32 3.0, %v2509_v61  ;;  %1045 = vmatmul.f32.gmra.mxu2 %v307_v27  ;;  %836 = vmatmul.f32.gmra.mxu1 %v308_v25  ;;  %v792_v48 = vpop.f32.mrf.mxu1  ;;  %v7060_v27 = vld [vmem:[#allocation14_spill] sm:$0xff] }
 0x21d   : > { %v3018_v12 = vmax.f32 %v2762_v63, 0.0  ;;  %v580_v15 = vpop.f32.mrf.mxu0  ;;  %4038 = vst [vmem:[%s5722_s24 + $0x268] sm:$0xff] %v3782_v57  ;;  %1254 = vmatmul.f32.gmra.mxu3 %v308_v25 }
 0x21e   : > { %v3021_v6 = vmax.f32 %v2765_v43, 0.0  ;;  %v581_v29 = vadd.f32 %v580_v15, %v4787_v53  ;;  %v1204_v21 = vpop.f32.mrf.mxu3  ;;  %4041 = vst [vmem:[%s5722_s24 + $0x280] sm:$0xff] %v3785_v10 }
 0x21f   : > { %v3274_v20 = vmin.f32 %v3018_v12, 6.0  ;;  %v1205_v23 = vadd.f32 %v1204_v21, %v996_v19  ;;  %v7061_v21 = vld [vmem:[#allocation15_spill] sm:$0xff] }
 0x220   : > { %v3277_v8 = vmin.f32 %v3021_v6, 6.0  ;;  %v790_v16 = vadd.f32 %v789_v36, %v581_v29 }
 0x221   : > { %v3530_v17 = vmul.f32 %v3274_v20, %v2506_v5  ;;  %v2510_v37 = vadd.f32 %v7056_v45, %v1205_v23 }
 0x222   : > { %v3533_v33 = vmul.f32 %v3277_v8, %v2509_v61  ;;  %v2513_v51 = vadd.f32 %v7057_v49, %v790_v16  ;;  %v998_v9 = vpop.f32.mrf.mxu2  ;;  %v311_v61 = vld [vmem:[%s4672_s14 + $0x280] sm:$0xff] }
 0x223   : > { %v3786_v34 = vmul.f32 0.16666667, %v3530_v17  ;;  %v2766_v22 = vadd.f32 3.0, %v2510_v37  ;;  %v999_v54 = vadd.f32 %v998_v9, %v4827_v24  ;;  %630 = vmatmul.f32.gmra.mxu0 %v309_v46 }
 0x224   : > { %v3789_v35 = vmul.f32 0.16666667, %v3533_v33  ;;  %v2769_v31 = vadd.f32 3.0, %v2513_v51  ;;  %1048 = vmatmul.f32.gmra.mxu2 %v309_v46  ;;  %839 = vmatmul.f32.gmra.mxu1 %v310_v59  ;;  %v795_v19 = vpop.f32.mrf.mxu1  ;;  %v313_v33 = vld [vmem:[%s4672_s14 + $0x290] sm:$0xff] }
 0x225   : > { %v3022_v58 = vmax.f32 %v2766_v22, 0.0  ;;  %v583_v50 = vpop.f32.mrf.mxu0  ;;  %4042 = vst [vmem:[%s5722_s24 + $0x288] sm:$0xff] %v3786_v34  ;;  %1257 = vmatmul.f32.gmra.mxu3 %v310_v59 }
 0x226   : > { %v3025_v32 = vmax.f32 %v2769_v31, 0.0  ;;  %v584_v44 = vadd.f32 %v583_v50, %v4787_v53  ;;  %v1207_v60 = vpop.f32.mrf.mxu3  ;;  %4045 = vst [vmem:[%s5722_s24 + $0x2a0] sm:$0xff] %v3789_v35  ;;  %v314_v35 = vld [vmem:[%s4672_s14 + $0x298] sm:$0xff] }
 0x227   : > { %v3278_v62 = vmin.f32 %v3022_v58, 6.0  ;;  %v1208_v42 = vadd.f32 %v1207_v60, %v999_v54  ;;  %v7062_v58 = vld [vmem:[#allocation16_spill] sm:$0xff] }
 0x228   : > { %v3281_v41 = vmin.f32 %v3025_v32, 6.0  ;;  %v793_v47 = vadd.f32 %v792_v48, %v584_v44  ;;  %v7063_v32 = vld [vmem:[#allocation17_spill] sm:$0xff] }
 0x229   : > { %v3534_v2 = vmul.f32 %v3278_v62, %v2510_v37  ;;  %v2514_v56 = vadd.f32 %v7058_v4, %v1208_v42 }
 0x22a   : > { %v3537_v26 = vmul.f32 %v3281_v41, %v2513_v51  ;;  %v2517_v18 = vadd.f32 %v7059_v0, %v793_v47  ;;  %v1001_v28 = vpop.f32.mrf.mxu2  ;;  %v378_v47 = vld [vmem:[%s6821_s1 + $0x98] sm:$0xff] }
 0x22b   : > { %v3790_v1 = vmul.f32 0.16666667, %v3534_v2  ;;  %v2770_v3 = vadd.f32 3.0, %v2514_v56  ;;  %v1002_v5 = vadd.f32 %v1001_v28, %v4827_v24  ;;  %633 = vmatmul.f32.gmra.mxu0 %v311_v61  ;;  %v442_v2 = vld [vmem:[%s6821_s1 + $0x298] sm:$0xff]  ;;  %1762 = vmatpush.msrb.mxu2 %v378_v47  ;;  %v320_v47 = vld [vmem:[%s4672_s14 + $0x2c8] sm:$0xff] }
 0x22c   : > { %v3793_v11 = vmul.f32 0.16666667, %v3537_v26  ;;  %v2773_v14 = vadd.f32 3.0, %v2517_v18  ;;  %1051 = vmatmul.f32.gmra.mxu2 %v311_v61  ;;  %842 = vmatmul.f32.gmra.mxu1 %v312_v40  ;;  %v798_v30 = vpop.f32.mrf.mxu1  ;;  %v315_v26 = vld [vmem:[%s4672_s14 + $0x2a0] sm:$0xff] }
 0x22d   : > { %v3026_v39 = vmax.f32 %v2770_v3, 0.0  ;;  %v586_v7 = vpop.f32.mrf.mxu0  ;;  %4046 = vst [vmem:[%s5722_s24 + $0x2a8] sm:$0xff] %v3790_v1  ;;  %1260 = vmatmul.f32.gmra.mxu3 %v312_v40  ;;  %v7064_v61 = vld [vmem:[#allocation18_spill] sm:$0xff] }
 0x22e   : > { %v3029_v57 = vmax.f32 %v2773_v14, 0.0  ;;  %v587_v63 = vadd.f32 %v586_v7, %v4787_v53  ;;  %v1210_v52 = vpop.f32.mrf.mxu3  ;;  %4049 = vst [vmem:[%s5722_s24 + $0x2c0] sm:$0xff] %v3793_v11  ;;  %1971 = vmatpush.msrb.mxu3 %v442_v2  ;;  %v316_v14 = vld [vmem:[%s4672_s14 + $0x2a8] sm:$0xff] }
 0x22f   : > { %v3282_v10 = vmin.f32 %v3026_v39, 6.0  ;;  %v1211_v43 = vadd.f32 %v1210_v52, %v1002_v5  ;;  %v7065_v52 = vld [vmem:[#allocation19_spill] sm:$0xff] }
 0x230   : > { %v3285_v55 = vmin.f32 %v3029_v57, 6.0  ;;  %v796_v12 = vadd.f32 %v795_v19, %v587_v63 }
 0x231   : > { %v3538_v15 = vmul.f32 %v3282_v10, %v2514_v56  ;;  %v2518_v6 = vadd.f32 %v7060_v27, %v1211_v43 }
 0x232   : > { %v3541_v29 = vmul.f32 %v3285_v55, %v2517_v18  ;;  %v2521_v20 = vadd.f32 %v7061_v21, %v796_v12  ;;  %v1004_v25 = vpop.f32.mrf.mxu2  ;;  %v377_v55 = vld [vmem:[%s6821_s1 + $0x90] sm:$0xff] }
 0x233   : > { %v3794_v23 = vmul.f32 0.16666667, %v3538_v15  ;;  %v2774_v36 = vadd.f32 3.0, %v2518_v6  ;;  %v1005_v17 = vadd.f32 %v1004_v25, %v4827_v24  ;;  %636 = vmatmul.f32.gmra.mxu0 %v313_v33 }
 0x234   : > { %v3797_v8 = vmul.f32 0.16666667, %v3541_v29  ;;  %v2777_v16 = vadd.f32 3.0, %v2521_v20  ;;  %1054 = vmatmul.f32.gmra.mxu2 %v313_v33  ;;  %845 = vmatmul.f32.gmra.mxu1 %v314_v35  ;;  %v801_v11 = vpop.f32.mrf.mxu1 }
 0x235   : > { %v3030_v45 = vmax.f32 %v2774_v36, 0.0  ;;  %v589_v37 = vpop.f32.mrf.mxu0  ;;  %4050 = vst [vmem:[%s5722_s24 + $0x2c8] sm:$0xff] %v3794_v23  ;;  %1263 = vmatmul.f32.gmra.mxu3 %v314_v35  ;;  %1344 = vmatpush.msrb.mxu0 %v377_v55 }
 0x236   : > { %v3033_v49 = vmax.f32 %v2777_v16, 0.0  ;;  %v590_v51 = vadd.f32 %v589_v37, %v4787_v53  ;;  %v1213_v34 = vpop.f32.mrf.mxu3  ;;  %4053 = vst [vmem:[%s5722_s24 + $0x2e0] sm:$0xff] %v3797_v8 }
 0x237   : > { %v3286_v22 = vmin.f32 %v3030_v45, 6.0  ;;  %v1214_v9 = vadd.f32 %v1213_v34, %v1005_v17  ;;  %v318_v45 = vld [vmem:[%s4672_s14 + $0x2b8] sm:$0xff] }
 0x238   : > { %v3289_v31 = vmin.f32 %v3033_v49, 6.0  ;;  %v799_v54 = vadd.f32 %v798_v30, %v590_v51  ;;  %v7066_v51 = vld [vmem:[#allocation20_spill] sm:$0xff] }
 0x239   : > { %v3542_v38 = vmul.f32 %v3286_v22, %v2518_v6  ;;  %v2522_v50 = vadd.f32 %v7062_v58, %v1214_v9  ;;  %v441_v6 = vld [vmem:[%s6821_s1 + $0x290] sm:$0xff]  ;;  %v7067_v9 = vld [vmem:[#allocation21_spill] sm:$0xff] }
 0x23a   : > { %v3545_v46 = vmul.f32 %v3289_v31, %v2521_v20  ;;  %v2525_v44 = vadd.f32 %v7063_v32, %v799_v54  ;;  %v1007_v42 = vpop.f32.mrf.mxu2  ;;  %v317_v20 = vld [vmem:[%s4672_s14 + $0x2b0] sm:$0xff]  ;;  %1553 = vmatpush.msrb.mxu1 %v441_v6 }
 0x23b   : > { %v3798_v60 = vmul.f32 0.16666667, %v3542_v38  ;;  %v2778_v62 = vadd.f32 3.0, %v2522_v50  ;;  %v1008_v41 = vadd.f32 %v1007_v42, %v4827_v24  ;;  %639 = vmatmul.f32.gmra.mxu0 %v315_v26 }
 0x23c   : > { %v3801_v48 = vmul.f32 0.16666667, %v3545_v46  ;;  %v2781_v59 = vadd.f32 3.0, %v2525_v44  ;;  %1057 = vmatmul.f32.gmra.mxu2 %v315_v26  ;;  %848 = vmatmul.f32.gmra.mxu1 %v316_v14  ;;  %v7068_v26 = vld [vmem:[#allocation22_spill] sm:$0xff] }
 0x23d   : > { %v3034_v4 = vmax.f32 %v2778_v62, 0.0  ;;  %v592_v56 = vpop.f32.mrf.mxu0  ;;  %4054 = vst [vmem:[%s5722_s24 + $0x2e8] sm:$0xff] %v3798_v60  ;;  %1266 = vmatmul.f32.gmra.mxu3 %v316_v14 }
 0x23e   : > { %v3037_v0 = vmax.f32 %v2781_v59, 0.0  ;;  %v593_v18 = vadd.f32 %v592_v56, %v4787_v53  ;;  %v1216_v1 = vpop.f32.mrf.mxu3  ;;  %4057 = vst [vmem:[%s5722_s24 + $0x300] sm:$0xff] %v3801_v48 }
 0x23f   : > { %v3290_v3 = vmin.f32 %v3034_v4, 6.0  ;;  %v1217_v28 = vadd.f32 %v1216_v1, %v1008_v41  ;;  %v7069_v1 = vld [vmem:[#allocation23_spill] sm:$0xff] }
 0x240   : > { %v3293_v5 = vmin.f32 %v3037_v0, 6.0  ;;  %v802_v39 = vadd.f32 %v801_v11, %v593_v18  ;;  %v804_v17 = vpop.f32.mrf.mxu1 }
 0x241   : > { %v3546_v7 = vmul.f32 %v3290_v3, %v2522_v50  ;;  %v2526_v57 = vadd.f32 %v7064_v61, %v1217_v28 }
 0x242   : > { %v3549_v63 = vmul.f32 %v3293_v5, %v2525_v44  ;;  %v2529_v10 = vadd.f32 %v7065_v52, %v802_v39  ;;  %v1010_v40 = vpop.f32.mrf.mxu2  ;;  %v319_v44 = vld [vmem:[%s4672_s14 + $0x2c0] sm:$0xff] }
 0x243   : > { %v3802_v43 = vmul.f32 0.16666667, %v3546_v7  ;;  %v2782_v19 = vadd.f32 3.0, %v2526_v57  ;;  %v1011_v27 = vadd.f32 %v1010_v40, %v4827_v24  ;;  %642 = vmatmul.f32.gmra.mxu0 %v317_v20 }
 0x244   : > { %v3805_v12 = vmul.f32 0.16666667, %v3549_v63  ;;  %v2785_v15 = vadd.f32 3.0, %v2529_v10  ;;  %1060 = vmatmul.f32.gmra.mxu2 %v317_v20  ;;  %851 = vmatmul.f32.gmra.mxu1 %v318_v45  ;;  %v321_v63 = vld [vmem:[%s4672_s14 + $0x2d0] sm:$0xff] }
 0x245   : > { %v3038_v29 = vmax.f32 %v2782_v19, 0.0  ;;  %v595_v21 = vpop.f32.mrf.mxu0  ;;  %4058 = vst [vmem:[%s5722_s24 + $0x308] sm:$0xff] %v3802_v43  ;;  %1269 = vmatmul.f32.gmra.mxu3 %v318_v45 }
 0x246   : > { %v3041_v23 = vmax.f32 %v2785_v15, 0.0  ;;  %v596_v36 = vadd.f32 %v595_v21, %v4787_v53  ;;  %v1219_v25 = vpop.f32.mrf.mxu3  ;;  %4061 = vst [vmem:[%s5722_s24 + $0x320] sm:$0xff] %v3805_v12  ;;  %v322_v12 = vld [vmem:[%s4672_s14 + $0x2d8] sm:$0xff] }
 0x247   : > { %v3294_v8 = vmin.f32 %v3038_v29, 6.0  ;;  %v1220_v16 = vadd.f32 %v1219_v25, %v1011_v27  ;;  %v7070_v29 = vld [vmem:[#allocation24_spill] sm:$0xff] }
 0x248   : > { %v3297_v37 = vmin.f32 %v3041_v23, 6.0  ;;  %v805_v33 = vadd.f32 %v804_v17, %v596_v36  ;;  %v7071_v23 = vld [vmem:[#allocation25_spill] sm:$0xff] }
 0x249   : > { %v3550_v49 = vmul.f32 %v3294_v8, %v2526_v57  ;;  %v2530_v34 = vadd.f32 %v7066_v51, %v1220_v16  ;;  %v807_v41 = vpop.f32.mrf.mxu1 }
 0x24a   : > { %v3553_v22 = vmul.f32 %v3297_v37, %v2529_v10  ;;  %v2533_v30 = vadd.f32 %v7067_v9, %v805_v33  ;;  %v1013_v54 = vpop.f32.mrf.mxu2  ;;  %v374_v33 = vld [vmem:[%s6821_s1 + $0x78] sm:$0xff] }
 0x24b   : > { %v3806_v35 = vmul.f32 0.16666667, %v3550_v49  ;;  %v2786_v31 = vadd.f32 3.0, %v2530_v34  ;;  %v1014_v50 = vadd.f32 %v1013_v54, %v4827_v24  ;;  %645 = vmatmul.f32.gmra.mxu0 %v319_v44  ;;  %v438_v49 = vld [vmem:[%s6821_s1 + $0x278] sm:$0xff]  ;;  %1763 = vmatpush.msrb.mxu2 %v374_v33  ;;  %v328_v33 = vld [vmem:[%s4672_s14 + $0x308] sm:$0xff] }
 0x24c   : > { %v3809_v38 = vmul.f32 0.16666667, %v3553_v22  ;;  %v2789_v58 = vadd.f32 3.0, %v2533_v30  ;;  %1063 = vmatmul.f32.gmra.mxu2 %v319_v44  ;;  %854 = vmatmul.f32.gmra.mxu1 %v320_v47  ;;  %v323_v22 = vld [vmem:[%s4672_s14 + $0x2e0] sm:$0xff] }
 0x24d   : > { %v3042_v46 = vmax.f32 %v2786_v31, 0.0  ;;  %v598_v32 = vpop.f32.mrf.mxu0  ;;  %4062 = vst [vmem:[%s5722_s24 + $0x328] sm:$0xff] %v3806_v35  ;;  %1272 = vmatmul.f32.gmra.mxu3 %v320_v47  ;;  %v7072_v44 = vld [vmem:[#allocation26_spill] sm:$0xff] }
 0x24e   : > { %v3045_v60 = vmax.f32 %v2789_v58, 0.0  ;;  %v599_v62 = vadd.f32 %v598_v32, %v4787_v53  ;;  %v1222_v42 = vpop.f32.mrf.mxu3  ;;  %4065 = vst [vmem:[%s5722_s24 + $0x340] sm:$0xff] %v3809_v38  ;;  %1972 = vmatpush.msrb.mxu3 %v438_v49  ;;  %v324_v58 = vld [vmem:[%s4672_s14 + $0x2e8] sm:$0xff] }
 0x24f   : > { %v3298_v48 = vmin.f32 %v3042_v46, 6.0  ;;  %v1223_v59 = vadd.f32 %v1222_v42, %v1014_v50  ;;  %v7073_v42 = vld [vmem:[#allocation27_spill] sm:$0xff] }
 0x250   : > { %v3301_v2 = vmin.f32 %v3045_v60, 6.0  ;;  %v808_v4 = vadd.f32 %v807_v41, %v599_v62 }
 0x251   : > { %v3554_v56 = vmul.f32 %v3298_v48, %v2530_v34  ;;  %v2534_v0 = vadd.f32 %v7068_v26, %v1223_v59  ;;  %v810_v55 = vpop.f32.mrf.mxu1 }
 0x252   : > { %v3557_v18 = vmul.f32 %v3301_v2, %v2533_v30  ;;  %v2537_v3 = vadd.f32 %v7069_v1, %v808_v4  ;;  %v1016_v14 = vpop.f32.mrf.mxu2  ;;  %v373_v2 = vld [vmem:[%s6821_s1 + $0x70] sm:$0xff] }
 0x253   : > { %v3810_v28 = vmul.f32 0.16666667, %v3554_v56  ;;  %v2790_v11 = vadd.f32 3.0, %v2534_v0  ;;  %v1017_v7 = vadd.f32 %v1016_v14, %v4827_v24  ;;  %648 = vmatmul.f32.gmra.mxu0 %v321_v63 }
 0x254   : > { %v3813_v5 = vmul.f32 0.16666667, %v3557_v18  ;;  %v2793_v39 = vadd.f32 3.0, %v2537_v3  ;;  %1066 = vmatmul.f32.gmra.mxu2 %v321_v63  ;;  %857 = vmatmul.f32.gmra.mxu1 %v322_v12 }
 0x255   : > { %v3046_v61 = vmax.f32 %v2790_v11, 0.0  ;;  %v601_v57 = vpop.f32.mrf.mxu0  ;;  %4066 = vst [vmem:[%s5722_s24 + $0x348] sm:$0xff] %v3810_v28  ;;  %1275 = vmatmul.f32.gmra.mxu3 %v322_v12  ;;  %1345 = vmatpush.msrb.mxu0 %v373_v2 }
 0x256   : > { %v3049_v52 = vmax.f32 %v2793_v39, 0.0  ;;  %v602_v10 = vadd.f32 %v601_v57, %v4787_v53  ;;  %v1225_v43 = vpop.f32.mrf.mxu3  ;;  %4069 = vst [vmem:[%s5722_s24 + $0x360] sm:$0xff] %v3813_v5 }
 0x257   : > { %v3302_v19 = vmin.f32 %v3046_v61, 6.0  ;;  %v1226_v40 = vadd.f32 %v1225_v43, %v1017_v7  ;;  %v326_v61 = vld [vmem:[%s4672_s14 + $0x2f8] sm:$0xff] }
 0x258   : > { %v3305_v15 = vmin.f32 %v3049_v52, 6.0  ;;  %v811_v27 = vadd.f32 %v810_v55, %v602_v10  ;;  %v7074_v10 = vld [vmem:[#allocation28_spill] sm:$0xff] }
 0x259   : > { %v3558_v6 = vmul.f32 %v3302_v19, %v2534_v0  ;;  %v2538_v21 = vadd.f32 %v7070_v29, %v1226_v40  ;;  %v813_v38 = vpop.f32.mrf.mxu1  ;;  %v437_v0 = vld [vmem:[%s6821_s1 + $0x270] sm:$0xff]  ;;  %v7075_v40 = vld [vmem:[#allocation29_spill] sm:$0xff] }
 0x25a   : > { %v3561_v20 = vmul.f32 %v3305_v15, %v2537_v3  ;;  %v2541_v36 = vadd.f32 %v7071_v23, %v811_v27  ;;  %v1019_v16 = vpop.f32.mrf.mxu2  ;;  %v325_v3 = vld [vmem:[%s4672_s14 + $0x2f0] sm:$0xff]  ;;  %1554 = vmatpush.msrb.mxu1 %v437_v0 }
 0x25b   : > { %v3814_v25 = vmul.f32 0.16666667, %v3558_v6  ;;  %v2794_v8 = vadd.f32 3.0, %v2538_v21  ;;  %v1020_v37 = vadd.f32 %v1019_v16, %v4827_v24  ;;  %651 = vmatmul.f32.gmra.mxu0 %v323_v22 }
 0x25c   : > { %v3817_v17 = vmul.f32 0.16666667, %v3561_v20  ;;  %v2797_v45 = vadd.f32 3.0, %v2541_v36  ;;  %1069 = vmatmul.f32.gmra.mxu2 %v323_v22  ;;  %860 = vmatmul.f32.gmra.mxu1 %v324_v58  ;;  %v7076_v22 = vld [vmem:[#allocation30_spill] sm:$0xff] }
 0x25d   : > { %v3050_v51 = vmax.f32 %v2794_v8, 0.0  ;;  %v604_v34 = vpop.f32.mrf.mxu0  ;;  %4070 = vst [vmem:[%s5722_s24 + $0x368] sm:$0xff] %v3814_v25  ;;  %1278 = vmatmul.f32.gmra.mxu3 %v324_v58 }
 0x25e   : > { %v3053_v9 = vmax.f32 %v2797_v45, 0.0  ;;  %v605_v30 = vadd.f32 %v604_v34, %v4787_v53  ;;  %v1228_v35 = vpop.f32.mrf.mxu3  ;;  %4073 = vst [vmem:[%s5722_s24 + $0x380] sm:$0xff] %v3817_v17 }
 0x25f   : > { %v3306_v31 = vmin.f32 %v3050_v51, 6.0  ;;  %v1229_v54 = vadd.f32 %v1228_v35, %v1020_v37  ;;  %v7077_v35 = vld [vmem:[#allocation31_spill] sm:$0xff] }
 0x260   : > { %v3309_v50 = vmin.f32 %v3053_v9, 6.0  ;;  %v814_v46 = vadd.f32 %v813_v38, %v605_v30 }
 0x261   : > { %v3562_v32 = vmul.f32 %v3306_v31, %v2538_v21  ;;  %v2542_v60 = vadd.f32 %v7072_v44, %v1229_v54  ;;  %v816_v7 = vpop.f32.mrf.mxu1 }
 0x262   : > { %v3565_v62 = vmul.f32 %v3309_v50, %v2541_v36  ;;  %v2545_v48 = vadd.f32 %v7073_v42, %v814_v46  ;;  %v1022_v47 = vpop.f32.mrf.mxu2  ;;  %v327_v36 = vld [vmem:[%s4672_s14 + $0x300] sm:$0xff] }
 0x263   : > { %v3818_v59 = vmul.f32 0.16666667, %v3562_v32  ;;  %v2798_v41 = vadd.f32 3.0, %v2542_v60  ;;  %v1023_v26 = vadd.f32 %v1022_v47, %v4827_v24  ;;  %654 = vmatmul.f32.gmra.mxu0 %v325_v3 }
 0x264   : > { %v3821_v4 = vmul.f32 0.16666667, %v3565_v62  ;;  %v2801_v56 = vadd.f32 3.0, %v2545_v48  ;;  %1072 = vmatmul.f32.gmra.mxu2 %v325_v3  ;;  %863 = vmatmul.f32.gmra.mxu1 %v326_v61  ;;  %v329_v62 = vld [vmem:[%s4672_s14 + $0x310] sm:$0xff] }
 0x265   : > { %v3054_v18 = vmax.f32 %v2798_v41, 0.0  ;;  %v607_v1 = vpop.f32.mrf.mxu0  ;;  %4074 = vst [vmem:[%s5722_s24 + $0x388] sm:$0xff] %v3818_v59  ;;  %1281 = vmatmul.f32.gmra.mxu3 %v326_v61 }
 0x266   : > { %v3057_v28 = vmax.f32 %v2801_v56, 0.0  ;;  %v608_v11 = vadd.f32 %v607_v1, %v4787_v53  ;;  %v1231_v14 = vpop.f32.mrf.mxu3  ;;  %4077 = vst [vmem:[%s5722_s24 + $0x3a0] sm:$0xff] %v3821_v4  ;;  %v330_v4 = vld [vmem:[%s4672_s14 + $0x318] sm:$0xff] }
 0x267   : > { %v3310_v5 = vmin.f32 %v3054_v18, 6.0  ;;  %v1232_v39 = vadd.f32 %v1231_v14, %v1023_v26  ;;  %v7078_v18 = vld [vmem:[#allocation32_spill] sm:$0xff] }
 0x268   : > { %v3313_v57 = vmin.f32 %v3057_v28, 6.0  ;;  %v817_v63 = vadd.f32 %v816_v7, %v608_v11  ;;  %v7079_v28 = vld [vmem:[#allocation33_spill] sm:$0xff] }
 0x269   : > { %v3566_v52 = vmul.f32 %v3310_v5, %v2542_v60  ;;  %v2546_v43 = vadd.f32 %v7074_v10, %v1232_v39  ;;  %v819_v37 = vpop.f32.mrf.mxu1 }
 0x26a   : > { %v3569_v19 = vmul.f32 %v3313_v57, %v2545_v48  ;;  %v2549_v55 = vadd.f32 %v7075_v40, %v817_v63  ;;  %v1025_v27 = vpop.f32.mrf.mxu2  ;;  %v370_v63 = vld [vmem:[%s6821_s1 + $0x58] sm:$0xff] }
 0x26b   : > { %v3822_v12 = vmul.f32 0.16666667, %v3566_v52  ;;  %v2802_v15 = vadd.f32 3.0, %v2546_v43  ;;  %v1026_v21 = vadd.f32 %v1025_v27, %v4827_v24  ;;  %657 = vmatmul.f32.gmra.mxu0 %v327_v36  ;;  %v434_v52 = vld [vmem:[%s6821_s1 + $0x258] sm:$0xff]  ;;  %1764 = vmatpush.msrb.mxu2 %v370_v63  ;;  %v336_v63 = vld [vmem:[%s4672_s14 + $0x348] sm:$0xff] }
 0x26c   : > { %v3825_v6 = vmul.f32 0.16666667, %v3569_v19  ;;  %v2805_v29 = vadd.f32 3.0, %v2549_v55  ;;  %1075 = vmatmul.f32.gmra.mxu2 %v327_v36  ;;  %866 = vmatmul.f32.gmra.mxu1 %v328_v33  ;;  %v331_v19 = vld [vmem:[%s4672_s14 + $0x320] sm:$0xff] }
 0x26d   : > { %v3058_v20 = vmax.f32 %v2802_v15, 0.0  ;;  %v610_v23 = vpop.f32.mrf.mxu0  ;;  %4078 = vst [vmem:[%s5722_s24 + $0x3a8] sm:$0xff] %v3822_v12  ;;  %1284 = vmatmul.f32.gmra.mxu3 %v328_v33  ;;  %v7080_v36 = vld [vmem:[#allocation34_spill] sm:$0xff] }
 0x26e   : > { %v3061_v25 = vmax.f32 %v2805_v29, 0.0  ;;  %v611_v8 = vadd.f32 %v610_v23, %v4787_v53  ;;  %v1234_v16 = vpop.f32.mrf.mxu3  ;;  %4081 = vst [vmem:[%s5722_s24 + $0x3c0] sm:$0xff] %v3825_v6  ;;  %1973 = vmatpush.msrb.mxu3 %v434_v52  ;;  %v332_v29 = vld [vmem:[%s4672_s14 + $0x328] sm:$0xff] }
 0x26f   : > { %v3314_v17 = vmin.f32 %v3058_v20, 6.0  ;;  %v1235_v45 = vadd.f32 %v1234_v16, %v1026_v21  ;;  %v7081_v16 = vld [vmem:[#allocation35_spill] sm:$0xff] }
 0x270   : > { %v3317_v49 = vmin.f32 %v3061_v25, 6.0  ;;  %v820_v51 = vadd.f32 %v819_v37, %v611_v8 }
 0x271   : > { %v3570_v34 = vmul.f32 %v3314_v17, %v2546_v43  ;;  %v2550_v9 = vadd.f32 %v7076_v22, %v1235_v45  ;;  %v822_v2 = vpop.f32.mrf.mxu1 }
 0x272   : > { %v3573_v30 = vmul.f32 %v3317_v49, %v2549_v55  ;;  %v2553_v31 = vadd.f32 %v7077_v35, %v820_v51  ;;  %v1028_v58 = vpop.f32.mrf.mxu2  ;;  %v369_v49 = vld [vmem:[%s6821_s1 + $0x50] sm:$0xff] }
 0x273   : > { %v3826_v54 = vmul.f32 0.16666667, %v3570_v34  ;;  %v2806_v38 = vadd.f32 3.0, %v2550_v9  ;;  %v1029_v32 = vadd.f32 %v1028_v58, %v4827_v24  ;;  %660 = vmatmul.f32.gmra.mxu0 %v329_v62 }
 0x274   : > { %v3829_v50 = vmul.f32 0.16666667, %v3573_v30  ;;  %v2809_v46 = vadd.f32 3.0, %v2553_v31  ;;  %1078 = vmatmul.f32.gmra.mxu2 %v329_v62  ;;  %869 = vmatmul.f32.gmra.mxu1 %v330_v4 }
 0x275   : > { %v3062_v44 = vmax.f32 %v2806_v38, 0.0  ;;  %v613_v60 = vpop.f32.mrf.mxu0  ;;  %4082 = vst [vmem:[%s5722_s24 + $0x3c8] sm:$0xff] %v3826_v54  ;;  %1287 = vmatmul.f32.gmra.mxu3 %v330_v4  ;;  %1346 = vmatpush.msrb.mxu0 %v369_v49 }
 0x276   : > { %v3065_v42 = vmax.f32 %v2809_v46, 0.0  ;;  %v614_v48 = vadd.f32 %v613_v60, %v4787_v53  ;;  %v1237_v59 = vpop.f32.mrf.mxu3  ;;  %4085 = vst [vmem:[%s5722_s24 + $0x3e0] sm:$0xff] %v3829_v50 }
 0x277   : > { %v3318_v41 = vmin.f32 %v3062_v44, 6.0  ;;  %v1238_v47 = vadd.f32 %v1237_v59, %v1029_v32  ;;  %v334_v44 = vld [vmem:[%s4672_s14 + $0x338] sm:$0xff] }
 0x278   : > { %v3321_v56 = vmin.f32 %v3065_v42, 6.0  ;;  %v823_v26 = vadd.f32 %v822_v2, %v614_v48  ;;  %v7082_v48 = vld [vmem:[#allocation36_spill] sm:$0xff] }
 0x279   : > { %v3574_v0 = vmul.f32 %v3318_v41, %v2550_v9  ;;  %v2554_v1 = vadd.f32 %v7078_v18, %v1238_v47  ;;  %v825_v6 = vpop.f32.mrf.mxu1  ;;  %v433_v9 = vld [vmem:[%s6821_s1 + $0x250] sm:$0xff]  ;;  %v7083_v47 = vld [vmem:[#allocation37_spill] sm:$0xff] }
 0x27a   : > { %v3577_v3 = vmul.f32 %v3321_v56, %v2553_v31  ;;  %v2557_v11 = vadd.f32 %v7079_v28, %v823_v26  ;;  %v1031_v39 = vpop.f32.mrf.mxu2  ;;  %v333_v31 = vld [vmem:[%s4672_s14 + $0x330] sm:$0xff]  ;;  %1555 = vmatpush.msrb.mxu1 %v433_v9 }
 0x27b   : > { %v3830_v14 = vmul.f32 0.16666667, %v3574_v0  ;;  %v2810_v5 = vadd.f32 3.0, %v2554_v1  ;;  %v1032_v57 = vadd.f32 %v1031_v39, %v4827_v24  ;;  %663 = vmatmul.f32.gmra.mxu0 %v331_v19 }
 0x27c   : > { %v3833_v7 = vmul.f32 0.16666667, %v3577_v3  ;;  %v2813_v61 = vadd.f32 3.0, %v2557_v11  ;;  %1081 = vmatmul.f32.gmra.mxu2 %v331_v19  ;;  %872 = vmatmul.f32.gmra.mxu1 %v332_v29  ;;  %v7084_v19 = vld [vmem:[#allocation38_spill] sm:$0xff] }
 0x27d   : > { %v3066_v10 = vmax.f32 %v2810_v5, 0.0  ;;  %v616_v43 = vpop.f32.mrf.mxu0  ;;  %4086 = vst [vmem:[%s5722_s24 + $0x3e8] sm:$0xff] %v3830_v14  ;;  %1290 = vmatmul.f32.gmra.mxu3 %v332_v29 }
 0x27e   : > { %v3069_v40 = vmax.f32 %v2813_v61, 0.0  ;;  %v617_v55 = vadd.f32 %v616_v43, %v4787_v53  ;;  %v1240_v12 = vpop.f32.mrf.mxu3  ;;  %4089 = vst [vmem:[%s5722_s24 + $0x400] sm:$0xff] %v3833_v7 }
 0x27f   : > { %v3322_v15 = vmin.f32 %v3066_v10, 6.0  ;;  %v1241_v27 = vadd.f32 %v1240_v12, %v1032_v57  ;;  %v7085_v12 = vld [vmem:[#allocation39_spill] sm:$0xff] }
 0x280   : > { %v3325_v21 = vmin.f32 %v3069_v40, 6.0  ;;  %v826_v20 = vadd.f32 %v825_v6, %v617_v55 }
 0x281   : > { %v3578_v23 = vmul.f32 %v3322_v15, %v2554_v1  ;;  %v2558_v25 = vadd.f32 %v7080_v36, %v1241_v27  ;;  %v828_v32 = vpop.f32.mrf.mxu1 }
 0x282   : > { %v3581_v8 = vmul.f32 %v3325_v21, %v2557_v11  ;;  %v2561_v17 = vadd.f32 %v7081_v16, %v826_v20  ;;  %v1034_v33 = vpop.f32.mrf.mxu2  ;;  %v335_v11 = vld [vmem:[%s4672_s14 + $0x340] sm:$0xff] }
 0x283   : > { %v3834_v45 = vmul.f32 0.16666667, %v3578_v23  ;;  %v2814_v37 = vadd.f32 3.0, %v2558_v25  ;;  %v1035_v22 = vadd.f32 %v1034_v33, %v4827_v24  ;;  %666 = vmatmul.f32.gmra.mxu0 %v333_v31 }
 0x284   : > { %v3837_v51 = vmul.f32 0.16666667, %v3581_v8  ;;  %v2817_v34 = vadd.f32 3.0, %v2561_v17  ;;  %1084 = vmatmul.f32.gmra.mxu2 %v333_v31  ;;  %875 = vmatmul.f32.gmra.mxu1 %v334_v44  ;;  %v337_v8 = vld [vmem:[%s4672_s14 + $0x350] sm:$0xff] }
 0x285   : > { %v3070_v30 = vmax.f32 %v2814_v37, 0.0  ;;  %v619_v35 = vpop.f32.mrf.mxu0  ;;  %4090 = vst [vmem:[%s5722_s24 + $0x408] sm:$0xff] %v3834_v45  ;;  %1293 = vmatmul.f32.gmra.mxu3 %v334_v44 }
 0x286   : > { %v3073_v54 = vmax.f32 %v2817_v34, 0.0  ;;  %v620_v38 = vadd.f32 %v619_v35, %v4787_v53  ;;  %v1243_v58 = vpop.f32.mrf.mxu3  ;;  %4093 = vst [vmem:[%s5722_s24 + $0x420] sm:$0xff] %v3837_v51  ;;  %v338_v51 = vld [vmem:[%s4672_s14 + $0x358] sm:$0xff] }
 0x287   : > { %v3326_v50 = vmin.f32 %v3070_v30, 6.0  ;;  %v1244_v46 = vadd.f32 %v1243_v58, %v1035_v22  ;;  %v7086_v30 = vld [vmem:[#allocation40_spill] sm:$0xff] }
 0x288   : > { %v3329_v60 = vmin.f32 %v3073_v54, 6.0  ;;  %v829_v62 = vadd.f32 %v828_v32, %v620_v38  ;;  %v7087_v54 = vld [vmem:[#allocation41_spill] sm:$0xff] }
 0x289   : > { %v3582_v42 = vmul.f32 %v3326_v50, %v2558_v25  ;;  %v2562_v59 = vadd.f32 %v7082_v48, %v1244_v46  ;;  %v831_v57 = vpop.f32.mrf.mxu1 }
 0x28a   : > { %v3585_v41 = vmul.f32 %v3329_v60, %v2561_v17  ;;  %v2565_v2 = vadd.f32 %v7083_v47, %v829_v62  ;;  %v1037_v26 = vpop.f32.mrf.mxu2  ;;  %v366_v62 = vld [vmem:[%s6821_s1 + $0x38] sm:$0xff] }
 0x28b   : > { %v3838_v4 = vmul.f32 0.16666667, %v3582_v42  ;;  %v2818_v56 = vadd.f32 3.0, %v2562_v59  ;;  %v1038_v1 = vadd.f32 %v1037_v26, %v4827_v24  ;;  %669 = vmatmul.f32.gmra.mxu0 %v335_v11  ;;  %v430_v42 = vld [vmem:[%s6821_s1 + $0x238] sm:$0xff]  ;;  %1765 = vmatpush.msrb.mxu2 %v366_v62  ;;  %v344_v62 = vld [vmem:[%s4672_s14 + $0x388] sm:$0xff] }
 0x28c   : > { %v3841_v0 = vmul.f32 0.16666667, %v3585_v41  ;;  %v2821_v18 = vadd.f32 3.0, %v2565_v2  ;;  %1087 = vmatmul.f32.gmra.mxu2 %v335_v11  ;;  %878 = vmatmul.f32.gmra.mxu1 %v336_v63  ;;  %v339_v41 = vld [vmem:[%s4672_s14 + $0x360] sm:$0xff] }
 0x28d   : > { %v3074_v3 = vmax.f32 %v2818_v56, 0.0  ;;  %v622_v28 = vpop.f32.mrf.mxu0  ;;  %4094 = vst [vmem:[%s5722_s24 + $0x428] sm:$0xff] %v3838_v4  ;;  %1296 = vmatmul.f32.gmra.mxu3 %v336_v63  ;;  %v7088_v11 = vld [vmem:[#allocation42_spill] sm:$0xff] }
 0x28e   : > { %v3077_v14 = vmax.f32 %v2821_v18, 0.0  ;;  %v623_v5 = vadd.f32 %v622_v28, %v4787_v53  ;;  %v1246_v39 = vpop.f32.mrf.mxu3  ;;  %4097 = vst [vmem:[%s5722_s24 + $0x440] sm:$0xff] %v3841_v0  ;;  %1974 = vmatpush.msrb.mxu3 %v430_v42  ;;  %v340_v18 = vld [vmem:[%s4672_s14 + $0x368] sm:$0xff] }
 0x28f   : > { %v3330_v7 = vmin.f32 %v3074_v3, 6.0  ;;  %v1247_v61 = vadd.f32 %v1246_v39, %v1038_v1  ;;  %v7089_v39 = vld [vmem:[#allocation43_spill] sm:$0xff] }
 0x290   : > { %v3333_v52 = vmin.f32 %v3077_v14, 6.0  ;;  %v832_v10 = vadd.f32 %v831_v57, %v623_v5 }
 0x291   : > { %v3586_v43 = vmul.f32 %v3330_v7, %v2562_v59  ;;  %v2566_v40 = vadd.f32 %v7084_v19, %v1247_v61  ;;  %v834_v49 = vpop.f32.mrf.mxu1 }
 0x292   : > { %v3589_v55 = vmul.f32 %v3333_v52, %v2565_v2  ;;  %v2569_v15 = vadd.f32 %v7085_v12, %v832_v10  ;;  %v1040_v29 = vpop.f32.mrf.mxu2  ;;  %v365_v52 = vld [vmem:[%s6821_s1 + $0x30] sm:$0xff] }
 0x293   : > { %v3842_v27 = vmul.f32 0.16666667, %v3586_v43  ;;  %v2822_v6 = vadd.f32 3.0, %v2566_v40  ;;  %v1041_v23 = vadd.f32 %v1040_v29, %v4827_v24  ;;  %672 = vmatmul.f32.gmra.mxu0 %v337_v8 }
 0x294   : > { %v3845_v21 = vmul.f32 0.16666667, %v3589_v55  ;;  %v2825_v20 = vadd.f32 3.0, %v2569_v15  ;;  %1090 = vmatmul.f32.gmra.mxu2 %v337_v8  ;;  %881 = vmatmul.f32.gmra.mxu1 %v338_v51 }
 0x295   : > { %v3078_v36 = vmax.f32 %v2822_v6, 0.0  ;;  %v625_v25 = vpop.f32.mrf.mxu0  ;;  %4098 = vst [vmem:[%s5722_s24 + $0x448] sm:$0xff] %v3842_v27  ;;  %1299 = vmatmul.f32.gmra.mxu3 %v338_v51  ;;  %1347 = vmatpush.msrb.mxu0 %v365_v52 }
 0x296   : > { %v3081_v16 = vmax.f32 %v2825_v20, 0.0  ;;  %v626_v17 = vadd.f32 %v625_v25, %v4787_v53  ;;  %v1249_v45 = vpop.f32.mrf.mxu3  ;;  %4101 = vst [vmem:[%s5722_s24 + $0x460] sm:$0xff] %v3845_v21 }
 0x297   : > { %v3334_v37 = vmin.f32 %v3078_v36, 6.0  ;;  %v1250_v33 = vadd.f32 %v1249_v45, %v1041_v23  ;;  %v342_v36 = vld [vmem:[%s4672_s14 + $0x378] sm:$0xff] }
 0x298   : > { %v3337_v34 = vmin.f32 %v3081_v16, 6.0  ;;  %v835_v22 = vadd.f32 %v834_v49, %v626_v17  ;;  %v7090_v17 = vld [vmem:[#allocation44_spill] sm:$0xff] }
 0x299   : > { %v3590_v9 = vmul.f32 %v3334_v37, %v2566_v40  ;;  %v2570_v35 = vadd.f32 %v7086_v30, %v1250_v33  ;;  %v837_v0 = vpop.f32.mrf.mxu1  ;;  %v429_v40 = vld [vmem:[%s6821_s1 + $0x230] sm:$0xff]  ;;  %v7091_v33 = vld [vmem:[#allocation45_spill] sm:$0xff] }
 0x29a   : > { %v3593_v31 = vmul.f32 %v3337_v34, %v2569_v15  ;;  %v2573_v38 = vadd.f32 %v7087_v54, %v835_v22  ;;  %v1043_v46 = vpop.f32.mrf.mxu2  ;;  %v341_v15 = vld [vmem:[%s4672_s14 + $0x370] sm:$0xff]  ;;  %1556 = vmatpush.msrb.mxu1 %v429_v40 }
 0x29b   : > { %v3846_v58 = vmul.f32 0.16666667, %v3590_v9  ;;  %v2826_v50 = vadd.f32 3.0, %v2570_v35  ;;  %v1044_v60 = vadd.f32 %v1043_v46, %v4827_v24  ;;  %675 = vmatmul.f32.gmra.mxu0 %v339_v41 }
 0x29c   : > { %v3849_v32 = vmul.f32 0.16666667, %v3593_v31  ;;  %v2829_v44 = vadd.f32 3.0, %v2573_v38  ;;  %1093 = vmatmul.f32.gmra.mxu2 %v339_v41  ;;  %884 = vmatmul.f32.gmra.mxu1 %v340_v18  ;;  %v7092_v41 = vld [vmem:[#allocation46_spill] sm:$0xff] }
 0x29d   : > { %v3082_v48 = vmax.f32 %v2826_v50, 0.0  ;;  %v628_v59 = vpop.f32.mrf.mxu0  ;;  %4102 = vst [vmem:[%s5722_s24 + $0x468] sm:$0xff] %v3846_v58  ;;  %1302 = vmatmul.f32.gmra.mxu3 %v340_v18 }
 0x29e   : > { %v3085_v47 = vmax.f32 %v2829_v44, 0.0  ;;  %v629_v2 = vadd.f32 %v628_v59, %v4787_v53  ;;  %v1252_v4 = vpop.f32.mrf.mxu3  ;;  %4105 = vst [vmem:[%s5722_s24 + $0x480] sm:$0xff] %v3849_v32 }
 0x29f   : > { %v3338_v56 = vmin.f32 %v3082_v48, 6.0  ;;  %v1253_v26 = vadd.f32 %v1252_v4, %v1044_v60  ;;  %v7093_v4 = vld [vmem:[#allocation47_spill] sm:$0xff] }
 0x2a0   : > { %v3341_v1 = vmin.f32 %v3085_v47, 6.0  ;;  %v838_v3 = vadd.f32 %v837_v0, %v629_v2 }
 0x2a1   : > { %v3594_v28 = vmul.f32 %v3338_v56, %v2570_v35  ;;  %v2574_v14 = vadd.f32 %v7088_v11, %v1253_v26  ;;  %v840_v23 = vpop.f32.mrf.mxu1 }
 0x2a2   : > { %v3597_v5 = vmul.f32 %v3341_v1, %v2573_v38  ;;  %v2577_v7 = vadd.f32 %v7089_v39, %v838_v3  ;;  %v1046_v63 = vpop.f32.mrf.mxu2  ;;  %v343_v38 = vld [vmem:[%s4672_s14 + $0x380] sm:$0xff] }
 0x2a3   : > { %v3850_v61 = vmul.f32 0.16666667, %v3594_v28  ;;  %v2830_v57 = vadd.f32 3.0, %v2574_v14  ;;  %v1047_v19 = vadd.f32 %v1046_v63, %v4827_v24  ;;  %678 = vmatmul.f32.gmra.mxu0 %v341_v15 }
 0x2a4   : > { %v3853_v10 = vmul.f32 0.16666667, %v3597_v5  ;;  %v2833_v43 = vadd.f32 3.0, %v2577_v7  ;;  %1096 = vmatmul.f32.gmra.mxu2 %v341_v15  ;;  %887 = vmatmul.f32.gmra.mxu1 %v342_v36  ;;  %v345_v5 = vld [vmem:[%s4672_s14 + $0x390] sm:$0xff] }
 0x2a5   : > { %v3086_v55 = vmax.f32 %v2830_v57, 0.0  ;;  %v631_v12 = vpop.f32.mrf.mxu0  ;;  %4106 = vst [vmem:[%s5722_s24 + $0x488] sm:$0xff] %v3850_v61  ;;  %1305 = vmatmul.f32.gmra.mxu3 %v342_v36 }
 0x2a6   : > { %v3089_v27 = vmax.f32 %v2833_v43, 0.0  ;;  %v632_v6 = vadd.f32 %v631_v12, %v4787_v53  ;;  %v1255_v29 = vpop.f32.mrf.mxu3  ;;  %4109 = vst [vmem:[%s5722_s24 + $0x4a0] sm:$0xff] %v3853_v10  ;;  %v346_v10 = vld [vmem:[%s4672_s14 + $0x398] sm:$0xff] }
 0x2a7   : > { %v3342_v21 = vmin.f32 %v3086_v55, 6.0  ;;  %v1256_v20 = vadd.f32 %v1255_v29, %v1047_v19  ;;  %v7094_v55 = vld [vmem:[#allocation48_spill] sm:$0xff] }
 0x2a8   : > { %v3345_v25 = vmin.f32 %v3089_v27, 6.0  ;;  %v841_v8 = vadd.f32 %v840_v23, %v632_v6  ;;  %v7095_v27 = vld [vmem:[#allocation49_spill] sm:$0xff] }
 0x2a9   : > { %v3598_v16 = vmul.f32 %v3342_v21, %v2574_v14  ;;  %v2578_v45 = vadd.f32 %v7090_v17, %v1256_v20  ;;  %v843_v60 = vpop.f32.mrf.mxu1 }
 0x2aa   : > { %v3601_v37 = vmul.f32 %v3345_v25, %v2577_v7  ;;  %v2581_v49 = vadd.f32 %v7091_v33, %v841_v8  ;;  %v1049_v22 = vpop.f32.mrf.mxu2  ;;  %v362_v8 = vld [vmem:[%s6821_s1 + $0x18] sm:$0xff] }
 0x2ab   : > { %v3854_v51 = vmul.f32 0.16666667, %v3598_v16  ;;  %v2834_v34 = vadd.f32 3.0, %v2578_v45  ;;  %v1050_v35 = vadd.f32 %v1049_v22, %v4827_v24  ;;  %681 = vmatmul.f32.gmra.mxu0 %v343_v38  ;;  %v426_v16 = vld [vmem:[%s6821_s1 + $0x218] sm:$0xff]  ;;  %1766 = vmatpush.msrb.mxu2 %v362_v8  ;;  %v352_v8 = vld [vmem:[%s4672_s14 + $0x3c8] sm:$0xff] }
 0x2ac   : > { %v3857_v9 = vmul.f32 0.16666667, %v3601_v37  ;;  %v2837_v30 = vadd.f32 3.0, %v2581_v49  ;;  %1099 = vmatmul.f32.gmra.mxu2 %v343_v38  ;;  %890 = vmatmul.f32.gmra.mxu1 %v344_v62  ;;  %v347_v37 = vld [vmem:[%s4672_s14 + $0x3a0] sm:$0xff] }
 0x2ad   : > { %v3090_v31 = vmax.f32 %v2834_v34, 0.0  ;;  %v634_v54 = vpop.f32.mrf.mxu0  ;;  %4110 = vst [vmem:[%s5722_s24 + $0x4a8] sm:$0xff] %v3854_v51  ;;  %1308 = vmatmul.f32.gmra.mxu3 %v344_v62  ;;  %v7096_v38 = vld [vmem:[#allocation50_spill] sm:$0xff] }
 0x2ae   : > { %v3093_v58 = vmax.f32 %v2837_v30, 0.0  ;;  %v635_v50 = vadd.f32 %v634_v54, %v4787_v53  ;;  %v1258_v46 = vpop.f32.mrf.mxu3  ;;  %4113 = vst [vmem:[%s5722_s24 + $0x4c0] sm:$0xff] %v3857_v9  ;;  %1975 = vmatpush.msrb.mxu3 %v426_v16  ;;  %v348_v30 = vld [vmem:[%s4672_s14 + $0x3a8] sm:$0xff] }
 0x2af   : > { %v3346_v32 = vmin.f32 %v3090_v31, 6.0  ;;  %v1259_v44 = vadd.f32 %v1258_v46, %v1050_v35  ;;  %v7097_v46 = vld [vmem:[#allocation51_spill] sm:$0xff] }
 0x2b0   : > { %v3349_v42 = vmin.f32 %v3093_v58, 6.0  ;;  %v844_v48 = vadd.f32 %v843_v60, %v635_v50 }
 0x2b1   : > { %v3602_v59 = vmul.f32 %v3346_v32, %v2578_v45  ;;  %v2582_v47 = vadd.f32 %v7092_v41, %v1259_v44  ;;  %v846_v52 = vpop.f32.mrf.mxu1 }
 0x2b2   : > { %v3605_v2 = vmul.f32 %v3349_v42, %v2581_v49  ;;  %v2585_v56 = vadd.f32 %v7093_v4, %v844_v48  ;;  %v1052_v18 = vpop.f32.mrf.mxu2  ;;  %v361_v42 = vld [vmem:[%s6821_s1 + $0x10] sm:$0xff] }
 0x2b3   : > { %v3858_v26 = vmul.f32 0.16666667, %v3602_v59  ;;  %v2838_v0 = vadd.f32 3.0, %v2582_v47  ;;  %v1053_v28 = vadd.f32 %v1052_v18, %v4827_v24  ;;  %684 = vmatmul.f32.gmra.mxu0 %v345_v5 }
 0x2b4   : > { %v3861_v1 = vmul.f32 0.16666667, %v3605_v2  ;;  %v2841_v3 = vadd.f32 3.0, %v2585_v56  ;;  %1102 = vmatmul.f32.gmra.mxu2 %v345_v5  ;;  %893 = vmatmul.f32.gmra.mxu1 %v346_v10 }
 0x2b5   : > { %v3094_v11 = vmax.f32 %v2838_v0, 0.0  ;;  %v637_v14 = vpop.f32.mrf.mxu0  ;;  %4114 = vst [vmem:[%s5722_s24 + $0x4c8] sm:$0xff] %v3858_v26  ;;  %1311 = vmatmul.f32.gmra.mxu3 %v346_v10  ;;  %1348 = vmatpush.msrb.mxu0 %v361_v42 }
 0x2b6   : > { %v3097_v39 = vmax.f32 %v2841_v3, 0.0  ;;  %v638_v7 = vadd.f32 %v637_v14, %v4787_v53  ;;  %v1261_v61 = vpop.f32.mrf.mxu3  ;;  %4117 = vst [vmem:[%s5722_s24 + $0x4e0] sm:$0xff] %v3861_v1 }
 0x2b7   : > { %v3350_v57 = vmin.f32 %v3094_v11, 6.0  ;;  %v1262_v63 = vadd.f32 %v1261_v61, %v1053_v28  ;;  %v350_v11 = vld [vmem:[%s4672_s14 + $0x3b8] sm:$0xff] }
 0x2b8   : > { %v3353_v43 = vmin.f32 %v3097_v39, 6.0  ;;  %v847_v19 = vadd.f32 %v846_v52, %v638_v7  ;;  %v7098_v7 = vld [vmem:[#allocation52_spill] sm:$0xff] }
 0x2b9   : > { %v3606_v40 = vmul.f32 %v3350_v57, %v2582_v47  ;;  %v2586_v12 = vadd.f32 %v7094_v55, %v1262_v63  ;;  %v849_v9 = vpop.f32.mrf.mxu1  ;;  %v425_v47 = vld [vmem:[%s6821_s1 + $0x210] sm:$0xff]  ;;  %v7099_v63 = vld [vmem:[#allocation53_spill] sm:$0xff] }
 0x2ba   : > { %v3609_v15 = vmul.f32 %v3353_v43, %v2585_v56  ;;  %v2589_v6 = vadd.f32 %v7095_v27, %v847_v19  ;;  %v1055_v20 = vpop.f32.mrf.mxu2  ;;  %v349_v56 = vld [vmem:[%s4672_s14 + $0x3b0] sm:$0xff]  ;;  %1557 = vmatpush.msrb.mxu1 %v425_v47 }
 0x2bb   : > { %v3862_v29 = vmul.f32 0.16666667, %v3606_v40  ;;  %v2842_v21 = vadd.f32 3.0, %v2586_v12  ;;  %v1056_v25 = vadd.f32 %v1055_v20, %v4827_v24  ;;  %687 = vmatmul.f32.gmra.mxu0 %v347_v37 }
 0x2bc   : > { %v3865_v23 = vmul.f32 0.16666667, %v3609_v15  ;;  %v2845_v36 = vadd.f32 3.0, %v2589_v6  ;;  %1105 = vmatmul.f32.gmra.mxu2 %v347_v37  ;;  %896 = vmatmul.f32.gmra.mxu1 %v348_v30  ;;  %v7100_v37 = vld [vmem:[#allocation54_spill] sm:$0xff] }
 0x2bd   : > { %v3098_v17 = vmax.f32 %v2842_v21, 0.0  ;;  %v640_v45 = vpop.f32.mrf.mxu0  ;;  %4118 = vst [vmem:[%s5722_s24 + $0x4e8] sm:$0xff] %v3862_v29  ;;  %1314 = vmatmul.f32.gmra.mxu3 %v348_v30 }
 0x2be   : > { %v3101_v33 = vmax.f32 %v2845_v36, 0.0  ;;  %v641_v49 = vadd.f32 %v640_v45, %v4787_v53  ;;  %v1264_v51 = vpop.f32.mrf.mxu3  ;;  %4121 = vst [vmem:[%s5722_s24 + $0x500] sm:$0xff] %v3865_v23 }
 0x2bf   : > { %v3354_v34 = vmin.f32 %v3098_v17, 6.0  ;;  %v1265_v22 = vadd.f32 %v1264_v51, %v1056_v25  ;;  %v7101_v51 = vld [vmem:[#allocation55_spill] sm:$0xff] }
 0x2c0   : > { %v3357_v35 = vmin.f32 %v3101_v33, 6.0  ;;  %v850_v31 = vadd.f32 %v849_v9, %v641_v49 }
 0x2c1   : > { %v3610_v54 = vmul.f32 %v3354_v34, %v2586_v12  ;;  %v2590_v58 = vadd.f32 %v7096_v38, %v1265_v22  ;;  %v852_v28 = vpop.f32.mrf.mxu1 }
 0x2c2   : > { %v3613_v50 = vmul.f32 %v3357_v35, %v2589_v6  ;;  %v2593_v32 = vadd.f32 %v7097_v46, %v850_v31  ;;  %v1058_v62 = vpop.f32.mrf.mxu2  ;;  %v351_v6 = vld [vmem:[%s4672_s14 + $0x3c0] sm:$0xff] }
 0x2c3   : > { %v3866_v44 = vmul.f32 0.16666667, %v3610_v54  ;;  %v2846_v60 = vadd.f32 3.0, %v2590_v58  ;;  %v1059_v41 = vadd.f32 %v1058_v62, %v4827_v24  ;;  %690 = vmatmul.f32.gmra.mxu0 %v349_v56 }
 0x2c4   : > { %v3869_v48 = vmul.f32 0.16666667, %v3613_v50  ;;  %v2849_v59 = vadd.f32 3.0, %v2593_v32  ;;  %1108 = vmatmul.f32.gmra.mxu2 %v349_v56  ;;  %899 = vmatmul.f32.gmra.mxu1 %v350_v11  ;;  %v353_v50 = vld [vmem:[%s4672_s14 + $0x3d0] sm:$0xff] }
 0x2c5   : > { %v3102_v2 = vmax.f32 %v2846_v60, 0.0  ;;  %v643_v4 = vpop.f32.mrf.mxu0  ;;  %4122 = vst [vmem:[%s5722_s24 + $0x508] sm:$0xff] %v3866_v44  ;;  %1317 = vmatmul.f32.gmra.mxu3 %v350_v11 }
 0x2c6   : > { %v3105_v26 = vmax.f32 %v2849_v59, 0.0  ;;  %v644_v0 = vadd.f32 %v643_v4, %v4787_v53  ;;  %v1267_v18 = vpop.f32.mrf.mxu3  ;;  %4125 = vst [vmem:[%s5722_s24 + $0x520] sm:$0xff] %v3869_v48  ;;  %v354_v48 = vld [vmem:[%s4672_s14 + $0x3d8] sm:$0xff] }
 0x2c7   : > { %v3358_v1 = vmin.f32 %v3102_v2, 6.0  ;;  %v1268_v3 = vadd.f32 %v1267_v18, %v1059_v41  ;;  %v7102_v2 = vld [vmem:[#allocation56_spill] sm:$0xff] }
 0x2c8   : > { %v3361_v14 = vmin.f32 %v3105_v26, 6.0  ;;  %v853_v5 = vadd.f32 %v852_v28, %v644_v0  ;;  %v7103_v26 = vld [vmem:[#allocation57_spill] sm:$0xff] }
 0x2c9   : > { %v3614_v39 = vmul.f32 %v3358_v1, %v2590_v58  ;;  %v2594_v61 = vadd.f32 %v7098_v7, %v1268_v3  ;;  %v855_v25 = vpop.f32.mrf.mxu1  ;;  %v355_v7 = vld [vmem:[%s4672_s14 + $0x3e0] sm:$0xff] }
 0x2ca   : > { %v3617_v57 = vmul.f32 %v3361_v14, %v2593_v32  ;;  %v2597_v52 = vadd.f32 %v7099_v63, %v853_v5  ;;  %v1061_v19 = vpop.f32.mrf.mxu2 }
 0x2cb   : > { %v3870_v10 = vmul.f32 0.16666667, %v3614_v39  ;;  %v2850_v43 = vadd.f32 3.0, %v2594_v61  ;;  %v1062_v12 = vadd.f32 %v1061_v19, %v4827_v24  ;;  %693 = vmatmul.f32.gmra.mxu0 %v351_v6  ;;  %v356_v19 = vld [vmem:[%s4672_s14 + $0x3e8] sm:$0xff] }
 0x2cc   : > { %v3873_v40 = vmul.f32 0.16666667, %v3617_v57  ;;  %v2853_v55 = vadd.f32 3.0, %v2597_v52  ;;  %1111 = vmatmul.f32.gmra.mxu2 %v351_v6  ;;  %902 = vmatmul.f32.gmra.mxu1 %v352_v8 }
 0x2cd   : > { %v3106_v15 = vmax.f32 %v2850_v43, 0.0  ;;  %v646_v27 = vpop.f32.mrf.mxu0  ;;  %4126 = vst [vmem:[%s5722_s24 + $0x528] sm:$0xff] %v3870_v10  ;;  %1320 = vmatmul.f32.gmra.mxu3 %v352_v8 }
 0x2ce   : > { %v3109_v29 = vmax.f32 %v2853_v55, 0.0  ;;  %v647_v21 = vadd.f32 %v646_v27, %v4787_v53  ;;  %v1270_v20 = vpop.f32.mrf.mxu3  ;;  %4129 = vst [vmem:[%s5722_s24 + $0x540] sm:$0xff] %v3873_v40 }
 0x2cf   : > { %v3362_v23 = vmin.f32 %v3106_v15, 6.0  ;;  %v1271_v36 = vadd.f32 %v1270_v20, %v1062_v12  ;;  %v7104_v15 = vld [vmem:[#allocation58_spill] sm:$0xff] }
 0x2d0   : > { %v3365_v16 = vmin.f32 %v3109_v29, 6.0  ;;  %v856_v17 = vadd.f32 %v855_v25, %v647_v21  ;;  %v7105_v29 = vld [vmem:[#allocation59_spill] sm:$0xff] }
 0x2d1   : > { %v3618_v45 = vmul.f32 %v3362_v23, %v2594_v61  ;;  %v2598_v33 = vadd.f32 %v7100_v37, %v1271_v36  ;;  %v858_v42 = vpop.f32.mrf.mxu1  ;;  %v357_v37 = vld [vmem:[%s4672_s14 + $0x3f0] sm:$0xff] }
 0x2d2   : > { %v3621_v49 = vmul.f32 %v3365_v16, %v2597_v52  ;;  %v2601_v34 = vadd.f32 %v7101_v51, %v856_v17  ;;  %v1064_v30 = vpop.f32.mrf.mxu2 }
 0x2d3   : > { %v3874_v22 = vmul.f32 0.16666667, %v3618_v45  ;;  %v2854_v9 = vadd.f32 3.0, %v2598_v33  ;;  %v1065_v54 = vadd.f32 %v1064_v30, %v4827_v24  ;;  %696 = vmatmul.f32.gmra.mxu0 %v353_v50  ;;  %v358_v30 = vld [vmem:[%s4672_s14 + $0x3f8] sm:$0xff] }
 0x2d4   : > { %v3877_v35 = vmul.f32 0.16666667, %v3621_v49  ;;  %v2857_v31 = vadd.f32 3.0, %v2601_v34  ;;  %1114 = vmatmul.f32.gmra.mxu2 %v353_v50  ;;  %905 = vmatmul.f32.gmra.mxu1 %v354_v48 }
 0x2d5   : > { %v3110_v38 = vmax.f32 %v2854_v9, 0.0  ;;  %v649_v58 = vpop.f32.mrf.mxu0  ;;  %4130 = vst [vmem:[%s5722_s24 + $0x548] sm:$0xff] %v3874_v22  ;;  %1323 = vmatmul.f32.gmra.mxu3 %v354_v48 }
 0x2d6   : > { %v3113_v46 = vmax.f32 %v2857_v31, 0.0  ;;  %v650_v32 = vadd.f32 %v649_v58, %v4787_v53  ;;  %v1273_v44 = vpop.f32.mrf.mxu3  ;;  %4133 = vst [vmem:[%s5722_s24 + $0x560] sm:$0xff] %v3877_v35 }
 0x2d7   : > { %v3366_v60 = vmin.f32 %v3110_v38, 6.0  ;;  %v1274_v62 = vadd.f32 %v1273_v44, %v1065_v54  ;;  %v7106_v38 = vld [vmem:[#allocation60_spill] sm:$0xff] }
 0x2d8   : > { %v3369_v59 = vmin.f32 %v3113_v46, 6.0  ;;  %v859_v41 = vadd.f32 %v858_v42, %v650_v32  ;;  %v7107_v46 = vld [vmem:[#allocation61_spill] sm:$0xff] }
 0x2d9   : > { %v3622_v47 = vmul.f32 %v3366_v60, %v2598_v33  ;;  %v2602_v4 = vadd.f32 %v7102_v2, %v1274_v62  ;;  %v861_v43 = vpop.f32.mrf.mxu1 }
 0x2da   : > { %v3625_v56 = vmul.f32 %v3369_v59, %v2601_v34  ;;  %v2605_v0 = vadd.f32 %v7103_v26, %v859_v41  ;;  %v1067_v3 = vpop.f32.mrf.mxu2 }
 0x2db   : > { %v3878_v18 = vmul.f32 0.16666667, %v3622_v47  ;;  %v2858_v1 = vadd.f32 3.0, %v2602_v4  ;;  %v1068_v14 = vadd.f32 %v1067_v3, %v4827_v24  ;;  %699 = vmatmul.f32.gmra.mxu0 %v355_v7 }
 0x2dc   : > { %v3881_v28 = vmul.f32 0.16666667, %v3625_v56  ;;  %v2861_v11 = vadd.f32 3.0, %v2605_v0  ;;  %1117 = vmatmul.f32.gmra.mxu2 %v355_v7  ;;  %908 = vmatmul.f32.gmra.mxu1 %v356_v19  ;;  %v7109_v7 = vld [vmem:[#allocation63_spill] sm:$0xff] }
 0x2dd   : > { %v3114_v5 = vmax.f32 %v2858_v1, 0.0  ;;  %v652_v39 = vpop.f32.mrf.mxu0  ;;  %4134 = vst [vmem:[%s5722_s24 + $0x568] sm:$0xff] %v3878_v18  ;;  %1326 = vmatmul.f32.gmra.mxu3 %v356_v19 }
 0x2de   : > { %v3117_v61 = vmax.f32 %v2861_v11, 0.0  ;;  %v653_v57 = vadd.f32 %v652_v39, %v4787_v53  ;;  %v1276_v63 = vpop.f32.mrf.mxu3  ;;  %4137 = vst [vmem:[%s5722_s24 + $0x580] sm:$0xff] %v3881_v28  ;;  %v4314_v28 = vld [vmem:[%s4672_s14] sm:$0xff] }
 0x2df   : > { %v3370_v52 = vmin.f32 %v3114_v5, 6.0  ;;  %v1277_v10 = vadd.f32 %v1276_v63, %v1068_v14  ;;  %v7108_v14 = vld [vmem:[#allocation62_spill] sm:$0xff] }
 0x2e0   : > { %v3373_v40 = vmin.f32 %v3117_v61, 6.0  ;;  %v862_v55 = vadd.f32 %v861_v43, %v653_v57  ;;  %v4315_v57 = vld [vmem:[%s4672_s14 + $0x8] sm:$0xff] }
 0x2e1   : > { %v3626_v12 = vmul.f32 %v3370_v52, %v2602_v4  ;;  %v2606_v27 = vadd.f32 %v7104_v15, %v1277_v10  ;;  %v864_v9 = vpop.f32.mrf.mxu1 }
 0x2e2   : > { %v3629_v6 = vmul.f32 %v3373_v40, %v2605_v0  ;;  %v2609_v21 = vadd.f32 %v7105_v29, %v862_v55  ;;  %v1070_v36 = vpop.f32.mrf.mxu2 }
 0x2e3   : > { %v3882_v20 = vmul.f32 0.16666667, %v3626_v12  ;;  %v2862_v23 = vadd.f32 3.0, %v2606_v27  ;;  %v1071_v16 = vadd.f32 %v1070_v36, %v4827_v24  ;;  %702 = vmatmul.f32.gmra.mxu0 %v357_v37 }
 0x2e4   : > { %v3885_v25 = vmul.f32 0.16666667, %v3629_v6  ;;  %v2865_v8 = vadd.f32 3.0, %v2609_v21  ;;  %1120 = vmatmul.f32.gmra.mxu2 %v357_v37  ;;  %911 = vmatmul.f32.gmra.mxu1 %v358_v30  ;;  %v7111_v37 = vld [vmem:[#allocation65_spill] sm:$0xff] }
 0x2e5   : > { %v3118_v17 = vmax.f32 %v2862_v23, 0.0  ;;  %v655_v45 = vpop.f32.mrf.mxu0  ;;  %4138 = vst [vmem:[%s5722_s24 + $0x588] sm:$0xff] %v3882_v20  ;;  %1329 = vmatmul.f32.gmra.mxu3 %v358_v30 }
 0x2e6   : > { %v3121_v33 = vmax.f32 %v2865_v8, 0.0  ;;  %v656_v49 = vadd.f32 %v655_v45, %v4787_v53  ;;  %v1279_v51 = vpop.f32.mrf.mxu3  ;;  %4141 = vst [vmem:[%s5722_s24 + $0x5a0] sm:$0xff] %v3885_v25  ;;  %v4316_v25 = vld [vmem:[%s4672_s14 + $0x10] sm:$0xff] }
 0x2e7   : > { %v3374_v34 = vmin.f32 %v3118_v17, 6.0  ;;  %v1280_v22 = vadd.f32 %v1279_v51, %v1071_v16  ;;  %v7110_v16 = vld [vmem:[#allocation64_spill] sm:$0xff] }
 0x2e8   : > { %v3377_v35 = vmin.f32 %v3121_v33, 6.0  ;;  %v865_v31 = vadd.f32 %v864_v9, %v656_v49  ;;  %v4317_v49 = vld [vmem:[%s4672_s14 + $0x18] sm:$0xff] }
 0x2e9   : > { %v3630_v54 = vmul.f32 %v3374_v34, %v2606_v27  ;;  %v2610_v58 = vadd.f32 %v7106_v38, %v1280_v22  ;;  %v867_v18 = vpop.f32.mrf.mxu1 }
 0x2ea   : > { %v3633_v50 = vmul.f32 %v3377_v35, %v2609_v21  ;;  %v2613_v32 = vadd.f32 %v7107_v46, %v865_v31  ;;  %v1073_v62 = vpop.f32.mrf.mxu2 }
 0x2eb   : > { %v3886_v44 = vmul.f32 0.16666667, %v3630_v54  ;;  %v2866_v60 = vadd.f32 3.0, %v2610_v58  ;;  %v1074_v59 = vadd.f32 %v1073_v62, %v4827_v24  ;;  %1349 = vmatmul.f32.vlgmr.msrb.gmra.mxu0 %v4314_v28 }
 0x2ec   : > { %v3889_v42 = vmul.f32 0.16666667, %v3633_v50  ;;  %v2869_v48 = vadd.f32 3.0, %v2613_v32  ;;  %1767 = vmatmul.f32.vlgmr.msrb.gmra.mxu2 %v4314_v28  ;;  %1558 = vmatmul.f32.vlgmr.msrb.gmra.mxu1 %v4315_v57 }
 0x2ed   : > { %v3122_v41 = vmax.f32 %v2866_v60, 0.0  ;;  %v658_v47 = vpop.f32.mrf.mxu0  ;;  %4142 = vst [vmem:[%s5722_s24 + $0x5a8] sm:$0xff] %v3886_v44  ;;  %1976 = vmatmul.f32.vlgmr.msrb.gmra.mxu3 %v4315_v57 }
 0x2ee   : > { %v3125_v2 = vmax.f32 %v2869_v48, 0.0  ;;  %v659_v4 = vadd.f32 %v658_v47, %v4787_v53  ;;  %v1282_v56 = vpop.f32.mrf.mxu3  ;;  %4145 = vst [vmem:[%s5722_s24 + $0x5c0] sm:$0xff] %v3889_v42  ;;  %v4318_v42 = vld [vmem:[%s4672_s14 + $0x20] sm:$0xff] }
 0x2ef   : > { %v3378_v26 = vmin.f32 %v3122_v41, 6.0  ;;  %v1283_v0 = vadd.f32 %v1282_v56, %v1074_v59  ;;  %v7112_v59 = vld [vmem:[#allocation66_spill] sm:$0xff]  ;;  %v4319_v56 = vld [vmem:[%s4672_s14 + $0x28] sm:$0xff] }
 0x2f0   : > { %v3381_v1 = vmin.f32 %v3125_v2, 6.0  ;;  %v868_v3 = vadd.f32 %v867_v18, %v659_v4  ;;  %v7113_v2 = vld [vmem:[#allocation67_spill] sm:$0xff] }
 0x2f1   : > { %v3634_v11 = vmul.f32 %v3378_v26, %v2610_v58  ;;  %v2614_v5 = vadd.f32 %v7108_v14, %v1283_v0  ;;  %v870_v20 = vpop.f32.mrf.mxu1 }
 0x2f2   : > { %v3637_v39 = vmul.f32 %v3381_v1, %v2613_v32  ;;  %v2617_v61 = vadd.f32 %v7109_v7, %v868_v3  ;;  %v1076_v10 = vpop.f32.mrf.mxu2 }
 0x2f3   : > { %v3890_v63 = vmul.f32 0.16666667, %v3634_v11  ;;  %v2870_v52 = vadd.f32 3.0, %v2614_v5  ;;  %v1077_v40 = vadd.f32 %v1076_v10, %v4827_v24  ;;  %1352 = vmatmul.f32.gmra.mxu0 %v4316_v25 }
 0x2f4   : > { %v3893_v43 = vmul.f32 0.16666667, %v3637_v39  ;;  %v2873_v19 = vadd.f32 3.0, %v2617_v61  ;;  %1770 = vmatmul.f32.gmra.mxu2 %v4316_v25  ;;  %1561 = vmatmul.f32.gmra.mxu1 %v4317_v49 }
 0x2f5   : > { %v3126_v55 = vmax.f32 %v2870_v52, 0.0  ;;  %v661_v12 = vpop.f32.mrf.mxu0  ;;  %4146 = vst [vmem:[%s5722_s24 + $0x5c8] sm:$0xff] %v3890_v63  ;;  %1979 = vmatmul.f32.gmra.mxu3 %v4317_v49 }
 0x2f6   : > { %v3129_v15 = vmax.f32 %v2873_v19, 0.0  ;;  %v662_v27 = vadd.f32 %v661_v12, %v4787_v53  ;;  %v1285_v6 = vpop.f32.mrf.mxu3  ;;  %4149 = vst [vmem:[%s5722_s24 + $0x5e0] sm:$0xff] %v3893_v43  ;;  %v4320_v43 = vld [vmem:[%s4672_s14 + $0x30] sm:$0xff] }
 0x2f7   : > { %v3382_v29 = vmin.f32 %v3126_v55, 6.0  ;;  %v1286_v21 = vadd.f32 %v1285_v6, %v1077_v40  ;;  %v7114_v40 = vld [vmem:[#allocation68_spill] sm:$0xff]  ;;  %v4321_v6 = vld [vmem:[%s4672_s14 + $0x38] sm:$0xff] }
 0x2f8   : > { %v3385_v23 = vmin.f32 %v3129_v15, 6.0  ;;  %v871_v36 = vadd.f32 %v870_v20, %v662_v27  ;;  %v7115_v15 = vld [vmem:[#allocation69_spill] sm:$0xff] }
 0x2f9   : > { %v3638_v8 = vmul.f32 %v3382_v29, %v2614_v5  ;;  %v2618_v17 = vadd.f32 %v7110_v16, %v1286_v21  ;;  %v873_v44 = vpop.f32.mrf.mxu1 }
 0x2fa   : > { %v3641_v45 = vmul.f32 %v3385_v23, %v2617_v61  ;;  %v2621_v33 = vadd.f32 %v7111_v37, %v871_v36  ;;  %v1079_v22 = vpop.f32.mrf.mxu2 }
 0x2fb   : > { %v3894_v51 = vmul.f32 0.16666667, %v3638_v8  ;;  %v2874_v34 = vadd.f32 3.0, %v2618_v17  ;;  %v1080_v35 = vadd.f32 %v1079_v22, %v4827_v24  ;;  %1355 = vmatmul.f32.gmra.mxu0 %v4318_v42 }
 0x2fc   : > { %v3897_v9 = vmul.f32 0.16666667, %v3641_v45  ;;  %v2877_v30 = vadd.f32 3.0, %v2621_v33  ;;  %1773 = vmatmul.f32.gmra.mxu2 %v4318_v42  ;;  %1564 = vmatmul.f32.gmra.mxu1 %v4319_v56 }
 0x2fd   : > { %v3130_v31 = vmax.f32 %v2874_v34, 0.0  ;;  %v664_v54 = vpop.f32.mrf.mxu0  ;;  %4150 = vst [vmem:[%s5722_s24 + $0x5e8] sm:$0xff] %v3894_v51  ;;  %1982 = vmatmul.f32.gmra.mxu3 %v4319_v56 }
 0x2fe   : > { %v3133_v38 = vmax.f32 %v2877_v30, 0.0  ;;  %v665_v58 = vadd.f32 %v664_v54, %v4787_v53  ;;  %v1288_v50 = vpop.f32.mrf.mxu3  ;;  %4153 = vst [vmem:[%s5722_s24 + $0x600] sm:$0xff] %v3897_v9  ;;  %v4322_v9 = vld [vmem:[%s4672_s14 + $0x40] sm:$0xff] }
 0x2ff   : > { %v3386_v46 = vmin.f32 %v3130_v31, 6.0  ;;  %v1289_v32 = vadd.f32 %v1288_v50, %v1080_v35  ;;  %v7116_v35 = vld [vmem:[#allocation70_spill] sm:$0xff]  ;;  %v4323_v50 = vld [vmem:[%s4672_s14 + $0x48] sm:$0xff] }
 0x300   : > { %v3389_v60 = vmin.f32 %v3133_v38, 6.0  ;;  %v874_v62 = vadd.f32 %v873_v44, %v665_v58  ;;  %v7117_v38 = vld [vmem:[#allocation71_spill] sm:$0xff] }
 0x301   : > { %v3642_v48 = vmul.f32 %v3386_v46, %v2618_v17  ;;  %v2622_v41 = vadd.f32 %v7112_v59, %v1289_v32  ;;  %v876_v63 = vpop.f32.mrf.mxu1 }
 0x302   : > { %v3645_v47 = vmul.f32 %v3389_v60, %v2621_v33  ;;  %v2625_v4 = vadd.f32 %v7113_v2, %v874_v62  ;;  %v1082_v18 = vpop.f32.mrf.mxu2 }
 0x303   : > { %v3898_v26 = vmul.f32 0.16666667, %v3642_v48  ;;  %v2878_v0 = vadd.f32 3.0, %v2622_v41  ;;  %v1083_v28 = vadd.f32 %v1082_v18, %v4827_v24  ;;  %1358 = vmatmul.f32.gmra.mxu0 %v4320_v43 }
 0x304   : > { %v3901_v1 = vmul.f32 0.16666667, %v3645_v47  ;;  %v2881_v3 = vadd.f32 3.0, %v2625_v4  ;;  %1776 = vmatmul.f32.gmra.mxu2 %v4320_v43  ;;  %1567 = vmatmul.f32.gmra.mxu1 %v4321_v6 }
 0x305   : > { %v3134_v11 = vmax.f32 %v2878_v0, 0.0  ;;  %v667_v14 = vpop.f32.mrf.mxu0  ;;  %4154 = vst [vmem:[%s5722_s24 + $0x608] sm:$0xff] %v3898_v26  ;;  %1985 = vmatmul.f32.gmra.mxu3 %v4321_v6 }
 0x306   : > { %v3137_v5 = vmax.f32 %v2881_v3, 0.0  ;;  %v668_v39 = vadd.f32 %v667_v14, %v4787_v53  ;;  %v1291_v7 = vpop.f32.mrf.mxu3  ;;  %4157 = vst [vmem:[%s5722_s24 + $0x620] sm:$0xff] %v3901_v1  ;;  %v4324_v1 = vld [vmem:[%s4672_s14 + $0x50] sm:$0xff] }
 0x307   : > { %v3390_v61 = vmin.f32 %v3134_v11, 6.0  ;;  %v1292_v57 = vadd.f32 %v1291_v7, %v1083_v28  ;;  %v7118_v28 = vld [vmem:[#allocation72_spill] sm:$0xff]  ;;  %v4325_v7 = vld [vmem:[%s4672_s14 + $0x58] sm:$0xff] }
 0x308   : > { %v3393_v52 = vmin.f32 %v3137_v5, 6.0  ;;  %v877_v10 = vadd.f32 %v876_v63, %v668_v39  ;;  %v7119_v5 = vld [vmem:[#allocation73_spill] sm:$0xff] }
 0x309   : > { %v3646_v19 = vmul.f32 %v3390_v61, %v2622_v41  ;;  %v2626_v55 = vadd.f32 %v7114_v40, %v1292_v57  ;;  %v879_v51 = vpop.f32.mrf.mxu1 }
 0x30a   : > { %v3649_v12 = vmul.f32 %v3393_v52, %v2625_v4  ;;  %v2629_v27 = vadd.f32 %v7115_v15, %v877_v10  ;;  %v1085_v20 = vpop.f32.mrf.mxu2 }
 0x30b   : > { %v3902_v29 = vmul.f32 0.16666667, %v3646_v19  ;;  %v2882_v21 = vadd.f32 3.0, %v2626_v55  ;;  %v1086_v25 = vadd.f32 %v1085_v20, %v4827_v24  ;;  %1361 = vmatmul.f32.gmra.mxu0 %v4322_v9 }
 0x30c   : > { %v3905_v23 = vmul.f32 0.16666667, %v3649_v12  ;;  %v2885_v36 = vadd.f32 3.0, %v2629_v27  ;;  %1779 = vmatmul.f32.gmra.mxu2 %v4322_v9  ;;  %1570 = vmatmul.f32.gmra.mxu1 %v4323_v50 }
 0x30d   : > { %v3138_v8 = vmax.f32 %v2882_v21, 0.0  ;;  %v670_v16 = vpop.f32.mrf.mxu0  ;;  %4158 = vst [vmem:[%s5722_s24 + $0x628] sm:$0xff] %v3902_v29  ;;  %1988 = vmatmul.f32.gmra.mxu3 %v4323_v50 }
 0x30e   : > { %v3141_v17 = vmax.f32 %v2885_v36, 0.0  ;;  %v671_v45 = vadd.f32 %v670_v16, %v4787_v53  ;;  %v1294_v37 = vpop.f32.mrf.mxu3  ;;  %4161 = vst [vmem:[%s5722_s24 + $0x640] sm:$0xff] %v3905_v23  ;;  %v4326_v23 = vld [vmem:[%s4672_s14 + $0x60] sm:$0xff] }
 0x30f   : > { %v3394_v33 = vmin.f32 %v3138_v8, 6.0  ;;  %v1295_v49 = vadd.f32 %v1294_v37, %v1086_v25  ;;  %v7120_v25 = vld [vmem:[#allocation74_spill] sm:$0xff]  ;;  %v4327_v37 = vld [vmem:[%s4672_s14 + $0x68] sm:$0xff] }
 0x310   : > { %v3397_v34 = vmin.f32 %v3141_v17, 6.0  ;;  %v880_v22 = vadd.f32 %v879_v51, %v671_v45  ;;  %v7121_v17 = vld [vmem:[#allocation75_spill] sm:$0xff] }
 0x311   : > { %v3650_v30 = vmul.f32 %v3394_v33, %v2626_v55  ;;  %v2630_v31 = vadd.f32 %v7116_v35, %v1295_v49  ;;  %v882_v26 = vpop.f32.mrf.mxu1 }
 0x312   : > { %v3653_v54 = vmul.f32 %v3397_v34, %v2629_v27  ;;  %v2633_v58 = vadd.f32 %v7117_v38, %v880_v22  ;;  %v1088_v44 = vpop.f32.mrf.mxu2 }
 0x313   : > { %v3906_v46 = vmul.f32 0.16666667, %v3650_v30  ;;  %v2886_v32 = vadd.f32 3.0, %v2630_v31  ;;  %v1089_v42 = vadd.f32 %v1088_v44, %v4827_v24  ;;  %1364 = vmatmul.f32.gmra.mxu0 %v4324_v1 }
 0x314   : > { %v3909_v60 = vmul.f32 0.16666667, %v3653_v54  ;;  %v2889_v62 = vadd.f32 3.0, %v2633_v58  ;;  %1782 = vmatmul.f32.gmra.mxu2 %v4324_v1  ;;  %1573 = vmatmul.f32.gmra.mxu1 %v4325_v7 }
 0x315   : > { %v3142_v48 = vmax.f32 %v2886_v32, 0.0  ;;  %v673_v59 = vpop.f32.mrf.mxu0  ;;  %4162 = vst [vmem:[%s5722_s24 + $0x648] sm:$0xff] %v3906_v46  ;;  %1991 = vmatmul.f32.gmra.mxu3 %v4325_v7 }
 0x316   : > { %v3145_v41 = vmax.f32 %v2889_v62, 0.0  ;;  %v674_v47 = vadd.f32 %v673_v59, %v4787_v53  ;;  %v1297_v2 = vpop.f32.mrf.mxu3  ;;  %4165 = vst [vmem:[%s5722_s24 + $0x660] sm:$0xff] %v3909_v60  ;;  %v4328_v60 = vld [vmem:[%s4672_s14 + $0x70] sm:$0xff] }
 0x317   : > { %v3398_v4 = vmin.f32 %v3142_v48, 6.0  ;;  %v1298_v56 = vadd.f32 %v1297_v2, %v1089_v42  ;;  %v7122_v42 = vld [vmem:[#allocation76_spill] sm:$0xff]  ;;  %v4329_v2 = vld [vmem:[%s4672_s14 + $0x78] sm:$0xff] }
 0x318   : > { %v3401_v0 = vmin.f32 %v3145_v41, 6.0  ;;  %v883_v18 = vadd.f32 %v882_v26, %v674_v47  ;;  %v7123_v41 = vld [vmem:[#allocation77_spill] sm:$0xff] }
 0x319   : > { %v3654_v3 = vmul.f32 %v3398_v4, %v2630_v31  ;;  %v2634_v11 = vadd.f32 %v7118_v28, %v1298_v56  ;;  %v885_v29 = vpop.f32.mrf.mxu1 }
 0x31a   : > { %v3657_v14 = vmul.f32 %v3401_v0, %v2633_v58  ;;  %v2637_v39 = vadd.f32 %v7119_v5, %v883_v18  ;;  %v1091_v63 = vpop.f32.mrf.mxu2 }
 0x31b   : > { %v3910_v61 = vmul.f32 0.16666667, %v3654_v3  ;;  %v2890_v57 = vadd.f32 3.0, %v2634_v11  ;;  %v1092_v43 = vadd.f32 %v1091_v63, %v4827_v24  ;;  %1367 = vmatmul.f32.gmra.mxu0 %v4326_v23 }
 0x31c   : > { %v3913_v52 = vmul.f32 0.16666667, %v3657_v14  ;;  %v2893_v10 = vadd.f32 3.0, %v2637_v39  ;;  %1785 = vmatmul.f32.gmra.mxu2 %v4326_v23  ;;  %1576 = vmatmul.f32.gmra.mxu1 %v4327_v37 }
 0x31d   : > { %v3146_v19 = vmax.f32 %v2890_v57, 0.0  ;;  %v676_v40 = vpop.f32.mrf.mxu0  ;;  %4166 = vst [vmem:[%s5722_s24 + $0x668] sm:$0xff] %v3910_v61  ;;  %1994 = vmatmul.f32.gmra.mxu3 %v4327_v37 }
 0x31e   : > { %v3149_v55 = vmax.f32 %v2893_v10, 0.0  ;;  %v677_v12 = vadd.f32 %v676_v40, %v4787_v53  ;;  %v1300_v15 = vpop.f32.mrf.mxu3  ;;  %4169 = vst [vmem:[%s5722_s24 + $0x680] sm:$0xff] %v3913_v52  ;;  %v4330_v52 = vld [vmem:[%s4672_s14 + $0x80] sm:$0xff] }
 0x31f   : > { %v3402_v27 = vmin.f32 %v3146_v19, 6.0  ;;  %v1301_v6 = vadd.f32 %v1300_v15, %v1092_v43  ;;  %v7124_v43 = vld [vmem:[#allocation78_spill] sm:$0xff]  ;;  %v4331_v15 = vld [vmem:[%s4672_s14 + $0x88] sm:$0xff] }
 0x320   : > { %v3405_v21 = vmin.f32 %v3149_v55, 6.0  ;;  %v886_v20 = vadd.f32 %v885_v29, %v677_v12  ;;  %v7125_v55 = vld [vmem:[#allocation79_spill] sm:$0xff] }
 0x321   : > { %v3658_v36 = vmul.f32 %v3402_v27, %v2634_v11  ;;  %v2638_v8 = vadd.f32 %v7120_v25, %v1301_v6  ;;  %v888_v46 = vpop.f32.mrf.mxu1 }
 0x322   : > { %v3661_v16 = vmul.f32 %v3405_v21, %v2637_v39  ;;  %v2641_v45 = vadd.f32 %v7121_v17, %v886_v20  ;;  %v1094_v51 = vpop.f32.mrf.mxu2 }
 0x323   : > { %v3914_v33 = vmul.f32 0.16666667, %v3658_v36  ;;  %v2894_v49 = vadd.f32 3.0, %v2638_v8  ;;  %v1095_v9 = vadd.f32 %v1094_v51, %v4827_v24  ;;  %1370 = vmatmul.f32.gmra.mxu0 %v4328_v60 }
 0x324   : > { %v3917_v34 = vmul.f32 0.16666667, %v3661_v16  ;;  %v2897_v22 = vadd.f32 3.0, %v2641_v45  ;;  %1788 = vmatmul.f32.gmra.mxu2 %v4328_v60  ;;  %1579 = vmatmul.f32.gmra.mxu1 %v4329_v2 }
 0x325   : > { %v3150_v30 = vmax.f32 %v2894_v49, 0.0  ;;  %v679_v35 = vpop.f32.mrf.mxu0  ;;  %4170 = vst [vmem:[%s5722_s24 + $0x688] sm:$0xff] %v3914_v33  ;;  %1997 = vmatmul.f32.gmra.mxu3 %v4329_v2 }
 0x326   : > { %v3153_v31 = vmax.f32 %v2897_v22, 0.0  ;;  %v680_v54 = vadd.f32 %v679_v35, %v4787_v53  ;;  %v1303_v38 = vpop.f32.mrf.mxu3  ;;  %4173 = vst [vmem:[%s5722_s24 + $0x6a0] sm:$0xff] %v3917_v34  ;;  %v4332_v34 = vld [vmem:[%s4672_s14 + $0x90] sm:$0xff] }
 0x327   : > { %v3406_v58 = vmin.f32 %v3150_v30, 6.0  ;;  %v1304_v50 = vadd.f32 %v1303_v38, %v1095_v9  ;;  %v7126_v9 = vld [vmem:[#allocation80_spill] sm:$0xff]  ;;  %v4333_v38 = vld [vmem:[%s4672_s14 + $0x98] sm:$0xff] }
 0x328   : > { %v3409_v32 = vmin.f32 %v3153_v31, 6.0  ;;  %v889_v44 = vadd.f32 %v888_v46, %v680_v54  ;;  %v7127_v31 = vld [vmem:[#allocation81_spill] sm:$0xff] }
 0x329   : > { %v3662_v62 = vmul.f32 %v3406_v58, %v2638_v8  ;;  %v2642_v48 = vadd.f32 %v7122_v42, %v1304_v50  ;;  %v891_v61 = vpop.f32.mrf.mxu1 }
 0x32a   : > { %v3665_v59 = vmul.f32 %v3409_v32, %v2641_v45  ;;  %v2645_v47 = vadd.f32 %v7123_v41, %v889_v44  ;;  %v1097_v26 = vpop.f32.mrf.mxu2 }
 0x32b   : > { %v3918_v4 = vmul.f32 0.16666667, %v3662_v62  ;;  %v2898_v56 = vadd.f32 3.0, %v2642_v48  ;;  %v1098_v1 = vadd.f32 %v1097_v26, %v4827_v24  ;;  %1373 = vmatmul.f32.gmra.mxu0 %v4330_v52 }
 0x32c   : > { %v3921_v0 = vmul.f32 0.16666667, %v3665_v59  ;;  %v2901_v18 = vadd.f32 3.0, %v2645_v47  ;;  %1791 = vmatmul.f32.gmra.mxu2 %v4330_v52  ;;  %1582 = vmatmul.f32.gmra.mxu1 %v4331_v15 }
 0x32d   : > { %v3154_v3 = vmax.f32 %v2898_v56, 0.0  ;;  %v682_v28 = vpop.f32.mrf.mxu0  ;;  %4174 = vst [vmem:[%s5722_s24 + $0x6a8] sm:$0xff] %v3918_v4  ;;  %2000 = vmatmul.f32.gmra.mxu3 %v4331_v15 }
 0x32e   : > { %v3157_v11 = vmax.f32 %v2901_v18, 0.0  ;;  %v683_v14 = vadd.f32 %v682_v28, %v4787_v53  ;;  %v1306_v5 = vpop.f32.mrf.mxu3  ;;  %4177 = vst [vmem:[%s5722_s24 + $0x6c0] sm:$0xff] %v3921_v0  ;;  %v4334_v0 = vld [vmem:[%s4672_s14 + $0xa0] sm:$0xff] }
 0x32f   : > { %v3410_v39 = vmin.f32 %v3154_v3, 6.0  ;;  %v1307_v7 = vadd.f32 %v1306_v5, %v1098_v1  ;;  %v7128_v1 = vld [vmem:[#allocation82_spill] sm:$0xff]  ;;  %v4335_v5 = vld [vmem:[%s4672_s14 + $0xa8] sm:$0xff] }
 0x330   : > { %v3413_v57 = vmin.f32 %v3157_v11, 6.0  ;;  %v892_v63 = vadd.f32 %v891_v61, %v683_v14  ;;  %v7129_v11 = vld [vmem:[#allocation83_spill] sm:$0xff] }
 0x331   : > { %v3666_v10 = vmul.f32 %v3410_v39, %v2642_v48  ;;  %v2646_v19 = vadd.f32 %v7124_v43, %v1307_v7  ;;  %v894_v33 = vpop.f32.mrf.mxu1 }
 0x332   : > { %v3669_v40 = vmul.f32 %v3413_v57, %v2645_v47  ;;  %v2649_v12 = vadd.f32 %v7125_v55, %v892_v63  ;;  %v1100_v29 = vpop.f32.mrf.mxu2 }
 0x333   : > { %v3922_v27 = vmul.f32 0.16666667, %v3666_v10  ;;  %v2902_v6 = vadd.f32 3.0, %v2646_v19  ;;  %v1101_v23 = vadd.f32 %v1100_v29, %v4827_v24  ;;  %1376 = vmatmul.f32.gmra.mxu0 %v4332_v34 }
 0x334   : > { %v3925_v21 = vmul.f32 0.16666667, %v3669_v40  ;;  %v2905_v20 = vadd.f32 3.0, %v2649_v12  ;;  %1794 = vmatmul.f32.gmra.mxu2 %v4332_v34  ;;  %1585 = vmatmul.f32.gmra.mxu1 %v4333_v38 }
 0x335   : > { %v3158_v36 = vmax.f32 %v2902_v6, 0.0  ;;  %v685_v25 = vpop.f32.mrf.mxu0  ;;  %4178 = vst [vmem:[%s5722_s24 + $0x6c8] sm:$0xff] %v3922_v27  ;;  %2003 = vmatmul.f32.gmra.mxu3 %v4333_v38 }
 0x336   : > { %v3161_v8 = vmax.f32 %v2905_v20, 0.0  ;;  %v686_v16 = vadd.f32 %v685_v25, %v4787_v53  ;;  %v1309_v17 = vpop.f32.mrf.mxu3  ;;  %4181 = vst [vmem:[%s5722_s24 + $0x6e0] sm:$0xff] %v3925_v21  ;;  %v4336_v21 = vld [vmem:[%s4672_s14 + $0xb0] sm:$0xff] }
 0x337   : > { %v3414_v45 = vmin.f32 %v3158_v36, 6.0  ;;  %v1310_v37 = vadd.f32 %v1309_v17, %v1101_v23  ;;  %v7130_v23 = vld [vmem:[#allocation84_spill] sm:$0xff]  ;;  %v4337_v17 = vld [vmem:[%s4672_s14 + $0xb8] sm:$0xff] }
 0x338   : > { %v3417_v49 = vmin.f32 %v3161_v8, 6.0  ;;  %v895_v51 = vadd.f32 %v894_v33, %v686_v16  ;;  %v7131_v8 = vld [vmem:[#allocation85_spill] sm:$0xff] }
 0x339   : > { %v3670_v22 = vmul.f32 %v3414_v45, %v2646_v19  ;;  %v2650_v30 = vadd.f32 %v7126_v9, %v1310_v37  ;;  %v897_v4 = vpop.f32.mrf.mxu1 }
 0x33a   : > { %v3673_v35 = vmul.f32 %v3417_v49, %v2649_v12  ;;  %v2653_v54 = vadd.f32 %v7127_v31, %v895_v51  ;;  %v1103_v46 = vpop.f32.mrf.mxu2 }
 0x33b   : > { %v3926_v58 = vmul.f32 0.16666667, %v3670_v22  ;;  %v2906_v50 = vadd.f32 3.0, %v2650_v30  ;;  %v1104_v60 = vadd.f32 %v1103_v46, %v4827_v24  ;;  %1379 = vmatmul.f32.gmra.mxu0 %v4334_v0 }
 0x33c   : > { %v3929_v32 = vmul.f32 0.16666667, %v3673_v35  ;;  %v2909_v44 = vadd.f32 3.0, %v2653_v54  ;;  %1797 = vmatmul.f32.gmra.mxu2 %v4334_v0  ;;  %1588 = vmatmul.f32.gmra.mxu1 %v4335_v5 }
 0x33d   : > { %v3162_v62 = vmax.f32 %v2906_v50, 0.0  ;;  %v688_v42 = vpop.f32.mrf.mxu0  ;;  %4182 = vst [vmem:[%s5722_s24 + $0x6e8] sm:$0xff] %v3926_v58  ;;  %2006 = vmatmul.f32.gmra.mxu3 %v4335_v5 }
 0x33e   : > { %v3165_v48 = vmax.f32 %v2909_v44, 0.0  ;;  %v689_v59 = vadd.f32 %v688_v42, %v4787_v53  ;;  %v1312_v41 = vpop.f32.mrf.mxu3  ;;  %4185 = vst [vmem:[%s5722_s24 + $0x700] sm:$0xff] %v3929_v32  ;;  %v4338_v32 = vld [vmem:[%s4672_s14 + $0xc0] sm:$0xff] }
 0x33f   : > { %v3418_v47 = vmin.f32 %v3162_v62, 6.0  ;;  %v1313_v2 = vadd.f32 %v1312_v41, %v1104_v60  ;;  %v7132_v60 = vld [vmem:[#allocation86_spill] sm:$0xff]  ;;  %v4339_v41 = vld [vmem:[%s4672_s14 + $0xc8] sm:$0xff] }
 0x340   : > { %v3421_v56 = vmin.f32 %v3165_v48, 6.0  ;;  %v898_v26 = vadd.f32 %v897_v4, %v689_v59  ;;  %v7133_v48 = vld [vmem:[#allocation87_spill] sm:$0xff] }
 0x341   : > { %v3674_v18 = vmul.f32 %v3418_v47, %v2650_v30  ;;  %v2654_v3 = vadd.f32 %v7128_v1, %v1313_v2  ;;  %v900_v27 = vpop.f32.mrf.mxu1 }
 0x342   : > { %v3677_v28 = vmul.f32 %v3421_v56, %v2653_v54  ;;  %v2657_v14 = vadd.f32 %v7129_v11, %v898_v26  ;;  %v1106_v61 = vpop.f32.mrf.mxu2 }
 0x343   : > { %v3930_v39 = vmul.f32 0.16666667, %v3674_v18  ;;  %v2910_v7 = vadd.f32 3.0, %v2654_v3  ;;  %v1107_v52 = vadd.f32 %v1106_v61, %v4827_v24  ;;  %1382 = vmatmul.f32.gmra.mxu0 %v4336_v21 }
 0x344   : > { %v3933_v57 = vmul.f32 0.16666667, %v3677_v28  ;;  %v2913_v63 = vadd.f32 3.0, %v2657_v14  ;;  %1800 = vmatmul.f32.gmra.mxu2 %v4336_v21  ;;  %1591 = vmatmul.f32.gmra.mxu1 %v4337_v17 }
 0x345   : > { %v3166_v10 = vmax.f32 %v2910_v7, 0.0  ;;  %v691_v43 = vpop.f32.mrf.mxu0  ;;  %4186 = vst [vmem:[%s5722_s24 + $0x708] sm:$0xff] %v3930_v39  ;;  %2009 = vmatmul.f32.gmra.mxu3 %v4337_v17 }
 0x346   : > { %v3169_v19 = vmax.f32 %v2913_v63, 0.0  ;;  %v692_v40 = vadd.f32 %v691_v43, %v4787_v53  ;;  %v1315_v55 = vpop.f32.mrf.mxu3  ;;  %4189 = vst [vmem:[%s5722_s24 + $0x720] sm:$0xff] %v3933_v57  ;;  %v4340_v57 = vld [vmem:[%s4672_s14 + $0xd0] sm:$0xff] }
 0x347   : > { %v3422_v12 = vmin.f32 %v3166_v10, 6.0  ;;  %v1316_v15 = vadd.f32 %v1315_v55, %v1107_v52  ;;  %v7134_v52 = vld [vmem:[#allocation88_spill] sm:$0xff]  ;;  %v4341_v55 = vld [vmem:[%s4672_s14 + $0xd8] sm:$0xff] }
 0x348   : > { %v3425_v6 = vmin.f32 %v3169_v19, 6.0  ;;  %v901_v29 = vadd.f32 %v900_v27, %v692_v40  ;;  %v7135_v19 = vld [vmem:[#allocation89_spill] sm:$0xff] }
 0x349   : > { %v3678_v20 = vmul.f32 %v3422_v12, %v2654_v3  ;;  %v2658_v36 = vadd.f32 %v7130_v23, %v1316_v15  ;;  %v903_v58 = vpop.f32.mrf.mxu1 }
 0x34a   : > { %v3681_v25 = vmul.f32 %v3425_v6, %v2657_v14  ;;  %v2661_v16 = vadd.f32 %v7131_v8, %v901_v29  ;;  %v1109_v33 = vpop.f32.mrf.mxu2 }
 0x34b   : > { %v3934_v45 = vmul.f32 0.16666667, %v3678_v20  ;;  %v2914_v37 = vadd.f32 3.0, %v2658_v36  ;;  %v1110_v34 = vadd.f32 %v1109_v33, %v4827_v24  ;;  %1385 = vmatmul.f32.gmra.mxu0 %v4338_v32 }
 0x34c   : > { %v3937_v49 = vmul.f32 0.16666667, %v3681_v25  ;;  %v2917_v51 = vadd.f32 3.0, %v2661_v16  ;;  %1803 = vmatmul.f32.gmra.mxu2 %v4338_v32  ;;  %1594 = vmatmul.f32.gmra.mxu1 %v4339_v41 }
 0x34d   : > { %v3170_v22 = vmax.f32 %v2914_v37, 0.0  ;;  %v694_v9 = vpop.f32.mrf.mxu0  ;;  %4190 = vst [vmem:[%s5722_s24 + $0x728] sm:$0xff] %v3934_v45  ;;  %2012 = vmatmul.f32.gmra.mxu3 %v4339_v41 }
 0x34e   : > { %v3173_v30 = vmax.f32 %v2917_v51, 0.0  ;;  %v695_v35 = vadd.f32 %v694_v9, %v4787_v53  ;;  %v1318_v31 = vpop.f32.mrf.mxu3  ;;  %4193 = vst [vmem:[%s5722_s24 + $0x740] sm:$0xff] %v3937_v49  ;;  %v4342_v49 = vld [vmem:[%s4672_s14 + $0xe0] sm:$0xff] }
 0x34f   : > { %v3426_v54 = vmin.f32 %v3170_v22, 6.0  ;;  %v1319_v38 = vadd.f32 %v1318_v31, %v1110_v34  ;;  %v7136_v34 = vld [vmem:[#allocation90_spill] sm:$0xff]  ;;  %v4343_v31 = vld [vmem:[%s4672_s14 + $0xe8] sm:$0xff] }
 0x350   : > { %v3429_v50 = vmin.f32 %v3173_v30, 6.0  ;;  %v904_v46 = vadd.f32 %v903_v58, %v695_v35  ;;  %v7137_v30 = vld [vmem:[#allocation91_spill] sm:$0xff] }
 0x351   : > { %v3682_v44 = vmul.f32 %v3426_v54, %v2658_v36  ;;  %v2662_v62 = vadd.f32 %v7132_v60, %v1319_v38  ;;  %v906_v39 = vpop.f32.mrf.mxu1 }
 0x352   : > { %v3685_v42 = vmul.f32 %v3429_v50, %v2661_v16  ;;  %v2665_v59 = vadd.f32 %v7133_v48, %v904_v46  ;;  %v1112_v4 = vpop.f32.mrf.mxu2 }
 0x353   : > { %v3938_v47 = vmul.f32 0.16666667, %v3682_v44  ;;  %v2918_v2 = vadd.f32 3.0, %v2662_v62  ;;  %v1113_v0 = vadd.f32 %v1112_v4, %v4827_v24  ;;  %1388 = vmatmul.f32.gmra.mxu0 %v4340_v57 }
 0x354   : > { %v3941_v56 = vmul.f32 0.16666667, %v3685_v42  ;;  %v2921_v26 = vadd.f32 3.0, %v2665_v59  ;;  %1806 = vmatmul.f32.gmra.mxu2 %v4340_v57  ;;  %1597 = vmatmul.f32.gmra.mxu1 %v4341_v55 }
 0x355   : > { %v3174_v18 = vmax.f32 %v2918_v2, 0.0  ;;  %v697_v1 = vpop.f32.mrf.mxu0  ;;  %4194 = vst [vmem:[%s5722_s24 + $0x748] sm:$0xff] %v3938_v47  ;;  %2015 = vmatmul.f32.gmra.mxu3 %v4341_v55 }
 0x356   : > { %v3177_v3 = vmax.f32 %v2921_v26, 0.0  ;;  %v698_v28 = vadd.f32 %v697_v1, %v4787_v53  ;;  %v1321_v11 = vpop.f32.mrf.mxu3  ;;  %4197 = vst [vmem:[%s5722_s24 + $0x760] sm:$0xff] %v3941_v56  ;;  %v4344_v56 = vld [vmem:[%s4672_s14 + $0xf0] sm:$0xff] }
 0x357   : > { %v3430_v14 = vmin.f32 %v3174_v18, 6.0  ;;  %v1322_v5 = vadd.f32 %v1321_v11, %v1113_v0  ;;  %v7138_v0 = vld [vmem:[#allocation92_spill] sm:$0xff]  ;;  %v4345_v11 = vld [vmem:[%s4672_s14 + $0xf8] sm:$0xff] }
 0x358   : > { %v3433_v7 = vmin.f32 %v3177_v3, 6.0  ;;  %v907_v61 = vadd.f32 %v906_v39, %v698_v28  ;;  %v7139_v3 = vld [vmem:[#allocation93_spill] sm:$0xff] }
 0x359   : > { %v3686_v63 = vmul.f32 %v3430_v14, %v2662_v62  ;;  %v2666_v10 = vadd.f32 %v7134_v52, %v1322_v5  ;;  %v909_v45 = vpop.f32.mrf.mxu1 }
 0x35a   : > { %v3689_v43 = vmul.f32 %v3433_v7, %v2665_v59  ;;  %v2669_v40 = vadd.f32 %v7135_v19, %v907_v61  ;;  %v1115_v27 = vpop.f32.mrf.mxu2 }
 0x35b   : > { %v3942_v12 = vmul.f32 0.16666667, %v3686_v63  ;;  %v2922_v15 = vadd.f32 3.0, %v2666_v10  ;;  %v1116_v21 = vadd.f32 %v1115_v27, %v4827_v24  ;;  %1391 = vmatmul.f32.gmra.mxu0 %v4342_v49 }
 0x35c   : > { %v3945_v6 = vmul.f32 0.16666667, %v3689_v43  ;;  %v2925_v29 = vadd.f32 3.0, %v2669_v40  ;;  %1809 = vmatmul.f32.gmra.mxu2 %v4342_v49  ;;  %1600 = vmatmul.f32.gmra.mxu1 %v4343_v31 }
 0x35d   : > { %v3178_v20 = vmax.f32 %v2922_v15, 0.0  ;;  %v700_v23 = vpop.f32.mrf.mxu0  ;;  %4198 = vst [vmem:[%s5722_s24 + $0x768] sm:$0xff] %v3942_v12  ;;  %2018 = vmatmul.f32.gmra.mxu3 %v4343_v31 }
 0x35e   : > { %v3181_v36 = vmax.f32 %v2925_v29, 0.0  ;;  %v701_v25 = vadd.f32 %v700_v23, %v4787_v53  ;;  %v1324_v8 = vpop.f32.mrf.mxu3  ;;  %4201 = vst [vmem:[%s5722_s24 + $0x780] sm:$0xff] %v3945_v6  ;;  %v4347_v29 = vld [vmem:[%s4672_s14 + $0x100] sm:$0xff] }
 0x35f   : > { %v3434_v16 = vmin.f32 %v3178_v20, 6.0  ;;  %v1325_v17 = vadd.f32 %v1324_v8, %v1116_v21  ;;  %v7140_v20 = vld [vmem:[#allocation94_spill] sm:$0xff] }
 0x360   : > { %v3437_v37 = vmin.f32 %v3181_v36, 6.0  ;;  %v910_v33 = vadd.f32 %v909_v45, %v701_v25  ;;  %v7141_v25 = vld [vmem:[#allocation95_spill] sm:$0xff] }
 0x361   : > { %v3690_v51 = vmul.f32 %v3434_v16, %v2666_v10  ;;  %v2670_v22 = vadd.f32 %v7136_v34, %v1325_v17  ;;  %v912_v47 = vpop.f32.mrf.mxu1  ;;  %v4348_v16 = vld [vmem:[%s4672_s14 + $0x108] sm:$0xff] }
 0x362   : > { %v3693_v9 = vmul.f32 %v3437_v37, %v2669_v40  ;;  %v2673_v35 = vadd.f32 %v7137_v30, %v910_v33  ;;  %v1118_v58 = vpop.f32.mrf.mxu2 }
 0x363   : > { %v3946_v54 = vmul.f32 0.16666667, %v3690_v51  ;;  %v2926_v38 = vadd.f32 3.0, %v2670_v22  ;;  %v1119_v32 = vadd.f32 %v1118_v58, %v4827_v24  ;;  %1394 = vmatmul.f32.gmra.mxu0 %v4344_v56 }
 0x364   : > { %v3949_v50 = vmul.f32 0.16666667, %v3693_v9  ;;  %v2929_v46 = vadd.f32 3.0, %v2673_v35  ;;  %1812 = vmatmul.f32.gmra.mxu2 %v4344_v56  ;;  %1603 = vmatmul.f32.gmra.mxu1 %v4345_v11 }
 0x365   : > { %v3182_v44 = vmax.f32 %v2926_v38, 0.0  ;;  %v703_v60 = vpop.f32.mrf.mxu0  ;;  %4202 = vst [vmem:[%s5722_s24 + $0x788] sm:$0xff] %v3946_v54  ;;  %2021 = vmatmul.f32.gmra.mxu3 %v4345_v11 }
 0x366   : > { %v3185_v62 = vmax.f32 %v2929_v46, 0.0  ;;  %v704_v42 = vadd.f32 %v703_v60, %v4787_v53  ;;  %v1327_v48 = vpop.f32.mrf.mxu3  ;;  %4205 = vst [vmem:[%s5722_s24 + $0x7a0] sm:$0xff] %v3949_v50  ;;  %v4346_v53 = vld [vmem:[%s6822_s2] sm:$0xf]  ;;  %v4349_v46 = vld [vmem:[%s4672_s14 + $0x110] sm:$0xff] }
 0x367   : > { %v3438_v59 = vmin.f32 %v3182_v44, 6.0  ;;  %v1328_v41 = vadd.f32 %v1327_v48, %v1119_v32  ;;  %v6326_v14 = vperm.slane %v4346_v53, 2  ;;  %v6333_v21 = vperm.slane %v4346_v53, 3  ;;  %v7142_v44 = vld [vmem:[#allocation96_spill] sm:$0xff] }
 0x368   : > { %v3441_v2 = vmin.f32 %v3185_v62, 6.0  ;;  %v913_v4 = vadd.f32 %v912_v47, %v704_v42  ;;  %v7143_v42 = vld [vmem:[#allocation97_spill] sm:$0xff] }
 0x369   : > { %v3694_v26 = vmul.f32 %v3438_v59, %v2670_v22  ;;  %v2674_v18 = vadd.f32 %v7138_v0, %v1328_v41  ;;  %v1559_v15 = vpop.f32.mrf.mxu1  ;;  %v4350_v59 = vld [vmem:[%s4672_s14 + $0x118] sm:$0xff] }
 0x36a   : > { %v3697_v1 = vmul.f32 %v3441_v2, %v2673_v35  ;;  %v2677_v28 = vadd.f32 %v7139_v3, %v913_v4  ;;  %v1121_v7 = vpop.f32.mrf.mxu2 }
 0x36b   : > { %v3950_v5 = vmul.f32 0.16666667, %v3694_v26  ;;  %v2930_v39 = vadd.f32 3.0, %v2674_v18  ;;  %v1122_v63 = vadd.f32 %v1121_v7, %v4827_v24  ;;  %1397 = vmatmul.f32.gmra.mxu0 %v4347_v29 }
 0x36c   : > { %v3953_v61 = vmul.f32 0.16666667, %v3697_v1  ;;  %v2933_v57 = vadd.f32 3.0, %v2677_v28  ;;  %1815 = vmatmul.f32.gmra.mxu2 %v4347_v29  ;;  %1606 = vmatmul.f32.gmra.mxu1 %v4348_v16 }
 0x36d   : > { %v3186_v52 = vmax.f32 %v2930_v39, 0.0  ;;  %v1350_v10 = vpop.f32.mrf.mxu0  ;;  %4206 = vst [vmem:[%s5722_s24 + $0x7a8] sm:$0xff] %v3950_v5  ;;  %2024 = vmatmul.f32.gmra.mxu3 %v4348_v16 }
 0x36e   : > { %v3189_v43 = vmax.f32 %v2933_v57, 0.0  ;;  %v1330_v19 = vpop.f32.mrf.mxu3  ;;  %v1351_v40 = vadd.f32 %v1350_v10, %v6326_v14  ;;  %4209 = vst [vmem:[%s5722_s24 + $0x7c0] sm:$0xff] %v3953_v61  ;;  %v4351_v61 = vld [vmem:[%s4672_s14 + $0x120] sm:$0xff] }
 0x36f   : > { %v3442_v55 = vmin.f32 %v3186_v52, 6.0  ;;  %v1331_v12 = vadd.f32 %v1330_v19, %v1122_v63  ;;  %v7144_v63 = vld [vmem:[#allocation98_spill] sm:$0xff] }
 0x370   : > { %v3445_v27 = vmin.f32 %v3189_v43, 6.0  ;;  %v1560_v6 = vadd.f32 %v1559_v15, %v1351_v40  ;;  %v7145_v43 = vld [vmem:[#allocation99_spill] sm:$0xff] }
 0x371   : > { %v3698_v24 = vmul.f32 %v3442_v55, %v2674_v18  ;;  %v2678_v23 = vadd.f32 %v7140_v20, %v1331_v12  ;;  %v1562_v38 = vpop.f32.mrf.mxu1  ;;  %v4352_v40 = vld [vmem:[%s4672_s14 + $0x128] sm:$0xff] }
 0x372   : > { %v3701_v36 = vmul.f32 %v3445_v27, %v2677_v28  ;;  %v2427_v8 = vadd.f32 %v7141_v25, %v1560_v6  ;;  %v1768_v37 = vpop.f32.mrf.mxu2 }
 0x373   : > { %v3954_v17 = vmul.f32 0.16666667, %v3698_v24  ;;  %v2934_v45 = vadd.f32 3.0, %v2678_v23  ;;  %v1769_v51 = vadd.f32 %v1768_v37, %v6333_v21  ;;  %1400 = vmatmul.f32.gmra.mxu0 %v4349_v46 }
 0x374   : > { %v3957_v33 = vmul.f32 0.16666667, %v3701_v36  ;;  %v2683_v49 = vadd.f32 3.0, %v2427_v8  ;;  %1818 = vmatmul.f32.gmra.mxu2 %v4349_v46  ;;  %1609 = vmatmul.f32.gmra.mxu1 %v4350_v59 }
 0x375   : > { %v3190_v34 = vmax.f32 %v2934_v45, 0.0  ;;  %v1353_v22 = vpop.f32.mrf.mxu0  ;;  %4210 = vst [vmem:[%s5722_s24 + $0x7c8] sm:$0xff] %v3954_v17  ;;  %2027 = vmatmul.f32.gmra.mxu3 %v4350_v59 }
 0x376   : > { %v2939_v9 = vmax.f32 %v2683_v49, 0.0  ;;  %v1354_v30 = vadd.f32 %v1353_v22, %v6326_v14  ;;  %v1977_v35 = vpop.f32.mrf.mxu3  ;;  %4213 = vst [vmem:[%s5722_s24 + $0x7e0] sm:$0xff] %v3957_v33  ;;  %v4353_v33 = vld [vmem:[%s4672_s14 + $0x130] sm:$0xff] }
 0x377   : > { %v3446_v31 = vmin.f32 %v3190_v34, 6.0  ;;  %v1978_v54 = vadd.f32 %v1977_v35, %v1769_v51  ;;  %v7146_v51 = vld [vmem:[#allocation100_spill] sm:$0xff]  ;;  %v4354_v35 = vld [vmem:[%s4672_s14 + $0x138] sm:$0xff] }
 0x378   : > { %v3195_v58 = vmin.f32 %v2939_v9, 6.0  ;;  %v1563_v50 = vadd.f32 %v1562_v38, %v1354_v30  ;;  %v7147_v9 = vld [vmem:[#allocation101_spill] sm:$0xff] }
 0x379   : > { %v3702_v32 = vmul.f32 %v3446_v31, %v2678_v23  ;;  %v2428_v60 = vadd.f32 %v7142_v44, %v1978_v54  ;;  %v1565_v5 = vpop.f32.mrf.mxu1 }
 0x37a   : > { %v3451_v62 = vmul.f32 %v3195_v58, %v2427_v8  ;;  %v2431_v48 = vadd.f32 %v7143_v42, %v1563_v50  ;;  %v1771_v2 = vpop.f32.mrf.mxu2 }
 0x37b   : > { %v3958_v41 = vmul.f32 0.16666667, %v3702_v32  ;;  %v2684_v47 = vadd.f32 3.0, %v2428_v60  ;;  %v1772_v26 = vadd.f32 %v1771_v2, %v6333_v21  ;;  %1403 = vmatmul.f32.gmra.mxu0 %v4351_v61 }
 0x37c   : > { %v3707_v4 = vmul.f32 0.16666667, %v3451_v62  ;;  %v2687_v56 = vadd.f32 3.0, %v2431_v48  ;;  %1821 = vmatmul.f32.gmra.mxu2 %v4351_v61  ;;  %1612 = vmatmul.f32.gmra.mxu1 %v4352_v40 }
 0x37d   : > { %v2940_v0 = vmax.f32 %v2684_v47, 0.0  ;;  %v1356_v18 = vpop.f32.mrf.mxu0  ;;  %4214 = vst [vmem:[%s5722_s24 + $0x7e8] sm:$0xff] %v3958_v41  ;;  %2030 = vmatmul.f32.gmra.mxu3 %v4352_v40 }
 0x37e   : > { %v2943_v1 = vmax.f32 %v2687_v56, 0.0  ;;  %v1357_v3 = vadd.f32 %v1356_v18, %v6326_v14  ;;  %v1980_v28 = vpop.f32.mrf.mxu3  ;;  %3963 = vst [vmem:[%s5722_s24 + $0x10] sm:$0xff] %v3707_v4  ;;  %v4355_v4 = vld [vmem:[%s4672_s14 + $0x140] sm:$0xff] }
 0x37f   : > { %v3196_v11 = vmin.f32 %v2940_v0, 6.0  ;;  %v1981_v53 = vadd.f32 %v1980_v28, %v1772_v26  ;;  %v7148_v26 = vld [vmem:[#allocation102_spill] sm:$0xff]  ;;  %v4356_v28 = vld [vmem:[%s4672_s14 + $0x148] sm:$0xff] }
 0x380   : > { %v3199_v39 = vmin.f32 %v2943_v1, 6.0  ;;  %v1566_v7 = vadd.f32 %v1565_v5, %v1357_v3  ;;  %v7149_v1 = vld [vmem:[#allocation103_spill] sm:$0xff] }
 0x381   : > { %v3452_v57 = vmul.f32 %v3196_v11, %v2428_v60  ;;  %v2432_v52 = vadd.f32 %v7144_v63, %v1981_v53  ;;  %v1568_v17 = vpop.f32.mrf.mxu1 }
 0x382   : > { %v3455_v10 = vmul.f32 %v3199_v39, %v2431_v48  ;;  %v2435_v19 = vadd.f32 %v7145_v43, %v1566_v7  ;;  %v1774_v15 = vpop.f32.mrf.mxu2 }
 0x383   : > { %v3708_v55 = vmul.f32 0.16666667, %v3452_v57  ;;  %v2688_v12 = vadd.f32 3.0, %v2432_v52  ;;  %v1775_v29 = vadd.f32 %v1774_v15, %v6333_v21  ;;  %1406 = vmatmul.f32.gmra.mxu0 %v4353_v33 }
 0x384   : > { %v3711_v27 = vmul.f32 0.16666667, %v3455_v10  ;;  %v2691_v6 = vadd.f32 3.0, %v2435_v19  ;;  %1824 = vmatmul.f32.gmra.mxu2 %v4353_v33  ;;  %1615 = vmatmul.f32.gmra.mxu1 %v4354_v35 }
 0x385   : > { %v2944_v24 = vmax.f32 %v2688_v12, 0.0  ;;  %v1359_v20 = vpop.f32.mrf.mxu0  ;;  %3964 = vst [vmem:[%s5722_s24 + $0x18] sm:$0xff] %v3708_v55  ;;  %2033 = vmatmul.f32.gmra.mxu3 %v4354_v35 }
 0x386   : > { %v2947_v23 = vmax.f32 %v2691_v6, 0.0  ;;  %v1360_v36 = vadd.f32 %v1359_v20, %v6326_v14  ;;  %v1983_v25 = vpop.f32.mrf.mxu3  ;;  %3967 = vst [vmem:[%s5722_s24 + $0x30] sm:$0xff] %v3711_v27  ;;  %v4357_v27 = vld [vmem:[%s4672_s14 + $0x150] sm:$0xff] }
 0x387   : > { %v3200_v8 = vmin.f32 %v2944_v24, 6.0  ;;  %v1984_v16 = vadd.f32 %v1983_v25, %v1775_v29  ;;  %v7150_v29 = vld [vmem:[#allocation104_spill] sm:$0xff]  ;;  %v4358_v25 = vld [vmem:[%s4672_s14 + $0x158] sm:$0xff] }
 0x388   : > { %v3203_v45 = vmin.f32 %v2947_v23, 6.0  ;;  %v1569_v37 = vadd.f32 %v1568_v17, %v1360_v36  ;;  %v7151_v23 = vld [vmem:[#allocation105_spill] sm:$0xff] }
 0x389   : > { %v3456_v49 = vmul.f32 %v3200_v8, %v2432_v52  ;;  %v2436_v34 = vadd.f32 %v7146_v51, %v1984_v16  ;;  %v1571_v41 = vpop.f32.mrf.mxu1 }
 0x38a   : > { %v3459_v22 = vmul.f32 %v3203_v45, %v2435_v19  ;;  %v2439_v30 = vadd.f32 %v7147_v9, %v1569_v37  ;;  %v1777_v38 = vpop.f32.mrf.mxu2 }
 0x38b   : > { %v3712_v31 = vmul.f32 0.16666667, %v3456_v49  ;;  %v2692_v54 = vadd.f32 3.0, %v2436_v34  ;;  %v1778_v46 = vadd.f32 %v1777_v38, %v6333_v21  ;;  %1409 = vmatmul.f32.gmra.mxu0 %v4355_v4 }
 0x38c   : > { %v3715_v58 = vmul.f32 0.16666667, %v3459_v22  ;;  %v2695_v50 = vadd.f32 3.0, %v2439_v30  ;;  %1827 = vmatmul.f32.gmra.mxu2 %v4355_v4  ;;  %1618 = vmatmul.f32.gmra.mxu1 %v4356_v28 }
 0x38d   : > { %v2948_v32 = vmax.f32 %v2692_v54, 0.0  ;;  %v1362_v44 = vpop.f32.mrf.mxu0  ;;  %3968 = vst [vmem:[%s5722_s24 + $0x38] sm:$0xff] %v3712_v31  ;;  %2036 = vmatmul.f32.gmra.mxu3 %v4356_v28 }
 0x38e   : > { %v2951_v60 = vmax.f32 %v2695_v50, 0.0  ;;  %v1363_v62 = vadd.f32 %v1362_v44, %v6326_v14  ;;  %v1986_v42 = vpop.f32.mrf.mxu3  ;;  %3971 = vst [vmem:[%s5722_s24 + $0x50] sm:$0xff] %v3715_v58  ;;  %v4359_v58 = vld [vmem:[%s4672_s14 + $0x160] sm:$0xff] }
 0x38f   : > { %v3204_v48 = vmin.f32 %v2948_v32, 6.0  ;;  %v1987_v59 = vadd.f32 %v1986_v42, %v1778_v46  ;;  %v7152_v46 = vld [vmem:[#allocation106_spill] sm:$0xff]  ;;  %v4360_v42 = vld [vmem:[%s4672_s14 + $0x168] sm:$0xff] }
 0x390   : > { %v3207_v47 = vmin.f32 %v2951_v60, 6.0  ;;  %v1572_v2 = vadd.f32 %v1571_v41, %v1363_v62  ;;  %v7153_v60 = vld [vmem:[#allocation107_spill] sm:$0xff] }
 0x391   : > { %v3460_v56 = vmul.f32 %v3204_v48, %v2436_v34  ;;  %v2440_v0 = vadd.f32 %v7148_v26, %v1987_v59  ;;  %v1574_v55 = vpop.f32.mrf.mxu1 }
 0x392   : > { %v3463_v18 = vmul.f32 %v3207_v47, %v2439_v30  ;;  %v2443_v3 = vadd.f32 %v7149_v1, %v1572_v2  ;;  %v1780_v5 = vpop.f32.mrf.mxu2 }
 0x393   : > { %v3716_v11 = vmul.f32 0.16666667, %v3460_v56  ;;  %v2696_v53 = vadd.f32 3.0, %v2440_v0  ;;  %v1781_v61 = vadd.f32 %v1780_v5, %v6333_v21  ;;  %1412 = vmatmul.f32.gmra.mxu0 %v4357_v27 }
 0x394   : > { %v3719_v39 = vmul.f32 0.16666667, %v3463_v18  ;;  %v2699_v7 = vadd.f32 3.0, %v2443_v3  ;;  %1830 = vmatmul.f32.gmra.mxu2 %v4357_v27  ;;  %1621 = vmatmul.f32.gmra.mxu1 %v4358_v25 }
 0x395   : > { %v2952_v57 = vmax.f32 %v2696_v53, 0.0  ;;  %v1365_v63 = vpop.f32.mrf.mxu0  ;;  %3972 = vst [vmem:[%s5722_s24 + $0x58] sm:$0xff] %v3716_v11  ;;  %2039 = vmatmul.f32.gmra.mxu3 %v4358_v25 }
 0x396   : > { %v2955_v52 = vmax.f32 %v2699_v7, 0.0  ;;  %v1366_v10 = vadd.f32 %v1365_v63, %v6326_v14  ;;  %v1989_v43 = vpop.f32.mrf.mxu3  ;;  %3975 = vst [vmem:[%s5722_s24 + $0x70] sm:$0xff] %v3719_v39  ;;  %v4361_v39 = vld [vmem:[%s4672_s14 + $0x170] sm:$0xff] }
 0x397   : > { %v3208_v19 = vmin.f32 %v2952_v57, 6.0  ;;  %v1990_v40 = vadd.f32 %v1989_v43, %v1781_v61  ;;  %v7154_v61 = vld [vmem:[#allocation108_spill] sm:$0xff]  ;;  %v4362_v43 = vld [vmem:[%s4672_s14 + $0x178] sm:$0xff] }
 0x398   : > { %v3211_v12 = vmin.f32 %v2955_v52, 6.0  ;;  %v1575_v15 = vadd.f32 %v1574_v55, %v1366_v10  ;;  %v7155_v52 = vld [vmem:[#allocation109_spill] sm:$0xff] }
 0x399   : > { %v3464_v6 = vmul.f32 %v3208_v19, %v2440_v0  ;;  %v2444_v24 = vadd.f32 %v7150_v29, %v1990_v40  ;;  %v1577_v31 = vpop.f32.mrf.mxu1 }
 0x39a   : > { %v3467_v20 = vmul.f32 %v3211_v12, %v2443_v3  ;;  %v2447_v36 = vadd.f32 %v7151_v23, %v1575_v15  ;;  %v1783_v17 = vpop.f32.mrf.mxu2 }
 0x39b   : > { %v3720_v8 = vmul.f32 0.16666667, %v3464_v6  ;;  %v2700_v16 = vadd.f32 3.0, %v2444_v24  ;;  %v1784_v33 = vadd.f32 %v1783_v17, %v6333_v21  ;;  %1415 = vmatmul.f32.gmra.mxu0 %v4359_v58 }
 0x39c   : > { %v3723_v45 = vmul.f32 0.16666667, %v3467_v20  ;;  %v2703_v37 = vadd.f32 3.0, %v2447_v36  ;;  %1833 = vmatmul.f32.gmra.mxu2 %v4359_v58  ;;  %1624 = vmatmul.f32.gmra.mxu1 %v4360_v42 }
 0x39d   : > { %v2956_v49 = vmax.f32 %v2700_v16, 0.0  ;;  %v1368_v51 = vpop.f32.mrf.mxu0  ;;  %3976 = vst [vmem:[%s5722_s24 + $0x78] sm:$0xff] %v3720_v8  ;;  %2042 = vmatmul.f32.gmra.mxu3 %v4360_v42 }
 0x39e   : > { %v2959_v34 = vmax.f32 %v2703_v37, 0.0  ;;  %v1369_v22 = vadd.f32 %v1368_v51, %v6326_v14  ;;  %v1992_v9 = vpop.f32.mrf.mxu3  ;;  %3979 = vst [vmem:[%s5722_s24 + $0x90] sm:$0xff] %v3723_v45  ;;  %v4363_v45 = vld [vmem:[%s4672_s14 + $0x180] sm:$0xff] }
 0x39f   : > { %v3212_v30 = vmin.f32 %v2956_v49, 6.0  ;;  %v1993_v35 = vadd.f32 %v1992_v9, %v1784_v33  ;;  %v7156_v33 = vld [vmem:[#allocation110_spill] sm:$0xff]  ;;  %v4364_v9 = vld [vmem:[%s4672_s14 + $0x188] sm:$0xff] }
 0x3a0   : > { %v3215_v54 = vmin.f32 %v2959_v34, 6.0  ;;  %v1578_v38 = vadd.f32 %v1577_v31, %v1369_v22  ;;  %v7157_v34 = vld [vmem:[#allocation111_spill] sm:$0xff] }
 0x3a1   : > { %v3468_v50 = vmul.f32 %v3212_v30, %v2444_v24  ;;  %v2448_v32 = vadd.f32 %v7152_v46, %v1993_v35  ;;  %v1580_v11 = vpop.f32.mrf.mxu1 }
 0x3a2   : > { %v3471_v44 = vmul.f32 %v3215_v54, %v2447_v36  ;;  %v2451_v62 = vadd.f32 %v7153_v60, %v1578_v38  ;;  %v1786_v41 = vpop.f32.mrf.mxu2 }
 0x3a3   : > { %v3724_v48 = vmul.f32 0.16666667, %v3468_v50  ;;  %v2704_v59 = vadd.f32 3.0, %v2448_v32  ;;  %v1787_v4 = vadd.f32 %v1786_v41, %v6333_v21  ;;  %1418 = vmatmul.f32.gmra.mxu0 %v4361_v39 }
 0x3a4   : > { %v3727_v47 = vmul.f32 0.16666667, %v3471_v44  ;;  %v2707_v2 = vadd.f32 3.0, %v2451_v62  ;;  %1836 = vmatmul.f32.gmra.mxu2 %v4361_v39  ;;  %1627 = vmatmul.f32.gmra.mxu1 %v4362_v43 }
 0x3a5   : > { %v2960_v56 = vmax.f32 %v2704_v59, 0.0  ;;  %v1371_v26 = vpop.f32.mrf.mxu0  ;;  %3980 = vst [vmem:[%s5722_s24 + $0x98] sm:$0xff] %v3724_v48  ;;  %2045 = vmatmul.f32.gmra.mxu3 %v4362_v43 }
 0x3a6   : > { %v2963_v0 = vmax.f32 %v2707_v2, 0.0  ;;  %v1372_v18 = vadd.f32 %v1371_v26, %v6326_v14  ;;  %v1995_v1 = vpop.f32.mrf.mxu3  ;;  %3983 = vst [vmem:[%s5722_s24 + $0xb0] sm:$0xff] %v3727_v47  ;;  %v4365_v47 = vld [vmem:[%s4672_s14 + $0x190] sm:$0xff] }
 0x3a7   : > { %v3216_v3 = vmin.f32 %v2960_v56, 6.0  ;;  %v1996_v28 = vadd.f32 %v1995_v1, %v1787_v4  ;;  %v7158_v4 = vld [vmem:[#allocation112_spill] sm:$0xff]  ;;  %v4366_v1 = vld [vmem:[%s4672_s14 + $0x198] sm:$0xff] }
 0x3a8   : > { %v3219_v53 = vmin.f32 %v2963_v0, 6.0  ;;  %v1581_v5 = vadd.f32 %v1580_v11, %v1372_v18  ;;  %v7159_v0 = vld [vmem:[#allocation113_spill] sm:$0xff] }
 0x3a9   : > { %v3472_v7 = vmul.f32 %v3216_v3, %v2448_v32  ;;  %v2452_v57 = vadd.f32 %v7154_v61, %v1996_v28  ;;  %v1583_v8 = vpop.f32.mrf.mxu1 }
 0x3aa   : > { %v3475_v63 = vmul.f32 %v3219_v53, %v2451_v62  ;;  %v2455_v10 = vadd.f32 %v7155_v52, %v1581_v5  ;;  %v1789_v55 = vpop.f32.mrf.mxu2 }
 0x3ab   : > { %v3728_v19 = vmul.f32 0.16666667, %v3472_v7  ;;  %v2708_v40 = vadd.f32 3.0, %v2452_v57  ;;  %v1790_v27 = vadd.f32 %v1789_v55, %v6333_v21  ;;  %1421 = vmatmul.f32.gmra.mxu0 %v4363_v45 }
 0x3ac   : > { %v3731_v12 = vmul.f32 0.16666667, %v3475_v63  ;;  %v2711_v15 = vadd.f32 3.0, %v2455_v10  ;;  %1839 = vmatmul.f32.gmra.mxu2 %v4363_v45  ;;  %1630 = vmatmul.f32.gmra.mxu1 %v4364_v9 }
 0x3ad   : > { %v2964_v6 = vmax.f32 %v2708_v40, 0.0  ;;  %v1374_v29 = vpop.f32.mrf.mxu0  ;;  %3984 = vst [vmem:[%s5722_s24 + $0xb8] sm:$0xff] %v3728_v19  ;;  %2048 = vmatmul.f32.gmra.mxu3 %v4364_v9 }
 0x3ae   : > { %v2967_v24 = vmax.f32 %v2711_v15, 0.0  ;;  %v1375_v20 = vadd.f32 %v1374_v29, %v6326_v14  ;;  %v1998_v23 = vpop.f32.mrf.mxu3  ;;  %3987 = vst [vmem:[%s5722_s24 + $0xd0] sm:$0xff] %v3731_v12  ;;  %v4367_v12 = vld [vmem:[%s4672_s14 + $0x1a0] sm:$0xff] }
 0x3af   : > { %v3220_v36 = vmin.f32 %v2964_v6, 6.0  ;;  %v1999_v25 = vadd.f32 %v1998_v23, %v1790_v27  ;;  %v7160_v27 = vld [vmem:[#allocation114_spill] sm:$0xff]  ;;  %v4368_v23 = vld [vmem:[%s4672_s14 + $0x1a8] sm:$0xff] }
 0x3b0   : > { %v3223_v16 = vmin.f32 %v2967_v24, 6.0  ;;  %v1584_v17 = vadd.f32 %v1583_v8, %v1375_v20  ;;  %v7161_v24 = vld [vmem:[#allocation115_spill] sm:$0xff] }
 0x3b1   : > { %v3476_v37 = vmul.f32 %v3220_v36, %v2452_v57  ;;  %v2456_v49 = vadd.f32 %v7156_v33, %v1999_v25  ;;  %v1586_v48 = vpop.f32.mrf.mxu1 }
 0x3b2   : > { %v3479_v51 = vmul.f32 %v3223_v16, %v2455_v10  ;;  %v2459_v22 = vadd.f32 %v7157_v34, %v1584_v17  ;;  %v1792_v31 = vpop.f32.mrf.mxu2 }
 0x3b3   : > { %v3732_v30 = vmul.f32 0.16666667, %v3476_v37  ;;  %v2712_v35 = vadd.f32 3.0, %v2456_v49  ;;  %v1793_v58 = vadd.f32 %v1792_v31, %v6333_v21  ;;  %1424 = vmatmul.f32.gmra.mxu0 %v4365_v47 }
 0x3b4   : > { %v3735_v54 = vmul.f32 0.16666667, %v3479_v51  ;;  %v2715_v38 = vadd.f32 3.0, %v2459_v22  ;;  %1842 = vmatmul.f32.gmra.mxu2 %v4365_v47  ;;  %1633 = vmatmul.f32.gmra.mxu1 %v4366_v1 }
 0x3b5   : > { %v2968_v50 = vmax.f32 %v2712_v35, 0.0  ;;  %v1377_v46 = vpop.f32.mrf.mxu0  ;;  %3988 = vst [vmem:[%s5722_s24 + $0xd8] sm:$0xff] %v3732_v30  ;;  %2051 = vmatmul.f32.gmra.mxu3 %v4366_v1 }
 0x3b6   : > { %v2971_v32 = vmax.f32 %v2715_v38, 0.0  ;;  %v1378_v44 = vadd.f32 %v1377_v46, %v6326_v14  ;;  %v2001_v60 = vpop.f32.mrf.mxu3  ;;  %3991 = vst [vmem:[%s5722_s24 + $0xf0] sm:$0xff] %v3735_v54  ;;  %v4369_v54 = vld [vmem:[%s4672_s14 + $0x1b0] sm:$0xff] }
 0x3b7   : > { %v3224_v62 = vmin.f32 %v2968_v50, 6.0  ;;  %v2002_v42 = vadd.f32 %v2001_v60, %v1793_v58  ;;  %v7162_v58 = vld [vmem:[#allocation116_spill] sm:$0xff]  ;;  %v4370_v60 = vld [vmem:[%s4672_s14 + $0x1b8] sm:$0xff] }
 0x3b8   : > { %v3227_v59 = vmin.f32 %v2971_v32, 6.0  ;;  %v1587_v41 = vadd.f32 %v1586_v48, %v1378_v44  ;;  %v7163_v32 = vld [vmem:[#allocation117_spill] sm:$0xff] }
 0x3b9   : > { %v3480_v2 = vmul.f32 %v3224_v62, %v2456_v49  ;;  %v2460_v56 = vadd.f32 %v7158_v4, %v2002_v42  ;;  %v1589_v19 = vpop.f32.mrf.mxu1 }
 0x3ba   : > { %v3483_v26 = vmul.f32 %v3227_v59, %v2459_v22  ;;  %v2463_v18 = vadd.f32 %v7159_v0, %v1587_v41  ;;  %v1795_v11 = vpop.f32.mrf.mxu2 }
 0x3bb   : > { %v3736_v3 = vmul.f32 0.16666667, %v3480_v2  ;;  %v2716_v28 = vadd.f32 3.0, %v2460_v56  ;;  %v1796_v39 = vadd.f32 %v1795_v11, %v6333_v21  ;;  %1427 = vmatmul.f32.gmra.mxu0 %v4367_v12 }
 0x3bc   : > { %v3739_v53 = vmul.f32 0.16666667, %v3483_v26  ;;  %v2719_v5 = vadd.f32 3.0, %v2463_v18  ;;  %1845 = vmatmul.f32.gmra.mxu2 %v4367_v12  ;;  %1636 = vmatmul.f32.gmra.mxu1 %v4368_v23 }
 0x3bd   : > { %v2972_v7 = vmax.f32 %v2716_v28, 0.0  ;;  %v1380_v61 = vpop.f32.mrf.mxu0  ;;  %3992 = vst [vmem:[%s5722_s24 + $0xf8] sm:$0xff] %v3736_v3  ;;  %2054 = vmatmul.f32.gmra.mxu3 %v4368_v23 }
 0x3be   : > { %v2975_v57 = vmax.f32 %v2719_v5, 0.0  ;;  %v1381_v63 = vadd.f32 %v1380_v61, %v6326_v14  ;;  %v2004_v52 = vpop.f32.mrf.mxu3  ;;  %3995 = vst [vmem:[%s5722_s24 + $0x110] sm:$0xff] %v3739_v53  ;;  %v4371_v53 = vld [vmem:[%s4672_s14 + $0x1c0] sm:$0xff] }
 0x3bf   : > { %v3228_v10 = vmin.f32 %v2972_v7, 6.0  ;;  %v2005_v43 = vadd.f32 %v2004_v52, %v1796_v39  ;;  %v7164_v39 = vld [vmem:[#allocation118_spill] sm:$0xff]  ;;  %v4372_v52 = vld [vmem:[%s4672_s14 + $0x1c8] sm:$0xff] }
 0x3c0   : > { %v3231_v40 = vmin.f32 %v2975_v57, 6.0  ;;  %v1590_v55 = vadd.f32 %v1589_v19, %v1381_v63  ;;  %v7165_v57 = vld [vmem:[#allocation119_spill] sm:$0xff] }
 0x3c1   : > { %v3484_v15 = vmul.f32 %v3228_v10, %v2460_v56  ;;  %v2464_v6 = vadd.f32 %v7160_v27, %v2005_v43  ;;  %v1592_v30 = vpop.f32.mrf.mxu1 }
 0x3c2   : > { %v3487_v29 = vmul.f32 %v3231_v40, %v2463_v18  ;;  %v2467_v20 = vadd.f32 %v7161_v24, %v1590_v55  ;;  %v1798_v8 = vpop.f32.mrf.mxu2 }
 0x3c3   : > { %v3740_v36 = vmul.f32 0.16666667, %v3484_v15  ;;  %v2720_v25 = vadd.f32 3.0, %v2464_v6  ;;  %v1799_v45 = vadd.f32 %v1798_v8, %v6333_v21  ;;  %1430 = vmatmul.f32.gmra.mxu0 %v4369_v54 }
 0x3c4   : > { %v3743_v16 = vmul.f32 0.16666667, %v3487_v29  ;;  %v2723_v17 = vadd.f32 3.0, %v2467_v20  ;;  %1848 = vmatmul.f32.gmra.mxu2 %v4369_v54  ;;  %1639 = vmatmul.f32.gmra.mxu1 %v4370_v60 }
 0x3c5   : > { %v2976_v37 = vmax.f32 %v2720_v25, 0.0  ;;  %v1383_v33 = vpop.f32.mrf.mxu0  ;;  %3996 = vst [vmem:[%s5722_s24 + $0x118] sm:$0xff] %v3740_v36  ;;  %2057 = vmatmul.f32.gmra.mxu3 %v4370_v60 }
 0x3c6   : > { %v2979_v49 = vmax.f32 %v2723_v17, 0.0  ;;  %v1384_v51 = vadd.f32 %v1383_v33, %v6326_v14  ;;  %v2007_v34 = vpop.f32.mrf.mxu3  ;;  %3999 = vst [vmem:[%s5722_s24 + $0x130] sm:$0xff] %v3743_v16  ;;  %v4373_v16 = vld [vmem:[%s4672_s14 + $0x1d0] sm:$0xff] }
 0x3c7   : > { %v3232_v22 = vmin.f32 %v2976_v37, 6.0  ;;  %v2008_v9 = vadd.f32 %v2007_v34, %v1799_v45  ;;  %v7166_v45 = vld [vmem:[#allocation120_spill] sm:$0xff]  ;;  %v4374_v34 = vld [vmem:[%s4672_s14 + $0x1d8] sm:$0xff] }
 0x3c8   : > { %v3235_v35 = vmin.f32 %v2979_v49, 6.0  ;;  %v1593_v31 = vadd.f32 %v1592_v30, %v1384_v51  ;;  %v7167_v49 = vld [vmem:[#allocation121_spill] sm:$0xff] }
 0x3c9   : > { %v3488_v38 = vmul.f32 %v3232_v22, %v2464_v6  ;;  %v2468_v50 = vadd.f32 %v7162_v58, %v2008_v9  ;;  %v1595_v3 = vpop.f32.mrf.mxu1 }
 0x3ca   : > { %v3491_v46 = vmul.f32 %v3235_v35, %v2467_v20  ;;  %v2471_v44 = vadd.f32 %v7163_v32, %v1593_v31  ;;  %v1801_v48 = vpop.f32.mrf.mxu2 }
 0x3cb   : > { %v3744_v62 = vmul.f32 0.16666667, %v3488_v38  ;;  %v2724_v42 = vadd.f32 3.0, %v2468_v50  ;;  %v1802_v47 = vadd.f32 %v1801_v48, %v6333_v21  ;;  %1433 = vmatmul.f32.gmra.mxu0 %v4371_v53 }
 0x3cc   : > { %v3747_v59 = vmul.f32 0.16666667, %v3491_v46  ;;  %v2727_v41 = vadd.f32 3.0, %v2471_v44  ;;  %1851 = vmatmul.f32.gmra.mxu2 %v4371_v53  ;;  %1642 = vmatmul.f32.gmra.mxu1 %v4372_v52 }
 0x3cd   : > { %v2980_v2 = vmax.f32 %v2724_v42, 0.0  ;;  %v1386_v4 = vpop.f32.mrf.mxu0  ;;  %4000 = vst [vmem:[%s5722_s24 + $0x138] sm:$0xff] %v3744_v62  ;;  %2060 = vmatmul.f32.gmra.mxu3 %v4372_v52 }
 0x3ce   : > { %v2983_v56 = vmax.f32 %v2727_v41, 0.0  ;;  %v1387_v26 = vadd.f32 %v1386_v4, %v6326_v14  ;;  %v2010_v0 = vpop.f32.mrf.mxu3  ;;  %4003 = vst [vmem:[%s5722_s24 + $0x150] sm:$0xff] %v3747_v59  ;;  %v4375_v59 = vld [vmem:[%s4672_s14 + $0x1e0] sm:$0xff] }
 0x3cf   : > { %v3236_v18 = vmin.f32 %v2980_v2, 6.0  ;;  %v2011_v1 = vadd.f32 %v2010_v0, %v1802_v47  ;;  %v7168_v47 = vld [vmem:[#allocation122_spill] sm:$0xff]  ;;  %v4376_v0 = vld [vmem:[%s4672_s14 + $0x1e8] sm:$0xff] }
 0x3d0   : > { %v3239_v28 = vmin.f32 %v2983_v56, 6.0  ;;  %v1596_v11 = vadd.f32 %v1595_v3, %v1387_v26  ;;  %v7169_v56 = vld [vmem:[#allocation123_spill] sm:$0xff] }
 0x3d1   : > { %v3492_v5 = vmul.f32 %v3236_v18, %v2468_v50  ;;  %v2472_v7 = vadd.f32 %v7164_v39, %v2011_v1  ;;  %v1598_v36 = vpop.f32.mrf.mxu1 }
 0x3d2   : > { %v3495_v61 = vmul.f32 %v3239_v28, %v2471_v44  ;;  %v2475_v63 = vadd.f32 %v7165_v57, %v1596_v11  ;;  %v1804_v19 = vpop.f32.mrf.mxu2 }
 0x3d3   : > { %v3748_v10 = vmul.f32 0.16666667, %v3492_v5  ;;  %v2728_v43 = vadd.f32 3.0, %v2472_v7  ;;  %v1805_v12 = vadd.f32 %v1804_v19, %v6333_v21  ;;  %1436 = vmatmul.f32.gmra.mxu0 %v4373_v16 }
 0x3d4   : > { %v3751_v40 = vmul.f32 0.16666667, %v3495_v61  ;;  %v2731_v55 = vadd.f32 3.0, %v2475_v63  ;;  %1854 = vmatmul.f32.gmra.mxu2 %v4373_v16  ;;  %1645 = vmatmul.f32.gmra.mxu1 %v4374_v34 }
 0x3d5   : > { %v2984_v15 = vmax.f32 %v2728_v43, 0.0  ;;  %v1389_v27 = vpop.f32.mrf.mxu0  ;;  %4004 = vst [vmem:[%s5722_s24 + $0x158] sm:$0xff] %v3748_v10  ;;  %2063 = vmatmul.f32.gmra.mxu3 %v4374_v34 }
 0x3d6   : > { %v2987_v6 = vmax.f32 %v2731_v55, 0.0  ;;  %v1390_v29 = vadd.f32 %v1389_v27, %v6326_v14  ;;  %v2013_v24 = vpop.f32.mrf.mxu3  ;;  %4007 = vst [vmem:[%s5722_s24 + $0x170] sm:$0xff] %v3751_v40  ;;  %v4377_v40 = vld [vmem:[%s4672_s14 + $0x1f0] sm:$0xff] }
 0x3d7   : > { %v3240_v20 = vmin.f32 %v2984_v15, 6.0  ;;  %v2014_v23 = vadd.f32 %v2013_v24, %v1805_v12  ;;  %v7170_v12 = vld [vmem:[#allocation124_spill] sm:$0xff]  ;;  %v4378_v24 = vld [vmem:[%s4672_s14 + $0x1f8] sm:$0xff] }
 0x3d8   : > { %v3243_v25 = vmin.f32 %v2987_v6, 6.0  ;;  %v1599_v8 = vadd.f32 %v1598_v36, %v1390_v29  ;;  %v7171_v6 = vld [vmem:[#allocation125_spill] sm:$0xff] }
 0x3d9   : > { %v3496_v17 = vmul.f32 %v3240_v20, %v2472_v7  ;;  %v2476_v37 = vadd.f32 %v7166_v45, %v2014_v23  ;;  %v1601_v62 = vpop.f32.mrf.mxu1 }
 0x3da   : > { %v3499_v33 = vmul.f32 %v3243_v25, %v2475_v63  ;;  %v2479_v51 = vadd.f32 %v7167_v49, %v1599_v8  ;;  %v1807_v30 = vpop.f32.mrf.mxu2 }
 0x3db   : > { %v3752_v22 = vmul.f32 0.16666667, %v3496_v17  ;;  %v2732_v9 = vadd.f32 3.0, %v2476_v37  ;;  %v1808_v54 = vadd.f32 %v1807_v30, %v6333_v21  ;;  %1439 = vmatmul.f32.gmra.mxu0 %v4375_v59 }
 0x3dc   : > { %v3755_v35 = vmul.f32 0.16666667, %v3499_v33  ;;  %v2735_v31 = vadd.f32 3.0, %v2479_v51  ;;  %1857 = vmatmul.f32.gmra.mxu2 %v4375_v59  ;;  %1648 = vmatmul.f32.gmra.mxu1 %v4376_v0 }
 0x3dd   : > { %v2988_v38 = vmax.f32 %v2732_v9, 0.0  ;;  %v1392_v58 = vpop.f32.mrf.mxu0  ;;  %4008 = vst [vmem:[%s5722_s24 + $0x178] sm:$0xff] %v3752_v22  ;;  %2066 = vmatmul.f32.gmra.mxu3 %v4376_v0 }
 0x3de   : > { %v2991_v50 = vmax.f32 %v2735_v31, 0.0  ;;  %v1393_v46 = vadd.f32 %v1392_v58, %v6326_v14  ;;  %v2016_v32 = vpop.f32.mrf.mxu3  ;;  %4011 = vst [vmem:[%s5722_s24 + $0x190] sm:$0xff] %v3755_v35  ;;  %v4379_v35 = vld [vmem:[%s4672_s14 + $0x200] sm:$0xff] }
 0x3df   : > { %v3244_v44 = vmin.f32 %v2988_v38, 6.0  ;;  %v2017_v60 = vadd.f32 %v2016_v32, %v1808_v54  ;;  %v7172_v54 = vld [vmem:[#allocation126_spill] sm:$0xff]  ;;  %v4380_v32 = vld [vmem:[%s4672_s14 + $0x208] sm:$0xff] }
 0x3e0   : > { %v3247_v42 = vmin.f32 %v2991_v50, 6.0  ;;  %v1602_v48 = vadd.f32 %v1601_v62, %v1393_v46  ;;  %v7173_v50 = vld [vmem:[#allocation127_spill] sm:$0xff] }
 0x3e1   : > { %v3500_v41 = vmul.f32 %v3244_v44, %v2476_v37  ;;  %v2480_v2 = vadd.f32 %v7168_v47, %v2017_v60  ;;  %v1604_v10 = vpop.f32.mrf.mxu1 }
 0x3e2   : > { %v3503_v4 = vmul.f32 %v3247_v42, %v2479_v51  ;;  %v2483_v26 = vadd.f32 %v7169_v56, %v1602_v48  ;;  %v1810_v3 = vpop.f32.mrf.mxu2 }
 0x3e3   : > { %v3756_v18 = vmul.f32 0.16666667, %v3500_v41  ;;  %v2736_v1 = vadd.f32 3.0, %v2480_v2  ;;  %v1811_v53 = vadd.f32 %v1810_v3, %v6333_v21  ;;  %1442 = vmatmul.f32.gmra.mxu0 %v4377_v40 }
 0x3e4   : > { %v3759_v28 = vmul.f32 0.16666667, %v3503_v4  ;;  %v2739_v11 = vadd.f32 3.0, %v2483_v26  ;;  %1860 = vmatmul.f32.gmra.mxu2 %v4377_v40  ;;  %1651 = vmatmul.f32.gmra.mxu1 %v4378_v24 }
 0x3e5   : > { %v2992_v5 = vmax.f32 %v2736_v1, 0.0  ;;  %v1395_v39 = vpop.f32.mrf.mxu0  ;;  %4012 = vst [vmem:[%s5722_s24 + $0x198] sm:$0xff] %v3756_v18  ;;  %2069 = vmatmul.f32.gmra.mxu3 %v4378_v24 }
 0x3e6   : > { %v2995_v7 = vmax.f32 %v2739_v11, 0.0  ;;  %v1396_v61 = vadd.f32 %v1395_v39, %v6326_v14  ;;  %v2019_v57 = vpop.f32.mrf.mxu3  ;;  %4015 = vst [vmem:[%s5722_s24 + $0x1b0] sm:$0xff] %v3759_v28  ;;  %v4381_v28 = vld [vmem:[%s4672_s14 + $0x210] sm:$0xff] }
 0x3e7   : > { %v3248_v63 = vmin.f32 %v2992_v5, 6.0  ;;  %v2020_v52 = vadd.f32 %v2019_v57, %v1811_v53  ;;  %v7174_v53 = vld [vmem:[#allocation128_spill] sm:$0xff]  ;;  %v4382_v57 = vld [vmem:[%s4672_s14 + $0x218] sm:$0xff] }
 0x3e8   : > { %v3251_v43 = vmin.f32 %v2995_v7, 6.0  ;;  %v1605_v19 = vadd.f32 %v1604_v10, %v1396_v61  ;;  %v7175_v7 = vld [vmem:[#allocation129_spill] sm:$0xff] }
 0x3e9   : > { %v3504_v55 = vmul.f32 %v3248_v63, %v2480_v2  ;;  %v2484_v15 = vadd.f32 %v7170_v12, %v2020_v52  ;;  %v1607_v22 = vpop.f32.mrf.mxu1 }
 0x3ea   : > { %v3507_v27 = vmul.f32 %v3251_v43, %v2483_v26  ;;  %v2487_v29 = vadd.f32 %v7171_v6, %v1605_v19  ;;  %v1813_v36 = vpop.f32.mrf.mxu2 }
 0x3eb   : > { %v3760_v20 = vmul.f32 0.16666667, %v3504_v55  ;;  %v2740_v23 = vadd.f32 3.0, %v2484_v15  ;;  %v1814_v16 = vadd.f32 %v1813_v36, %v6333_v21  ;;  %1445 = vmatmul.f32.gmra.mxu0 %v4379_v35 }
 0x3ec   : > { %v3763_v25 = vmul.f32 0.16666667, %v3507_v27  ;;  %v2743_v8 = vadd.f32 3.0, %v2487_v29  ;;  %1863 = vmatmul.f32.gmra.mxu2 %v4379_v35  ;;  %1654 = vmatmul.f32.gmra.mxu1 %v4380_v32 }
 0x3ed   : > { %v2996_v17 = vmax.f32 %v2740_v23, 0.0  ;;  %v1398_v45 = vpop.f32.mrf.mxu0  ;;  %4016 = vst [vmem:[%s5722_s24 + $0x1b8] sm:$0xff] %v3760_v20  ;;  %2072 = vmatmul.f32.gmra.mxu3 %v4380_v32 }
 0x3ee   : > { %v2999_v37 = vmax.f32 %v2743_v8, 0.0  ;;  %v1399_v33 = vadd.f32 %v1398_v45, %v6326_v14  ;;  %v2022_v49 = vpop.f32.mrf.mxu3  ;;  %4019 = vst [vmem:[%s5722_s24 + $0x1d0] sm:$0xff] %v3763_v25  ;;  %v4383_v25 = vld [vmem:[%s4672_s14 + $0x220] sm:$0xff] }
 0x3ef   : > { %v3252_v51 = vmin.f32 %v2996_v17, 6.0  ;;  %v2023_v34 = vadd.f32 %v2022_v49, %v1814_v16  ;;  %v7176_v16 = vld [vmem:[#allocation130_spill] sm:$0xff]  ;;  %v4384_v49 = vld [vmem:[%s4672_s14 + $0x228] sm:$0xff] }
 0x3f0   : > { %v3255_v9 = vmin.f32 %v2999_v37, 6.0  ;;  %v1608_v30 = vadd.f32 %v1607_v22, %v1399_v33  ;;  %v7177_v37 = vld [vmem:[#allocation131_spill] sm:$0xff] }
 0x3f1   : > { %v3508_v31 = vmul.f32 %v3252_v51, %v2484_v15  ;;  %v2488_v38 = vadd.f32 %v7172_v54, %v2023_v34  ;;  %v1610_v18 = vpop.f32.mrf.mxu1 }
 0x3f2   : > { %v3511_v58 = vmul.f32 %v3255_v9, %v2487_v29  ;;  %v2491_v46 = vadd.f32 %v7173_v50, %v1608_v30  ;;  %v1816_v62 = vpop.f32.mrf.mxu2 }
 0x3f3   : > { %v3764_v44 = vmul.f32 0.16666667, %v3508_v31  ;;  %v2744_v60 = vadd.f32 3.0, %v2488_v38  ;;  %v1817_v59 = vadd.f32 %v1816_v62, %v6333_v21  ;;  %1448 = vmatmul.f32.gmra.mxu0 %v4381_v28 }
 0x3f4   : > { %v3767_v42 = vmul.f32 0.16666667, %v3511_v58  ;;  %v2747_v48 = vadd.f32 3.0, %v2491_v46  ;;  %1866 = vmatmul.f32.gmra.mxu2 %v4381_v28  ;;  %1657 = vmatmul.f32.gmra.mxu1 %v4382_v57 }
 0x3f5   : > { %v3000_v41 = vmax.f32 %v2744_v60, 0.0  ;;  %v1401_v47 = vpop.f32.mrf.mxu0  ;;  %4020 = vst [vmem:[%s5722_s24 + $0x1d8] sm:$0xff] %v3764_v44  ;;  %2075 = vmatmul.f32.gmra.mxu3 %v4382_v57 }
 0x3f6   : > { %v3003_v2 = vmax.f32 %v2747_v48, 0.0  ;;  %v1402_v4 = vadd.f32 %v1401_v47, %v6326_v14  ;;  %v2025_v56 = vpop.f32.mrf.mxu3  ;;  %4023 = vst [vmem:[%s5722_s24 + $0x1f0] sm:$0xff] %v3767_v42  ;;  %v4385_v42 = vld [vmem:[%s4672_s14 + $0x230] sm:$0xff] }
 0x3f7   : > { %v3256_v26 = vmin.f32 %v3000_v41, 6.0  ;;  %v2026_v0 = vadd.f32 %v2025_v56, %v1817_v59  ;;  %v7178_v59 = vld [vmem:[#allocation132_spill] sm:$0xff]  ;;  %v4386_v56 = vld [vmem:[%s4672_s14 + $0x238] sm:$0xff] }
 0x3f8   : > { %v3259_v1 = vmin.f32 %v3003_v2, 6.0  ;;  %v1611_v3 = vadd.f32 %v1610_v18, %v1402_v4  ;;  %v7179_v2 = vld [vmem:[#allocation133_spill] sm:$0xff] }
 0x3f9   : > { %v3512_v11 = vmul.f32 %v3256_v26, %v2488_v38  ;;  %v2492_v5 = vadd.f32 %v7174_v53, %v2026_v0  ;;  %v1613_v20 = vpop.f32.mrf.mxu1 }
 0x3fa   : > { %v3515_v39 = vmul.f32 %v3259_v1, %v2491_v46  ;;  %v2495_v61 = vadd.f32 %v7175_v7, %v1611_v3  ;;  %v1819_v10 = vpop.f32.mrf.mxu2 }
 0x3fb   : > { %v3768_v63 = vmul.f32 0.16666667, %v3512_v11  ;;  %v2748_v52 = vadd.f32 3.0, %v2492_v5  ;;  %v1820_v40 = vadd.f32 %v1819_v10, %v6333_v21  ;;  %1451 = vmatmul.f32.gmra.mxu0 %v4383_v25 }
 0x3fc   : > { %v3771_v43 = vmul.f32 0.16666667, %v3515_v39  ;;  %v2751_v19 = vadd.f32 3.0, %v2495_v61  ;;  %1869 = vmatmul.f32.gmra.mxu2 %v4383_v25  ;;  %1660 = vmatmul.f32.gmra.mxu1 %v4384_v49 }
 0x3fd   : > { %v3004_v55 = vmax.f32 %v2748_v52, 0.0  ;;  %v1404_v12 = vpop.f32.mrf.mxu0  ;;  %4024 = vst [vmem:[%s5722_s24 + $0x1f8] sm:$0xff] %v3768_v63  ;;  %2078 = vmatmul.f32.gmra.mxu3 %v4384_v49 }
 0x3fe   : > { %v3007_v15 = vmax.f32 %v2751_v19, 0.0  ;;  %v1405_v27 = vadd.f32 %v1404_v12, %v6326_v14  ;;  %v2028_v6 = vpop.f32.mrf.mxu3  ;;  %4027 = vst [vmem:[%s5722_s24 + $0x210] sm:$0xff] %v3771_v43  ;;  %v4387_v43 = vld [vmem:[%s4672_s14 + $0x240] sm:$0xff] }
 0x3ff   : > { %v3260_v29 = vmin.f32 %v3004_v55, 6.0  ;;  %v2029_v24 = vadd.f32 %v2028_v6, %v1820_v40  ;;  %v7180_v40 = vld [vmem:[#allocation134_spill] sm:$0xff]  ;;  %v4388_v6 = vld [vmem:[%s4672_s14 + $0x248] sm:$0xff] }
 0x400   : > { %v3263_v23 = vmin.f32 %v3007_v15, 6.0  ;;  %v1614_v36 = vadd.f32 %v1613_v20, %v1405_v27  ;;  %v7181_v15 = vld [vmem:[#allocation135_spill] sm:$0xff] }
 0x401   : > { %v3516_v8 = vmul.f32 %v3260_v29, %v2492_v5  ;;  %v2496_v17 = vadd.f32 %v7176_v16, %v2029_v24  ;;  %v1616_v44 = vpop.f32.mrf.mxu1 }
 0x402   : > { %v3519_v45 = vmul.f32 %v3263_v23, %v2495_v61  ;;  %v2499_v33 = vadd.f32 %v7177_v37, %v1614_v36  ;;  %v1822_v22 = vpop.f32.mrf.mxu2 }
 0x403   : > { %v3772_v51 = vmul.f32 0.16666667, %v3516_v8  ;;  %v2752_v34 = vadd.f32 3.0, %v2496_v17  ;;  %v1823_v35 = vadd.f32 %v1822_v22, %v6333_v21  ;;  %1454 = vmatmul.f32.gmra.mxu0 %v4385_v42 }
 0x404   : > { %v3775_v9 = vmul.f32 0.16666667, %v3519_v45  ;;  %v2755_v30 = vadd.f32 3.0, %v2499_v33  ;;  %1872 = vmatmul.f32.gmra.mxu2 %v4385_v42  ;;  %1663 = vmatmul.f32.gmra.mxu1 %v4386_v56 }
 0x405   : > { %v3008_v31 = vmax.f32 %v2752_v34, 0.0  ;;  %v1407_v54 = vpop.f32.mrf.mxu0  ;;  %4028 = vst [vmem:[%s5722_s24 + $0x218] sm:$0xff] %v3772_v51  ;;  %2081 = vmatmul.f32.gmra.mxu3 %v4386_v56 }
 0x406   : > { %v3011_v38 = vmax.f32 %v2755_v30, 0.0  ;;  %v1408_v58 = vadd.f32 %v1407_v54, %v6326_v14  ;;  %v2031_v50 = vpop.f32.mrf.mxu3  ;;  %4031 = vst [vmem:[%s5722_s24 + $0x230] sm:$0xff] %v3775_v9  ;;  %v4389_v9 = vld [vmem:[%s4672_s14 + $0x250] sm:$0xff] }
 0x407   : > { %v3264_v46 = vmin.f32 %v3008_v31, 6.0  ;;  %v2032_v32 = vadd.f32 %v2031_v50, %v1823_v35  ;;  %v7182_v35 = vld [vmem:[#allocation136_spill] sm:$0xff]  ;;  %v4390_v50 = vld [vmem:[%s4672_s14 + $0x258] sm:$0xff] }
 0x408   : > { %v3267_v60 = vmin.f32 %v3011_v38, 6.0  ;;  %v1617_v62 = vadd.f32 %v1616_v44, %v1408_v58  ;;  %v7183_v38 = vld [vmem:[#allocation137_spill] sm:$0xff] }
 0x409   : > { %v3520_v48 = vmul.f32 %v3264_v46, %v2496_v17  ;;  %v2500_v41 = vadd.f32 %v7178_v59, %v2032_v32  ;;  %v1619_v63 = vpop.f32.mrf.mxu1 }
 0x40a   : > { %v3523_v47 = vmul.f32 %v3267_v60, %v2499_v33  ;;  %v2503_v4 = vadd.f32 %v7179_v2, %v1617_v62  ;;  %v1825_v18 = vpop.f32.mrf.mxu2 }
 0x40b   : > { %v3776_v26 = vmul.f32 0.16666667, %v3520_v48  ;;  %v2756_v0 = vadd.f32 3.0, %v2500_v41  ;;  %v1826_v28 = vadd.f32 %v1825_v18, %v6333_v21  ;;  %1457 = vmatmul.f32.gmra.mxu0 %v4387_v43 }
 0x40c   : > { %v3779_v1 = vmul.f32 0.16666667, %v3523_v47  ;;  %v2759_v3 = vadd.f32 3.0, %v2503_v4  ;;  %1875 = vmatmul.f32.gmra.mxu2 %v4387_v43  ;;  %1666 = vmatmul.f32.gmra.mxu1 %v4388_v6 }
 0x40d   : > { %v3012_v11 = vmax.f32 %v2756_v0, 0.0  ;;  %v1410_v53 = vpop.f32.mrf.mxu0  ;;  %4032 = vst [vmem:[%s5722_s24 + $0x238] sm:$0xff] %v3776_v26  ;;  %2084 = vmatmul.f32.gmra.mxu3 %v4388_v6 }
 0x40e   : > { %v3015_v5 = vmax.f32 %v2759_v3, 0.0  ;;  %v1411_v39 = vadd.f32 %v1410_v53, %v6326_v14  ;;  %v2034_v7 = vpop.f32.mrf.mxu3  ;;  %4035 = vst [vmem:[%s5722_s24 + $0x250] sm:$0xff] %v3779_v1  ;;  %v4391_v1 = vld [vmem:[%s4672_s14 + $0x260] sm:$0xff] }
 0x40f   : > { %v3268_v61 = vmin.f32 %v3012_v11, 6.0  ;;  %v2035_v57 = vadd.f32 %v2034_v7, %v1826_v28  ;;  %v7184_v28 = vld [vmem:[#allocation138_spill] sm:$0xff]  ;;  %v4392_v7 = vld [vmem:[%s4672_s14 + $0x268] sm:$0xff] }
 0x410   : > { %v3271_v52 = vmin.f32 %v3015_v5, 6.0  ;;  %v1620_v10 = vadd.f32 %v1619_v63, %v1411_v39  ;;  %v7185_v5 = vld [vmem:[#allocation139_spill] sm:$0xff] }
 0x411   : > { %v3524_v19 = vmul.f32 %v3268_v61, %v2500_v41  ;;  %v2504_v55 = vadd.f32 %v7180_v40, %v2035_v57  ;;  %v1622_v51 = vpop.f32.mrf.mxu1 }
 0x412   : > { %v3527_v12 = vmul.f32 %v3271_v52, %v2503_v4  ;;  %v2507_v27 = vadd.f32 %v7181_v15, %v1620_v10  ;;  %v1828_v20 = vpop.f32.mrf.mxu2 }
 0x413   : > { %v3780_v29 = vmul.f32 0.16666667, %v3524_v19  ;;  %v2760_v24 = vadd.f32 3.0, %v2504_v55  ;;  %v1829_v25 = vadd.f32 %v1828_v20, %v6333_v21  ;;  %1460 = vmatmul.f32.gmra.mxu0 %v4389_v9 }
 0x414   : > { %v3783_v23 = vmul.f32 0.16666667, %v3527_v12  ;;  %v2763_v36 = vadd.f32 3.0, %v2507_v27  ;;  %1878 = vmatmul.f32.gmra.mxu2 %v4389_v9  ;;  %1669 = vmatmul.f32.gmra.mxu1 %v4390_v50 }
 0x415   : > { %v3016_v8 = vmax.f32 %v2760_v24, 0.0  ;;  %v1413_v16 = vpop.f32.mrf.mxu0  ;;  %4036 = vst [vmem:[%s5722_s24 + $0x258] sm:$0xff] %v3780_v29  ;;  %2087 = vmatmul.f32.gmra.mxu3 %v4390_v50 }
 0x416   : > { %v3019_v17 = vmax.f32 %v2763_v36, 0.0  ;;  %v1414_v45 = vadd.f32 %v1413_v16, %v6326_v14  ;;  %v2037_v37 = vpop.f32.mrf.mxu3  ;;  %4039 = vst [vmem:[%s5722_s24 + $0x270] sm:$0xff] %v3783_v23  ;;  %v4393_v23 = vld [vmem:[%s4672_s14 + $0x270] sm:$0xff] }
 0x417   : > { %v3272_v33 = vmin.f32 %v3016_v8, 6.0  ;;  %v2038_v49 = vadd.f32 %v2037_v37, %v1829_v25  ;;  %v7186_v25 = vld [vmem:[#allocation140_spill] sm:$0xff]  ;;  %v4394_v37 = vld [vmem:[%s4672_s14 + $0x278] sm:$0xff] }
 0x418   : > { %v3275_v34 = vmin.f32 %v3019_v17, 6.0  ;;  %v1623_v22 = vadd.f32 %v1622_v51, %v1414_v45  ;;  %v7187_v17 = vld [vmem:[#allocation141_spill] sm:$0xff] }
 0x419   : > { %v3528_v30 = vmul.f32 %v3272_v33, %v2504_v55  ;;  %v2508_v31 = vadd.f32 %v7182_v35, %v2038_v49  ;;  %v1625_v26 = vpop.f32.mrf.mxu1 }
 0x41a   : > { %v3531_v54 = vmul.f32 %v3275_v34, %v2507_v27  ;;  %v2511_v58 = vadd.f32 %v7183_v38, %v1623_v22  ;;  %v1831_v44 = vpop.f32.mrf.mxu2 }
 0x41b   : > { %v3784_v46 = vmul.f32 0.16666667, %v3528_v30  ;;  %v2764_v32 = vadd.f32 3.0, %v2508_v31  ;;  %v1832_v42 = vadd.f32 %v1831_v44, %v6333_v21  ;;  %1463 = vmatmul.f32.gmra.mxu0 %v4391_v1 }
 0x41c   : > { %v3787_v60 = vmul.f32 0.16666667, %v3531_v54  ;;  %v2767_v62 = vadd.f32 3.0, %v2511_v58  ;;  %1881 = vmatmul.f32.gmra.mxu2 %v4391_v1  ;;  %1672 = vmatmul.f32.gmra.mxu1 %v4392_v7 }
 0x41d   : > { %v3020_v48 = vmax.f32 %v2764_v32, 0.0  ;;  %v1416_v59 = vpop.f32.mrf.mxu0  ;;  %4040 = vst [vmem:[%s5722_s24 + $0x278] sm:$0xff] %v3784_v46  ;;  %2090 = vmatmul.f32.gmra.mxu3 %v4392_v7 }
 0x41e   : > { %v3023_v41 = vmax.f32 %v2767_v62, 0.0  ;;  %v1417_v47 = vadd.f32 %v1416_v59, %v6326_v14  ;;  %v2040_v2 = vpop.f32.mrf.mxu3  ;;  %4043 = vst [vmem:[%s5722_s24 + $0x290] sm:$0xff] %v3787_v60  ;;  %v4395_v60 = vld [vmem:[%s4672_s14 + $0x280] sm:$0xff] }
 0x41f   : > { %v3276_v4 = vmin.f32 %v3020_v48, 6.0  ;;  %v2041_v56 = vadd.f32 %v2040_v2, %v1832_v42  ;;  %v7188_v42 = vld [vmem:[#allocation142_spill] sm:$0xff]  ;;  %v4396_v2 = vld [vmem:[%s4672_s14 + $0x288] sm:$0xff] }
 0x420   : > { %v3279_v0 = vmin.f32 %v3023_v41, 6.0  ;;  %v1626_v18 = vadd.f32 %v1625_v26, %v1417_v47  ;;  %v7189_v41 = vld [vmem:[#allocation143_spill] sm:$0xff] }
 0x421   : > { %v3532_v3 = vmul.f32 %v3276_v4, %v2508_v31  ;;  %v2512_v11 = vadd.f32 %v7184_v28, %v2041_v56  ;;  %v1628_v29 = vpop.f32.mrf.mxu1 }
 0x422   : > { %v3535_v53 = vmul.f32 %v3279_v0, %v2511_v58  ;;  %v2515_v39 = vadd.f32 %v7185_v5, %v1626_v18  ;;  %v1834_v63 = vpop.f32.mrf.mxu2 }
 0x423   : > { %v3788_v61 = vmul.f32 0.16666667, %v3532_v3  ;;  %v2768_v57 = vadd.f32 3.0, %v2512_v11  ;;  %v1835_v43 = vadd.f32 %v1834_v63, %v6333_v21  ;;  %1466 = vmatmul.f32.gmra.mxu0 %v4393_v23 }
 0x424   : > { %v3791_v52 = vmul.f32 0.16666667, %v3535_v53  ;;  %v2771_v10 = vadd.f32 3.0, %v2515_v39  ;;  %1884 = vmatmul.f32.gmra.mxu2 %v4393_v23  ;;  %1675 = vmatmul.f32.gmra.mxu1 %v4394_v37 }
 0x425   : > { %v3024_v19 = vmax.f32 %v2768_v57, 0.0  ;;  %v1419_v40 = vpop.f32.mrf.mxu0  ;;  %4044 = vst [vmem:[%s5722_s24 + $0x298] sm:$0xff] %v3788_v61  ;;  %2093 = vmatmul.f32.gmra.mxu3 %v4394_v37 }
 0x426   : > { %v3027_v55 = vmax.f32 %v2771_v10, 0.0  ;;  %v1420_v12 = vadd.f32 %v1419_v40, %v6326_v14  ;;  %v2043_v15 = vpop.f32.mrf.mxu3  ;;  %4047 = vst [vmem:[%s5722_s24 + $0x2b0] sm:$0xff] %v3791_v52  ;;  %v4397_v52 = vld [vmem:[%s4672_s14 + $0x290] sm:$0xff] }
 0x427   : > { %v3280_v27 = vmin.f32 %v3024_v19, 6.0  ;;  %v2044_v6 = vadd.f32 %v2043_v15, %v1835_v43  ;;  %v7190_v43 = vld [vmem:[#allocation144_spill] sm:$0xff]  ;;  %v4398_v15 = vld [vmem:[%s4672_s14 + $0x298] sm:$0xff] }
 0x428   : > { %v3283_v24 = vmin.f32 %v3027_v55, 6.0  ;;  %v1629_v20 = vadd.f32 %v1628_v29, %v1420_v12  ;;  %v7191_v55 = vld [vmem:[#allocation145_spill] sm:$0xff] }
 0x429   : > { %v3536_v36 = vmul.f32 %v3280_v27, %v2512_v11  ;;  %v2516_v8 = vadd.f32 %v7186_v25, %v2044_v6  ;;  %v1631_v46 = vpop.f32.mrf.mxu1 }
 0x42a   : > { %v3539_v16 = vmul.f32 %v3283_v24, %v2515_v39  ;;  %v2519_v45 = vadd.f32 %v7187_v17, %v1629_v20  ;;  %v1837_v51 = vpop.f32.mrf.mxu2 }
 0x42b   : > { %v3792_v33 = vmul.f32 0.16666667, %v3536_v36  ;;  %v2772_v49 = vadd.f32 3.0, %v2516_v8  ;;  %v1838_v9 = vadd.f32 %v1837_v51, %v6333_v21  ;;  %1469 = vmatmul.f32.gmra.mxu0 %v4395_v60 }
 0x42c   : > { %v3795_v34 = vmul.f32 0.16666667, %v3539_v16  ;;  %v2775_v22 = vadd.f32 3.0, %v2519_v45  ;;  %1887 = vmatmul.f32.gmra.mxu2 %v4395_v60  ;;  %1678 = vmatmul.f32.gmra.mxu1 %v4396_v2 }
 0x42d   : > { %v3028_v30 = vmax.f32 %v2772_v49, 0.0  ;;  %v1422_v35 = vpop.f32.mrf.mxu0  ;;  %4048 = vst [vmem:[%s5722_s24 + $0x2b8] sm:$0xff] %v3792_v33  ;;  %2096 = vmatmul.f32.gmra.mxu3 %v4396_v2 }
 0x42e   : > { %v3031_v31 = vmax.f32 %v2775_v22, 0.0  ;;  %v1423_v54 = vadd.f32 %v1422_v35, %v6326_v14  ;;  %v2046_v38 = vpop.f32.mrf.mxu3  ;;  %4051 = vst [vmem:[%s5722_s24 + $0x2d0] sm:$0xff] %v3795_v34  ;;  %v4399_v34 = vld [vmem:[%s4672_s14 + $0x2a0] sm:$0xff] }
 0x42f   : > { %v3284_v58 = vmin.f32 %v3028_v30, 6.0  ;;  %v2047_v50 = vadd.f32 %v2046_v38, %v1838_v9  ;;  %v7192_v9 = vld [vmem:[#allocation146_spill] sm:$0xff]  ;;  %v4400_v38 = vld [vmem:[%s4672_s14 + $0x2a8] sm:$0xff] }
 0x430   : > { %v3287_v32 = vmin.f32 %v3031_v31, 6.0  ;;  %v1632_v44 = vadd.f32 %v1631_v46, %v1423_v54  ;;  %v7193_v31 = vld [vmem:[#allocation147_spill] sm:$0xff] }
 0x431   : > { %v3540_v62 = vmul.f32 %v3284_v58, %v2516_v8  ;;  %v2520_v48 = vadd.f32 %v7188_v42, %v2047_v50  ;;  %v1634_v61 = vpop.f32.mrf.mxu1 }
 0x432   : > { %v3543_v59 = vmul.f32 %v3287_v32, %v2519_v45  ;;  %v2523_v47 = vadd.f32 %v7189_v41, %v1632_v44  ;;  %v1840_v26 = vpop.f32.mrf.mxu2 }
 0x433   : > { %v3796_v4 = vmul.f32 0.16666667, %v3540_v62  ;;  %v2776_v56 = vadd.f32 3.0, %v2520_v48  ;;  %v1841_v1 = vadd.f32 %v1840_v26, %v6333_v21  ;;  %1472 = vmatmul.f32.gmra.mxu0 %v4397_v52 }
 0x434   : > { %v3799_v0 = vmul.f32 0.16666667, %v3543_v59  ;;  %v2779_v18 = vadd.f32 3.0, %v2523_v47  ;;  %1890 = vmatmul.f32.gmra.mxu2 %v4397_v52  ;;  %1681 = vmatmul.f32.gmra.mxu1 %v4398_v15 }
 0x435   : > { %v3032_v3 = vmax.f32 %v2776_v56, 0.0  ;;  %v1425_v28 = vpop.f32.mrf.mxu0  ;;  %4052 = vst [vmem:[%s5722_s24 + $0x2d8] sm:$0xff] %v3796_v4  ;;  %2099 = vmatmul.f32.gmra.mxu3 %v4398_v15 }
 0x436   : > { %v3035_v11 = vmax.f32 %v2779_v18, 0.0  ;;  %v1426_v53 = vadd.f32 %v1425_v28, %v6326_v14  ;;  %v2049_v5 = vpop.f32.mrf.mxu3  ;;  %4055 = vst [vmem:[%s5722_s24 + $0x2f0] sm:$0xff] %v3799_v0  ;;  %v4401_v0 = vld [vmem:[%s4672_s14 + $0x2b0] sm:$0xff] }
 0x437   : > { %v3288_v39 = vmin.f32 %v3032_v3, 6.0  ;;  %v2050_v7 = vadd.f32 %v2049_v5, %v1841_v1  ;;  %v7194_v1 = vld [vmem:[#allocation148_spill] sm:$0xff]  ;;  %v4402_v5 = vld [vmem:[%s4672_s14 + $0x2b8] sm:$0xff] }
 0x438   : > { %v3291_v57 = vmin.f32 %v3035_v11, 6.0  ;;  %v1635_v63 = vadd.f32 %v1634_v61, %v1426_v53  ;;  %v7195_v11 = vld [vmem:[#allocation149_spill] sm:$0xff] }
 0x439   : > { %v3544_v10 = vmul.f32 %v3288_v39, %v2520_v48  ;;  %v2524_v19 = vadd.f32 %v7190_v43, %v2050_v7  ;;  %v1637_v33 = vpop.f32.mrf.mxu1 }
 0x43a   : > { %v3547_v40 = vmul.f32 %v3291_v57, %v2523_v47  ;;  %v2527_v12 = vadd.f32 %v7191_v55, %v1635_v63  ;;  %v1843_v29 = vpop.f32.mrf.mxu2 }
 0x43b   : > { %v3800_v27 = vmul.f32 0.16666667, %v3544_v10  ;;  %v2780_v6 = vadd.f32 3.0, %v2524_v19  ;;  %v1844_v23 = vadd.f32 %v1843_v29, %v6333_v21  ;;  %1475 = vmatmul.f32.gmra.mxu0 %v4399_v34 }
 0x43c   : > { %v3803_v24 = vmul.f32 0.16666667, %v3547_v40  ;;  %v2783_v20 = vadd.f32 3.0, %v2527_v12  ;;  %1893 = vmatmul.f32.gmra.mxu2 %v4399_v34  ;;  %1684 = vmatmul.f32.gmra.mxu1 %v4400_v38 }
 0x43d   : > { %v3036_v36 = vmax.f32 %v2780_v6, 0.0  ;;  %v1428_v25 = vpop.f32.mrf.mxu0  ;;  %4056 = vst [vmem:[%s5722_s24 + $0x2f8] sm:$0xff] %v3800_v27  ;;  %2102 = vmatmul.f32.gmra.mxu3 %v4400_v38 }
 0x43e   : > { %v3039_v8 = vmax.f32 %v2783_v20, 0.0  ;;  %v1429_v16 = vadd.f32 %v1428_v25, %v6326_v14  ;;  %v2052_v17 = vpop.f32.mrf.mxu3  ;;  %4059 = vst [vmem:[%s5722_s24 + $0x310] sm:$0xff] %v3803_v24  ;;  %v4403_v24 = vld [vmem:[%s4672_s14 + $0x2c0] sm:$0xff] }
 0x43f   : > { %v3292_v45 = vmin.f32 %v3036_v36, 6.0  ;;  %v2053_v37 = vadd.f32 %v2052_v17, %v1844_v23  ;;  %v7196_v23 = vld [vmem:[#allocation150_spill] sm:$0xff]  ;;  %v4404_v17 = vld [vmem:[%s4672_s14 + $0x2c8] sm:$0xff] }
 0x440   : > { %v3295_v49 = vmin.f32 %v3039_v8, 6.0  ;;  %v1638_v51 = vadd.f32 %v1637_v33, %v1429_v16  ;;  %v7197_v8 = vld [vmem:[#allocation151_spill] sm:$0xff] }
 0x441   : > { %v3548_v22 = vmul.f32 %v3292_v45, %v2524_v19  ;;  %v2528_v30 = vadd.f32 %v7192_v9, %v2053_v37  ;;  %v1640_v4 = vpop.f32.mrf.mxu1 }
 0x442   : > { %v3551_v35 = vmul.f32 %v3295_v49, %v2527_v12  ;;  %v2531_v54 = vadd.f32 %v7193_v31, %v1638_v51  ;;  %v1846_v46 = vpop.f32.mrf.mxu2 }
 0x443   : > { %v3804_v58 = vmul.f32 0.16666667, %v3548_v22  ;;  %v2784_v50 = vadd.f32 3.0, %v2528_v30  ;;  %v1847_v60 = vadd.f32 %v1846_v46, %v6333_v21  ;;  %1478 = vmatmul.f32.gmra.mxu0 %v4401_v0 }
 0x444   : > { %v3807_v32 = vmul.f32 0.16666667, %v3551_v35  ;;  %v2787_v44 = vadd.f32 3.0, %v2531_v54  ;;  %1896 = vmatmul.f32.gmra.mxu2 %v4401_v0  ;;  %1687 = vmatmul.f32.gmra.mxu1 %v4402_v5 }
 0x445   : > { %v3040_v62 = vmax.f32 %v2784_v50, 0.0  ;;  %v1431_v42 = vpop.f32.mrf.mxu0  ;;  %4060 = vst [vmem:[%s5722_s24 + $0x318] sm:$0xff] %v3804_v58  ;;  %2105 = vmatmul.f32.gmra.mxu3 %v4402_v5 }
 0x446   : > { %v3043_v48 = vmax.f32 %v2787_v44, 0.0  ;;  %v1432_v59 = vadd.f32 %v1431_v42, %v6326_v14  ;;  %v2055_v41 = vpop.f32.mrf.mxu3  ;;  %4063 = vst [vmem:[%s5722_s24 + $0x330] sm:$0xff] %v3807_v32  ;;  %v4405_v32 = vld [vmem:[%s4672_s14 + $0x2d0] sm:$0xff] }
 0x447   : > { %v3296_v47 = vmin.f32 %v3040_v62, 6.0  ;;  %v2056_v2 = vadd.f32 %v2055_v41, %v1847_v60  ;;  %v7198_v60 = vld [vmem:[#allocation152_spill] sm:$0xff]  ;;  %v4406_v41 = vld [vmem:[%s4672_s14 + $0x2d8] sm:$0xff] }
 0x448   : > { %v3299_v56 = vmin.f32 %v3043_v48, 6.0  ;;  %v1641_v26 = vadd.f32 %v1640_v4, %v1432_v59  ;;  %v7199_v48 = vld [vmem:[#allocation153_spill] sm:$0xff] }
 0x449   : > { %v3552_v18 = vmul.f32 %v3296_v47, %v2528_v30  ;;  %v2532_v3 = vadd.f32 %v7194_v1, %v2056_v2  ;;  %v1643_v27 = vpop.f32.mrf.mxu1 }
 0x44a   : > { %v3555_v28 = vmul.f32 %v3299_v56, %v2531_v54  ;;  %v2535_v53 = vadd.f32 %v7195_v11, %v1641_v26  ;;  %v1849_v61 = vpop.f32.mrf.mxu2 }
 0x44b   : > { %v3808_v39 = vmul.f32 0.16666667, %v3552_v18  ;;  %v2788_v7 = vadd.f32 3.0, %v2532_v3  ;;  %v1850_v52 = vadd.f32 %v1849_v61, %v6333_v21  ;;  %1481 = vmatmul.f32.gmra.mxu0 %v4403_v24 }
 0x44c   : > { %v3811_v57 = vmul.f32 0.16666667, %v3555_v28  ;;  %v2791_v63 = vadd.f32 3.0, %v2535_v53  ;;  %1899 = vmatmul.f32.gmra.mxu2 %v4403_v24  ;;  %1690 = vmatmul.f32.gmra.mxu1 %v4404_v17 }
 0x44d   : > { %v3044_v10 = vmax.f32 %v2788_v7, 0.0  ;;  %v1434_v43 = vpop.f32.mrf.mxu0  ;;  %4064 = vst [vmem:[%s5722_s24 + $0x338] sm:$0xff] %v3808_v39  ;;  %2108 = vmatmul.f32.gmra.mxu3 %v4404_v17 }
 0x44e   : > { %v3047_v19 = vmax.f32 %v2791_v63, 0.0  ;;  %v1435_v40 = vadd.f32 %v1434_v43, %v6326_v14  ;;  %v2058_v55 = vpop.f32.mrf.mxu3  ;;  %4067 = vst [vmem:[%s5722_s24 + $0x350] sm:$0xff] %v3811_v57  ;;  %v4407_v57 = vld [vmem:[%s4672_s14 + $0x2e0] sm:$0xff] }
 0x44f   : > { %v3300_v12 = vmin.f32 %v3044_v10, 6.0  ;;  %v2059_v15 = vadd.f32 %v2058_v55, %v1850_v52  ;;  %v7200_v52 = vld [vmem:[#allocation154_spill] sm:$0xff]  ;;  %v4408_v55 = vld [vmem:[%s4672_s14 + $0x2e8] sm:$0xff] }
 0x450   : > { %v3303_v6 = vmin.f32 %v3047_v19, 6.0  ;;  %v1644_v29 = vadd.f32 %v1643_v27, %v1435_v40  ;;  %v7201_v19 = vld [vmem:[#allocation155_spill] sm:$0xff] }
 0x451   : > { %v3556_v20 = vmul.f32 %v3300_v12, %v2532_v3  ;;  %v2536_v36 = vadd.f32 %v7196_v23, %v2059_v15  ;;  %v1646_v58 = vpop.f32.mrf.mxu1 }
 0x452   : > { %v3559_v25 = vmul.f32 %v3303_v6, %v2535_v53  ;;  %v2539_v16 = vadd.f32 %v7197_v8, %v1644_v29  ;;  %v1852_v33 = vpop.f32.mrf.mxu2 }
 0x453   : > { %v3812_v45 = vmul.f32 0.16666667, %v3556_v20  ;;  %v2792_v37 = vadd.f32 3.0, %v2536_v36  ;;  %v1853_v34 = vadd.f32 %v1852_v33, %v6333_v21  ;;  %1484 = vmatmul.f32.gmra.mxu0 %v4405_v32 }
 0x454   : > { %v3815_v49 = vmul.f32 0.16666667, %v3559_v25  ;;  %v2795_v51 = vadd.f32 3.0, %v2539_v16  ;;  %1902 = vmatmul.f32.gmra.mxu2 %v4405_v32  ;;  %1693 = vmatmul.f32.gmra.mxu1 %v4406_v41 }
 0x455   : > { %v3048_v22 = vmax.f32 %v2792_v37, 0.0  ;;  %v1437_v9 = vpop.f32.mrf.mxu0  ;;  %4068 = vst [vmem:[%s5722_s24 + $0x358] sm:$0xff] %v3812_v45  ;;  %2111 = vmatmul.f32.gmra.mxu3 %v4406_v41 }
 0x456   : > { %v3051_v30 = vmax.f32 %v2795_v51, 0.0  ;;  %v1438_v35 = vadd.f32 %v1437_v9, %v6326_v14  ;;  %v2061_v31 = vpop.f32.mrf.mxu3  ;;  %4071 = vst [vmem:[%s5722_s24 + $0x370] sm:$0xff] %v3815_v49  ;;  %v4409_v49 = vld [vmem:[%s4672_s14 + $0x2f0] sm:$0xff] }
 0x457   : > { %v3304_v54 = vmin.f32 %v3048_v22, 6.0  ;;  %v2062_v38 = vadd.f32 %v2061_v31, %v1853_v34  ;;  %v7202_v34 = vld [vmem:[#allocation156_spill] sm:$0xff]  ;;  %v4410_v31 = vld [vmem:[%s4672_s14 + $0x2f8] sm:$0xff] }
 0x458   : > { %v3307_v50 = vmin.f32 %v3051_v30, 6.0  ;;  %v1647_v46 = vadd.f32 %v1646_v58, %v1438_v35  ;;  %v7203_v30 = vld [vmem:[#allocation157_spill] sm:$0xff] }
 0x459   : > { %v3560_v44 = vmul.f32 %v3304_v54, %v2536_v36  ;;  %v2540_v62 = vadd.f32 %v7198_v60, %v2062_v38  ;;  %v1649_v39 = vpop.f32.mrf.mxu1 }
 0x45a   : > { %v3563_v42 = vmul.f32 %v3307_v50, %v2539_v16  ;;  %v2543_v59 = vadd.f32 %v7199_v48, %v1647_v46  ;;  %v1855_v4 = vpop.f32.mrf.mxu2 }
 0x45b   : > { %v3816_v47 = vmul.f32 0.16666667, %v3560_v44  ;;  %v2796_v2 = vadd.f32 3.0, %v2540_v62  ;;  %v1856_v0 = vadd.f32 %v1855_v4, %v6333_v21  ;;  %1487 = vmatmul.f32.gmra.mxu0 %v4407_v57 }
 0x45c   : > { %v3819_v56 = vmul.f32 0.16666667, %v3563_v42  ;;  %v2799_v26 = vadd.f32 3.0, %v2543_v59  ;;  %1905 = vmatmul.f32.gmra.mxu2 %v4407_v57  ;;  %1696 = vmatmul.f32.gmra.mxu1 %v4408_v55 }
 0x45d   : > { %v3052_v18 = vmax.f32 %v2796_v2, 0.0  ;;  %v1440_v1 = vpop.f32.mrf.mxu0  ;;  %4072 = vst [vmem:[%s5722_s24 + $0x378] sm:$0xff] %v3816_v47  ;;  %2114 = vmatmul.f32.gmra.mxu3 %v4408_v55 }
 0x45e   : > { %v3055_v3 = vmax.f32 %v2799_v26, 0.0  ;;  %v1441_v28 = vadd.f32 %v1440_v1, %v6326_v14  ;;  %v2064_v11 = vpop.f32.mrf.mxu3  ;;  %4075 = vst [vmem:[%s5722_s24 + $0x390] sm:$0xff] %v3819_v56  ;;  %v4411_v56 = vld [vmem:[%s4672_s14 + $0x300] sm:$0xff] }
 0x45f   : > { %v3308_v53 = vmin.f32 %v3052_v18, 6.0  ;;  %v2065_v5 = vadd.f32 %v2064_v11, %v1856_v0  ;;  %v7204_v0 = vld [vmem:[#allocation158_spill] sm:$0xff]  ;;  %v4412_v11 = vld [vmem:[%s4672_s14 + $0x308] sm:$0xff] }
 0x460   : > { %v3311_v7 = vmin.f32 %v3055_v3, 6.0  ;;  %v1650_v61 = vadd.f32 %v1649_v39, %v1441_v28  ;;  %v7205_v3 = vld [vmem:[#allocation159_spill] sm:$0xff] }
 0x461   : > { %v3564_v63 = vmul.f32 %v3308_v53, %v2540_v62  ;;  %v2544_v10 = vadd.f32 %v7200_v52, %v2065_v5  ;;  %v1652_v45 = vpop.f32.mrf.mxu1 }
 0x462   : > { %v3567_v43 = vmul.f32 %v3311_v7, %v2543_v59  ;;  %v2547_v40 = vadd.f32 %v7201_v19, %v1650_v61  ;;  %v1858_v27 = vpop.f32.mrf.mxu2 }
 0x463   : > { %v3820_v12 = vmul.f32 0.16666667, %v3564_v63  ;;  %v2800_v15 = vadd.f32 3.0, %v2544_v10  ;;  %v1859_v24 = vadd.f32 %v1858_v27, %v6333_v21  ;;  %1490 = vmatmul.f32.gmra.mxu0 %v4409_v49 }
 0x464   : > { %v3823_v6 = vmul.f32 0.16666667, %v3567_v43  ;;  %v2803_v29 = vadd.f32 3.0, %v2547_v40  ;;  %1908 = vmatmul.f32.gmra.mxu2 %v4409_v49  ;;  %1699 = vmatmul.f32.gmra.mxu1 %v4410_v31 }
 0x465   : > { %v3056_v20 = vmax.f32 %v2800_v15, 0.0  ;;  %v1443_v23 = vpop.f32.mrf.mxu0  ;;  %4076 = vst [vmem:[%s5722_s24 + $0x398] sm:$0xff] %v3820_v12  ;;  %2117 = vmatmul.f32.gmra.mxu3 %v4410_v31 }
 0x466   : > { %v3059_v36 = vmax.f32 %v2803_v29, 0.0  ;;  %v1444_v25 = vadd.f32 %v1443_v23, %v6326_v14  ;;  %v2067_v8 = vpop.f32.mrf.mxu3  ;;  %4079 = vst [vmem:[%s5722_s24 + $0x3b0] sm:$0xff] %v3823_v6  ;;  %v4413_v6 = vld [vmem:[%s4672_s14 + $0x310] sm:$0xff] }
 0x467   : > { %v3312_v16 = vmin.f32 %v3056_v20, 6.0  ;;  %v2068_v17 = vadd.f32 %v2067_v8, %v1859_v24  ;;  %v7206_v24 = vld [vmem:[#allocation160_spill] sm:$0xff]  ;;  %v4414_v8 = vld [vmem:[%s4672_s14 + $0x318] sm:$0xff] }
 0x468   : > { %v3315_v37 = vmin.f32 %v3059_v36, 6.0  ;;  %v1653_v33 = vadd.f32 %v1652_v45, %v1444_v25  ;;  %v7207_v36 = vld [vmem:[#allocation161_spill] sm:$0xff] }
 0x469   : > { %v3568_v51 = vmul.f32 %v3312_v16, %v2544_v10  ;;  %v2548_v22 = vadd.f32 %v7202_v34, %v2068_v17  ;;  %v1655_v47 = vpop.f32.mrf.mxu1 }
 0x46a   : > { %v3571_v9 = vmul.f32 %v3315_v37, %v2547_v40  ;;  %v2551_v35 = vadd.f32 %v7203_v30, %v1653_v33  ;;  %v1861_v58 = vpop.f32.mrf.mxu2 }
 0x46b   : > { %v3824_v54 = vmul.f32 0.16666667, %v3568_v51  ;;  %v2804_v38 = vadd.f32 3.0, %v2548_v22  ;;  %v1862_v32 = vadd.f32 %v1861_v58, %v6333_v21  ;;  %1493 = vmatmul.f32.gmra.mxu0 %v4411_v56 }
 0x46c   : > { %v3827_v50 = vmul.f32 0.16666667, %v3571_v9  ;;  %v2807_v46 = vadd.f32 3.0, %v2551_v35  ;;  %1911 = vmatmul.f32.gmra.mxu2 %v4411_v56  ;;  %1702 = vmatmul.f32.gmra.mxu1 %v4412_v11 }
 0x46d   : > { %v3060_v44 = vmax.f32 %v2804_v38, 0.0  ;;  %v1446_v60 = vpop.f32.mrf.mxu0  ;;  %4080 = vst [vmem:[%s5722_s24 + $0x3b8] sm:$0xff] %v3824_v54  ;;  %2120 = vmatmul.f32.gmra.mxu3 %v4412_v11 }
 0x46e   : > { %v3063_v62 = vmax.f32 %v2807_v46, 0.0  ;;  %v1447_v42 = vadd.f32 %v1446_v60, %v6326_v14  ;;  %v2070_v48 = vpop.f32.mrf.mxu3  ;;  %4083 = vst [vmem:[%s5722_s24 + $0x3d0] sm:$0xff] %v3827_v50  ;;  %v4415_v50 = vld [vmem:[%s4672_s14 + $0x320] sm:$0xff] }
 0x46f   : > { %v3316_v59 = vmin.f32 %v3060_v44, 6.0  ;;  %v2071_v41 = vadd.f32 %v2070_v48, %v1862_v32  ;;  %v7208_v32 = vld [vmem:[#allocation162_spill] sm:$0xff]  ;;  %v4416_v48 = vld [vmem:[%s4672_s14 + $0x328] sm:$0xff] }
 0x470   : > { %v3319_v2 = vmin.f32 %v3063_v62, 6.0  ;;  %v1656_v4 = vadd.f32 %v1655_v47, %v1447_v42  ;;  %v7209_v62 = vld [vmem:[#allocation163_spill] sm:$0xff] }
 0x471   : > { %v3572_v26 = vmul.f32 %v3316_v59, %v2548_v22  ;;  %v2552_v18 = vadd.f32 %v7204_v0, %v2071_v41  ;;  %v1658_v12 = vpop.f32.mrf.mxu1 }
 0x472   : > { %v3575_v1 = vmul.f32 %v3319_v2, %v2551_v35  ;;  %v2555_v28 = vadd.f32 %v7205_v3, %v1656_v4  ;;  %v1864_v39 = vpop.f32.mrf.mxu2 }
 0x473   : > { %v3828_v53 = vmul.f32 0.16666667, %v3572_v26  ;;  %v2808_v5 = vadd.f32 3.0, %v2552_v18  ;;  %v1865_v57 = vadd.f32 %v1864_v39, %v6333_v21  ;;  %1496 = vmatmul.f32.gmra.mxu0 %v4413_v6 }
 0x474   : > { %v3831_v7 = vmul.f32 0.16666667, %v3575_v1  ;;  %v2811_v61 = vadd.f32 3.0, %v2555_v28  ;;  %1914 = vmatmul.f32.gmra.mxu2 %v4413_v6  ;;  %1705 = vmatmul.f32.gmra.mxu1 %v4414_v8 }
 0x475   : > { %v3064_v63 = vmax.f32 %v2808_v5, 0.0  ;;  %v1449_v52 = vpop.f32.mrf.mxu0  ;;  %4084 = vst [vmem:[%s5722_s24 + $0x3d8] sm:$0xff] %v3828_v53  ;;  %2123 = vmatmul.f32.gmra.mxu3 %v4414_v8 }
 0x476   : > { %v3067_v10 = vmax.f32 %v2811_v61, 0.0  ;;  %v1450_v43 = vadd.f32 %v1449_v52, %v6326_v14  ;;  %v2073_v19 = vpop.f32.mrf.mxu3  ;;  %4087 = vst [vmem:[%s5722_s24 + $0x3f0] sm:$0xff] %v3831_v7  ;;  %v4417_v7 = vld [vmem:[%s4672_s14 + $0x330] sm:$0xff] }
 0x477   : > { %v3320_v40 = vmin.f32 %v3064_v63, 6.0  ;;  %v2074_v55 = vadd.f32 %v2073_v19, %v1865_v57  ;;  %v7210_v57 = vld [vmem:[#allocation164_spill] sm:$0xff]  ;;  %v4418_v19 = vld [vmem:[%s4672_s14 + $0x338] sm:$0xff] }
 0x478   : > { %v3323_v15 = vmin.f32 %v3067_v10, 6.0  ;;  %v1659_v27 = vadd.f32 %v1658_v12, %v1450_v43  ;;  %v7211_v10 = vld [vmem:[#allocation165_spill] sm:$0xff] }
 0x479   : > { %v3576_v29 = vmul.f32 %v3320_v40, %v2552_v18  ;;  %v2556_v20 = vadd.f32 %v7206_v24, %v2074_v55  ;;  %v1661_v54 = vpop.f32.mrf.mxu1 }
 0x47a   : > { %v3579_v23 = vmul.f32 %v3323_v15, %v2555_v28  ;;  %v2559_v25 = vadd.f32 %v7207_v36, %v1659_v27  ;;  %v1867_v45 = vpop.f32.mrf.mxu2 }
 0x47b   : > { %v3832_v16 = vmul.f32 0.16666667, %v3576_v29  ;;  %v2812_v17 = vadd.f32 3.0, %v2556_v20  ;;  %v1868_v49 = vadd.f32 %v1867_v45, %v6333_v21  ;;  %1499 = vmatmul.f32.gmra.mxu0 %v4415_v50 }
 0x47c   : > { %v3835_v37 = vmul.f32 0.16666667, %v3579_v23  ;;  %v2815_v33 = vadd.f32 3.0, %v2559_v25  ;;  %1917 = vmatmul.f32.gmra.mxu2 %v4415_v50  ;;  %1708 = vmatmul.f32.gmra.mxu1 %v4416_v48 }
 0x47d   : > { %v3068_v51 = vmax.f32 %v2812_v17, 0.0  ;;  %v1452_v34 = vpop.f32.mrf.mxu0  ;;  %4088 = vst [vmem:[%s5722_s24 + $0x3f8] sm:$0xff] %v3832_v16  ;;  %2126 = vmatmul.f32.gmra.mxu3 %v4416_v48 }
 0x47e   : > { %v3071_v22 = vmax.f32 %v2815_v33, 0.0  ;;  %v1453_v9 = vadd.f32 %v1452_v34, %v6326_v14  ;;  %v2076_v30 = vpop.f32.mrf.mxu3  ;;  %4091 = vst [vmem:[%s5722_s24 + $0x410] sm:$0xff] %v3835_v37  ;;  %v4419_v37 = vld [vmem:[%s4672_s14 + $0x340] sm:$0xff] }
 0x47f   : > { %v3324_v35 = vmin.f32 %v3068_v51, 6.0  ;;  %v2077_v31 = vadd.f32 %v2076_v30, %v1868_v49  ;;  %v7212_v49 = vld [vmem:[#allocation166_spill] sm:$0xff]  ;;  %v4420_v30 = vld [vmem:[%s4672_s14 + $0x348] sm:$0xff] }
 0x480   : > { %v3327_v38 = vmin.f32 %v3071_v22, 6.0  ;;  %v1662_v58 = vadd.f32 %v1661_v54, %v1453_v9  ;;  %v7213_v22 = vld [vmem:[#allocation167_spill] sm:$0xff] }
 0x481   : > { %v3580_v46 = vmul.f32 %v3324_v35, %v2556_v20  ;;  %v2560_v44 = vadd.f32 %v7208_v32, %v2077_v31  ;;  %v1664_v53 = vpop.f32.mrf.mxu1 }
 0x482   : > { %v3583_v60 = vmul.f32 %v3327_v38, %v2559_v25  ;;  %v2563_v42 = vadd.f32 %v7209_v62, %v1662_v58  ;;  %v1870_v47 = vpop.f32.mrf.mxu2 }
 0x483   : > { %v3836_v59 = vmul.f32 0.16666667, %v3580_v46  ;;  %v2816_v41 = vadd.f32 3.0, %v2560_v44  ;;  %v1871_v56 = vadd.f32 %v1870_v47, %v6333_v21  ;;  %1502 = vmatmul.f32.gmra.mxu0 %v4417_v7 }
 0x484   : > { %v3839_v2 = vmul.f32 0.16666667, %v3583_v60  ;;  %v2819_v4 = vadd.f32 3.0, %v2563_v42  ;;  %1920 = vmatmul.f32.gmra.mxu2 %v4417_v7  ;;  %1711 = vmatmul.f32.gmra.mxu1 %v4418_v19 }
 0x485   : > { %v3072_v26 = vmax.f32 %v2816_v41, 0.0  ;;  %v1455_v0 = vpop.f32.mrf.mxu0  ;;  %4092 = vst [vmem:[%s5722_s24 + $0x418] sm:$0xff] %v3836_v59  ;;  %2129 = vmatmul.f32.gmra.mxu3 %v4418_v19 }
 0x486   : > { %v3075_v18 = vmax.f32 %v2819_v4, 0.0  ;;  %v1456_v1 = vadd.f32 %v1455_v0, %v6326_v14  ;;  %v2079_v3 = vpop.f32.mrf.mxu3  ;;  %4095 = vst [vmem:[%s5722_s24 + $0x430] sm:$0xff] %v3839_v2  ;;  %v4421_v2 = vld [vmem:[%s4672_s14 + $0x350] sm:$0xff] }
 0x487   : > { %v3328_v28 = vmin.f32 %v3072_v26, 6.0  ;;  %v2080_v11 = vadd.f32 %v2079_v3, %v1871_v56  ;;  %v7214_v56 = vld [vmem:[#allocation168_spill] sm:$0xff]  ;;  %v4422_v3 = vld [vmem:[%s4672_s14 + $0x358] sm:$0xff] }
 0x488   : > { %v3331_v5 = vmin.f32 %v3075_v18, 6.0  ;;  %v1665_v39 = vadd.f32 %v1664_v53, %v1456_v1  ;;  %v7215_v18 = vld [vmem:[#allocation169_spill] sm:$0xff] }
 0x489   : > { %v3584_v61 = vmul.f32 %v3328_v28, %v2560_v44  ;;  %v2564_v63 = vadd.f32 %v7210_v57, %v2080_v11  ;;  %v1667_v16 = vpop.f32.mrf.mxu1 }
 0x48a   : > { %v3587_v52 = vmul.f32 %v3331_v5, %v2563_v42  ;;  %v2567_v43 = vadd.f32 %v7211_v10, %v1665_v39  ;;  %v1873_v12 = vpop.f32.mrf.mxu2 }
 0x48b   : > { %v3840_v40 = vmul.f32 0.16666667, %v3584_v61  ;;  %v2820_v55 = vadd.f32 3.0, %v2564_v63  ;;  %v1874_v6 = vadd.f32 %v1873_v12, %v6333_v21  ;;  %1505 = vmatmul.f32.gmra.mxu0 %v4419_v37 }
 0x48c   : > { %v3843_v15 = vmul.f32 0.16666667, %v3587_v52  ;;  %v2823_v27 = vadd.f32 3.0, %v2567_v43  ;;  %1923 = vmatmul.f32.gmra.mxu2 %v4419_v37  ;;  %1714 = vmatmul.f32.gmra.mxu1 %v4420_v30 }
 0x48d   : > { %v3076_v29 = vmax.f32 %v2820_v55, 0.0  ;;  %v1458_v24 = vpop.f32.mrf.mxu0  ;;  %4096 = vst [vmem:[%s5722_s24 + $0x438] sm:$0xff] %v3840_v40  ;;  %2132 = vmatmul.f32.gmra.mxu3 %v4420_v30 }
 0x48e   : > { %v3079_v20 = vmax.f32 %v2823_v27, 0.0  ;;  %v1459_v23 = vadd.f32 %v1458_v24, %v6326_v14  ;;  %v2082_v36 = vpop.f32.mrf.mxu3  ;;  %4099 = vst [vmem:[%s5722_s24 + $0x450] sm:$0xff] %v3843_v15  ;;  %v4423_v15 = vld [vmem:[%s4672_s14 + $0x360] sm:$0xff] }
 0x48f   : > { %v3332_v25 = vmin.f32 %v3076_v29, 6.0  ;;  %v2083_v8 = vadd.f32 %v2082_v36, %v1874_v6  ;;  %v7216_v6 = vld [vmem:[#allocation170_spill] sm:$0xff]  ;;  %v4424_v36 = vld [vmem:[%s4672_s14 + $0x368] sm:$0xff] }
 0x490   : > { %v3335_v17 = vmin.f32 %v3079_v20, 6.0  ;;  %v1668_v45 = vadd.f32 %v1667_v16, %v1459_v23  ;;  %v7217_v20 = vld [vmem:[#allocation171_spill] sm:$0xff] }
 0x491   : > { %v3588_v33 = vmul.f32 %v3332_v25, %v2564_v63  ;;  %v2568_v51 = vadd.f32 %v7212_v49, %v2083_v8  ;;  %v1670_v59 = vpop.f32.mrf.mxu1 }
 0x492   : > { %v3591_v34 = vmul.f32 %v3335_v17, %v2567_v43  ;;  %v2571_v9 = vadd.f32 %v7213_v22, %v1668_v45  ;;  %v1876_v54 = vpop.f32.mrf.mxu2 }
 0x493   : > { %v3844_v35 = vmul.f32 0.16666667, %v3588_v33  ;;  %v2824_v31 = vadd.f32 3.0, %v2568_v51  ;;  %v1877_v50 = vadd.f32 %v1876_v54, %v6333_v21  ;;  %1508 = vmatmul.f32.gmra.mxu0 %v4421_v2 }
 0x494   : > { %v3847_v38 = vmul.f32 0.16666667, %v3591_v34  ;;  %v2827_v58 = vadd.f32 3.0, %v2571_v9  ;;  %1926 = vmatmul.f32.gmra.mxu2 %v4421_v2  ;;  %1717 = vmatmul.f32.gmra.mxu1 %v4422_v3 }
 0x495   : > { %v3080_v46 = vmax.f32 %v2824_v31, 0.0  ;;  %v1461_v32 = vpop.f32.mrf.mxu0  ;;  %4100 = vst [vmem:[%s5722_s24 + $0x458] sm:$0xff] %v3844_v35  ;;  %2135 = vmatmul.f32.gmra.mxu3 %v4422_v3 }
 0x496   : > { %v3083_v44 = vmax.f32 %v2827_v58, 0.0  ;;  %v1462_v60 = vadd.f32 %v1461_v32, %v6326_v14  ;;  %v2085_v62 = vpop.f32.mrf.mxu3  ;;  %4103 = vst [vmem:[%s5722_s24 + $0x470] sm:$0xff] %v3847_v38  ;;  %v4425_v38 = vld [vmem:[%s4672_s14 + $0x370] sm:$0xff] }
 0x497   : > { %v3336_v42 = vmin.f32 %v3080_v46, 6.0  ;;  %v2086_v48 = vadd.f32 %v2085_v62, %v1877_v50  ;;  %v7218_v50 = vld [vmem:[#allocation172_spill] sm:$0xff]  ;;  %v4426_v62 = vld [vmem:[%s4672_s14 + $0x378] sm:$0xff] }
 0x498   : > { %v3339_v41 = vmin.f32 %v3083_v44, 6.0  ;;  %v1671_v47 = vadd.f32 %v1670_v59, %v1462_v60  ;;  %v7219_v44 = vld [vmem:[#allocation173_spill] sm:$0xff] }
 0x499   : > { %v3592_v4 = vmul.f32 %v3336_v42, %v2568_v51  ;;  %v2572_v26 = vadd.f32 %v7214_v56, %v2086_v48  ;;  %v1673_v40 = vpop.f32.mrf.mxu1 }
 0x49a   : > { %v3595_v0 = vmul.f32 %v3339_v41, %v2571_v9  ;;  %v2575_v1 = vadd.f32 %v7215_v18, %v1671_v47  ;;  %v1879_v53 = vpop.f32.mrf.mxu2 }
 0x49b   : > { %v3848_v28 = vmul.f32 0.16666667, %v3592_v4  ;;  %v2828_v11 = vadd.f32 3.0, %v2572_v26  ;;  %v1880_v7 = vadd.f32 %v1879_v53, %v6333_v21  ;;  %1511 = vmatmul.f32.gmra.mxu0 %v4423_v15 }
 0x49c   : > { %v3851_v5 = vmul.f32 0.16666667, %v3595_v0  ;;  %v2831_v39 = vadd.f32 3.0, %v2575_v1  ;;  %1929 = vmatmul.f32.gmra.mxu2 %v4423_v15  ;;  %1720 = vmatmul.f32.gmra.mxu1 %v4424_v36 }
 0x49d   : > { %v3084_v61 = vmax.f32 %v2828_v11, 0.0  ;;  %v1464_v57 = vpop.f32.mrf.mxu0  ;;  %4104 = vst [vmem:[%s5722_s24 + $0x478] sm:$0xff] %v3848_v28  ;;  %2138 = vmatmul.f32.gmra.mxu3 %v4424_v36 }
 0x49e   : > { %v3087_v63 = vmax.f32 %v2831_v39, 0.0  ;;  %v1465_v52 = vadd.f32 %v1464_v57, %v6326_v14  ;;  %v2088_v10 = vpop.f32.mrf.mxu3  ;;  %4107 = vst [vmem:[%s5722_s24 + $0x490] sm:$0xff] %v3851_v5  ;;  %v4427_v5 = vld [vmem:[%s4672_s14 + $0x380] sm:$0xff] }
 0x49f   : > { %v3340_v43 = vmin.f32 %v3084_v61, 6.0  ;;  %v2089_v19 = vadd.f32 %v2088_v10, %v1880_v7  ;;  %v7220_v7 = vld [vmem:[#allocation174_spill] sm:$0xff]  ;;  %v4428_v10 = vld [vmem:[%s4672_s14 + $0x388] sm:$0xff] }
 0x4a0   : > { %v3343_v55 = vmin.f32 %v3087_v63, 6.0  ;;  %v1674_v12 = vadd.f32 %v1673_v40, %v1465_v52  ;;  %v7221_v63 = vld [vmem:[#allocation175_spill] sm:$0xff] }
 0x4a1   : > { %v3596_v27 = vmul.f32 %v3340_v43, %v2572_v26  ;;  %v2576_v29 = vadd.f32 %v7216_v6, %v2089_v19  ;;  %v1676_v35 = vpop.f32.mrf.mxu1 }
 0x4a2   : > { %v3599_v24 = vmul.f32 %v3343_v55, %v2575_v1  ;;  %v2579_v23 = vadd.f32 %v7217_v20, %v1674_v12  ;;  %v1882_v16 = vpop.f32.mrf.mxu2 }
 0x4a3   : > { %v3852_v25 = vmul.f32 0.16666667, %v3596_v27  ;;  %v2832_v8 = vadd.f32 3.0, %v2576_v29  ;;  %v1883_v37 = vadd.f32 %v1882_v16, %v6333_v21  ;;  %1514 = vmatmul.f32.gmra.mxu0 %v4425_v38 }
 0x4a4   : > { %v3855_v17 = vmul.f32 0.16666667, %v3599_v24  ;;  %v2835_v45 = vadd.f32 3.0, %v2579_v23  ;;  %1932 = vmatmul.f32.gmra.mxu2 %v4425_v38  ;;  %1723 = vmatmul.f32.gmra.mxu1 %v4426_v62 }
 0x4a5   : > { %v3088_v33 = vmax.f32 %v2832_v8, 0.0  ;;  %v1467_v49 = vpop.f32.mrf.mxu0  ;;  %4108 = vst [vmem:[%s5722_s24 + $0x498] sm:$0xff] %v3852_v25  ;;  %2141 = vmatmul.f32.gmra.mxu3 %v4426_v62 }
 0x4a6   : > { %v3091_v51 = vmax.f32 %v2835_v45, 0.0  ;;  %v1468_v34 = vadd.f32 %v1467_v49, %v6326_v14  ;;  %v2091_v22 = vpop.f32.mrf.mxu3  ;;  %4111 = vst [vmem:[%s5722_s24 + $0x4b0] sm:$0xff] %v3855_v17  ;;  %v4429_v17 = vld [vmem:[%s4672_s14 + $0x390] sm:$0xff] }
 0x4a7   : > { %v3344_v9 = vmin.f32 %v3088_v33, 6.0  ;;  %v2092_v30 = vadd.f32 %v2091_v22, %v1883_v37  ;;  %v7222_v37 = vld [vmem:[#allocation176_spill] sm:$0xff]  ;;  %v4430_v22 = vld [vmem:[%s4672_s14 + $0x398] sm:$0xff] }
 0x4a8   : > { %v3347_v31 = vmin.f32 %v3091_v51, 6.0  ;;  %v1677_v54 = vadd.f32 %v1676_v35, %v1468_v34  ;;  %v7223_v51 = vld [vmem:[#allocation177_spill] sm:$0xff] }
 0x4a9   : > { %v3600_v58 = vmul.f32 %v3344_v9, %v2576_v29  ;;  %v2580_v46 = vadd.f32 %v7218_v50, %v2092_v30  ;;  %v1679_v28 = vpop.f32.mrf.mxu1 }
 0x4aa   : > { %v3603_v32 = vmul.f32 %v3347_v31, %v2579_v23  ;;  %v2583_v60 = vadd.f32 %v7219_v44, %v1677_v54  ;;  %v1885_v59 = vpop.f32.mrf.mxu2 }
 0x4ab   : > { %v3856_v42 = vmul.f32 0.16666667, %v3600_v58  ;;  %v2836_v48 = vadd.f32 3.0, %v2580_v46  ;;  %v1886_v2 = vadd.f32 %v1885_v59, %v6333_v21  ;;  %1517 = vmatmul.f32.gmra.mxu0 %v4427_v5 }
 0x4ac   : > { %v3859_v41 = vmul.f32 0.16666667, %v3603_v32  ;;  %v2839_v47 = vadd.f32 3.0, %v2583_v60  ;;  %1935 = vmatmul.f32.gmra.mxu2 %v4427_v5  ;;  %1726 = vmatmul.f32.gmra.mxu1 %v4428_v10 }
 0x4ad   : > { %v3092_v4 = vmax.f32 %v2836_v48, 0.0  ;;  %v1470_v56 = vpop.f32.mrf.mxu0  ;;  %4112 = vst [vmem:[%s5722_s24 + $0x4b8] sm:$0xff] %v3856_v42  ;;  %2144 = vmatmul.f32.gmra.mxu3 %v4428_v10 }
 0x4ae   : > { %v3095_v26 = vmax.f32 %v2839_v47, 0.0  ;;  %v1471_v0 = vadd.f32 %v1470_v56, %v6326_v14  ;;  %v2094_v18 = vpop.f32.mrf.mxu3  ;;  %4115 = vst [vmem:[%s5722_s24 + $0x4d0] sm:$0xff] %v3859_v41  ;;  %v4431_v41 = vld [vmem:[%s4672_s14 + $0x3a0] sm:$0xff] }
 0x4af   : > { %v3348_v1 = vmin.f32 %v3092_v4, 6.0  ;;  %v2095_v3 = vadd.f32 %v2094_v18, %v1886_v2  ;;  %v7224_v2 = vld [vmem:[#allocation178_spill] sm:$0xff]  ;;  %v4432_v18 = vld [vmem:[%s4672_s14 + $0x3a8] sm:$0xff] }
 0x4b0   : > { %v3351_v11 = vmin.f32 %v3095_v26, 6.0  ;;  %v1680_v53 = vadd.f32 %v1679_v28, %v1471_v0  ;;  %v7225_v26 = vld [vmem:[#allocation179_spill] sm:$0xff] }
 0x4b1   : > { %v3604_v39 = vmul.f32 %v3348_v1, %v2580_v46  ;;  %v2584_v61 = vadd.f32 %v7220_v7, %v2095_v3  ;;  %v1682_v25 = vpop.f32.mrf.mxu1 }
 0x4b2   : > { %v3607_v57 = vmul.f32 %v3351_v11, %v2583_v60  ;;  %v2587_v52 = vadd.f32 %v7221_v63, %v1680_v53  ;;  %v1888_v40 = vpop.f32.mrf.mxu2 }
 0x4b3   : > { %v3860_v43 = vmul.f32 0.16666667, %v3604_v39  ;;  %v2840_v19 = vadd.f32 3.0, %v2584_v61  ;;  %v1889_v15 = vadd.f32 %v1888_v40, %v6333_v21  ;;  %1520 = vmatmul.f32.gmra.mxu0 %v4429_v17 }
 0x4b4   : > { %v3863_v55 = vmul.f32 0.16666667, %v3607_v57  ;;  %v2843_v12 = vadd.f32 3.0, %v2587_v52  ;;  %1938 = vmatmul.f32.gmra.mxu2 %v4429_v17  ;;  %1729 = vmatmul.f32.gmra.mxu1 %v4430_v22 }
 0x4b5   : > { %v3096_v27 = vmax.f32 %v2840_v19, 0.0  ;;  %v1473_v6 = vpop.f32.mrf.mxu0  ;;  %4116 = vst [vmem:[%s5722_s24 + $0x4d8] sm:$0xff] %v3860_v43  ;;  %2147 = vmatmul.f32.gmra.mxu3 %v4430_v22 }
 0x4b6   : > { %v3099_v29 = vmax.f32 %v2843_v12, 0.0  ;;  %v1474_v24 = vadd.f32 %v1473_v6, %v6326_v14  ;;  %v2097_v20 = vpop.f32.mrf.mxu3  ;;  %4119 = vst [vmem:[%s5722_s24 + $0x4f0] sm:$0xff] %v3863_v55  ;;  %v4433_v55 = vld [vmem:[%s4672_s14 + $0x3b0] sm:$0xff] }
 0x4b7   : > { %v3352_v23 = vmin.f32 %v3096_v27, 6.0  ;;  %v2098_v36 = vadd.f32 %v2097_v20, %v1889_v15  ;;  %v7226_v15 = vld [vmem:[#allocation180_spill] sm:$0xff]  ;;  %v4434_v20 = vld [vmem:[%s4672_s14 + $0x3b8] sm:$0xff] }
 0x4b8   : > { %v3355_v8 = vmin.f32 %v3099_v29, 6.0  ;;  %v1683_v16 = vadd.f32 %v1682_v25, %v1474_v24  ;;  %v7227_v29 = vld [vmem:[#allocation181_spill] sm:$0xff] }
 0x4b9   : > { %v3608_v45 = vmul.f32 %v3352_v23, %v2584_v61  ;;  %v2588_v33 = vadd.f32 %v7222_v37, %v2098_v36  ;;  %v1685_v42 = vpop.f32.mrf.mxu1 }
 0x4ba   : > { %v3611_v49 = vmul.f32 %v3355_v8, %v2587_v52  ;;  %v2591_v34 = vadd.f32 %v7223_v51, %v1683_v16  ;;  %v1891_v35 = vpop.f32.mrf.mxu2 }
 0x4bb   : > { %v3864_v9 = vmul.f32 0.16666667, %v3608_v45  ;;  %v2844_v30 = vadd.f32 3.0, %v2588_v33  ;;  %v1892_v38 = vadd.f32 %v1891_v35, %v6333_v21  ;;  %1523 = vmatmul.f32.gmra.mxu0 %v4431_v41 }
 0x4bc   : > { %v3867_v31 = vmul.f32 0.16666667, %v3611_v49  ;;  %v2847_v54 = vadd.f32 3.0, %v2591_v34  ;;  %1941 = vmatmul.f32.gmra.mxu2 %v4431_v41  ;;  %1732 = vmatmul.f32.gmra.mxu1 %v4432_v18 }
 0x4bd   : > { %v3100_v58 = vmax.f32 %v2844_v30, 0.0  ;;  %v1476_v50 = vpop.f32.mrf.mxu0  ;;  %4120 = vst [vmem:[%s5722_s24 + $0x4f8] sm:$0xff] %v3864_v9  ;;  %2150 = vmatmul.f32.gmra.mxu3 %v4432_v18 }
 0x4be   : > { %v3103_v46 = vmax.f32 %v2847_v54, 0.0  ;;  %v1477_v32 = vadd.f32 %v1476_v50, %v6326_v14  ;;  %v2100_v44 = vpop.f32.mrf.mxu3  ;;  %4123 = vst [vmem:[%s5722_s24 + $0x510] sm:$0xff] %v3867_v31  ;;  %v4435_v31 = vld [vmem:[%s4672_s14 + $0x3c0] sm:$0xff] }
 0x4bf   : > { %v3356_v60 = vmin.f32 %v3100_v58, 6.0  ;;  %v2101_v62 = vadd.f32 %v2100_v44, %v1892_v38  ;;  %v7228_v38 = vld [vmem:[#allocation182_spill] sm:$0xff]  ;;  %v4436_v44 = vld [vmem:[%s4672_s14 + $0x3c8] sm:$0xff] }
 0x4c0   : > { %v3359_v48 = vmin.f32 %v3103_v46, 6.0  ;;  %v1686_v59 = vadd.f32 %v1685_v42, %v1477_v32  ;;  %v7229_v46 = vld [vmem:[#allocation183_spill] sm:$0xff] }
 0x4c1   : > { %v3612_v47 = vmul.f32 %v3356_v60, %v2588_v33  ;;  %v2592_v4 = vadd.f32 %v7224_v2, %v2101_v62  ;;  %v1688_v43 = vpop.f32.mrf.mxu1 }
 0x4c2   : > { %v3615_v56 = vmul.f32 %v3359_v48, %v2591_v34  ;;  %v2595_v0 = vadd.f32 %v7225_v26, %v1686_v59  ;;  %v1894_v28 = vpop.f32.mrf.mxu2 }
 0x4c3   : > { %v3868_v1 = vmul.f32 0.16666667, %v3612_v47  ;;  %v2848_v3 = vadd.f32 3.0, %v2592_v4  ;;  %v1895_v5 = vadd.f32 %v1894_v28, %v6333_v21  ;;  %1526 = vmatmul.f32.gmra.mxu0 %v4433_v55 }
 0x4c4   : > { %v3871_v11 = vmul.f32 0.16666667, %v3615_v56  ;;  %v2851_v53 = vadd.f32 3.0, %v2595_v0  ;;  %1944 = vmatmul.f32.gmra.mxu2 %v4433_v55  ;;  %1735 = vmatmul.f32.gmra.mxu1 %v4434_v20 }
 0x4c5   : > { %v3104_v39 = vmax.f32 %v2848_v3, 0.0  ;;  %v1479_v7 = vpop.f32.mrf.mxu0  ;;  %4124 = vst [vmem:[%s5722_s24 + $0x518] sm:$0xff] %v3868_v1  ;;  %2153 = vmatmul.f32.gmra.mxu3 %v4434_v20 }
 0x4c6   : > { %v3107_v61 = vmax.f32 %v2851_v53, 0.0  ;;  %v1480_v57 = vadd.f32 %v1479_v7, %v6326_v14  ;;  %v2103_v63 = vpop.f32.mrf.mxu3  ;;  %4127 = vst [vmem:[%s5722_s24 + $0x530] sm:$0xff] %v3871_v11  ;;  %v4437_v11 = vld [vmem:[%s4672_s14 + $0x3d0] sm:$0xff] }
 0x4c7   : > { %v3360_v52 = vmin.f32 %v3104_v39, 6.0  ;;  %v2104_v10 = vadd.f32 %v2103_v63, %v1895_v5  ;;  %v7230_v5 = vld [vmem:[#allocation184_spill] sm:$0xff]  ;;  %v4438_v63 = vld [vmem:[%s4672_s14 + $0x3d8] sm:$0xff] }
 0x4c8   : > { %v3363_v19 = vmin.f32 %v3107_v61, 6.0  ;;  %v1689_v40 = vadd.f32 %v1688_v43, %v1480_v57  ;;  %v7231_v61 = vld [vmem:[#allocation185_spill] sm:$0xff] }
 0x4c9   : > { %v3616_v12 = vmul.f32 %v3360_v52, %v2592_v4  ;;  %v2596_v27 = vadd.f32 %v7226_v15, %v2104_v10  ;;  %v1691_v9 = vpop.f32.mrf.mxu1 }
 0x4ca   : > { %v3619_v6 = vmul.f32 %v3363_v19, %v2595_v0  ;;  %v2599_v24 = vadd.f32 %v7227_v29, %v1689_v40  ;;  %v1897_v25 = vpop.f32.mrf.mxu2 }
 0x4cb   : > { %v3872_v23 = vmul.f32 0.16666667, %v3616_v12  ;;  %v2852_v36 = vadd.f32 3.0, %v2596_v27  ;;  %v1898_v17 = vadd.f32 %v1897_v25, %v6333_v21  ;;  %1529 = vmatmul.f32.gmra.mxu0 %v4435_v31 }
 0x4cc   : > { %v3875_v8 = vmul.f32 0.16666667, %v3619_v6  ;;  %v2855_v16 = vadd.f32 3.0, %v2599_v24  ;;  %1947 = vmatmul.f32.gmra.mxu2 %v4435_v31  ;;  %1738 = vmatmul.f32.gmra.mxu1 %v4436_v44 }
 0x4cd   : > { %v3108_v45 = vmax.f32 %v2852_v36, 0.0  ;;  %v1482_v37 = vpop.f32.mrf.mxu0  ;;  %4128 = vst [vmem:[%s5722_s24 + $0x538] sm:$0xff] %v3872_v23  ;;  %2156 = vmatmul.f32.gmra.mxu3 %v4436_v44 }
 0x4ce   : > { %v3111_v33 = vmax.f32 %v2855_v16, 0.0  ;;  %v1483_v49 = vadd.f32 %v1482_v37, %v6326_v14  ;;  %v2106_v51 = vpop.f32.mrf.mxu3  ;;  %4131 = vst [vmem:[%s5722_s24 + $0x550] sm:$0xff] %v3875_v8  ;;  %v4439_v8 = vld [vmem:[%s4672_s14 + $0x3e0] sm:$0xff] }
 0x4cf   : > { %v3364_v34 = vmin.f32 %v3108_v45, 6.0  ;;  %v2107_v22 = vadd.f32 %v2106_v51, %v1898_v17  ;;  %v7232_v17 = vld [vmem:[#allocation186_spill] sm:$0xff]  ;;  %v4440_v51 = vld [vmem:[%s4672_s14 + $0x3e8] sm:$0xff] }
 0x4d0   : > { %v3367_v30 = vmin.f32 %v3111_v33, 6.0  ;;  %v1692_v35 = vadd.f32 %v1691_v9, %v1483_v49  ;;  %v7233_v33 = vld [vmem:[#allocation187_spill] sm:$0xff] }
 0x4d1   : > { %v3620_v54 = vmul.f32 %v3364_v34, %v2596_v27  ;;  %v2600_v58 = vadd.f32 %v7228_v38, %v2107_v22  ;;  %v1694_v1 = vpop.f32.mrf.mxu1 }
 0x4d2   : > { %v3623_v50 = vmul.f32 %v3367_v30, %v2599_v24  ;;  %v2603_v32 = vadd.f32 %v7229_v46, %v1692_v35  ;;  %v1900_v42 = vpop.f32.mrf.mxu2 }
 0x4d3   : > { %v3876_v60 = vmul.f32 0.16666667, %v3620_v54  ;;  %v2856_v62 = vadd.f32 3.0, %v2600_v58  ;;  %v1901_v41 = vadd.f32 %v1900_v42, %v6333_v21  ;;  %1532 = vmatmul.f32.gmra.mxu0 %v4437_v11 }
 0x4d4   : > { %v3879_v48 = vmul.f32 0.16666667, %v3623_v50  ;;  %v2859_v59 = vadd.f32 3.0, %v2603_v32  ;;  %1950 = vmatmul.f32.gmra.mxu2 %v4437_v11  ;;  %1741 = vmatmul.f32.gmra.mxu1 %v4438_v63 }
 0x4d5   : > { %v3112_v47 = vmax.f32 %v2856_v62, 0.0  ;;  %v1485_v2 = vpop.f32.mrf.mxu0  ;;  %4132 = vst [vmem:[%s5722_s24 + $0x558] sm:$0xff] %v3876_v60  ;;  %2159 = vmatmul.f32.gmra.mxu3 %v4438_v63 }
 0x4d6   : > { %v3115_v4 = vmax.f32 %v2859_v59, 0.0  ;;  %v1486_v56 = vadd.f32 %v1485_v2, %v6326_v14  ;;  %v2109_v26 = vpop.f32.mrf.mxu3  ;;  %4135 = vst [vmem:[%s5722_s24 + $0x570] sm:$0xff] %v3879_v48  ;;  %v4441_v48 = vld [vmem:[%s4672_s14 + $0x3f0] sm:$0xff] }
 0x4d7   : > { %v3368_v0 = vmin.f32 %v3112_v47, 6.0  ;;  %v2110_v18 = vadd.f32 %v2109_v26, %v1901_v41  ;;  %v7234_v41 = vld [vmem:[#allocation188_spill] sm:$0xff]  ;;  %v4442_v26 = vld [vmem:[%s4672_s14 + $0x3f8] sm:$0xff] }
 0x4d8   : > { %v3371_v3 = vmin.f32 %v3115_v4, 6.0  ;;  %v1695_v28 = vadd.f32 %v1694_v1, %v1486_v56  ;;  %v7235_v4 = vld [vmem:[#allocation189_spill] sm:$0xff] }
 0x4d9   : > { %v3624_v53 = vmul.f32 %v3368_v0, %v2600_v58  ;;  %v2604_v39 = vadd.f32 %v7230_v5, %v2110_v18  ;;  %v1697_v23 = vpop.f32.mrf.mxu1 }
 0x4da   : > { %v3627_v7 = vmul.f32 %v3371_v3, %v2603_v32  ;;  %v2607_v57 = vadd.f32 %v7231_v61, %v1695_v28  ;;  %v1903_v43 = vpop.f32.mrf.mxu2 }
 0x4db   : > { %v3880_v52 = vmul.f32 0.16666667, %v3624_v53  ;;  %v2860_v10 = vadd.f32 3.0, %v2604_v39  ;;  %v1904_v55 = vadd.f32 %v1903_v43, %v6333_v21  ;;  %1535 = vmatmul.f32.gmra.mxu0 %v4439_v8 }
 0x4dc   : > { %v3883_v19 = vmul.f32 0.16666667, %v3627_v7  ;;  %v2863_v40 = vadd.f32 3.0, %v2607_v57  ;;  %1953 = vmatmul.f32.gmra.mxu2 %v4439_v8  ;;  %1744 = vmatmul.f32.gmra.mxu1 %v4440_v51 }
 0x4dd   : > { %v3116_v12 = vmax.f32 %v2860_v10, 0.0  ;;  %v1488_v15 = vpop.f32.mrf.mxu0  ;;  %4136 = vst [vmem:[%s5722_s24 + $0x578] sm:$0xff] %v3880_v52  ;;  %2162 = vmatmul.f32.gmra.mxu3 %v4440_v51 }
 0x4de   : > { %v3119_v27 = vmax.f32 %v2863_v40, 0.0  ;;  %v1489_v6 = vadd.f32 %v1488_v15, %v6326_v14  ;;  %v2112_v29 = vpop.f32.mrf.mxu3  ;;  %4139 = vst [vmem:[%s5722_s24 + $0x590] sm:$0xff] %v3883_v19  ;;  %v7236_v40 = vld [vmem:[#allocation190_spill] sm:$0xff]  ;;  %v7237_v15 = vld [vmem:[#allocation191_spill] sm:$0xff] }
 0x4df   : > { %v3372_v24 = vmin.f32 %v3116_v12, 6.0  ;;  %v2113_v20 = vadd.f32 %v2112_v29, %v1904_v55 }
 0x4e0   : > { %v3375_v36 = vmin.f32 %v3119_v27, 6.0  ;;  %v1698_v25 = vadd.f32 %v1697_v23, %v1489_v6 }
 0x4e1   : > { %v3628_v16 = vmul.f32 %v3372_v24, %v2604_v39  ;;  %v2608_v45 = vadd.f32 %v7232_v17, %v2113_v20  ;;  %v1700_v60 = vpop.f32.mrf.mxu1 }
 0x4e2   : > { %v3631_v37 = vmul.f32 %v3375_v36, %v2607_v57  ;;  %v2611_v49 = vadd.f32 %v7233_v33, %v1698_v25  ;;  %v1906_v9 = vpop.f32.mrf.mxu2 }
 0x4e3   : > { %v3884_v34 = vmul.f32 0.16666667, %v3628_v16  ;;  %v2864_v22 = vadd.f32 3.0, %v2608_v45  ;;  %v1907_v31 = vadd.f32 %v1906_v9, %v6333_v21  ;;  %1538 = vmatmul.f32.gmra.mxu0 %v4441_v48  ;;  %v7238_v9 = vld [vmem:[#allocation192_spill] sm:$0xff] }
 0x4e4   : > { %v3887_v30 = vmul.f32 0.16666667, %v3631_v37  ;;  %v2867_v35 = vadd.f32 3.0, %v2611_v49  ;;  %1956 = vmatmul.f32.gmra.mxu2 %v4441_v48  ;;  %1747 = vmatmul.f32.gmra.mxu1 %v4442_v26 }
 0x4e5   : > { %v3120_v54 = vmax.f32 %v2864_v22, 0.0  ;;  %v1491_v38 = vpop.f32.mrf.mxu0  ;;  %4140 = vst [vmem:[%s5722_s24 + $0x598] sm:$0xff] %v3884_v34  ;;  %2165 = vmatmul.f32.gmra.mxu3 %v4442_v26 }
 0x4e6   : > { %v3123_v58 = vmax.f32 %v2867_v35, 0.0  ;;  %v1492_v50 = vadd.f32 %v1491_v38, %v6326_v14  ;;  %v2115_v46 = vpop.f32.mrf.mxu3  ;;  %4143 = vst [vmem:[%s5722_s24 + $0x5b0] sm:$0xff] %v3887_v30 }
 0x4e7   : > { %v3376_v32 = vmin.f32 %v3120_v54, 6.0  ;;  %v2116_v44 = vadd.f32 %v2115_v46, %v1907_v31  ;;  %v7239_v31 = vld [vmem:[#allocation193_spill] sm:$0xff] }
 0x4e8   : > { %v3379_v62 = vmin.f32 %v3123_v58, 6.0  ;;  %v1701_v42 = vadd.f32 %v1700_v60, %v1492_v50 }
 0x4e9   : > { %v3632_v59 = vmul.f32 %v3376_v32, %v2608_v45  ;;  %v2612_v47 = vadd.f32 %v7234_v41, %v2116_v44  ;;  %v1703_v52 = vpop.f32.mrf.mxu1 }
 0x4ea   : > { %v3635_v2 = vmul.f32 %v3379_v62, %v2611_v49  ;;  %v2615_v56 = vadd.f32 %v7235_v4, %v1701_v42  ;;  %v1909_v1 = vpop.f32.mrf.mxu2 }
 0x4eb   : > { %v3888_v0 = vmul.f32 0.16666667, %v3632_v59  ;;  %v2868_v18 = vadd.f32 3.0, %v2612_v47  ;;  %v1910_v11 = vadd.f32 %v1909_v1, %v6333_v21 }
 0x4ec   : > { %v3891_v3 = vmul.f32 0.16666667, %v3635_v2  ;;  %v2871_v28 = vadd.f32 3.0, %v2615_v56 }
 0x4ed   : > { %v3124_v53 = vmax.f32 %v2868_v18, 0.0  ;;  %v1494_v5 = vpop.f32.mrf.mxu0  ;;  %4144 = vst [vmem:[%s5722_s24 + $0x5b8] sm:$0xff] %v3888_v0  ;;  %v7240_v0 = vld [vmem:[#allocation194_spill] sm:$0xff] }
 0x4ee   : > { %v3127_v39 = vmax.f32 %v2871_v28, 0.0  ;;  %v1495_v7 = vadd.f32 %v1494_v5, %v6326_v14  ;;  %v2118_v61 = vpop.f32.mrf.mxu3  ;;  %4147 = vst [vmem:[%s5722_s24 + $0x5d0] sm:$0xff] %v3891_v3  ;;  %v7241_v3 = vld [vmem:[#allocation195_spill] sm:$0xff] }
 0x4ef   : > { %v3380_v57 = vmin.f32 %v3124_v53, 6.0  ;;  %v2119_v63 = vadd.f32 %v2118_v61, %v1910_v11 }
 0x4f0   : > { %v3383_v10 = vmin.f32 %v3127_v39, 6.0  ;;  %v1704_v43 = vadd.f32 %v1703_v52, %v1495_v7 }
 0x4f1   : > { %v3636_v19 = vmul.f32 %v3380_v57, %v2612_v47  ;;  %v2616_v55 = vadd.f32 %v7236_v40, %v2119_v63  ;;  %v1706_v49 = vpop.f32.mrf.mxu1 }
 0x4f2   : > { %v3639_v12 = vmul.f32 %v3383_v10, %v2615_v56  ;;  %v2619_v27 = vadd.f32 %v7237_v15, %v1704_v43  ;;  %v1912_v24 = vpop.f32.mrf.mxu2 }
 0x4f3   : > { %v3892_v6 = vmul.f32 0.16666667, %v3636_v19  ;;  %v2872_v29 = vadd.f32 3.0, %v2616_v55  ;;  %v1913_v36 = vadd.f32 %v1912_v24, %v6333_v21 }
 0x4f4   : > { %v3895_v20 = vmul.f32 0.16666667, %v3639_v12  ;;  %v2875_v23 = vadd.f32 3.0, %v2619_v27 }
 0x4f5   : > { %v3128_v25 = vmax.f32 %v2872_v29, 0.0  ;;  %v1497_v8 = vpop.f32.mrf.mxu0  ;;  %4148 = vst [vmem:[%s5722_s24 + $0x5d8] sm:$0xff] %v3892_v6  ;;  %v7242_v6 = vld [vmem:[#allocation196_spill] sm:$0xff] }
 0x4f6   : > { %v3131_v16 = vmax.f32 %v2875_v23, 0.0  ;;  %v1498_v17 = vadd.f32 %v1497_v8, %v6326_v14  ;;  %v2121_v45 = vpop.f32.mrf.mxu3  ;;  %4151 = vst [vmem:[%s5722_s24 + $0x5f0] sm:$0xff] %v3895_v20  ;;  %v7243_v20 = vld [vmem:[#allocation197_spill] sm:$0xff] }
 0x4f7   : > { %v3384_v37 = vmin.f32 %v3128_v25, 6.0  ;;  %v2122_v33 = vadd.f32 %v2121_v45, %v1913_v36 }
 0x4f8   : > { %v3387_v51 = vmin.f32 %v3131_v16, 6.0  ;;  %v1707_v34 = vadd.f32 %v1706_v49, %v1498_v17 }
 0x4f9   : > { %v3640_v22 = vmul.f32 %v3384_v37, %v2616_v55  ;;  %v2620_v30 = vadd.f32 %v7238_v9, %v2122_v33  ;;  %v1709_v2 = vpop.f32.mrf.mxu1 }
 0x4fa   : > { %v3643_v35 = vmul.f32 %v3387_v51, %v2619_v27  ;;  %v2623_v54 = vadd.f32 %v7239_v31, %v1707_v34  ;;  %v1915_v50 = vpop.f32.mrf.mxu2 }
 0x4fb   : > { %v3896_v38 = vmul.f32 0.16666667, %v3640_v22  ;;  %v2876_v58 = vadd.f32 3.0, %v2620_v30  ;;  %v1916_v44 = vadd.f32 %v1915_v50, %v6333_v21 }
 0x4fc   : > { %v3899_v46 = vmul.f32 0.16666667, %v3643_v35  ;;  %v2879_v32 = vadd.f32 3.0, %v2623_v54 }
 0x4fd   : > { %v3132_v60 = vmax.f32 %v2876_v58, 0.0  ;;  %v1500_v62 = vpop.f32.mrf.mxu0  ;;  %4152 = vst [vmem:[%s5722_s24 + $0x5f8] sm:$0xff] %v3896_v38  ;;  %v7244_v38 = vld [vmem:[#allocation198_spill] sm:$0xff] }
 0x4fe   : > { %v3135_v42 = vmax.f32 %v2879_v32, 0.0  ;;  %v1501_v48 = vadd.f32 %v1500_v62, %v6326_v14  ;;  %v2124_v59 = vpop.f32.mrf.mxu3  ;;  %4155 = vst [vmem:[%s5722_s24 + $0x610] sm:$0xff] %v3899_v46  ;;  %v7245_v46 = vld [vmem:[#allocation199_spill] sm:$0xff] }
 0x4ff   : > { %v3388_v41 = vmin.f32 %v3132_v60, 6.0  ;;  %v2125_v47 = vadd.f32 %v2124_v59, %v1916_v44 }
 0x500   : > { %v3391_v4 = vmin.f32 %v3135_v42, 6.0  ;;  %v1710_v56 = vadd.f32 %v1709_v2, %v1501_v48 }
 0x501   : > { %v3644_v26 = vmul.f32 %v3388_v41, %v2620_v30  ;;  %v2624_v18 = vadd.f32 %v7240_v0, %v2125_v47  ;;  %v1712_v55 = vpop.f32.mrf.mxu1 }
 0x502   : > { %v3647_v1 = vmul.f32 %v3391_v4, %v2623_v54  ;;  %v2627_v28 = vadd.f32 %v7241_v3, %v1710_v56  ;;  %v1918_v5 = vpop.f32.mrf.mxu2 }
 0x503   : > { %v3900_v11 = vmul.f32 0.16666667, %v3644_v26  ;;  %v2880_v53 = vadd.f32 3.0, %v2624_v18  ;;  %v1919_v61 = vadd.f32 %v1918_v5, %v6333_v21 }
 0x504   : > { %v3903_v39 = vmul.f32 0.16666667, %v3647_v1  ;;  %v2883_v7 = vadd.f32 3.0, %v2627_v28 }
 0x505   : > { %v3136_v57 = vmax.f32 %v2880_v53, 0.0  ;;  %v1503_v63 = vpop.f32.mrf.mxu0  ;;  %4156 = vst [vmem:[%s5722_s24 + $0x618] sm:$0xff] %v3900_v11  ;;  %v7246_v11 = vld [vmem:[#allocation200_spill] sm:$0xff] }
 0x506   : > { %v3139_v52 = vmax.f32 %v2883_v7, 0.0  ;;  %v1504_v10 = vadd.f32 %v1503_v63, %v6326_v14  ;;  %v2127_v43 = vpop.f32.mrf.mxu3  ;;  %4159 = vst [vmem:[%s5722_s24 + $0x630] sm:$0xff] %v3903_v39  ;;  %v7247_v39 = vld [vmem:[#allocation201_spill] sm:$0xff] }
 0x507   : > { %v3392_v19 = vmin.f32 %v3136_v57, 6.0  ;;  %v2128_v40 = vadd.f32 %v2127_v43, %v1919_v61 }
 0x508   : > { %v3395_v12 = vmin.f32 %v3139_v52, 6.0  ;;  %v1713_v15 = vadd.f32 %v1712_v55, %v1504_v10 }
 0x509   : > { %v3648_v27 = vmul.f32 %v3392_v19, %v2624_v18  ;;  %v2628_v29 = vadd.f32 %v7242_v6, %v2128_v40  ;;  %v1715_v30 = vpop.f32.mrf.mxu1 }
 0x50a   : > { %v3651_v24 = vmul.f32 %v3395_v12, %v2627_v28  ;;  %v2631_v23 = vadd.f32 %v7243_v20, %v1713_v15  ;;  %v1921_v8 = vpop.f32.mrf.mxu2 }
 0x50b   : > { %v3904_v36 = vmul.f32 0.16666667, %v3648_v27  ;;  %v2884_v25 = vadd.f32 3.0, %v2628_v29  ;;  %v1922_v45 = vadd.f32 %v1921_v8, %v6333_v21 }
 0x50c   : > { %v3907_v16 = vmul.f32 0.16666667, %v3651_v24  ;;  %v2887_v17 = vadd.f32 3.0, %v2631_v23 }
 0x50d   : > { %v3140_v37 = vmax.f32 %v2884_v25, 0.0  ;;  %v1506_v33 = vpop.f32.mrf.mxu0  ;;  %4160 = vst [vmem:[%s5722_s24 + $0x638] sm:$0xff] %v3904_v36  ;;  %v7248_v36 = vld [vmem:[#allocation202_spill] sm:$0xff] }
 0x50e   : > { %v3143_v49 = vmax.f32 %v2887_v17, 0.0  ;;  %v1507_v51 = vadd.f32 %v1506_v33, %v6326_v14  ;;  %v2130_v34 = vpop.f32.mrf.mxu3  ;;  %4163 = vst [vmem:[%s5722_s24 + $0x650] sm:$0xff] %v3907_v16  ;;  %v7249_v16 = vld [vmem:[#allocation203_spill] sm:$0xff] }
 0x50f   : > { %v3396_v22 = vmin.f32 %v3140_v37, 6.0  ;;  %v2131_v9 = vadd.f32 %v2130_v34, %v1922_v45 }
 0x510   : > { %v3399_v35 = vmin.f32 %v3143_v49, 6.0  ;;  %v1716_v31 = vadd.f32 %v1715_v30, %v1507_v51 }
 0x511   : > { %v3652_v54 = vmul.f32 %v3396_v22, %v2628_v29  ;;  %v2632_v58 = vadd.f32 %v7244_v38, %v2131_v9  ;;  %v1718_v18 = vpop.f32.mrf.mxu1 }
 0x512   : > { %v3655_v50 = vmul.f32 %v3399_v35, %v2631_v23  ;;  %v2635_v32 = vadd.f32 %v7245_v46, %v1716_v31  ;;  %v1924_v62 = vpop.f32.mrf.mxu2 }
 0x513   : > { %v3908_v44 = vmul.f32 0.16666667, %v3652_v54  ;;  %v2888_v60 = vadd.f32 3.0, %v2632_v58  ;;  %v1925_v59 = vadd.f32 %v1924_v62, %v6333_v21 }
 0x514   : > { %v3911_v42 = vmul.f32 0.16666667, %v3655_v50  ;;  %v2891_v48 = vadd.f32 3.0, %v2635_v32 }
 0x515   : > { %v3144_v41 = vmax.f32 %v2888_v60, 0.0  ;;  %v1509_v47 = vpop.f32.mrf.mxu0  ;;  %4164 = vst [vmem:[%s5722_s24 + $0x658] sm:$0xff] %v3908_v44  ;;  %v7250_v44 = vld [vmem:[#allocation204_spill] sm:$0xff] }
 0x516   : > { %v3147_v2 = vmax.f32 %v2891_v48, 0.0  ;;  %v1510_v4 = vadd.f32 %v1509_v47, %v6326_v14  ;;  %v2133_v56 = vpop.f32.mrf.mxu3  ;;  %4167 = vst [vmem:[%s5722_s24 + $0x670] sm:$0xff] %v3911_v42  ;;  %v7251_v42 = vld [vmem:[#allocation205_spill] sm:$0xff] }
 0x517   : > { %v3400_v26 = vmin.f32 %v3144_v41, 6.0  ;;  %v2134_v0 = vadd.f32 %v2133_v56, %v1925_v59 }
 0x518   : > { %v3403_v1 = vmin.f32 %v3147_v2, 6.0  ;;  %v1719_v3 = vadd.f32 %v1718_v18, %v1510_v4 }
 0x519   : > { %v3656_v28 = vmul.f32 %v3400_v26, %v2632_v58  ;;  %v2636_v53 = vadd.f32 %v7246_v11, %v2134_v0  ;;  %v1721_v29 = vpop.f32.mrf.mxu1 }
 0x51a   : > { %v3659_v5 = vmul.f32 %v3403_v1, %v2635_v32  ;;  %v2639_v7 = vadd.f32 %v7247_v39, %v1719_v3  ;;  %v1927_v63 = vpop.f32.mrf.mxu2 }
 0x51b   : > { %v3912_v61 = vmul.f32 0.16666667, %v3656_v28  ;;  %v2892_v57 = vadd.f32 3.0, %v2636_v53  ;;  %v1928_v43 = vadd.f32 %v1927_v63, %v6333_v21 }
 0x51c   : > { %v3915_v52 = vmul.f32 0.16666667, %v3659_v5  ;;  %v2895_v10 = vadd.f32 3.0, %v2639_v7 }
 0x51d   : > { %v3148_v19 = vmax.f32 %v2892_v57, 0.0  ;;  %v1512_v40 = vpop.f32.mrf.mxu0  ;;  %4168 = vst [vmem:[%s5722_s24 + $0x678] sm:$0xff] %v3912_v61  ;;  %v7252_v61 = vld [vmem:[#allocation206_spill] sm:$0xff] }
 0x51e   : > { %v3151_v55 = vmax.f32 %v2895_v10, 0.0  ;;  %v1513_v12 = vadd.f32 %v1512_v40, %v6326_v14  ;;  %v2136_v15 = vpop.f32.mrf.mxu3  ;;  %4171 = vst [vmem:[%s5722_s24 + $0x690] sm:$0xff] %v3915_v52  ;;  %v7253_v52 = vld [vmem:[#allocation207_spill] sm:$0xff] }
 0x51f   : > { %v3404_v27 = vmin.f32 %v3148_v19, 6.0  ;;  %v2137_v6 = vadd.f32 %v2136_v15, %v1928_v43 }
 0x520   : > { %v3407_v24 = vmin.f32 %v3151_v55, 6.0  ;;  %v1722_v20 = vadd.f32 %v1721_v29, %v1513_v12 }
 0x521   : > { %v3660_v23 = vmul.f32 %v3404_v27, %v2636_v53  ;;  %v2640_v25 = vadd.f32 %v7248_v36, %v2137_v6  ;;  %v1724_v58 = vpop.f32.mrf.mxu1 }
 0x522   : > { %v3663_v8 = vmul.f32 %v3407_v24, %v2639_v7  ;;  %v2643_v17 = vadd.f32 %v7249_v16, %v1722_v20  ;;  %v1930_v33 = vpop.f32.mrf.mxu2 }
 0x523   : > { %v3916_v45 = vmul.f32 0.16666667, %v3660_v23  ;;  %v2896_v37 = vadd.f32 3.0, %v2640_v25  ;;  %v1931_v34 = vadd.f32 %v1930_v33, %v6333_v21 }
 0x524   : > { %v3919_v49 = vmul.f32 0.16666667, %v3663_v8  ;;  %v2899_v51 = vadd.f32 3.0, %v2643_v17 }
 0x525   : > { %v3152_v22 = vmax.f32 %v2896_v37, 0.0  ;;  %v1515_v9 = vpop.f32.mrf.mxu0  ;;  %4172 = vst [vmem:[%s5722_s24 + $0x698] sm:$0xff] %v3916_v45  ;;  %v7254_v45 = vld [vmem:[#allocation208_spill] sm:$0xff] }
 0x526   : > { %v3155_v30 = vmax.f32 %v2899_v51, 0.0  ;;  %v1516_v35 = vadd.f32 %v1515_v9, %v6326_v14  ;;  %v2139_v31 = vpop.f32.mrf.mxu3  ;;  %4175 = vst [vmem:[%s5722_s24 + $0x6b0] sm:$0xff] %v3919_v49  ;;  %v7255_v49 = vld [vmem:[#allocation209_spill] sm:$0xff] }
 0x527   : > { %v3408_v54 = vmin.f32 %v3152_v22, 6.0  ;;  %v2140_v38 = vadd.f32 %v2139_v31, %v1931_v34 }
 0x528   : > { %v3411_v50 = vmin.f32 %v3155_v30, 6.0  ;;  %v1725_v46 = vadd.f32 %v1724_v58, %v1516_v35 }
 0x529   : > { %v3664_v32 = vmul.f32 %v3408_v54, %v2640_v25  ;;  %v2644_v60 = vadd.f32 %v7250_v44, %v2140_v38  ;;  %v1727_v53 = vpop.f32.mrf.mxu1 }
 0x52a   : > { %v3667_v62 = vmul.f32 %v3411_v50, %v2643_v17  ;;  %v2647_v48 = vadd.f32 %v7251_v42, %v1725_v46  ;;  %v1933_v47 = vpop.f32.mrf.mxu2 }
 0x52b   : > { %v3920_v59 = vmul.f32 0.16666667, %v3664_v32  ;;  %v2900_v41 = vadd.f32 3.0, %v2644_v60  ;;  %v1934_v56 = vadd.f32 %v1933_v47, %v6333_v21 }
 0x52c   : > { %v3923_v2 = vmul.f32 0.16666667, %v3667_v62  ;;  %v2903_v4 = vadd.f32 3.0, %v2647_v48 }
 0x52d   : > { %v3156_v26 = vmax.f32 %v2900_v41, 0.0  ;;  %v1518_v0 = vpop.f32.mrf.mxu0  ;;  %4176 = vst [vmem:[%s5722_s24 + $0x6b8] sm:$0xff] %v3920_v59  ;;  %v7256_v59 = vld [vmem:[#allocation210_spill] sm:$0xff] }
 0x52e   : > { %v3159_v18 = vmax.f32 %v2903_v4, 0.0  ;;  %v1519_v1 = vadd.f32 %v1518_v0, %v6326_v14  ;;  %v2142_v3 = vpop.f32.mrf.mxu3  ;;  %4179 = vst [vmem:[%s5722_s24 + $0x6d0] sm:$0xff] %v3923_v2  ;;  %v7257_v2 = vld [vmem:[#allocation211_spill] sm:$0xff] }
 0x52f   : > { %v3412_v28 = vmin.f32 %v3156_v26, 6.0  ;;  %v2143_v11 = vadd.f32 %v2142_v3, %v1934_v56 }
 0x530   : > { %v3415_v5 = vmin.f32 %v3159_v18, 6.0  ;;  %v1728_v39 = vadd.f32 %v1727_v53, %v1519_v1 }
 0x531   : > { %v3668_v7 = vmul.f32 %v3412_v28, %v2644_v60  ;;  %v2648_v57 = vadd.f32 %v7252_v61, %v2143_v11  ;;  %v1730_v25 = vpop.f32.mrf.mxu1 }
 0x532   : > { %v3671_v63 = vmul.f32 %v3415_v5, %v2647_v48  ;;  %v2651_v10 = vadd.f32 %v7253_v52, %v1728_v39  ;;  %v1936_v40 = vpop.f32.mrf.mxu2 }
 0x533   : > { %v3924_v43 = vmul.f32 0.16666667, %v3668_v7  ;;  %v2904_v19 = vadd.f32 3.0, %v2648_v57  ;;  %v1937_v15 = vadd.f32 %v1936_v40, %v6333_v21 }
 0x534   : > { %v3927_v55 = vmul.f32 0.16666667, %v3671_v63  ;;  %v2907_v12 = vadd.f32 3.0, %v2651_v10 }
 0x535   : > { %v3160_v27 = vmax.f32 %v2904_v19, 0.0  ;;  %v1521_v6 = vpop.f32.mrf.mxu0  ;;  %4180 = vst [vmem:[%s5722_s24 + $0x6d8] sm:$0xff] %v3924_v43  ;;  %v7258_v43 = vld [vmem:[#allocation212_spill] sm:$0xff] }
 0x536   : > { %v3163_v29 = vmax.f32 %v2907_v12, 0.0  ;;  %v1522_v24 = vadd.f32 %v1521_v6, %v6326_v14  ;;  %v2145_v20 = vpop.f32.mrf.mxu3  ;;  %4183 = vst [vmem:[%s5722_s24 + $0x6f0] sm:$0xff] %v3927_v55  ;;  %v7259_v55 = vld [vmem:[#allocation213_spill] sm:$0xff] }
 0x537   : > { %v3416_v23 = vmin.f32 %v3160_v27, 6.0  ;;  %v2146_v36 = vadd.f32 %v2145_v20, %v1937_v15 }
 0x538   : > { %v3419_v8 = vmin.f32 %v3163_v29, 6.0  ;;  %v1731_v16 = vadd.f32 %v1730_v25, %v1522_v24 }
 0x539   : > { %v3672_v17 = vmul.f32 %v3416_v23, %v2648_v57  ;;  %v2652_v37 = vadd.f32 %v7254_v45, %v2146_v36  ;;  %v1733_v60 = vpop.f32.mrf.mxu1 }
 0x53a   : > { %v3675_v33 = vmul.f32 %v3419_v8, %v2651_v10  ;;  %v2655_v51 = vadd.f32 %v7255_v49, %v1731_v16  ;;  %v1939_v9 = vpop.f32.mrf.mxu2 }
 0x53b   : > { %v3928_v34 = vmul.f32 0.16666667, %v3672_v17  ;;  %v2908_v22 = vadd.f32 3.0, %v2652_v37  ;;  %v1940_v31 = vadd.f32 %v1939_v9, %v6333_v21 }
 0x53c   : > { %v3931_v30 = vmul.f32 0.16666667, %v3675_v33  ;;  %v2911_v35 = vadd.f32 3.0, %v2655_v51 }
 0x53d   : > { %v3164_v54 = vmax.f32 %v2908_v22, 0.0  ;;  %v1524_v38 = vpop.f32.mrf.mxu0  ;;  %4184 = vst [vmem:[%s5722_s24 + $0x6f8] sm:$0xff] %v3928_v34  ;;  %v7260_v34 = vld [vmem:[#allocation214_spill] sm:$0xff] }
 0x53e   : > { %v3167_v58 = vmax.f32 %v2911_v35, 0.0  ;;  %v1525_v50 = vadd.f32 %v1524_v38, %v6326_v14  ;;  %v2148_v46 = vpop.f32.mrf.mxu3  ;;  %4187 = vst [vmem:[%s5722_s24 + $0x710] sm:$0xff] %v3931_v30  ;;  %v7261_v30 = vld [vmem:[#allocation215_spill] sm:$0xff] }
 0x53f   : > { %v3420_v32 = vmin.f32 %v3164_v54, 6.0  ;;  %v2149_v44 = vadd.f32 %v2148_v46, %v1940_v31 }
 0x540   : > { %v3423_v62 = vmin.f32 %v3167_v58, 6.0  ;;  %v1734_v42 = vadd.f32 %v1733_v60, %v1525_v50 }
 0x541   : > { %v3676_v48 = vmul.f32 %v3420_v32, %v2652_v37  ;;  %v2656_v41 = vadd.f32 %v7256_v59, %v2149_v44  ;;  %v1736_v57 = vpop.f32.mrf.mxu1 }
 0x542   : > { %v3679_v47 = vmul.f32 %v3423_v62, %v2655_v51  ;;  %v2659_v4 = vadd.f32 %v7257_v2, %v1734_v42  ;;  %v1942_v0 = vpop.f32.mrf.mxu2 }
 0x543   : > { %v3932_v56 = vmul.f32 0.16666667, %v3676_v48  ;;  %v2912_v26 = vadd.f32 3.0, %v2656_v41  ;;  %v1943_v3 = vadd.f32 %v1942_v0, %v6333_v21 }
 0x544   : > { %v3935_v18 = vmul.f32 0.16666667, %v3679_v47  ;;  %v2915_v1 = vadd.f32 3.0, %v2659_v4 }
 0x545   : > { %v3168_v28 = vmax.f32 %v2912_v26, 0.0  ;;  %v1527_v11 = vpop.f32.mrf.mxu0  ;;  %4188 = vst [vmem:[%s5722_s24 + $0x718] sm:$0xff] %v3932_v56  ;;  %v7262_v56 = vld [vmem:[#allocation216_spill] sm:$0xff] }
 0x546   : > { %v3171_v53 = vmax.f32 %v2915_v1, 0.0  ;;  %v1528_v5 = vadd.f32 %v1527_v11, %v6326_v14  ;;  %v2151_v39 = vpop.f32.mrf.mxu3  ;;  %4191 = vst [vmem:[%s5722_s24 + $0x730] sm:$0xff] %v3935_v18  ;;  %v7263_v18 = vld [vmem:[#allocation217_spill] sm:$0xff] }
 0x547   : > { %v3424_v7 = vmin.f32 %v3168_v28, 6.0  ;;  %v2152_v61 = vadd.f32 %v2151_v39, %v1943_v3 }
 0x548   : > { %v3427_v63 = vmin.f32 %v3171_v53, 6.0  ;;  %v1737_v52 = vadd.f32 %v1736_v57, %v1528_v5 }
 0x549   : > { %v3680_v10 = vmul.f32 %v3424_v7, %v2656_v41  ;;  %v2660_v19 = vadd.f32 %v7258_v43, %v2152_v61  ;;  %v1739_v37 = vpop.f32.mrf.mxu1 }
 0x54a   : > { %v3683_v40 = vmul.f32 %v3427_v63, %v2659_v4  ;;  %v2663_v12 = vadd.f32 %v7259_v55, %v1737_v52  ;;  %v1945_v6 = vpop.f32.mrf.mxu2 }
 0x54b   : > { %v3936_v15 = vmul.f32 0.16666667, %v3680_v10  ;;  %v2916_v27 = vadd.f32 3.0, %v2660_v19  ;;  %v1946_v20 = vadd.f32 %v1945_v6, %v6333_v21 }
 0x54c   : > { %v3939_v29 = vmul.f32 0.16666667, %v3683_v40  ;;  %v2919_v24 = vadd.f32 3.0, %v2663_v12 }
 0x54d   : > { %v3172_v23 = vmax.f32 %v2916_v27, 0.0  ;;  %v1530_v36 = vpop.f32.mrf.mxu0  ;;  %4192 = vst [vmem:[%s5722_s24 + $0x738] sm:$0xff] %v3936_v15  ;;  %v7264_v15 = vld [vmem:[#allocation218_spill] sm:$0xff] }
 0x54e   : > { %v3175_v25 = vmax.f32 %v2919_v24, 0.0  ;;  %v1531_v8 = vadd.f32 %v1530_v36, %v6326_v14  ;;  %v2154_v16 = vpop.f32.mrf.mxu3  ;;  %4195 = vst [vmem:[%s5722_s24 + $0x750] sm:$0xff] %v3939_v29  ;;  %v7265_v29 = vld [vmem:[#allocation219_spill] sm:$0xff] }
 0x54f   : > { %v3428_v17 = vmin.f32 %v3172_v23, 6.0  ;;  %v2155_v45 = vadd.f32 %v2154_v16, %v1946_v20 }
 0x550   : > { %v3431_v33 = vmin.f32 %v3175_v25, 6.0  ;;  %v1740_v49 = vadd.f32 %v1739_v37, %v1531_v8 }
 0x551   : > { %v3684_v51 = vmul.f32 %v3428_v17, %v2660_v19  ;;  %v2664_v22 = vadd.f32 %v7260_v34, %v2155_v45  ;;  %v1742_v41 = vpop.f32.mrf.mxu1 }
 0x552   : > { %v3687_v9 = vmul.f32 %v3431_v33, %v2663_v12  ;;  %v2667_v35 = vadd.f32 %v7261_v30, %v1740_v49  ;;  %v1948_v38 = vpop.f32.mrf.mxu2 }
 0x553   : > { %v3940_v31 = vmul.f32 0.16666667, %v3684_v51  ;;  %v2920_v54 = vadd.f32 3.0, %v2664_v22  ;;  %v1949_v46 = vadd.f32 %v1948_v38, %v6333_v21 }
 0x554   : > { %v3943_v58 = vmul.f32 0.16666667, %v3687_v9  ;;  %v2923_v50 = vadd.f32 3.0, %v2667_v35 }
 0x555   : > { %v3176_v32 = vmax.f32 %v2920_v54, 0.0  ;;  %v1533_v44 = vpop.f32.mrf.mxu0  ;;  %4196 = vst [vmem:[%s5722_s24 + $0x758] sm:$0xff] %v3940_v31  ;;  %v7266_v31 = vld [vmem:[#allocation220_spill] sm:$0xff] }
 0x556   : > { %v3179_v60 = vmax.f32 %v2923_v50, 0.0  ;;  %v1534_v62 = vadd.f32 %v1533_v44, %v6326_v14  ;;  %v2157_v42 = vpop.f32.mrf.mxu3  ;;  %4199 = vst [vmem:[%s5722_s24 + $0x770] sm:$0xff] %v3943_v58  ;;  %v7267_v58 = vld [vmem:[#allocation221_spill] sm:$0xff] }
 0x557   : > { %v3432_v48 = vmin.f32 %v3176_v32, 6.0  ;;  %v2158_v59 = vadd.f32 %v2157_v42, %v1949_v46 }
 0x558   : > { %v3435_v47 = vmin.f32 %v3179_v60, 6.0  ;;  %v1743_v2 = vadd.f32 %v1742_v41, %v1534_v62 }
 0x559   : > { %v3688_v4 = vmul.f32 %v3432_v48, %v2664_v22  ;;  %v2668_v26 = vadd.f32 %v7262_v56, %v2158_v59  ;;  %v1745_v19 = vpop.f32.mrf.mxu1 }
 0x55a   : > { %v3691_v0 = vmul.f32 %v3435_v47, %v2667_v35  ;;  %v2671_v1 = vadd.f32 %v7263_v18, %v1743_v2  ;;  %v1951_v11 = vpop.f32.mrf.mxu2 }
 0x55b   : > { %v3944_v3 = vmul.f32 0.16666667, %v3688_v4  ;;  %v2924_v28 = vadd.f32 3.0, %v2668_v26  ;;  %v1952_v39 = vadd.f32 %v1951_v11, %v6333_v21 }
 0x55c   : > { %v3947_v53 = vmul.f32 0.16666667, %v3691_v0  ;;  %v2927_v5 = vadd.f32 3.0, %v2671_v1 }
 0x55d   : > { %v3180_v7 = vmax.f32 %v2924_v28, 0.0  ;;  %v1536_v61 = vpop.f32.mrf.mxu0  ;;  %4200 = vst [vmem:[%s5722_s24 + $0x778] sm:$0xff] %v3944_v3 }
 0x55e   : > { %v3183_v57 = vmax.f32 %v2927_v5, 0.0  ;;  %v1537_v63 = vadd.f32 %v1536_v61, %v6326_v14  ;;  %v2160_v52 = vpop.f32.mrf.mxu3  ;;  %4203 = vst [vmem:[%s5722_s24 + $0x790] sm:$0xff] %v3947_v53 }
 0x55f   : > { %v3436_v10 = vmin.f32 %v3180_v7, 6.0  ;;  %v2161_v43 = vadd.f32 %v2160_v52, %v1952_v39 }
 0x560   : > { %v3439_v40 = vmin.f32 %v3183_v57, 6.0  ;;  %v1746_v55 = vadd.f32 %v1745_v19, %v1537_v63 }
 0x561   : > { %v3692_v12 = vmul.f32 %v3436_v10, %v2668_v26  ;;  %v2672_v27 = vadd.f32 %v7264_v15, %v2161_v43  ;;  %v1748_v22 = vpop.f32.mrf.mxu1 }
 0x562   : > { %v3695_v6 = vmul.f32 %v3439_v40, %v2671_v1  ;;  %v2675_v24 = vadd.f32 %v7265_v29, %v1746_v55  ;;  %v1954_v36 = vpop.f32.mrf.mxu2 }
 0x563   : > { %v3948_v20 = vmul.f32 0.16666667, %v3692_v12  ;;  %v2928_v23 = vadd.f32 3.0, %v2672_v27  ;;  %v1955_v16 = vadd.f32 %v1954_v36, %v6333_v21 }
 0x564   : > { %v3951_v25 = vmul.f32 0.16666667, %v3695_v6  ;;  %v2931_v8 = vadd.f32 3.0, %v2675_v24 }
 0x565   : > { %v3184_v17 = vmax.f32 %v2928_v23, 0.0  ;;  %v1539_v45 = vpop.f32.mrf.mxu0  ;;  %4204 = vst [vmem:[%s5722_s24 + $0x798] sm:$0xff] %v3948_v20 }
 0x566   : > { %v3187_v37 = vmax.f32 %v2931_v8, 0.0  ;;  %v1540_v33 = vadd.f32 %v1539_v45, %v6326_v14  ;;  %v2163_v49 = vpop.f32.mrf.mxu3  ;;  %4207 = vst [vmem:[%s5722_s24 + $0x7b0] sm:$0xff] %v3951_v25 }
 0x567   : > { %v3440_v51 = vmin.f32 %v3184_v17, 6.0  ;;  %v2164_v34 = vadd.f32 %v2163_v49, %v1955_v16 }
 0x568   : > { %v3443_v9 = vmin.f32 %v3187_v37, 6.0  ;;  %v1749_v30 = vadd.f32 %v1748_v22, %v1540_v33 }
 0x569   : > { %v3696_v35 = vmul.f32 %v3440_v51, %v2672_v27  ;;  %v2676_v54 = vadd.f32 %v7266_v31, %v2164_v34 }
 0x56a   : > { %v3699_v38 = vmul.f32 %v3443_v9, %v2675_v24  ;;  %v2679_v50 = vadd.f32 %v7267_v58, %v1749_v30  ;;  %v1957_v44 = vpop.f32.mrf.mxu2 }
 0x56b   : > { %v3952_v46 = vmul.f32 0.16666667, %v3696_v35  ;;  %v2932_v32 = vadd.f32 3.0, %v2676_v54  ;;  %v1958_v62 = vadd.f32 %v1957_v44, %v6333_v21 }
 0x56c   : > { %v3955_v60 = vmul.f32 0.16666667, %v3699_v38  ;;  %v2935_v14 = vadd.f32 3.0, %v2679_v50 }
 0x56d   : > { %v3188_v42 = vmax.f32 %v2932_v32, 0.0  ;;  %4208 = vst [vmem:[%s5722_s24 + $0x7b8] sm:$0xff] %v3952_v46 }
 0x56e   : > { %v3191_v48 = vmax.f32 %v2935_v14, 0.0  ;;  %v2166_v59 = vpop.f32.mrf.mxu3  ;;  %4211 = vst [vmem:[%s5722_s24 + $0x7d0] sm:$0xff] %v3955_v60 }
 0x56f   : > { %v3444_v41 = vmin.f32 %v3188_v42, 6.0  ;;  %v2167_v47 = vadd.f32 %v2166_v59, %v1958_v62 }
 0x570   : > { %v3447_v2 = vmin.f32 %v3191_v48, 6.0 }
 0x571   : > { %v3700_v4 = vmul.f32 %v3444_v41, %v2676_v54  ;;  %v2680_v56 = vadd.f32 %v5758_v13, %v2167_v47 }
 0x572   : > { %v3703_v26 = vmul.f32 %v3447_v2, %v2679_v50 }
 0x573   : > { %v3956_v0 = vmul.f32 0.16666667, %v3700_v4  ;;  %v2936_v18 = vadd.f32 3.0, %v2680_v56 }
 0x574   : > { %v3959_v1 = vmul.f32 0.16666667, %v3703_v26 }
 0x575   : > { %v3192_v3 = vmax.f32 %v2936_v18, 0.0  ;;  %4212 = vst [vmem:[%s5722_s24 + $0x7d8] sm:$0xff] %v3956_v0 }
 0x576   : > { %4215 = vst [vmem:[%s5722_s24 + $0x7f0] sm:$0xff] %v3959_v1 }
 0x577   : > { %v3448_v21 = vmin.f32 %v3192_v3, 6.0 }
 0x579   : > { %v3704_v28 = vmul.f32 %v3448_v21, %v2680_v56 }
 0x57b   : > { %v3960_v11 = vmul.f32 0.16666667, %v3704_v28 }
 0x57d   : > { %4216 = vst [vmem:[%s5722_s24 + $0x7f8] sm:$0xff] %v3960_v11 }
 0x57e PF: > { %s14_s15 = sadd.s32 1, %s4449_s15  }
 0x57f   : > { %p11_p4 = scmp.ge.s32.totalorder %s14_s15, 4  }
 0x581   :  { %13 = sbr.rel (!%p11_p4) target bundleno = 1 (0x1), region = 69 }

</bundles_post_ra>
